<compile_context>
chip_gen: v7x
topology: tpu7x:2x2x1
jax: 0.10.0
libtpu: 0.0.40
codegen_flags: <defaults>
</compile_context>

<pallas_src>
import math

import jax
import jax.numpy as jnp
from jax import lax
from jax.experimental import pallas as pl
from jax.experimental.pallas import tpu as pltpu

STATE_DIM = 5
ACTION_DIM = 1
HIDDEN = 128
N_LAYER = 3
N_HEAD = 4
HEAD_DIM = HIDDEN // N_HEAD
FFN = 4 * HIDDEN
MAX_LENGTH = 20
LN_EPS = 1e-5
FIN = 1 + STATE_DIM + ACTION_DIM    # packed token features: [rtg | state | action]
FIN_PAD = 8                         # padded to 8 (zero column) for clean sublanes
OUT_PAD = 128                       # action head output padded to a full lane slab

# TODO(synk): dropout (p=0.1) is treated as identity (inference/eval semantics).


def _layernorm(x, g, b):
    # E[x^2] - mu^2 form: both lane reductions issue from the same input pass
    # (shorter XLU dependency chain than the centered two-pass form).
    mu = jnp.mean(x, axis=-1, keepdims=True)
    ex2 = jnp.mean(x * x, axis=-1, keepdims=True)
    var = ex2 - mu * mu
    return (x - mu) * lax.rsqrt(var + LN_EPS) * g + b


def _dt_kernel(x_tok_ref, w_emb_ref, b_tok_ref, pe_ref, sel_ref, hmask_ref,
               ln0_g_ref, ln0_b_ref,
               wqkv_ref, bqkv_ref, wo_ref, bo_ref,
               ln1_g_ref, ln1_b_ref,
               w1_ref, b1_ref, w2_ref, b2_ref,
               ln2_g_ref, ln2_b_ref,
               wh1_ref, bh1_ref, wh2_ref, bh2_ref,
               out_ref):
    bf16 = jnp.bfloat16
    f32 = jnp.float32
    M = x_tok_ref.shape[1]          # Bblk * L rows per block
    T, L = sel_ref.shape
    Bblk = M // L

    # --- token embedding: one packed bf16 matmul covers return/state/action
    h = jnp.dot(x_tok_ref[0].astype(bf16), w_emb_ref[...].astype(bf16),
                preferred_element_type=f32)                           # (M, H)

    # --- per-token embed bias + batch-indexed positional encoding
    #     (faithfully reproduces the reference's pe[:batch] quirk)
    h = (h.reshape(Bblk, L, HIDDEN)
         + b_tok_ref[...][None, :, :]
         + pe_ref[0][:, None, :]).reshape(M, HIDDEN)

    # --- embed LayerNorm
    h = _layernorm(h, ln0_g_ref[...], ln0_b_ref[...])

    # Per-head one-hot lane masks (constant, cast once).
    hm = hmask_ref[...].astype(bf16)                                  # (N_HEAD, H)

    for l in range(N_LAYER):
        # ---------- self attention (post-norm encoder layer) ----------
        # 1/sqrt(HEAD_DIM) is already folded into the Q columns of wqkv/bqkv.
        qkv = jnp.dot(h.astype(bf16), wqkv_ref[l],
                      preferred_element_type=f32) + bqkv_ref[l]       # (M, 3H)
        q3 = qkv[:, 0 * HIDDEN:1 * HIDDEN].astype(bf16).reshape(Bblk, L, HIDDEN)
        k3 = qkv[:, 1 * HIDDEN:2 * HIDDEN].astype(bf16).reshape(Bblk, L, HIDDEN)
        v3 = qkv[:, 2 * HIDDEN:3 * HIDDEN].astype(bf16).reshape(Bblk, L, HIDDEN)

        # Per-head attention with full 128-lane operands: masking K restricts
        # the contraction to this head's lane band; masking V routes the
        # head's context into its own lane band (so the sum over heads is the
        # exact concat-of-heads).  No unaligned slices, concats or transposes.
        ctx = jnp.zeros((Bblk, L, HIDDEN), f32)
        for hh in range(N_HEAD):
            mh = hm[hh:hh + 1][None]                                  # (1, 1, H)
            s = jnp.einsum('bqd,bkd->bqk', q3, k3 * mh,
                           preferred_element_type=f32)                # (Bblk,L,L)
            s = s - jnp.max(s, axis=-1, keepdims=True)
            p = jnp.exp(s)
            p = p * pl.reciprocal(jnp.sum(p, axis=-1, keepdims=True),
                                  approx=True)
            ctx = ctx + jnp.einsum('bqk,bkd->bqd', p.astype(bf16), v3 * mh,
                                   preferred_element_type=f32)
        ctx = ctx.reshape(M, HIDDEN)
        attn = jnp.dot(ctx.astype(bf16), wo_ref[l],
                       preferred_element_type=f32) + bo_ref[l]
        h = _layernorm(h + attn, ln1_g_ref[l], ln1_b_ref[l])

        # ---------- feed-forward ----------
        f = jnp.dot(h.astype(bf16), w1_ref[l],
                    preferred_element_type=f32) + b1_ref[l]
        f = jnp.maximum(f, 0.0)
        f = jnp.dot(f.astype(bf16), w2_ref[l],
                    preferred_element_type=f32) + b2_ref[l]
        h = _layernorm(h + f, ln2_g_ref[l], ln2_b_ref[l])

    # ---------- select state-token rows (1, 4, 7, ...) via tiny batched matmul
    h_seq = h.astype(bf16).reshape(Bblk, L, HIDDEN)
    sel_b = jnp.broadcast_to(sel_ref[...].astype(bf16)[None], (Bblk, T, L))
    state_h = jnp.einsum('btl,blh->bth', sel_b, h_seq,
                         preferred_element_type=f32)                  # (Bblk,T,H)
    state_h = state_h.reshape(Bblk * T, HIDDEN)

    # ---------- action head (only state rows; lane-dense padded output)
    ph = jnp.dot(state_h.astype(bf16), wh1_ref[...],
                 preferred_element_type=f32) + bh1_ref[...]
    ph = jnp.maximum(ph, 0.0)
    a = jnp.dot(ph.astype(bf16), wh2_ref[...],
                preferred_element_type=f32) + bh2_ref[...]            # (Bblk*T,128)
    out_ref[0] = jnp.tanh(a)


def _positional_encoding(max_len, d_model):
    position = jnp.arange(max_len, dtype=jnp.float32)[:, None]
    div_term = jnp.exp(jnp.arange(0, d_model, 2, dtype=jnp.float32)
                       * (-math.log(10000.0) / d_model))
    ang = position * div_term
    pe = jnp.zeros((max_len, d_model), jnp.float32)
    pe = pe.at[:, 0::2].set(jnp.sin(ang))
    pe = pe.at[:, 1::2].set(jnp.cos(ang))
    return pe


def _num_tensorcores():
    """Best-effort TensorCore count per chip (v7x has 2, v5e/v6e have 1)."""
    try:
        kind = jax.devices()[0].device_kind.lower()
    except Exception:
        return 1
    return 2 if ("v7" in kind or "7x" in kind) else 1


def _choose_block(B, L, num_cores):
    """Pick sequences-per-block (Bblk) and number of grid blocks (nblk).

    Multi-TC chips (v7x): keep at least `num_cores` blocks so the 'parallel'
    grid axis shards across TensorCores.  Single-TC chips (v5e/v6e): fewest,
    largest blocks (extra grid steps are pure overhead there).  B is later
    padded up to nblk*Bblk, so awkward/prime batch sizes don't degrade."""
    max_m = 2048 if num_cores >= 2 else 4096
    bblk = max(1, min(B, max_m // L))
    if num_cores >= 2 and B >= num_cores:
        bblk = min(bblk, pl.cdiv(B, num_cores))
    nblk = pl.cdiv(B, bblk)
    return bblk, nblk


def init_params(key):
    """Deterministic synthetic parameters (shapes match the nn.Module)."""
    def lin(k, fan_in, fan_out):
        lim = 1.0 / math.sqrt(fan_in)
        kw, kb = jax.random.split(k)
        w = jax.random.uniform(kw, (fan_in, fan_out), jnp.float32, -lim, lim)
        b = jax.random.uniform(kb, (fan_out,), jnp.float32, -lim, lim)
        return w, b

    keys = iter(jax.random.split(key, 4 + 4 * N_LAYER + 2))
    p = {}
    p["w_ret"], p["b_ret"] = lin(next(keys), 1, HIDDEN)
    p["w_state"], p["b_state"] = lin(next(keys), STATE_DIM, HIDDEN)
    p["w_act"], p["b_act"] = lin(next(keys), ACTION_DIM, HIDDEN)
    p["ln0_g"] = jnp.ones((1, HIDDEN), jnp.float32)
    p["ln0_b"] = jnp.zeros((1, HIDDEN), jnp.float32)

    wqkv, bqkv, wo, bo, w1, b1, w2, b2 = [], [], [], [], [], [], [], []
    for _ in range(N_LAYER):
        w, b = lin(next(keys), HIDDEN, 3 * HIDDEN); wqkv.append(w); bqkv.append(b[None])
        w, b = lin(next(keys), HIDDEN, HIDDEN);     wo.append(w);   bo.append(b[None])
        w, b = lin(next(keys), HIDDEN, FFN);        w1.append(w);   b1.append(b[None])
        w, b = lin(next(keys), FFN, HIDDEN);        w2.append(w);   b2.append(b[None])
    p["wqkv"], p["bqkv"] = jnp.stack(wqkv), jnp.stack(bqkv)
    p["wo"], p["bo"] = jnp.stack(wo), jnp.stack(bo)
    p["w1"], p["b1"] = jnp.stack(w1), jnp.stack(b1)
    p["w2"], p["b2"] = jnp.stack(w2), jnp.stack(b2)
    p["ln1_g"] = jnp.ones((N_LAYER, 1, HIDDEN), jnp.float32)
    p["ln1_b"] = jnp.zeros((N_LAYER, 1, HIDDEN), jnp.float32)
    p["ln2_g"] = jnp.ones((N_LAYER, 1, HIDDEN), jnp.float32)
    p["ln2_b"] = jnp.zeros((N_LAYER, 1, HIDDEN), jnp.float32)

    w, b = lin(next(keys), HIDDEN, HIDDEN)
    p["wh1"], p["bh1"] = w, b[None]
    w, b = lin(next(keys), HIDDEN, ACTION_DIM)
    p["wh2"], p["bh2"] = w, b[None]
    return p


def decision_transformer_forward(params, states, actions, returns_to_go,
                                 timesteps=None, attention_mask=None):
    # timesteps / attention_mask are unused by the reference forward
    # (it builds an all-ones mask and never passes it to the transformer).
    del timesteps, attention_mask
    B, T, _ = states.shape
    L = 3 * T
    f32 = jnp.float32
    bf16 = jnp.bfloat16
    z = lambda *s: jnp.zeros(s, f32)

    # Pack per-token features [rtg | state | action | 0pad], interleaved (r, s, a).
    pad = FIN_PAD - FIN
    ret_feat = jnp.concatenate([returns_to_go,
                                z(B, T, STATE_DIM + ACTION_DIM + pad)], -1)
    st_feat = jnp.concatenate([z(B, T, 1), states, z(B, T, ACTION_DIM + pad)], -1)
    ac_feat = jnp.concatenate([z(B, T, 1 + STATE_DIM), actions, z(B, T, pad)], -1)
    x_tok = jnp.stack([ret_feat, st_feat, ac_feat], axis=2).reshape(B, L, FIN_PAD)

    # Packed embedding weight (one matmul covers return/state/action embeds)
    # and the per-token-type embed bias, tiled to L rows.
    w_emb = jnp.concatenate(
        [params["w_ret"], params["w_state"], params["w_act"],
         jnp.zeros((pad, HIDDEN), f32)], axis=0)                         # (8, H)
    b_tok = jnp.tile(
        jnp.stack([params["b_ret"], params["b_state"], params["b_act"]], 0),
        (T, 1))                                                          # (L, H)

    # Positional encoding: the reference (batch_first x, pe indexed by x.size(0))
    # adds pe[batch_idx] to every token of batch element `batch_idx`.
    # (The reference itself breaks for B > 3*MAX_LENGTH = 60.)
    pe = _positional_encoding(MAX_LENGTH * 3, HIDDEN)[:B]                # (B, H)

    # Chip-aware block/grid selection + batch padding to a whole grid.
    num_cores = _num_tensorcores()
    Bblk, nblk = _choose_block(B, L, num_cores)
    B_pad = Bblk * nblk
    M = Bblk * L
    if B_pad > B:
        x_tok = jnp.concatenate(
            [x_tok, jnp.zeros((B_pad - B, L, FIN_PAD), f32)], axis=0)
        pe = jnp.concatenate([pe, jnp.zeros((B_pad - B, HIDDEN), f32)], axis=0)
    x_tok = x_tok.reshape(nblk, M, FIN_PAD)
    pe = pe.reshape(nblk, Bblk, HIDDEN)

    # State-row selector: row 3t+1 of each length-L sequence.
    sel = (jnp.arange(L)[None, :] == (3 * jnp.arange(T) + 1)[:, None]).astype(f32)
    # Per-head one-hot lane-band masks.
    head_mask = (jnp.arange(HIDDEN)[None, :] // HEAD_DIM
                 == jnp.arange(N_HEAD)[:, None]).astype(f32)             # (4, H)

    # Fold 1/sqrt(head_dim) into the Q columns; cast matmul weights to bf16
    # (accumulation stays f32 in-kernel; biases / LN params stay f32).
    scale = 1.0 / math.sqrt(HEAD_DIM)
    wqkv = params["wqkv"].at[:, :, :HIDDEN].multiply(scale).astype(bf16)
    bqkv = params["bqkv"].at[:, :, :HIDDEN].multiply(scale)
    wo = params["wo"].astype(bf16)
    w1 = params["w1"].astype(bf16)
    w2 = params["w2"].astype(bf16)
    wh1 = params["wh1"].astype(bf16)
    # Pad the action head's last linear to a full 128-lane output slab.
    wh2p = jnp.concatenate(
        [params["wh2"], jnp.zeros((HIDDEN, OUT_PAD - ACTION_DIM), f32)],
        axis=1).astype(bf16)
    bh2p = jnp.concatenate(
        [params["bh2"], jnp.zeros((1, OUT_PAD - ACTION_DIM), f32)], axis=1)

    args = (x_tok, w_emb, b_tok, pe, sel, head_mask,
            params["ln0_g"], params["ln0_b"],
            wqkv, bqkv, wo, params["bo"],
            params["ln1_g"], params["ln1_b"],
            w1, params["b1"], w2, params["b2"],
            params["ln2_g"], params["ln2_b"],
            wh1, params["bh1"], wh2p, bh2p)

    full = lambda a: pl.BlockSpec(a.shape, lambda b, n=a.ndim: (0,) * n)
    per_blk = lambda a: pl.BlockSpec((1,) + a.shape[1:], lambda b: (b, 0, 0))

    in_specs = [per_blk(x_tok), full(w_emb), full(b_tok), per_blk(pe),
                full(sel), full(head_mask)]
    in_specs += [full(a) for a in args[6:]]

    out = pl.pallas_call(
        _dt_kernel,
        out_shape=jax.ShapeDtypeStruct((nblk, Bblk * T, OUT_PAD), f32),
        grid_spec=pltpu.PrefetchScalarGridSpec(
            num_scalar_prefetch=0,
            grid=(nblk,),
            in_specs=in_specs,
            out_specs=pl.BlockSpec((1, Bblk * T, OUT_PAD), lambda b: (b, 0, 0))),
        compiler_params=pltpu.CompilerParams(
            dimension_semantics=("parallel",),
            vmem_limit_bytes=(48 if num_cores >= 2 else 64) * 1024 * 1024),
    )(*args)

    # Lane-dense slab -> (B, T, ACTION_DIM); state rows were selected in-kernel,
    # padded batch rows are sliced off.
    return out.reshape(B_pad, T, OUT_PAD)[:B, :, :ACTION_DIM]


if __name__ == "__main__":
    key = jax.random.PRNGKey(0)
    kp, ks, ka, kr = jax.random.split(key, 4)
    params = init_params(kp)

    B, T = 2, 8
    states = jax.random.normal(ks, (B, T, STATE_DIM), jnp.float32)
    actions = jax.random.normal(ka, (B, T, ACTION_DIM), jnp.float32)
    returns_to_go = jax.random.normal(kr, (B, T, 1), jnp.float32)
    timesteps = jnp.tile(jnp.arange(T)[None, :], (B, 1))

    preds = decision_transformer_forward(params, states, actions,
                                         returns_to_go, timesteps)
    preds = jax.block_until_ready(preds)
    assert preds.shape == (B, T, ACTION_DIM), preds.shape
    assert bool(jnp.all(jnp.isfinite(preds)))
    print("KERNEL_OK")
</pallas_src>

<mosaic_0001>
module attributes {stable_mosaic.version = 11 : i64} {
  func.func @_dt_kernel(%arg0: i32, %arg1: memref<1x48x8xf32, #tpu.memory_space<vmem>>, %arg2: memref<8x128xf32, #tpu.memory_space<vmem>>, %arg3: memref<24x128xf32, #tpu.memory_space<vmem>>, %arg4: memref<1x2x128xf32, #tpu.memory_space<vmem>>, %arg5: memref<8x24xf32, #tpu.memory_space<vmem>>, %arg6: memref<4x128xf32, #tpu.memory_space<vmem>>, %arg7: memref<1x128xf32, #tpu.memory_space<vmem>>, %arg8: memref<1x128xf32, #tpu.memory_space<vmem>>, %arg9: memref<3x128x384xbf16, #tpu.memory_space<vmem>>, %arg10: memref<3x1x384xf32, #tpu.memory_space<vmem>>, %arg11: memref<3x128x128xbf16, #tpu.memory_space<vmem>>, %arg12: memref<3x1x128xf32, #tpu.memory_space<vmem>>, %arg13: memref<3x1x128xf32, #tpu.memory_space<vmem>>, %arg14: memref<3x1x128xf32, #tpu.memory_space<vmem>>, %arg15: memref<3x128x512xbf16, #tpu.memory_space<vmem>>, %arg16: memref<3x1x512xf32, #tpu.memory_space<vmem>>, %arg17: memref<3x512x128xbf16, #tpu.memory_space<vmem>>, %arg18: memref<3x1x128xf32, #tpu.memory_space<vmem>>, %arg19: memref<3x1x128xf32, #tpu.memory_space<vmem>>, %arg20: memref<3x1x128xf32, #tpu.memory_space<vmem>>, %arg21: memref<128x128xbf16, #tpu.memory_space<vmem>>, %arg22: memref<1x128xf32, #tpu.memory_space<vmem>>, %arg23: memref<128x128xbf16, #tpu.memory_space<vmem>>, %arg24: memref<1x128xf32, #tpu.memory_space<vmem>>, %arg25: memref<1x16x128xf32, #tpu.memory_space<vmem>>) attributes {dimension_semantics = [#tpu.dimension_semantics<parallel>], iteration_bounds = array<i64: 1>, scalar_prefetch = 0 : i64, scratch_operands = 0 : i64, tpu.core_type = #tpu.core_type<tc>, window_params = [{transform_indices = @transform_0, window_bounds = array<i64: 1, 48, 8>}, {pipeline_mode = #tpu.pipeline_mode<synchronous>, transform_indices = @transform_1, window_bounds = array<i64: 8, 128>}, {pipeline_mode = #tpu.pipeline_mode<synchronous>, transform_indices = @transform_2, window_bounds = array<i64: 24, 128>}, {transform_indices = @transform_3, window_bounds = array<i64: 1, 2, 128>}, {pipeline_mode = #tpu.pipeline_mode<synchronous>, transform_indices = @transform_4, window_bounds = array<i64: 8, 24>}, {pipeline_mode = #tpu.pipeline_mode<synchronous>, transform_indices = @transform_5, window_bounds = array<i64: 4, 128>}, {pipeline_mode = #tpu.pipeline_mode<synchronous>, transform_indices = @transform_6, window_bounds = array<i64: 1, 128>}, {pipeline_mode = #tpu.pipeline_mode<synchronous>, transform_indices = @transform_7, window_bounds = array<i64: 1, 128>}, {pipeline_mode = #tpu.pipeline_mode<synchronous>, transform_indices = @transform_8, window_bounds = array<i64: 3, 128, 384>}, {pipeline_mode = #tpu.pipeline_mode<synchronous>, transform_indices = @transform_9, window_bounds = array<i64: 3, 1, 384>}, {pipeline_mode = #tpu.pipeline_mode<synchronous>, transform_indices = @transform_10, window_bounds = array<i64: 3, 128, 128>}, {pipeline_mode = #tpu.pipeline_mode<synchronous>, transform_indices = @transform_11, window_bounds = array<i64: 3, 1, 128>}, {pipeline_mode = #tpu.pipeline_mode<synchronous>, transform_indices = @transform_12, window_bounds = array<i64: 3, 1, 128>}, {pipeline_mode = #tpu.pipeline_mode<synchronous>, transform_indices = @transform_13, window_bounds = array<i64: 3, 1, 128>}, {pipeline_mode = #tpu.pipeline_mode<synchronous>, transform_indices = @transform_14, window_bounds = array<i64: 3, 128, 512>}, {pipeline_mode = #tpu.pipeline_mode<synchronous>, transform_indices = @transform_15, window_bounds = array<i64: 3, 1, 512>}, {pipeline_mode = #tpu.pipeline_mode<synchronous>, transform_indices = @transform_16, window_bounds = array<i64: 3, 512, 128>}, {pipeline_mode = #tpu.pipeline_mode<synchronous>, transform_indices = @transform_17, window_bounds = array<i64: 3, 1, 128>}, {pipeline_mode = #tpu.pipeline_mode<synchronous>, transform_indices = @transform_18, window_bounds = array<i64: 3, 1, 128>}, {pipeline_mode = #tpu.pipeline_mode<synchronous>, transform_indices = @transform_19, window_bounds = array<i64: 3, 1, 128>}, {pipeline_mode = #tpu.pipeline_mode<synchronous>, transform_indices = @transform_20, window_bounds = array<i64: 128, 128>}, {pipeline_mode = #tpu.pipeline_mode<synchronous>, transform_indices = @transform_21, window_bounds = array<i64: 1, 128>}, {pipeline_mode = #tpu.pipeline_mode<synchronous>, transform_indices = @transform_22, window_bounds = array<i64: 128, 128>}, {pipeline_mode = #tpu.pipeline_mode<synchronous>, transform_indices = @transform_23, window_bounds = array<i64: 1, 128>}, {transform_indices = @transform_24, window_bounds = array<i64: 1, 16, 128>}]} {
    %c0 = arith.constant 0 : index
    %c0_0 = arith.constant 0 : index
    %c0_1 = arith.constant 0 : index
    %0 = vector.load %arg1[%c0, %c0_0, %c0_1] : memref<1x48x8xf32, #tpu.memory_space<vmem>>, vector<1x48x8xf32>
    %1 = vector.shape_cast %0 : vector<1x48x8xf32> to vector<48x8xf32>
    %2 = arith.truncf %1 : vector<48x8xf32> to vector<48x8xbf16>
    %c0_2 = arith.constant 0 : index
    %c0_3 = arith.constant 0 : index
    %3 = vector.load %arg2[%c0_2, %c0_3] : memref<8x128xf32, #tpu.memory_space<vmem>>, vector<8x128xf32>
    %4 = arith.truncf %3 : vector<8x128xf32> to vector<8x128xbf16>
    %cst = arith.constant dense<0.000000e+00> : vector<48x128xf32>
    %5 = tpu.matmul %2, %4, %cst {dimension_numbers = #tpu.dot_dimension_numbers<[1], [0], [0], [1], [0, 0, 1, 1], [], []>} : vector<48x8xbf16>, vector<8x128xbf16>, vector<48x128xf32> -> vector<48x128xf32>
    %6 = vector.shape_cast %5 : vector<48x128xf32> to vector<2x24x128xf32>
    %c0_4 = arith.constant 0 : index
    %c0_5 = arith.constant 0 : index
    %7 = vector.load %arg3[%c0_4, %c0_5] : memref<24x128xf32, #tpu.memory_space<vmem>>, vector<24x128xf32>
    %8 = vector.shape_cast %7 : vector<24x128xf32> to vector<1x24x128xf32>
    %9 = vector.broadcast %8 : vector<1x24x128xf32> to vector<2x24x128xf32>
    %10 = arith.addf %6, %9 : vector<2x24x128xf32>
    %c0_6 = arith.constant 0 : index
    %c0_7 = arith.constant 0 : index
    %c0_8 = arith.constant 0 : index
    %11 = vector.load %arg4[%c0_6, %c0_7, %c0_8] : memref<1x2x128xf32, #tpu.memory_space<vmem>>, vector<1x2x128xf32>
    %12 = vector.shape_cast %11 : vector<1x2x128xf32> to vector<2x128xf32>
    %13 = vector.shape_cast %12 : vector<2x128xf32> to vector<2x1x128xf32>
    %14 = vector.broadcast %13 : vector<2x1x128xf32> to vector<2x24x128xf32>
    %15 = arith.addf %10, %14 : vector<2x24x128xf32>
    %16 = vector.shape_cast %15 : vector<2x24x128xf32> to vector<48x128xf32>
    %c0_9 = arith.constant 0 : index
    %c0_10 = arith.constant 0 : index
    %17 = vector.load %arg7[%c0_9, %c0_10] : memref<1x128xf32, #tpu.memory_space<vmem>>, vector<1x128xf32>
    %c0_11 = arith.constant 0 : index
    %c0_12 = arith.constant 0 : index
    %18 = vector.load %arg8[%c0_11, %c0_12] : memref<1x128xf32, #tpu.memory_space<vmem>>, vector<1x128xf32>
    %cst_13 = arith.constant dense<0.000000e+00> : vector<48xf32>
    %19 = vector.multi_reduction <add>, %16, %cst_13 [1] : vector<48x128xf32> to vector<48xf32>
    %20 = vector.shape_cast %19 : vector<48xf32> to vector<48x1xf32>
    %cst_14 = arith.constant 1.280000e+02 : f32
    %21 = vector.broadcast %cst_14 : f32 to vector<48x1xf32>
    %22 = arith.divf %20, %21 : vector<48x1xf32>
    %23 = arith.mulf %16, %16 : vector<48x128xf32>
    %cst_15 = arith.constant dense<0.000000e+00> : vector<48xf32>
    %24 = vector.multi_reduction <add>, %23, %cst_15 [1] : vector<48x128xf32> to vector<48xf32>
    %25 = vector.shape_cast %24 : vector<48xf32> to vector<48x1xf32>
    %cst_16 = arith.constant 1.280000e+02 : f32
    %26 = vector.broadcast %cst_16 : f32 to vector<48x1xf32>
    %27 = arith.divf %25, %26 : vector<48x1xf32>
    %28 = arith.mulf %22, %22 : vector<48x1xf32>
    %29 = arith.subf %27, %28 : vector<48x1xf32>
    %30 = vector.broadcast %22 : vector<48x1xf32> to vector<48x128xf32>
    %31 = arith.subf %16, %30 : vector<48x128xf32>
    %cst_17 = arith.constant 9.99999974E-6 : f32
    %32 = vector.broadcast %cst_17 : f32 to vector<48x1xf32>
    %33 = arith.addf %29, %32 : vector<48x1xf32>
    %34 = math.rsqrt %33 : vector<48x1xf32>
    %35 = vector.broadcast %34 : vector<48x1xf32> to vector<48x128xf32>
    %36 = arith.mulf %31, %35 : vector<48x128xf32>
    %37 = vector.broadcast %17 : vector<1x128xf32> to vector<48x128xf32>
    %38 = arith.mulf %36, %37 : vector<48x128xf32>
    %39 = vector.broadcast %18 : vector<1x128xf32> to vector<48x128xf32>
    %40 = arith.addf %38, %39 : vector<48x128xf32>
    %c0_18 = arith.constant 0 : index
    %c0_19 = arith.constant 0 : index
    %41 = vector.load %arg6[%c0_18, %c0_19] : memref<4x128xf32, #tpu.memory_space<vmem>>, vector<4x128xf32>
    %42 = arith.truncf %41 : vector<4x128xf32> to vector<4x128xbf16>
    %43 = arith.truncf %40 : vector<48x128xf32> to vector<48x128xbf16>
    %c0_20 = arith.constant 0 : index
    %c0_21 = arith.constant 0 : index
    %c0_22 = arith.constant 0 : index
    %44 = vector.load %arg9[%c0_20, %c0_21, %c0_22] : memref<3x128x384xbf16, #tpu.memory_space<vmem>>, vector<1x128x384xbf16>
    %45 = vector.shape_cast %44 : vector<1x128x384xbf16> to vector<128x384xbf16>
    %cst_23 = arith.constant dense<0.000000e+00> : vector<48x384xf32>
    %46 = tpu.matmul %43, %45, %cst_23 {dimension_numbers = #tpu.dot_dimension_numbers<[1], [0], [0], [1], [0, 0, 1, 1], [], []>} : vector<48x128xbf16>, vector<128x384xbf16>, vector<48x384xf32> -> vector<48x384xf32>
    %c0_24 = arith.constant 0 : index
    %c0_25 = arith.constant 0 : index
    %c0_26 = arith.constant 0 : index
    %47 = vector.load %arg10[%c0_24, %c0_25, %c0_26] : memref<3x1x384xf32, #tpu.memory_space<vmem>>, vector<1x1x384xf32>
    %48 = vector.shape_cast %47 : vector<1x1x384xf32> to vector<1x384xf32>
    %49 = vector.broadcast %48 : vector<1x384xf32> to vector<48x384xf32>
    %50 = arith.addf %46, %49 : vector<48x384xf32>
    %51 = vector.extract_strided_slice %50 {offsets = [0, 0], sizes = [48, 128], strides = [1, 1]} : vector<48x384xf32> to vector<48x128xf32>
    %52 = arith.truncf %51 : vector<48x128xf32> to vector<48x128xbf16>
    %53 = vector.shape_cast %52 : vector<48x128xbf16> to vector<2x24x128xbf16>
    %54 = vector.extract_strided_slice %50 {offsets = [0, 128], sizes = [48, 128], strides = [1, 1]} : vector<48x384xf32> to vector<48x128xf32>
    %55 = arith.truncf %54 : vector<48x128xf32> to vector<48x128xbf16>
    %56 = vector.shape_cast %55 : vector<48x128xbf16> to vector<2x24x128xbf16>
    %57 = vector.extract_strided_slice %50 {offsets = [0, 256], sizes = [48, 128], strides = [1, 1]} : vector<48x384xf32> to vector<48x128xf32>
    %58 = arith.truncf %57 : vector<48x128xf32> to vector<48x128xbf16>
    %59 = vector.shape_cast %58 : vector<48x128xbf16> to vector<2x24x128xbf16>
    %cst_27 = arith.constant 0.000000e+00 : f32
    %60 = vector.broadcast %cst_27 : f32 to vector<2x24x128xf32>
    %61 = vector.extract_strided_slice %42 {offsets = [0, 0], sizes = [1, 128], strides = [1, 1]} : vector<4x128xbf16> to vector<1x128xbf16>
    %62 = vector.shape_cast %61 : vector<1x128xbf16> to vector<1x1x128xbf16>
    %63 = vector.broadcast %62 : vector<1x1x128xbf16> to vector<2x24x128xbf16>
    %64 = arith.mulf %56, %63 : vector<2x24x128xbf16>
    "tpu.trace_start"() <{level = 10 : i32, message = "bqd,bkd->bqk"}> : () -> ()
    %cst_28 = arith.constant dense<0.000000e+00> : vector<2x24x24xf32>
    %65 = tpu.matmul %53, %64, %cst_28 {dimension_numbers = #tpu.dot_dimension_numbers<[2], [2], [1], [1], [0, 0, 0, 1, 1, 1], [0], [0]>} : vector<2x24x128xbf16>, vector<2x24x128xbf16>, vector<2x24x24xf32> -> vector<2x24x24xf32>
    "tpu.trace_stop"() : () -> ()
    %cst_29 = arith.constant dense<0xFF800000> : vector<2x24xf32>
    %66 = vector.multi_reduction <maximumf>, %65, %cst_29 [2] : vector<2x24x24xf32> to vector<2x24xf32>
    %67 = vector.shape_cast %66 : vector<2x24xf32> to vector<2x24x1xf32>
    %68 = vector.broadcast %67 : vector<2x24x1xf32> to vector<2x24x24xf32>
    %69 = arith.subf %65, %68 : vector<2x24x24xf32>
    %70 = math.exp %69 : vector<2x24x24xf32>
    %cst_30 = arith.constant dense<0.000000e+00> : vector<2x24xf32>
    %71 = vector.multi_reduction <add>, %70, %cst_30 [2] : vector<2x24x24xf32> to vector<2x24xf32>
    %72 = vector.shape_cast %71 : vector<2x24xf32> to vector<2x24x1xf32>
    %73 = tpu.reciprocal %72 {approx = true} : vector<2x24x1xf32> -> vector<2x24x1xf32>
    %74 = vector.broadcast %73 : vector<2x24x1xf32> to vector<2x24x24xf32>
    %75 = arith.mulf %70, %74 : vector<2x24x24xf32>
    %76 = arith.truncf %75 : vector<2x24x24xf32> to vector<2x24x24xbf16>
    %77 = vector.broadcast %62 : vector<1x1x128xbf16> to vector<2x24x128xbf16>
    %78 = arith.mulf %59, %77 : vector<2x24x128xbf16>
    "tpu.trace_start"() <{level = 10 : i32, message = "bqk,bkd->bqd"}> : () -> ()
    %cst_31 = arith.constant dense<0.000000e+00> : vector<2x24x128xf32>
    %79 = tpu.matmul %76, %78, %cst_31 {dimension_numbers = #tpu.dot_dimension_numbers<[2], [1], [1], [2], [0, 0, 0, 1, 1, 2], [0], [0]>} : vector<2x24x24xbf16>, vector<2x24x128xbf16>, vector<2x24x128xf32> -> vector<2x24x128xf32>
    "tpu.trace_stop"() : () -> ()
    %80 = arith.addf %60, %79 : vector<2x24x128xf32>
    %81 = vector.extract_strided_slice %42 {offsets = [1, 0], sizes = [1, 128], strides = [1, 1]} : vector<4x128xbf16> to vector<1x128xbf16>
    %82 = vector.shape_cast %81 : vector<1x128xbf16> to vector<1x1x128xbf16>
    %83 = vector.broadcast %82 : vector<1x1x128xbf16> to vector<2x24x128xbf16>
    %84 = arith.mulf %56, %83 : vector<2x24x128xbf16>
    "tpu.trace_start"() <{level = 10 : i32, message = "bqd,bkd->bqk"}> : () -> ()
    %cst_32 = arith.constant dense<0.000000e+00> : vector<2x24x24xf32>
    %85 = tpu.matmul %53, %84, %cst_32 {dimension_numbers = #tpu.dot_dimension_numbers<[2], [2], [1], [1], [0, 0, 0, 1, 1, 1], [0], [0]>} : vector<2x24x128xbf16>, vector<2x24x128xbf16>, vector<2x24x24xf32> -> vector<2x24x24xf32>
    "tpu.trace_stop"() : () -> ()
    %cst_33 = arith.constant dense<0xFF800000> : vector<2x24xf32>
    %86 = vector.multi_reduction <maximumf>, %85, %cst_33 [2] : vector<2x24x24xf32> to vector<2x24xf32>
    %87 = vector.shape_cast %86 : vector<2x24xf32> to vector<2x24x1xf32>
    %88 = vector.broadcast %87 : vector<2x24x1xf32> to vector<2x24x24xf32>
    %89 = arith.subf %85, %88 : vector<2x24x24xf32>
    %90 = math.exp %89 : vector<2x24x24xf32>
    %cst_34 = arith.constant dense<0.000000e+00> : vector<2x24xf32>
    %91 = vector.multi_reduction <add>, %90, %cst_34 [2] : vector<2x24x24xf32> to vector<2x24xf32>
    %92 = vector.shape_cast %91 : vector<2x24xf32> to vector<2x24x1xf32>
    %93 = tpu.reciprocal %92 {approx = true} : vector<2x24x1xf32> -> vector<2x24x1xf32>
    %94 = vector.broadcast %93 : vector<2x24x1xf32> to vector<2x24x24xf32>
    %95 = arith.mulf %90, %94 : vector<2x24x24xf32>
    %96 = arith.truncf %95 : vector<2x24x24xf32> to vector<2x24x24xbf16>
    %97 = vector.broadcast %82 : vector<1x1x128xbf16> to vector<2x24x128xbf16>
    %98 = arith.mulf %59, %97 : vector<2x24x128xbf16>
    "tpu.trace_start"() <{level = 10 : i32, message = "bqk,bkd->bqd"}> : () -> ()
    %cst_35 = arith.constant dense<0.000000e+00> : vector<2x24x128xf32>
    %99 = tpu.matmul %96, %98, %cst_35 {dimension_numbers = #tpu.dot_dimension_numbers<[2], [1], [1], [2], [0, 0, 0, 1, 1, 2], [0], [0]>} : vector<2x24x24xbf16>, vector<2x24x128xbf16>, vector<2x24x128xf32> -> vector<2x24x128xf32>
    "tpu.trace_stop"() : () -> ()
    %100 = arith.addf %80, %99 : vector<2x24x128xf32>
    %101 = vector.extract_strided_slice %42 {offsets = [2, 0], sizes = [1, 128], strides = [1, 1]} : vector<4x128xbf16> to vector<1x128xbf16>
    %102 = vector.shape_cast %101 : vector<1x128xbf16> to vector<1x1x128xbf16>
    %103 = vector.broadcast %102 : vector<1x1x128xbf16> to vector<2x24x128xbf16>
    %104 = arith.mulf %56, %103 : vector<2x24x128xbf16>
    "tpu.trace_start"() <{level = 10 : i32, message = "bqd,bkd->bqk"}> : () -> ()
    %cst_36 = arith.constant dense<0.000000e+00> : vector<2x24x24xf32>
    %105 = tpu.matmul %53, %104, %cst_36 {dimension_numbers = #tpu.dot_dimension_numbers<[2], [2], [1], [1], [0, 0, 0, 1, 1, 1], [0], [0]>} : vector<2x24x128xbf16>, vector<2x24x128xbf16>, vector<2x24x24xf32> -> vector<2x24x24xf32>
    "tpu.trace_stop"() : () -> ()
    %cst_37 = arith.constant dense<0xFF800000> : vector<2x24xf32>
    %106 = vector.multi_reduction <maximumf>, %105, %cst_37 [2] : vector<2x24x24xf32> to vector<2x24xf32>
    %107 = vector.shape_cast %106 : vector<2x24xf32> to vector<2x24x1xf32>
    %108 = vector.broadcast %107 : vector<2x24x1xf32> to vector<2x24x24xf32>
    %109 = arith.subf %105, %108 : vector<2x24x24xf32>
    %110 = math.exp %109 : vector<2x24x24xf32>
    %cst_38 = arith.constant dense<0.000000e+00> : vector<2x24xf32>
    %111 = vector.multi_reduction <add>, %110, %cst_38 [2] : vector<2x24x24xf32> to vector<2x24xf32>
    %112 = vector.shape_cast %111 : vector<2x24xf32> to vector<2x24x1xf32>
    %113 = tpu.reciprocal %112 {approx = true} : vector<2x24x1xf32> -> vector<2x24x1xf32>
    %114 = vector.broadcast %113 : vector<2x24x1xf32> to vector<2x24x24xf32>
    %115 = arith.mulf %110, %114 : vector<2x24x24xf32>
    %116 = arith.truncf %115 : vector<2x24x24xf32> to vector<2x24x24xbf16>
    %117 = vector.broadcast %102 : vector<1x1x128xbf16> to vector<2x24x128xbf16>
    %118 = arith.mulf %59, %117 : vector<2x24x128xbf16>
    "tpu.trace_start"() <{level = 10 : i32, message = "bqk,bkd->bqd"}> : () -> ()
    %cst_39 = arith.constant dense<0.000000e+00> : vector<2x24x128xf32>
    %119 = tpu.matmul %116, %118, %cst_39 {dimension_numbers = #tpu.dot_dimension_numbers<[2], [1], [1], [2], [0, 0, 0, 1, 1, 2], [0], [0]>} : vector<2x24x24xbf16>, vector<2x24x128xbf16>, vector<2x24x128xf32> -> vector<2x24x128xf32>
    "tpu.trace_stop"() : () -> ()
    %120 = arith.addf %100, %119 : vector<2x24x128xf32>
    %121 = vector.extract_strided_slice %42 {offsets = [3, 0], sizes = [1, 128], strides = [1, 1]} : vector<4x128xbf16> to vector<1x128xbf16>
    %122 = vector.shape_cast %121 : vector<1x128xbf16> to vector<1x1x128xbf16>
    %123 = vector.broadcast %122 : vector<1x1x128xbf16> to vector<2x24x128xbf16>
    %124 = arith.mulf %56, %123 : vector<2x24x128xbf16>
    "tpu.trace_start"() <{level = 10 : i32, message = "bqd,bkd->bqk"}> : () -> ()
    %cst_40 = arith.constant dense<0.000000e+00> : vector<2x24x24xf32>
    %125 = tpu.matmul %53, %124, %cst_40 {dimension_numbers = #tpu.dot_dimension_numbers<[2], [2], [1], [1], [0, 0, 0, 1, 1, 1], [0], [0]>} : vector<2x24x128xbf16>, vector<2x24x128xbf16>, vector<2x24x24xf32> -> vector<2x24x24xf32>
    "tpu.trace_stop"() : () -> ()
    %cst_41 = arith.constant dense<0xFF800000> : vector<2x24xf32>
    %126 = vector.multi_reduction <maximumf>, %125, %cst_41 [2] : vector<2x24x24xf32> to vector<2x24xf32>
    %127 = vector.shape_cast %126 : vector<2x24xf32> to vector<2x24x1xf32>
    %128 = vector.broadcast %127 : vector<2x24x1xf32> to vector<2x24x24xf32>
    %129 = arith.subf %125, %128 : vector<2x24x24xf32>
    %130 = math.exp %129 : vector<2x24x24xf32>
    %cst_42 = arith.constant dense<0.000000e+00> : vector<2x24xf32>
    %131 = vector.multi_reduction <add>, %130, %cst_42 [2] : vector<2x24x24xf32> to vector<2x24xf32>
    %132 = vector.shape_cast %131 : vector<2x24xf32> to vector<2x24x1xf32>
    %133 = tpu.reciprocal %132 {approx = true} : vector<2x24x1xf32> -> vector<2x24x1xf32>
    %134 = vector.broadcast %133 : vector<2x24x1xf32> to vector<2x24x24xf32>
    %135 = arith.mulf %130, %134 : vector<2x24x24xf32>
    %136 = arith.truncf %135 : vector<2x24x24xf32> to vector<2x24x24xbf16>
    %137 = vector.broadcast %122 : vector<1x1x128xbf16> to vector<2x24x128xbf16>
    %138 = arith.mulf %59, %137 : vector<2x24x128xbf16>
    "tpu.trace_start"() <{level = 10 : i32, message = "bqk,bkd->bqd"}> : () -> ()
    %cst_43 = arith.constant dense<0.000000e+00> : vector<2x24x128xf32>
    %139 = tpu.matmul %136, %138, %cst_43 {dimension_numbers = #tpu.dot_dimension_numbers<[2], [1], [1], [2], [0, 0, 0, 1, 1, 2], [0], [0]>} : vector<2x24x24xbf16>, vector<2x24x128xbf16>, vector<2x24x128xf32> -> vector<2x24x128xf32>
    "tpu.trace_stop"() : () -> ()
    %140 = arith.addf %120, %139 : vector<2x24x128xf32>
    %141 = vector.shape_cast %140 : vector<2x24x128xf32> to vector<48x128xf32>
    %142 = arith.truncf %141 : vector<48x128xf32> to vector<48x128xbf16>
    %c0_44 = arith.constant 0 : index
    %c0_45 = arith.constant 0 : index
    %c0_46 = arith.constant 0 : index
    %143 = vector.load %arg11[%c0_44, %c0_45, %c0_46] : memref<3x128x128xbf16, #tpu.memory_space<vmem>>, vector<1x128x128xbf16>
    %144 = vector.shape_cast %143 : vector<1x128x128xbf16> to vector<128x128xbf16>
    %cst_47 = arith.constant dense<0.000000e+00> : vector<48x128xf32>
    %145 = tpu.matmul %142, %144, %cst_47 {dimension_numbers = #tpu.dot_dimension_numbers<[1], [0], [0], [1], [0, 0, 1, 1], [], []>} : vector<48x128xbf16>, vector<128x128xbf16>, vector<48x128xf32> -> vector<48x128xf32>
    %c0_48 = arith.constant 0 : index
    %c0_49 = arith.constant 0 : index
    %c0_50 = arith.constant 0 : index
    %146 = vector.load %arg12[%c0_48, %c0_49, %c0_50] : memref<3x1x128xf32, #tpu.memory_space<vmem>>, vector<1x1x128xf32>
    %147 = vector.shape_cast %146 : vector<1x1x128xf32> to vector<1x128xf32>
    %148 = vector.broadcast %147 : vector<1x128xf32> to vector<48x128xf32>
    %149 = arith.addf %145, %148 : vector<48x128xf32>
    %150 = arith.addf %40, %149 : vector<48x128xf32>
    %c0_51 = arith.constant 0 : index
    %c0_52 = arith.constant 0 : index
    %c0_53 = arith.constant 0 : index
    %151 = vector.load %arg13[%c0_51, %c0_52, %c0_53] : memref<3x1x128xf32, #tpu.memory_space<vmem>>, vector<1x1x128xf32>
    %152 = vector.shape_cast %151 : vector<1x1x128xf32> to vector<1x128xf32>
    %c0_54 = arith.constant 0 : index
    %c0_55 = arith.constant 0 : index
    %c0_56 = arith.constant 0 : index
    %153 = vector.load %arg14[%c0_54, %c0_55, %c0_56] : memref<3x1x128xf32, #tpu.memory_space<vmem>>, vector<1x1x128xf32>
    %154 = vector.shape_cast %153 : vector<1x1x128xf32> to vector<1x128xf32>
    %cst_57 = arith.constant dense<0.000000e+00> : vector<48xf32>
    %155 = vector.multi_reduction <add>, %150, %cst_57 [1] : vector<48x128xf32> to vector<48xf32>
    %156 = vector.shape_cast %155 : vector<48xf32> to vector<48x1xf32>
    %cst_58 = arith.constant 1.280000e+02 : f32
    %157 = vector.broadcast %cst_58 : f32 to vector<48x1xf32>
    %158 = arith.divf %156, %157 : vector<48x1xf32>
    %159 = arith.mulf %150, %150 : vector<48x128xf32>
    %cst_59 = arith.constant dense<0.000000e+00> : vector<48xf32>
    %160 = vector.multi_reduction <add>, %159, %cst_59 [1] : vector<48x128xf32> to vector<48xf32>
    %161 = vector.shape_cast %160 : vector<48xf32> to vector<48x1xf32>
    %cst_60 = arith.constant 1.280000e+02 : f32
    %162 = vector.broadcast %cst_60 : f32 to vector<48x1xf32>
    %163 = arith.divf %161, %162 : vector<48x1xf32>
    %164 = arith.mulf %158, %158 : vector<48x1xf32>
    %165 = arith.subf %163, %164 : vector<48x1xf32>
    %166 = vector.broadcast %158 : vector<48x1xf32> to vector<48x128xf32>
    %167 = arith.subf %150, %166 : vector<48x128xf32>
    %cst_61 = arith.constant 9.99999974E-6 : f32
    %168 = vector.broadcast %cst_61 : f32 to vector<48x1xf32>
    %169 = arith.addf %165, %168 : vector<48x1xf32>
    %170 = math.rsqrt %169 : vector<48x1xf32>
    %171 = vector.broadcast %170 : vector<48x1xf32> to vector<48x128xf32>
    %172 = arith.mulf %167, %171 : vector<48x128xf32>
    %173 = vector.broadcast %152 : vector<1x128xf32> to vector<48x128xf32>
    %174 = arith.mulf %172, %173 : vector<48x128xf32>
    %175 = vector.broadcast %154 : vector<1x128xf32> to vector<48x128xf32>
    %176 = arith.addf %174, %175 : vector<48x128xf32>
    %177 = arith.truncf %176 : vector<48x128xf32> to vector<48x128xbf16>
    %c0_62 = arith.constant 0 : index
    %c0_63 = arith.constant 0 : index
    %c0_64 = arith.constant 0 : index
    %178 = vector.load %arg15[%c0_62, %c0_63, %c0_64] : memref<3x128x512xbf16, #tpu.memory_space<vmem>>, vector<1x128x512xbf16>
    %179 = vector.shape_cast %178 : vector<1x128x512xbf16> to vector<128x512xbf16>
    %cst_65 = arith.constant dense<0.000000e+00> : vector<48x512xf32>
    %180 = tpu.matmul %177, %179, %cst_65 {dimension_numbers = #tpu.dot_dimension_numbers<[1], [0], [0], [1], [0, 0, 1, 1], [], []>} : vector<48x128xbf16>, vector<128x512xbf16>, vector<48x512xf32> -> vector<48x512xf32>
    %c0_66 = arith.constant 0 : index
    %c0_67 = arith.constant 0 : index
    %c0_68 = arith.constant 0 : index
    %181 = vector.load %arg16[%c0_66, %c0_67, %c0_68] : memref<3x1x512xf32, #tpu.memory_space<vmem>>, vector<1x1x512xf32>
    %182 = vector.shape_cast %181 : vector<1x1x512xf32> to vector<1x512xf32>
    %183 = vector.broadcast %182 : vector<1x512xf32> to vector<48x512xf32>
    %184 = arith.addf %180, %183 : vector<48x512xf32>
    %cst_69 = arith.constant 0.000000e+00 : f32
    %185 = vector.broadcast %cst_69 : f32 to vector<48x512xf32>
    %186 = arith.maximumf %184, %185 : vector<48x512xf32>
    %187 = arith.truncf %186 : vector<48x512xf32> to vector<48x512xbf16>
    %c0_70 = arith.constant 0 : index
    %c0_71 = arith.constant 0 : index
    %c0_72 = arith.constant 0 : index
    %188 = vector.load %arg17[%c0_70, %c0_71, %c0_72] : memref<3x512x128xbf16, #tpu.memory_space<vmem>>, vector<1x512x128xbf16>
    %189 = vector.shape_cast %188 : vector<1x512x128xbf16> to vector<512x128xbf16>
    %cst_73 = arith.constant dense<0.000000e+00> : vector<48x128xf32>
    %190 = tpu.matmul %187, %189, %cst_73 {dimension_numbers = #tpu.dot_dimension_numbers<[1], [0], [0], [1], [0, 0, 1, 1], [], []>} : vector<48x512xbf16>, vector<512x128xbf16>, vector<48x128xf32> -> vector<48x128xf32>
    %c0_74 = arith.constant 0 : index
    %c0_75 = arith.constant 0 : index
    %c0_76 = arith.constant 0 : index
    %191 = vector.load %arg18[%c0_74, %c0_75, %c0_76] : memref<3x1x128xf32, #tpu.memory_space<vmem>>, vector<1x1x128xf32>
    %192 = vector.shape_cast %191 : vector<1x1x128xf32> to vector<1x128xf32>
    %193 = vector.broadcast %192 : vector<1x128xf32> to vector<48x128xf32>
    %194 = arith.addf %190, %193 : vector<48x128xf32>
    %195 = arith.addf %176, %194 : vector<48x128xf32>
    %c0_77 = arith.constant 0 : index
    %c0_78 = arith.constant 0 : index
    %c0_79 = arith.constant 0 : index
    %196 = vector.load %arg19[%c0_77, %c0_78, %c0_79] : memref<3x1x128xf32, #tpu.memory_space<vmem>>, vector<1x1x128xf32>
    %197 = vector.shape_cast %196 : vector<1x1x128xf32> to vector<1x128xf32>
    %c0_80 = arith.constant 0 : index
    %c0_81 = arith.constant 0 : index
    %c0_82 = arith.constant 0 : index
    %198 = vector.load %arg20[%c0_80, %c0_81, %c0_82] : memref<3x1x128xf32, #tpu.memory_space<vmem>>, vector<1x1x128xf32>
    %199 = vector.shape_cast %198 : vector<1x1x128xf32> to vector<1x128xf32>
    %cst_83 = arith.constant dense<0.000000e+00> : vector<48xf32>
    %200 = vector.multi_reduction <add>, %195, %cst_83 [1] : vector<48x128xf32> to vector<48xf32>
    %201 = vector.shape_cast %200 : vector<48xf32> to vector<48x1xf32>
    %cst_84 = arith.constant 1.280000e+02 : f32
    %202 = vector.broadcast %cst_84 : f32 to vector<48x1xf32>
    %203 = arith.divf %201, %202 : vector<48x1xf32>
    %204 = arith.mulf %195, %195 : vector<48x128xf32>
    %cst_85 = arith.constant dense<0.000000e+00> : vector<48xf32>
    %205 = vector.multi_reduction <add>, %204, %cst_85 [1] : vector<48x128xf32> to vector<48xf32>
    %206 = vector.shape_cast %205 : vector<48xf32> to vector<48x1xf32>
    %cst_86 = arith.constant 1.280000e+02 : f32
    %207 = vector.broadcast %cst_86 : f32 to vector<48x1xf32>
    %208 = arith.divf %206, %207 : vector<48x1xf32>
    %209 = arith.mulf %203, %203 : vector<48x1xf32>
    %210 = arith.subf %208, %209 : vector<48x1xf32>
    %211 = vector.broadcast %203 : vector<48x1xf32> to vector<48x128xf32>
    %212 = arith.subf %195, %211 : vector<48x128xf32>
    %cst_87 = arith.constant 9.99999974E-6 : f32
    %213 = vector.broadcast %cst_87 : f32 to vector<48x1xf32>
    %214 = arith.addf %210, %213 : vector<48x1xf32>
    %215 = math.rsqrt %214 : vector<48x1xf32>
    %216 = vector.broadcast %215 : vector<48x1xf32> to vector<48x128xf32>
    %217 = arith.mulf %212, %216 : vector<48x128xf32>
    %218 = vector.broadcast %197 : vector<1x128xf32> to vector<48x128xf32>
    %219 = arith.mulf %217, %218 : vector<48x128xf32>
    %220 = vector.broadcast %199 : vector<1x128xf32> to vector<48x128xf32>
    %221 = arith.addf %219, %220 : vector<48x128xf32>
    %222 = arith.truncf %221 : vector<48x128xf32> to vector<48x128xbf16>
    %c1 = arith.constant 1 : index
    %c0_88 = arith.constant 0 : index
    %c0_89 = arith.constant 0 : index
    %223 = vector.load %arg9[%c1, %c0_88, %c0_89] : memref<3x128x384xbf16, #tpu.memory_space<vmem>>, vector<1x128x384xbf16>
    %224 = vector.shape_cast %223 : vector<1x128x384xbf16> to vector<128x384xbf16>
    %cst_90 = arith.constant dense<0.000000e+00> : vector<48x384xf32>
    %225 = tpu.matmul %222, %224, %cst_90 {dimension_numbers = #tpu.dot_dimension_numbers<[1], [0], [0], [1], [0, 0, 1, 1], [], []>} : vector<48x128xbf16>, vector<128x384xbf16>, vector<48x384xf32> -> vector<48x384xf32>
    %c1_91 = arith.constant 1 : index
    %c0_92 = arith.constant 0 : index
    %c0_93 = arith.constant 0 : index
    %226 = vector.load %arg10[%c1_91, %c0_92, %c0_93] : memref<3x1x384xf32, #tpu.memory_space<vmem>>, vector<1x1x384xf32>
    %227 = vector.shape_cast %226 : vector<1x1x384xf32> to vector<1x384xf32>
    %228 = vector.broadcast %227 : vector<1x384xf32> to vector<48x384xf32>
    %229 = arith.addf %225, %228 : vector<48x384xf32>
    %230 = vector.extract_strided_slice %229 {offsets = [0, 0], sizes = [48, 128], strides = [1, 1]} : vector<48x384xf32> to vector<48x128xf32>
    %231 = arith.truncf %230 : vector<48x128xf32> to vector<48x128xbf16>
    %232 = vector.shape_cast %231 : vector<48x128xbf16> to vector<2x24x128xbf16>
    %233 = vector.extract_strided_slice %229 {offsets = [0, 128], sizes = [48, 128], strides = [1, 1]} : vector<48x384xf32> to vector<48x128xf32>
    %234 = arith.truncf %233 : vector<48x128xf32> to vector<48x128xbf16>
    %235 = vector.shape_cast %234 : vector<48x128xbf16> to vector<2x24x128xbf16>
    %236 = vector.extract_strided_slice %229 {offsets = [0, 256], sizes = [48, 128], strides = [1, 1]} : vector<48x384xf32> to vector<48x128xf32>
    %237 = arith.truncf %236 : vector<48x128xf32> to vector<48x128xbf16>
    %238 = vector.shape_cast %237 : vector<48x128xbf16> to vector<2x24x128xbf16>
    %cst_94 = arith.constant 0.000000e+00 : f32
    %239 = vector.broadcast %cst_94 : f32 to vector<2x24x128xf32>
    %240 = vector.extract_strided_slice %42 {offsets = [0, 0], sizes = [1, 128], strides = [1, 1]} : vector<4x128xbf16> to vector<1x128xbf16>
    %241 = vector.shape_cast %240 : vector<1x128xbf16> to vector<1x1x128xbf16>
    %242 = vector.broadcast %241 : vector<1x1x128xbf16> to vector<2x24x128xbf16>
    %243 = arith.mulf %235, %242 : vector<2x24x128xbf16>
    "tpu.trace_start"() <{level = 10 : i32, message = "bqd,bkd->bqk"}> : () -> ()
    %cst_95 = arith.constant dense<0.000000e+00> : vector<2x24x24xf32>
    %244 = tpu.matmul %232, %243, %cst_95 {dimension_numbers = #tpu.dot_dimension_numbers<[2], [2], [1], [1], [0, 0, 0, 1, 1, 1], [0], [0]>} : vector<2x24x128xbf16>, vector<2x24x128xbf16>, vector<2x24x24xf32> -> vector<2x24x24xf32>
    "tpu.trace_stop"() : () -> ()
    %cst_96 = arith.constant dense<0xFF800000> : vector<2x24xf32>
    %245 = vector.multi_reduction <maximumf>, %244, %cst_96 [2] : vector<2x24x24xf32> to vector<2x24xf32>
    %246 = vector.shape_cast %245 : vector<2x24xf32> to vector<2x24x1xf32>
    %247 = vector.broadcast %246 : vector<2x24x1xf32> to vector<2x24x24xf32>
    %248 = arith.subf %244, %247 : vector<2x24x24xf32>
    %249 = math.exp %248 : vector<2x24x24xf32>
    %cst_97 = arith.constant dense<0.000000e+00> : vector<2x24xf32>
    %250 = vector.multi_reduction <add>, %249, %cst_97 [2] : vector<2x24x24xf32> to vector<2x24xf32>
    %251 = vector.shape_cast %250 : vector<2x24xf32> to vector<2x24x1xf32>
    %252 = tpu.reciprocal %251 {approx = true} : vector<2x24x1xf32> -> vector<2x24x1xf32>
    %253 = vector.broadcast %252 : vector<2x24x1xf32> to vector<2x24x24xf32>
    %254 = arith.mulf %249, %253 : vector<2x24x24xf32>
    %255 = arith.truncf %254 : vector<2x24x24xf32> to vector<2x24x24xbf16>
    %256 = vector.broadcast %241 : vector<1x1x128xbf16> to vector<2x24x128xbf16>
    %257 = arith.mulf %238, %256 : vector<2x24x128xbf16>
    "tpu.trace_start"() <{level = 10 : i32, message = "bqk,bkd->bqd"}> : () -> ()
    %cst_98 = arith.constant dense<0.000000e+00> : vector<2x24x128xf32>
    %258 = tpu.matmul %255, %257, %cst_98 {dimension_numbers = #tpu.dot_dimension_numbers<[2], [1], [1], [2], [0, 0, 0, 1, 1, 2], [0], [0]>} : vector<2x24x24xbf16>, vector<2x24x128xbf16>, vector<2x24x128xf32> -> vector<2x24x128xf32>
    "tpu.trace_stop"() : () -> ()
    %259 = arith.addf %239, %258 : vector<2x24x128xf32>
    %260 = vector.extract_strided_slice %42 {offsets = [1, 0], sizes = [1, 128], strides = [1, 1]} : vector<4x128xbf16> to vector<1x128xbf16>
    %261 = vector.shape_cast %260 : vector<1x128xbf16> to vector<1x1x128xbf16>
    %262 = vector.broadcast %261 : vector<1x1x128xbf16> to vector<2x24x128xbf16>
    %263 = arith.mulf %235, %262 : vector<2x24x128xbf16>
    "tpu.trace_start"() <{level = 10 : i32, message = "bqd,bkd->bqk"}> : () -> ()
    %cst_99 = arith.constant dense<0.000000e+00> : vector<2x24x24xf32>
    %264 = tpu.matmul %232, %263, %cst_99 {dimension_numbers = #tpu.dot_dimension_numbers<[2], [2], [1], [1], [0, 0, 0, 1, 1, 1], [0], [0]>} : vector<2x24x128xbf16>, vector<2x24x128xbf16>, vector<2x24x24xf32> -> vector<2x24x24xf32>
    "tpu.trace_stop"() : () -> ()
    %cst_100 = arith.constant dense<0xFF800000> : vector<2x24xf32>
    %265 = vector.multi_reduction <maximumf>, %264, %cst_100 [2] : vector<2x24x24xf32> to vector<2x24xf32>
    %266 = vector.shape_cast %265 : vector<2x24xf32> to vector<2x24x1xf32>
    %267 = vector.broadcast %266 : vector<2x24x1xf32> to vector<2x24x24xf32>
    %268 = arith.subf %264, %267 : vector<2x24x24xf32>
    %269 = math.exp %268 : vector<2x24x24xf32>
    %cst_101 = arith.constant dense<0.000000e+00> : vector<2x24xf32>
    %270 = vector.multi_reduction <add>, %269, %cst_101 [2] : vector<2x24x24xf32> to vector<2x24xf32>
    %271 = vector.shape_cast %270 : vector<2x24xf32> to vector<2x24x1xf32>
    %272 = tpu.reciprocal %271 {approx = true} : vector<2x24x1xf32> -> vector<2x24x1xf32>
    %273 = vector.broadcast %272 : vector<2x24x1xf32> to vector<2x24x24xf32>
    %274 = arith.mulf %269, %273 : vector<2x24x24xf32>
    %275 = arith.truncf %274 : vector<2x24x24xf32> to vector<2x24x24xbf16>
    %276 = vector.broadcast %261 : vector<1x1x128xbf16> to vector<2x24x128xbf16>
    %277 = arith.mulf %238, %276 : vector<2x24x128xbf16>
    "tpu.trace_start"() <{level = 10 : i32, message = "bqk,bkd->bqd"}> : () -> ()
    %cst_102 = arith.constant dense<0.000000e+00> : vector<2x24x128xf32>
    %278 = tpu.matmul %275, %277, %cst_102 {dimension_numbers = #tpu.dot_dimension_numbers<[2], [1], [1], [2], [0, 0, 0, 1, 1, 2], [0], [0]>} : vector<2x24x24xbf16>, vector<2x24x128xbf16>, vector<2x24x128xf32> -> vector<2x24x128xf32>
    "tpu.trace_stop"() : () -> ()
    %279 = arith.addf %259, %278 : vector<2x24x128xf32>
    %280 = vector.extract_strided_slice %42 {offsets = [2, 0], sizes = [1, 128], strides = [1, 1]} : vector<4x128xbf16> to vector<1x128xbf16>
    %281 = vector.shape_cast %280 : vector<1x128xbf16> to vector<1x1x128xbf16>
    %282 = vector.broadcast %281 : vector<1x1x128xbf16> to vector<2x24x128xbf16>
    %283 = arith.mulf %235, %282 : vector<2x24x128xbf16>
    "tpu.trace_start"() <{level = 10 : i32, message = "bqd,bkd->bqk"}> : () -> ()
    %cst_103 = arith.constant dense<0.000000e+00> : vector<2x24x24xf32>
    %284 = tpu.matmul %232, %283, %cst_103 {dimension_numbers = #tpu.dot_dimension_numbers<[2], [2], [1], [1], [0, 0, 0, 1, 1, 1], [0], [0]>} : vector<2x24x128xbf16>, vector<2x24x128xbf16>, vector<2x24x24xf32> -> vector<2x24x24xf32>
    "tpu.trace_stop"() : () -> ()
    %cst_104 = arith.constant dense<0xFF800000> : vector<2x24xf32>
    %285 = vector.multi_reduction <maximumf>, %284, %cst_104 [2] : vector<2x24x24xf32> to vector<2x24xf32>
    %286 = vector.shape_cast %285 : vector<2x24xf32> to vector<2x24x1xf32>
    %287 = vector.broadcast %286 : vector<2x24x1xf32> to vector<2x24x24xf32>
    %288 = arith.subf %284, %287 : vector<2x24x24xf32>
    %289 = math.exp %288 : vector<2x24x24xf32>
    %cst_105 = arith.constant dense<0.000000e+00> : vector<2x24xf32>
    %290 = vector.multi_reduction <add>, %289, %cst_105 [2] : vector<2x24x24xf32> to vector<2x24xf32>
    %291 = vector.shape_cast %290 : vector<2x24xf32> to vector<2x24x1xf32>
    %292 = tpu.reciprocal %291 {approx = true} : vector<2x24x1xf32> -> vector<2x24x1xf32>
    %293 = vector.broadcast %292 : vector<2x24x1xf32> to vector<2x24x24xf32>
    %294 = arith.mulf %289, %293 : vector<2x24x24xf32>
    %295 = arith.truncf %294 : vector<2x24x24xf32> to vector<2x24x24xbf16>
    %296 = vector.broadcast %281 : vector<1x1x128xbf16> to vector<2x24x128xbf16>
    %297 = arith.mulf %238, %296 : vector<2x24x128xbf16>
    "tpu.trace_start"() <{level = 10 : i32, message = "bqk,bkd->bqd"}> : () -> ()
    %cst_106 = arith.constant dense<0.000000e+00> : vector<2x24x128xf32>
    %298 = tpu.matmul %295, %297, %cst_106 {dimension_numbers = #tpu.dot_dimension_numbers<[2], [1], [1], [2], [0, 0, 0, 1, 1, 2], [0], [0]>} : vector<2x24x24xbf16>, vector<2x24x128xbf16>, vector<2x24x128xf32> -> vector<2x24x128xf32>
    "tpu.trace_stop"() : () -> ()
    %299 = arith.addf %279, %298 : vector<2x24x128xf32>
    %300 = vector.extract_strided_slice %42 {offsets = [3, 0], sizes = [1, 128], strides = [1, 1]} : vector<4x128xbf16> to vector<1x128xbf16>
    %301 = vector.shape_cast %300 : vector<1x128xbf16> to vector<1x1x128xbf16>
    %302 = vector.broadcast %301 : vector<1x1x128xbf16> to vector<2x24x128xbf16>
    %303 = arith.mulf %235, %302 : vector<2x24x128xbf16>
    "tpu.trace_start"() <{level = 10 : i32, message = "bqd,bkd->bqk"}> : () -> ()
    %cst_107 = arith.constant dense<0.000000e+00> : vector<2x24x24xf32>
    %304 = tpu.matmul %232, %303, %cst_107 {dimension_numbers = #tpu.dot_dimension_numbers<[2], [2], [1], [1], [0, 0, 0, 1, 1, 1], [0], [0]>} : vector<2x24x128xbf16>, vector<2x24x128xbf16>, vector<2x24x24xf32> -> vector<2x24x24xf32>
    "tpu.trace_stop"() : () -> ()
    %cst_108 = arith.constant dense<0xFF800000> : vector<2x24xf32>
    %305 = vector.multi_reduction <maximumf>, %304, %cst_108 [2] : vector<2x24x24xf32> to vector<2x24xf32>
    %306 = vector.shape_cast %305 : vector<2x24xf32> to vector<2x24x1xf32>
    %307 = vector.broadcast %306 : vector<2x24x1xf32> to vector<2x24x24xf32>
    %308 = arith.subf %304, %307 : vector<2x24x24xf32>
    %309 = math.exp %308 : vector<2x24x24xf32>
    %cst_109 = arith.constant dense<0.000000e+00> : vector<2x24xf32>
    %310 = vector.multi_reduction <add>, %309, %cst_109 [2] : vector<2x24x24xf32> to vector<2x24xf32>
    %311 = vector.shape_cast %310 : vector<2x24xf32> to vector<2x24x1xf32>
    %312 = tpu.reciprocal %311 {approx = true} : vector<2x24x1xf32> -> vector<2x24x1xf32>
    %313 = vector.broadcast %312 : vector<2x24x1xf32> to vector<2x24x24xf32>
    %314 = arith.mulf %309, %313 : vector<2x24x24xf32>
    %315 = arith.truncf %314 : vector<2x24x24xf32> to vector<2x24x24xbf16>
    %316 = vector.broadcast %301 : vector<1x1x128xbf16> to vector<2x24x128xbf16>
    %317 = arith.mulf %238, %316 : vector<2x24x128xbf16>
    "tpu.trace_start"() <{level = 10 : i32, message = "bqk,bkd->bqd"}> : () -> ()
    %cst_110 = arith.constant dense<0.000000e+00> : vector<2x24x128xf32>
    %318 = tpu.matmul %315, %317, %cst_110 {dimension_numbers = #tpu.dot_dimension_numbers<[2], [1], [1], [2], [0, 0, 0, 1, 1, 2], [0], [0]>} : vector<2x24x24xbf16>, vector<2x24x128xbf16>, vector<2x24x128xf32> -> vector<2x24x128xf32>
    "tpu.trace_stop"() : () -> ()
    %319 = arith.addf %299, %318 : vector<2x24x128xf32>
    %320 = vector.shape_cast %319 : vector<2x24x128xf32> to vector<48x128xf32>
    %321 = arith.truncf %320 : vector<48x128xf32> to vector<48x128xbf16>
    %c1_111 = arith.constant 1 : index
    %c0_112 = arith.constant 0 : index
    %c0_113 = arith.constant 0 : index
    %322 = vector.load %arg11[%c1_111, %c0_112, %c0_113] : memref<3x128x128xbf16, #tpu.memory_space<vmem>>, vector<1x128x128xbf16>
    %323 = vector.shape_cast %322 : vector<1x128x128xbf16> to vector<128x128xbf16>
    %cst_114 = arith.constant dense<0.000000e+00> : vector<48x128xf32>
    %324 = tpu.matmul %321, %323, %cst_114 {dimension_numbers = #tpu.dot_dimension_numbers<[1], [0], [0], [1], [0, 0, 1, 1], [], []>} : vector<48x128xbf16>, vector<128x128xbf16>, vector<48x128xf32> -> vector<48x128xf32>
    %c1_115 = arith.constant 1 : index
    %c0_116 = arith.constant 0 : index
    %c0_117 = arith.constant 0 : index
    %325 = vector.load %arg12[%c1_115, %c0_116, %c0_117] : memref<3x1x128xf32, #tpu.memory_space<vmem>>, vector<1x1x128xf32>
    %326 = vector.shape_cast %325 : vector<1x1x128xf32> to vector<1x128xf32>
    %327 = vector.broadcast %326 : vector<1x128xf32> to vector<48x128xf32>
    %328 = arith.addf %324, %327 : vector<48x128xf32>
    %329 = arith.addf %221, %328 : vector<48x128xf32>
    %c1_118 = arith.constant 1 : index
    %c0_119 = arith.constant 0 : index
    %c0_120 = arith.constant 0 : index
    %330 = vector.load %arg13[%c1_118, %c0_119, %c0_120] : memref<3x1x128xf32, #tpu.memory_space<vmem>>, vector<1x1x128xf32>
    %331 = vector.shape_cast %330 : vector<1x1x128xf32> to vector<1x128xf32>
    %c1_121 = arith.constant 1 : index
    %c0_122 = arith.constant 0 : index
    %c0_123 = arith.constant 0 : index
    %332 = vector.load %arg14[%c1_121, %c0_122, %c0_123] : memref<3x1x128xf32, #tpu.memory_space<vmem>>, vector<1x1x128xf32>
    %333 = vector.shape_cast %332 : vector<1x1x128xf32> to vector<1x128xf32>
    %cst_124 = arith.constant dense<0.000000e+00> : vector<48xf32>
    %334 = vector.multi_reduction <add>, %329, %cst_124 [1] : vector<48x128xf32> to vector<48xf32>
    %335 = vector.shape_cast %334 : vector<48xf32> to vector<48x1xf32>
    %cst_125 = arith.constant 1.280000e+02 : f32
    %336 = vector.broadcast %cst_125 : f32 to vector<48x1xf32>
    %337 = arith.divf %335, %336 : vector<48x1xf32>
    %338 = arith.mulf %329, %329 : vector<48x128xf32>
    %cst_126 = arith.constant dense<0.000000e+00> : vector<48xf32>
    %339 = vector.multi_reduction <add>, %338, %cst_126 [1] : vector<48x128xf32> to vector<48xf32>
    %340 = vector.shape_cast %339 : vector<48xf32> to vector<48x1xf32>
    %cst_127 = arith.constant 1.280000e+02 : f32
    %341 = vector.broadcast %cst_127 : f32 to vector<48x1xf32>
    %342 = arith.divf %340, %341 : vector<48x1xf32>
    %343 = arith.mulf %337, %337 : vector<48x1xf32>
    %344 = arith.subf %342, %343 : vector<48x1xf32>
    %345 = vector.broadcast %337 : vector<48x1xf32> to vector<48x128xf32>
    %346 = arith.subf %329, %345 : vector<48x128xf32>
    %cst_128 = arith.constant 9.99999974E-6 : f32
    %347 = vector.broadcast %cst_128 : f32 to vector<48x1xf32>
    %348 = arith.addf %344, %347 : vector<48x1xf32>
    %349 = math.rsqrt %348 : vector<48x1xf32>
    %350 = vector.broadcast %349 : vector<48x1xf32> to vector<48x128xf32>
    %351 = arith.mulf %346, %350 : vector<48x128xf32>
    %352 = vector.broadcast %331 : vector<1x128xf32> to vector<48x128xf32>
    %353 = arith.mulf %351, %352 : vector<48x128xf32>
    %354 = vector.broadcast %333 : vector<1x128xf32> to vector<48x128xf32>
    %355 = arith.addf %353, %354 : vector<48x128xf32>
    %356 = arith.truncf %355 : vector<48x128xf32> to vector<48x128xbf16>
    %c1_129 = arith.constant 1 : index
    %c0_130 = arith.constant 0 : index
    %c0_131 = arith.constant 0 : index
    %357 = vector.load %arg15[%c1_129, %c0_130, %c0_131] : memref<3x128x512xbf16, #tpu.memory_space<vmem>>, vector<1x128x512xbf16>
    %358 = vector.shape_cast %357 : vector<1x128x512xbf16> to vector<128x512xbf16>
    %cst_132 = arith.constant dense<0.000000e+00> : vector<48x512xf32>
    %359 = tpu.matmul %356, %358, %cst_132 {dimension_numbers = #tpu.dot_dimension_numbers<[1], [0], [0], [1], [0, 0, 1, 1], [], []>} : vector<48x128xbf16>, vector<128x512xbf16>, vector<48x512xf32> -> vector<48x512xf32>
    %c1_133 = arith.constant 1 : index
    %c0_134 = arith.constant 0 : index
    %c0_135 = arith.constant 0 : index
    %360 = vector.load %arg16[%c1_133, %c0_134, %c0_135] : memref<3x1x512xf32, #tpu.memory_space<vmem>>, vector<1x1x512xf32>
    %361 = vector.shape_cast %360 : vector<1x1x512xf32> to vector<1x512xf32>
    %362 = vector.broadcast %361 : vector<1x512xf32> to vector<48x512xf32>
    %363 = arith.addf %359, %362 : vector<48x512xf32>
    %cst_136 = arith.constant 0.000000e+00 : f32
    %364 = vector.broadcast %cst_136 : f32 to vector<48x512xf32>
    %365 = arith.maximumf %363, %364 : vector<48x512xf32>
    %366 = arith.truncf %365 : vector<48x512xf32> to vector<48x512xbf16>
    %c1_137 = arith.constant 1 : index
    %c0_138 = arith.constant 0 : index
    %c0_139 = arith.constant 0 : index
    %367 = vector.load %arg17[%c1_137, %c0_138, %c0_139] : memref<3x512x128xbf16, #tpu.memory_space<vmem>>, vector<1x512x128xbf16>
    %368 = vector.shape_cast %367 : vector<1x512x128xbf16> to vector<512x128xbf16>
    %cst_140 = arith.constant dense<0.000000e+00> : vector<48x128xf32>
    %369 = tpu.matmul %366, %368, %cst_140 {dimension_numbers = #tpu.dot_dimension_numbers<[1], [0], [0], [1], [0, 0, 1, 1], [], []>} : vector<48x512xbf16>, vector<512x128xbf16>, vector<48x128xf32> -> vector<48x128xf32>
    %c1_141 = arith.constant 1 : index
    %c0_142 = arith.constant 0 : index
    %c0_143 = arith.constant 0 : index
    %370 = vector.load %arg18[%c1_141, %c0_142, %c0_143] : memref<3x1x128xf32, #tpu.memory_space<vmem>>, vector<1x1x128xf32>
    %371 = vector.shape_cast %370 : vector<1x1x128xf32> to vector<1x128xf32>
    %372 = vector.broadcast %371 : vector<1x128xf32> to vector<48x128xf32>
    %373 = arith.addf %369, %372 : vector<48x128xf32>
    %374 = arith.addf %355, %373 : vector<48x128xf32>
    %c1_144 = arith.constant 1 : index
    %c0_145 = arith.constant 0 : index
    %c0_146 = arith.constant 0 : index
    %375 = vector.load %arg19[%c1_144, %c0_145, %c0_146] : memref<3x1x128xf32, #tpu.memory_space<vmem>>, vector<1x1x128xf32>
    %376 = vector.shape_cast %375 : vector<1x1x128xf32> to vector<1x128xf32>
    %c1_147 = arith.constant 1 : index
    %c0_148 = arith.constant 0 : index
    %c0_149 = arith.constant 0 : index
    %377 = vector.load %arg20[%c1_147, %c0_148, %c0_149] : memref<3x1x128xf32, #tpu.memory_space<vmem>>, vector<1x1x128xf32>
    %378 = vector.shape_cast %377 : vector<1x1x128xf32> to vector<1x128xf32>
    %cst_150 = arith.constant dense<0.000000e+00> : vector<48xf32>
    %379 = vector.multi_reduction <add>, %374, %cst_150 [1] : vector<48x128xf32> to vector<48xf32>
    %380 = vector.shape_cast %379 : vector<48xf32> to vector<48x1xf32>
    %cst_151 = arith.constant 1.280000e+02 : f32
    %381 = vector.broadcast %cst_151 : f32 to vector<48x1xf32>
    %382 = arith.divf %380, %381 : vector<48x1xf32>
    %383 = arith.mulf %374, %374 : vector<48x128xf32>
    %cst_152 = arith.constant dense<0.000000e+00> : vector<48xf32>
    %384 = vector.multi_reduction <add>, %383, %cst_152 [1] : vector<48x128xf32> to vector<48xf32>
    %385 = vector.shape_cast %384 : vector<48xf32> to vector<48x1xf32>
    %cst_153 = arith.constant 1.280000e+02 : f32
    %386 = vector.broadcast %cst_153 : f32 to vector<48x1xf32>
    %387 = arith.divf %385, %386 : vector<48x1xf32>
    %388 = arith.mulf %382, %382 : vector<48x1xf32>
    %389 = arith.subf %387, %388 : vector<48x1xf32>
    %390 = vector.broadcast %382 : vector<48x1xf32> to vector<48x128xf32>
    %391 = arith.subf %374, %390 : vector<48x128xf32>
    %cst_154 = arith.constant 9.99999974E-6 : f32
    %392 = vector.broadcast %cst_154 : f32 to vector<48x1xf32>
    %393 = arith.addf %389, %392 : vector<48x1xf32>
    %394 = math.rsqrt %393 : vector<48x1xf32>
    %395 = vector.broadcast %394 : vector<48x1xf32> to vector<48x128xf32>
    %396 = arith.mulf %391, %395 : vector<48x128xf32>
    %397 = vector.broadcast %376 : vector<1x128xf32> to vector<48x128xf32>
    %398 = arith.mulf %396, %397 : vector<48x128xf32>
    %399 = vector.broadcast %378 : vector<1x128xf32> to vector<48x128xf32>
    %400 = arith.addf %398, %399 : vector<48x128xf32>
    %401 = arith.truncf %400 : vector<48x128xf32> to vector<48x128xbf16>
    %c2 = arith.constant 2 : index
    %c0_155 = arith.constant 0 : index
    %c0_156 = arith.constant 0 : index
    %402 = vector.load %arg9[%c2, %c0_155, %c0_156] : memref<3x128x384xbf16, #tpu.memory_space<vmem>>, vector<1x128x384xbf16>
    %403 = vector.shape_cast %402 : vector<1x128x384xbf16> to vector<128x384xbf16>
    %cst_157 = arith.constant dense<0.000000e+00> : vector<48x384xf32>
    %404 = tpu.matmul %401, %403, %cst_157 {dimension_numbers = #tpu.dot_dimension_numbers<[1], [0], [0], [1], [0, 0, 1, 1], [], []>} : vector<48x128xbf16>, vector<128x384xbf16>, vector<48x384xf32> -> vector<48x384xf32>
    %c2_158 = arith.constant 2 : index
    %c0_159 = arith.constant 0 : index
    %c0_160 = arith.constant 0 : index
    %405 = vector.load %arg10[%c2_158, %c0_159, %c0_160] : memref<3x1x384xf32, #tpu.memory_space<vmem>>, vector<1x1x384xf32>
    %406 = vector.shape_cast %405 : vector<1x1x384xf32> to vector<1x384xf32>
    %407 = vector.broadcast %406 : vector<1x384xf32> to vector<48x384xf32>
    %408 = arith.addf %404, %407 : vector<48x384xf32>
    %409 = vector.extract_strided_slice %408 {offsets = [0, 0], sizes = [48, 128], strides = [1, 1]} : vector<48x384xf32> to vector<48x128xf32>
    %410 = arith.truncf %409 : vector<48x128xf32> to vector<48x128xbf16>
    %411 = vector.shape_cast %410 : vector<48x128xbf16> to vector<2x24x128xbf16>
    %412 = vector.extract_strided_slice %408 {offsets = [0, 128], sizes = [48, 128], strides = [1, 1]} : vector<48x384xf32> to vector<48x128xf32>
    %413 = arith.truncf %412 : vector<48x128xf32> to vector<48x128xbf16>
    %414 = vector.shape_cast %413 : vector<48x128xbf16> to vector<2x24x128xbf16>
    %415 = vector.extract_strided_slice %408 {offsets = [0, 256], sizes = [48, 128], strides = [1, 1]} : vector<48x384xf32> to vector<48x128xf32>
    %416 = arith.truncf %415 : vector<48x128xf32> to vector<48x128xbf16>
    %417 = vector.shape_cast %416 : vector<48x128xbf16> to vector<2x24x128xbf16>
    %cst_161 = arith.constant 0.000000e+00 : f32
    %418 = vector.broadcast %cst_161 : f32 to vector<2x24x128xf32>
    %419 = vector.extract_strided_slice %42 {offsets = [0, 0], sizes = [1, 128], strides = [1, 1]} : vector<4x128xbf16> to vector<1x128xbf16>
    %420 = vector.shape_cast %419 : vector<1x128xbf16> to vector<1x1x128xbf16>
    %421 = vector.broadcast %420 : vector<1x1x128xbf16> to vector<2x24x128xbf16>
    %422 = arith.mulf %414, %421 : vector<2x24x128xbf16>
    "tpu.trace_start"() <{level = 10 : i32, message = "bqd,bkd->bqk"}> : () -> ()
    %cst_162 = arith.constant dense<0.000000e+00> : vector<2x24x24xf32>
    %423 = tpu.matmul %411, %422, %cst_162 {dimension_numbers = #tpu.dot_dimension_numbers<[2], [2], [1], [1], [0, 0, 0, 1, 1, 1], [0], [0]>} : vector<2x24x128xbf16>, vector<2x24x128xbf16>, vector<2x24x24xf32> -> vector<2x24x24xf32>
    "tpu.trace_stop"() : () -> ()
    %cst_163 = arith.constant dense<0xFF800000> : vector<2x24xf32>
    %424 = vector.multi_reduction <maximumf>, %423, %cst_163 [2] : vector<2x24x24xf32> to vector<2x24xf32>
    %425 = vector.shape_cast %424 : vector<2x24xf32> to vector<2x24x1xf32>
    %426 = vector.broadcast %425 : vector<2x24x1xf32> to vector<2x24x24xf32>
    %427 = arith.subf %423, %426 : vector<2x24x24xf32>
    %428 = math.exp %427 : vector<2x24x24xf32>
    %cst_164 = arith.constant dense<0.000000e+00> : vector<2x24xf32>
    %429 = vector.multi_reduction <add>, %428, %cst_164 [2] : vector<2x24x24xf32> to vector<2x24xf32>
    %430 = vector.shape_cast %429 : vector<2x24xf32> to vector<2x24x1xf32>
    %431 = tpu.reciprocal %430 {approx = true} : vector<2x24x1xf32> -> vector<2x24x1xf32>
    %432 = vector.broadcast %431 : vector<2x24x1xf32> to vector<2x24x24xf32>
    %433 = arith.mulf %428, %432 : vector<2x24x24xf32>
    %434 = arith.truncf %433 : vector<2x24x24xf32> to vector<2x24x24xbf16>
    %435 = vector.broadcast %420 : vector<1x1x128xbf16> to vector<2x24x128xbf16>
    %436 = arith.mulf %417, %435 : vector<2x24x128xbf16>
    "tpu.trace_start"() <{level = 10 : i32, message = "bqk,bkd->bqd"}> : () -> ()
    %cst_165 = arith.constant dense<0.000000e+00> : vector<2x24x128xf32>
    %437 = tpu.matmul %434, %436, %cst_165 {dimension_numbers = #tpu.dot_dimension_numbers<[2], [1], [1], [2], [0, 0, 0, 1, 1, 2], [0], [0]>} : vector<2x24x24xbf16>, vector<2x24x128xbf16>, vector<2x24x128xf32> -> vector<2x24x128xf32>
    "tpu.trace_stop"() : () -> ()
    %438 = arith.addf %418, %437 : vector<2x24x128xf32>
    %439 = vector.extract_strided_slice %42 {offsets = [1, 0], sizes = [1, 128], strides = [1, 1]} : vector<4x128xbf16> to vector<1x128xbf16>
    %440 = vector.shape_cast %439 : vector<1x128xbf16> to vector<1x1x128xbf16>
    %441 = vector.broadcast %440 : vector<1x1x128xbf16> to vector<2x24x128xbf16>
    %442 = arith.mulf %414, %441 : vector<2x24x128xbf16>
    "tpu.trace_start"() <{level = 10 : i32, message = "bqd,bkd->bqk"}> : () -> ()
    %cst_166 = arith.constant dense<0.000000e+00> : vector<2x24x24xf32>
    %443 = tpu.matmul %411, %442, %cst_166 {dimension_numbers = #tpu.dot_dimension_numbers<[2], [2], [1], [1], [0, 0, 0, 1, 1, 1], [0], [0]>} : vector<2x24x128xbf16>, vector<2x24x128xbf16>, vector<2x24x24xf32> -> vector<2x24x24xf32>
    "tpu.trace_stop"() : () -> ()
    %cst_167 = arith.constant dense<0xFF800000> : vector<2x24xf32>
    %444 = vector.multi_reduction <maximumf>, %443, %cst_167 [2] : vector<2x24x24xf32> to vector<2x24xf32>
    %445 = vector.shape_cast %444 : vector<2x24xf32> to vector<2x24x1xf32>
    %446 = vector.broadcast %445 : vector<2x24x1xf32> to vector<2x24x24xf32>
    %447 = arith.subf %443, %446 : vector<2x24x24xf32>
    %448 = math.exp %447 : vector<2x24x24xf32>
    %cst_168 = arith.constant dense<0.000000e+00> : vector<2x24xf32>
    %449 = vector.multi_reduction <add>, %448, %cst_168 [2] : vector<2x24x24xf32> to vector<2x24xf32>
    %450 = vector.shape_cast %449 : vector<2x24xf32> to vector<2x24x1xf32>
    %451 = tpu.reciprocal %450 {approx = true} : vector<2x24x1xf32> -> vector<2x24x1xf32>
    %452 = vector.broadcast %451 : vector<2x24x1xf32> to vector<2x24x24xf32>
    %453 = arith.mulf %448, %452 : vector<2x24x24xf32>
    %454 = arith.truncf %453 : vector<2x24x24xf32> to vector<2x24x24xbf16>
    %455 = vector.broadcast %440 : vector<1x1x128xbf16> to vector<2x24x128xbf16>
    %456 = arith.mulf %417, %455 : vector<2x24x128xbf16>
    "tpu.trace_start"() <{level = 10 : i32, message = "bqk,bkd->bqd"}> : () -> ()
    %cst_169 = arith.constant dense<0.000000e+00> : vector<2x24x128xf32>
    %457 = tpu.matmul %454, %456, %cst_169 {dimension_numbers = #tpu.dot_dimension_numbers<[2], [1], [1], [2], [0, 0, 0, 1, 1, 2], [0], [0]>} : vector<2x24x24xbf16>, vector<2x24x128xbf16>, vector<2x24x128xf32> -> vector<2x24x128xf32>
    "tpu.trace_stop"() : () -> ()
    %458 = arith.addf %438, %457 : vector<2x24x128xf32>
    %459 = vector.extract_strided_slice %42 {offsets = [2, 0], sizes = [1, 128], strides = [1, 1]} : vector<4x128xbf16> to vector<1x128xbf16>
    %460 = vector.shape_cast %459 : vector<1x128xbf16> to vector<1x1x128xbf16>
    %461 = vector.broadcast %460 : vector<1x1x128xbf16> to vector<2x24x128xbf16>
    %462 = arith.mulf %414, %461 : vector<2x24x128xbf16>
    "tpu.trace_start"() <{level = 10 : i32, message = "bqd,bkd->bqk"}> : () -> ()
    %cst_170 = arith.constant dense<0.000000e+00> : vector<2x24x24xf32>
    %463 = tpu.matmul %411, %462, %cst_170 {dimension_numbers = #tpu.dot_dimension_numbers<[2], [2], [1], [1], [0, 0, 0, 1, 1, 1], [0], [0]>} : vector<2x24x128xbf16>, vector<2x24x128xbf16>, vector<2x24x24xf32> -> vector<2x24x24xf32>
    "tpu.trace_stop"() : () -> ()
    %cst_171 = arith.constant dense<0xFF800000> : vector<2x24xf32>
    %464 = vector.multi_reduction <maximumf>, %463, %cst_171 [2] : vector<2x24x24xf32> to vector<2x24xf32>
    %465 = vector.shape_cast %464 : vector<2x24xf32> to vector<2x24x1xf32>
    %466 = vector.broadcast %465 : vector<2x24x1xf32> to vector<2x24x24xf32>
    %467 = arith.subf %463, %466 : vector<2x24x24xf32>
    %468 = math.exp %467 : vector<2x24x24xf32>
    %cst_172 = arith.constant dense<0.000000e+00> : vector<2x24xf32>
    %469 = vector.multi_reduction <add>, %468, %cst_172 [2] : vector<2x24x24xf32> to vector<2x24xf32>
    %470 = vector.shape_cast %469 : vector<2x24xf32> to vector<2x24x1xf32>
    %471 = tpu.reciprocal %470 {approx = true} : vector<2x24x1xf32> -> vector<2x24x1xf32>
    %472 = vector.broadcast %471 : vector<2x24x1xf32> to vector<2x24x24xf32>
    %473 = arith.mulf %468, %472 : vector<2x24x24xf32>
    %474 = arith.truncf %473 : vector<2x24x24xf32> to vector<2x24x24xbf16>
    %475 = vector.broadcast %460 : vector<1x1x128xbf16> to vector<2x24x128xbf16>
    %476 = arith.mulf %417, %475 : vector<2x24x128xbf16>
    "tpu.trace_start"() <{level = 10 : i32, message = "bqk,bkd->bqd"}> : () -> ()
    %cst_173 = arith.constant dense<0.000000e+00> : vector<2x24x128xf32>
    %477 = tpu.matmul %474, %476, %cst_173 {dimension_numbers = #tpu.dot_dimension_numbers<[2], [1], [1], [2], [0, 0, 0, 1, 1, 2], [0], [0]>} : vector<2x24x24xbf16>, vector<2x24x128xbf16>, vector<2x24x128xf32> -> vector<2x24x128xf32>
    "tpu.trace_stop"() : () -> ()
    %478 = arith.addf %458, %477 : vector<2x24x128xf32>
    %479 = vector.extract_strided_slice %42 {offsets = [3, 0], sizes = [1, 128], strides = [1, 1]} : vector<4x128xbf16> to vector<1x128xbf16>
    %480 = vector.shape_cast %479 : vector<1x128xbf16> to vector<1x1x128xbf16>
    %481 = vector.broadcast %480 : vector<1x1x128xbf16> to vector<2x24x128xbf16>
    %482 = arith.mulf %414, %481 : vector<2x24x128xbf16>
    "tpu.trace_start"() <{level = 10 : i32, message = "bqd,bkd->bqk"}> : () -> ()
    %cst_174 = arith.constant dense<0.000000e+00> : vector<2x24x24xf32>
    %483 = tpu.matmul %411, %482, %cst_174 {dimension_numbers = #tpu.dot_dimension_numbers<[2], [2], [1], [1], [0, 0, 0, 1, 1, 1], [0], [0]>} : vector<2x24x128xbf16>, vector<2x24x128xbf16>, vector<2x24x24xf32> -> vector<2x24x24xf32>
    "tpu.trace_stop"() : () -> ()
    %cst_175 = arith.constant dense<0xFF800000> : vector<2x24xf32>
    %484 = vector.multi_reduction <maximumf>, %483, %cst_175 [2] : vector<2x24x24xf32> to vector<2x24xf32>
    %485 = vector.shape_cast %484 : vector<2x24xf32> to vector<2x24x1xf32>
    %486 = vector.broadcast %485 : vector<2x24x1xf32> to vector<2x24x24xf32>
    %487 = arith.subf %483, %486 : vector<2x24x24xf32>
    %488 = math.exp %487 : vector<2x24x24xf32>
    %cst_176 = arith.constant dense<0.000000e+00> : vector<2x24xf32>
    %489 = vector.multi_reduction <add>, %488, %cst_176 [2] : vector<2x24x24xf32> to vector<2x24xf32>
    %490 = vector.shape_cast %489 : vector<2x24xf32> to vector<2x24x1xf32>
    %491 = tpu.reciprocal %490 {approx = true} : vector<2x24x1xf32> -> vector<2x24x1xf32>
    %492 = vector.broadcast %491 : vector<2x24x1xf32> to vector<2x24x24xf32>
    %493 = arith.mulf %488, %492 : vector<2x24x24xf32>
    %494 = arith.truncf %493 : vector<2x24x24xf32> to vector<2x24x24xbf16>
    %495 = vector.broadcast %480 : vector<1x1x128xbf16> to vector<2x24x128xbf16>
    %496 = arith.mulf %417, %495 : vector<2x24x128xbf16>
    "tpu.trace_start"() <{level = 10 : i32, message = "bqk,bkd->bqd"}> : () -> ()
    %cst_177 = arith.constant dense<0.000000e+00> : vector<2x24x128xf32>
    %497 = tpu.matmul %494, %496, %cst_177 {dimension_numbers = #tpu.dot_dimension_numbers<[2], [1], [1], [2], [0, 0, 0, 1, 1, 2], [0], [0]>} : vector<2x24x24xbf16>, vector<2x24x128xbf16>, vector<2x24x128xf32> -> vector<2x24x128xf32>
    "tpu.trace_stop"() : () -> ()
    %498 = arith.addf %478, %497 : vector<2x24x128xf32>
    %499 = vector.shape_cast %498 : vector<2x24x128xf32> to vector<48x128xf32>
    %500 = arith.truncf %499 : vector<48x128xf32> to vector<48x128xbf16>
    %c2_178 = arith.constant 2 : index
    %c0_179 = arith.constant 0 : index
    %c0_180 = arith.constant 0 : index
    %501 = vector.load %arg11[%c2_178, %c0_179, %c0_180] : memref<3x128x128xbf16, #tpu.memory_space<vmem>>, vector<1x128x128xbf16>
    %502 = vector.shape_cast %501 : vector<1x128x128xbf16> to vector<128x128xbf16>
    %cst_181 = arith.constant dense<0.000000e+00> : vector<48x128xf32>
    %503 = tpu.matmul %500, %502, %cst_181 {dimension_numbers = #tpu.dot_dimension_numbers<[1], [0], [0], [1], [0, 0, 1, 1], [], []>} : vector<48x128xbf16>, vector<128x128xbf16>, vector<48x128xf32> -> vector<48x128xf32>
    %c2_182 = arith.constant 2 : index
    %c0_183 = arith.constant 0 : index
    %c0_184 = arith.constant 0 : index
    %504 = vector.load %arg12[%c2_182, %c0_183, %c0_184] : memref<3x1x128xf32, #tpu.memory_space<vmem>>, vector<1x1x128xf32>
    %505 = vector.shape_cast %504 : vector<1x1x128xf32> to vector<1x128xf32>
    %506 = vector.broadcast %505 : vector<1x128xf32> to vector<48x128xf32>
    %507 = arith.addf %503, %506 : vector<48x128xf32>
    %508 = arith.addf %400, %507 : vector<48x128xf32>
    %c2_185 = arith.constant 2 : index
    %c0_186 = arith.constant 0 : index
    %c0_187 = arith.constant 0 : index
    %509 = vector.load %arg13[%c2_185, %c0_186, %c0_187] : memref<3x1x128xf32, #tpu.memory_space<vmem>>, vector<1x1x128xf32>
    %510 = vector.shape_cast %509 : vector<1x1x128xf32> to vector<1x128xf32>
    %c2_188 = arith.constant 2 : index
    %c0_189 = arith.constant 0 : index
    %c0_190 = arith.constant 0 : index
    %511 = vector.load %arg14[%c2_188, %c0_189, %c0_190] : memref<3x1x128xf32, #tpu.memory_space<vmem>>, vector<1x1x128xf32>
    %512 = vector.shape_cast %511 : vector<1x1x128xf32> to vector<1x128xf32>
    %cst_191 = arith.constant dense<0.000000e+00> : vector<48xf32>
    %513 = vector.multi_reduction <add>, %508, %cst_191 [1] : vector<48x128xf32> to vector<48xf32>
    %514 = vector.shape_cast %513 : vector<48xf32> to vector<48x1xf32>
    %cst_192 = arith.constant 1.280000e+02 : f32
    %515 = vector.broadcast %cst_192 : f32 to vector<48x1xf32>
    %516 = arith.divf %514, %515 : vector<48x1xf32>
    %517 = arith.mulf %508, %508 : vector<48x128xf32>
    %cst_193 = arith.constant dense<0.000000e+00> : vector<48xf32>
    %518 = vector.multi_reduction <add>, %517, %cst_193 [1] : vector<48x128xf32> to vector<48xf32>
    %519 = vector.shape_cast %518 : vector<48xf32> to vector<48x1xf32>
    %cst_194 = arith.constant 1.280000e+02 : f32
    %520 = vector.broadcast %cst_194 : f32 to vector<48x1xf32>
    %521 = arith.divf %519, %520 : vector<48x1xf32>
    %522 = arith.mulf %516, %516 : vector<48x1xf32>
    %523 = arith.subf %521, %522 : vector<48x1xf32>
    %524 = vector.broadcast %516 : vector<48x1xf32> to vector<48x128xf32>
    %525 = arith.subf %508, %524 : vector<48x128xf32>
    %cst_195 = arith.constant 9.99999974E-6 : f32
    %526 = vector.broadcast %cst_195 : f32 to vector<48x1xf32>
    %527 = arith.addf %523, %526 : vector<48x1xf32>
    %528 = math.rsqrt %527 : vector<48x1xf32>
    %529 = vector.broadcast %528 : vector<48x1xf32> to vector<48x128xf32>
    %530 = arith.mulf %525, %529 : vector<48x128xf32>
    %531 = vector.broadcast %510 : vector<1x128xf32> to vector<48x128xf32>
    %532 = arith.mulf %530, %531 : vector<48x128xf32>
    %533 = vector.broadcast %512 : vector<1x128xf32> to vector<48x128xf32>
    %534 = arith.addf %532, %533 : vector<48x128xf32>
    %535 = arith.truncf %534 : vector<48x128xf32> to vector<48x128xbf16>
    %c2_196 = arith.constant 2 : index
    %c0_197 = arith.constant 0 : index
    %c0_198 = arith.constant 0 : index
    %536 = vector.load %arg15[%c2_196, %c0_197, %c0_198] : memref<3x128x512xbf16, #tpu.memory_space<vmem>>, vector<1x128x512xbf16>
    %537 = vector.shape_cast %536 : vector<1x128x512xbf16> to vector<128x512xbf16>
    %cst_199 = arith.constant dense<0.000000e+00> : vector<48x512xf32>
    %538 = tpu.matmul %535, %537, %cst_199 {dimension_numbers = #tpu.dot_dimension_numbers<[1], [0], [0], [1], [0, 0, 1, 1], [], []>} : vector<48x128xbf16>, vector<128x512xbf16>, vector<48x512xf32> -> vector<48x512xf32>
    %c2_200 = arith.constant 2 : index
    %c0_201 = arith.constant 0 : index
    %c0_202 = arith.constant 0 : index
    %539 = vector.load %arg16[%c2_200, %c0_201, %c0_202] : memref<3x1x512xf32, #tpu.memory_space<vmem>>, vector<1x1x512xf32>
    %540 = vector.shape_cast %539 : vector<1x1x512xf32> to vector<1x512xf32>
    %541 = vector.broadcast %540 : vector<1x512xf32> to vector<48x512xf32>
    %542 = arith.addf %538, %541 : vector<48x512xf32>
    %cst_203 = arith.constant 0.000000e+00 : f32
    %543 = vector.broadcast %cst_203 : f32 to vector<48x512xf32>
    %544 = arith.maximumf %542, %543 : vector<48x512xf32>
    %545 = arith.truncf %544 : vector<48x512xf32> to vector<48x512xbf16>
    %c2_204 = arith.constant 2 : index
    %c0_205 = arith.constant 0 : index
    %c0_206 = arith.constant 0 : index
    %546 = vector.load %arg17[%c2_204, %c0_205, %c0_206] : memref<3x512x128xbf16, #tpu.memory_space<vmem>>, vector<1x512x128xbf16>
    %547 = vector.shape_cast %546 : vector<1x512x128xbf16> to vector<512x128xbf16>
    %cst_207 = arith.constant dense<0.000000e+00> : vector<48x128xf32>
    %548 = tpu.matmul %545, %547, %cst_207 {dimension_numbers = #tpu.dot_dimension_numbers<[1], [0], [0], [1], [0, 0, 1, 1], [], []>} : vector<48x512xbf16>, vector<512x128xbf16>, vector<48x128xf32> -> vector<48x128xf32>
    %c2_208 = arith.constant 2 : index
    %c0_209 = arith.constant 0 : index
    %c0_210 = arith.constant 0 : index
    %549 = vector.load %arg18[%c2_208, %c0_209, %c0_210] : memref<3x1x128xf32, #tpu.memory_space<vmem>>, vector<1x1x128xf32>
    %550 = vector.shape_cast %549 : vector<1x1x128xf32> to vector<1x128xf32>
    %551 = vector.broadcast %550 : vector<1x128xf32> to vector<48x128xf32>
    %552 = arith.addf %548, %551 : vector<48x128xf32>
    %553 = arith.addf %534, %552 : vector<48x128xf32>
    %c2_211 = arith.constant 2 : index
    %c0_212 = arith.constant 0 : index
    %c0_213 = arith.constant 0 : index
    %554 = vector.load %arg19[%c2_211, %c0_212, %c0_213] : memref<3x1x128xf32, #tpu.memory_space<vmem>>, vector<1x1x128xf32>
    %555 = vector.shape_cast %554 : vector<1x1x128xf32> to vector<1x128xf32>
    %c2_214 = arith.constant 2 : index
    %c0_215 = arith.constant 0 : index
    %c0_216 = arith.constant 0 : index
    %556 = vector.load %arg20[%c2_214, %c0_215, %c0_216] : memref<3x1x128xf32, #tpu.memory_space<vmem>>, vector<1x1x128xf32>
    %557 = vector.shape_cast %556 : vector<1x1x128xf32> to vector<1x128xf32>
    %cst_217 = arith.constant dense<0.000000e+00> : vector<48xf32>
    %558 = vector.multi_reduction <add>, %553, %cst_217 [1] : vector<48x128xf32> to vector<48xf32>
    %559 = vector.shape_cast %558 : vector<48xf32> to vector<48x1xf32>
    %cst_218 = arith.constant 1.280000e+02 : f32
    %560 = vector.broadcast %cst_218 : f32 to vector<48x1xf32>
    %561 = arith.divf %559, %560 : vector<48x1xf32>
    %562 = arith.mulf %553, %553 : vector<48x128xf32>
    %cst_219 = arith.constant dense<0.000000e+00> : vector<48xf32>
    %563 = vector.multi_reduction <add>, %562, %cst_219 [1] : vector<48x128xf32> to vector<48xf32>
    %564 = vector.shape_cast %563 : vector<48xf32> to vector<48x1xf32>
    %cst_220 = arith.constant 1.280000e+02 : f32
    %565 = vector.broadcast %cst_220 : f32 to vector<48x1xf32>
    %566 = arith.divf %564, %565 : vector<48x1xf32>
    %567 = arith.mulf %561, %561 : vector<48x1xf32>
    %568 = arith.subf %566, %567 : vector<48x1xf32>
    %569 = vector.broadcast %561 : vector<48x1xf32> to vector<48x128xf32>
    %570 = arith.subf %553, %569 : vector<48x128xf32>
    %cst_221 = arith.constant 9.99999974E-6 : f32
    %571 = vector.broadcast %cst_221 : f32 to vector<48x1xf32>
    %572 = arith.addf %568, %571 : vector<48x1xf32>
    %573 = math.rsqrt %572 : vector<48x1xf32>
    %574 = vector.broadcast %573 : vector<48x1xf32> to vector<48x128xf32>
    %575 = arith.mulf %570, %574 : vector<48x128xf32>
    %576 = vector.broadcast %555 : vector<1x128xf32> to vector<48x128xf32>
    %577 = arith.mulf %575, %576 : vector<48x128xf32>
    %578 = vector.broadcast %557 : vector<1x128xf32> to vector<48x128xf32>
    %579 = arith.addf %577, %578 : vector<48x128xf32>
    %580 = arith.truncf %579 : vector<48x128xf32> to vector<48x128xbf16>
    %581 = vector.shape_cast %580 : vector<48x128xbf16> to vector<2x24x128xbf16>
    %c0_222 = arith.constant 0 : index
    %c0_223 = arith.constant 0 : index
    %582 = vector.load %arg5[%c0_222, %c0_223] : memref<8x24xf32, #tpu.memory_space<vmem>>, vector<8x24xf32>
    %583 = arith.truncf %582 : vector<8x24xf32> to vector<8x24xbf16>
    %584 = vector.shape_cast %583 : vector<8x24xbf16> to vector<1x8x24xbf16>
    %585 = vector.shape_cast %584 : vector<1x8x24xbf16> to vector<1x8x24xbf16>
    %586 = vector.broadcast %585 : vector<1x8x24xbf16> to vector<2x8x24xbf16>
    "tpu.trace_start"() <{level = 10 : i32, message = "btl,blh->bth"}> : () -> ()
    %cst_224 = arith.constant dense<0.000000e+00> : vector<2x8x128xf32>
    %587 = tpu.matmul %586, %581, %cst_224 {dimension_numbers = #tpu.dot_dimension_numbers<[2], [1], [1], [2], [0, 0, 0, 1, 1, 2], [0], [0]>} : vector<2x8x24xbf16>, vector<2x24x128xbf16>, vector<2x8x128xf32> -> vector<2x8x128xf32>
    "tpu.trace_stop"() : () -> ()
    %588 = vector.shape_cast %587 : vector<2x8x128xf32> to vector<16x128xf32>
    %589 = arith.truncf %588 : vector<16x128xf32> to vector<16x128xbf16>
    %c0_225 = arith.constant 0 : index
    %c0_226 = arith.constant 0 : index
    %590 = vector.load %arg21[%c0_225, %c0_226] : memref<128x128xbf16, #tpu.memory_space<vmem>>, vector<128x128xbf16>
    %cst_227 = arith.constant dense<0.000000e+00> : vector<16x128xf32>
    %591 = tpu.matmul %589, %590, %cst_227 {dimension_numbers = #tpu.dot_dimension_numbers<[1], [0], [0], [1], [0, 0, 1, 1], [], []>} : vector<16x128xbf16>, vector<128x128xbf16>, vector<16x128xf32> -> vector<16x128xf32>
    %c0_228 = arith.constant 0 : index
    %c0_229 = arith.constant 0 : index
    %592 = vector.load %arg22[%c0_228, %c0_229] : memref<1x128xf32, #tpu.memory_space<vmem>>, vector<1x128xf32>
    %593 = vector.broadcast %592 : vector<1x128xf32> to vector<16x128xf32>
    %594 = arith.addf %591, %593 : vector<16x128xf32>
    %cst_230 = arith.constant 0.000000e+00 : f32
    %595 = vector.broadcast %cst_230 : f32 to vector<16x128xf32>
    %596 = arith.maximumf %594, %595 : vector<16x128xf32>
    %597 = arith.truncf %596 : vector<16x128xf32> to vector<16x128xbf16>
    %c0_231 = arith.constant 0 : index
    %c0_232 = arith.constant 0 : index
    %598 = vector.load %arg23[%c0_231, %c0_232] : memref<128x128xbf16, #tpu.memory_space<vmem>>, vector<128x128xbf16>
    %cst_233 = arith.constant dense<0.000000e+00> : vector<16x128xf32>
    %599 = tpu.matmul %597, %598, %cst_233 {dimension_numbers = #tpu.dot_dimension_numbers<[1], [0], [0], [1], [0, 0, 1, 1], [], []>} : vector<16x128xbf16>, vector<128x128xbf16>, vector<16x128xf32> -> vector<16x128xf32>
    %c0_234 = arith.constant 0 : index
    %c0_235 = arith.constant 0 : index
    %600 = vector.load %arg24[%c0_234, %c0_235] : memref<1x128xf32, #tpu.memory_space<vmem>>, vector<1x128xf32>
    %601 = vector.broadcast %600 : vector<1x128xf32> to vector<16x128xf32>
    %602 = arith.addf %599, %601 : vector<16x128xf32>
    %603 = math.tanh %602 : vector<16x128xf32>
    %c0_236 = arith.constant 0 : index
    %c0_237 = arith.constant 0 : index
    %c0_238 = arith.constant 0 : index
    %604 = vector.load %arg25[%c0_236, %c0_237, %c0_238] : memref<1x16x128xf32, #tpu.memory_space<vmem>>, vector<1x16x128xf32>
    %605 = vector.shape_cast %604 : vector<1x16x128xf32> to vector<16x128xf32>
    %606 = vector.shape_cast %603 : vector<16x128xf32> to vector<1x16x128xf32>
    tpu.vector_store %arg25[%c0_236, %c0_237, %c0_238], %606 {strides = array<i32>} : memref<1x16x128xf32, #tpu.memory_space<vmem>>, vector<1x16x128xf32>,
    return
  }
  func.func @transform_0(%arg0: i32) -> (i32, i32, i32) {
    %c0_i32 = arith.constant 0 : i32
    %c0_i32_0 = arith.constant 0 : i32
    %c0_i32_1 = arith.constant 0 : i32
    return %arg0, %c0_i32, %c0_i32_0 : i32, i32, i32
  }
  func.func @transform_1(%arg0: i32) -> (i32, i32) {
    %c0_i32 = arith.constant 0 : i32
    %c0_i32_0 = arith.constant 0 : i32
    %c0_i32_1 = arith.constant 0 : i32
    return %c0_i32, %c0_i32_0 : i32, i32
  }
  func.func @transform_2(%arg0: i32) -> (i32, i32) {
    %c0_i32 = arith.constant 0 : i32
    %c0_i32_0 = arith.constant 0 : i32
    %c0_i32_1 = arith.constant 0 : i32
    return %c0_i32, %c0_i32_0 : i32, i32
  }
  func.func @transform_3(%arg0: i32) -> (i32, i32, i32) {
    %c0_i32 = arith.constant 0 : i32
    %c0_i32_0 = arith.constant 0 : i32
    %c0_i32_1 = arith.constant 0 : i32
    return %arg0, %c0_i32, %c0_i32_0 : i32, i32, i32
  }
  func.func @transform_4(%arg0: i32) -> (i32, i32) {
    %c0_i32 = arith.constant 0 : i32
    %c0_i32_0 = arith.constant 0 : i32
    %c0_i32_1 = arith.constant 0 : i32
    return %c0_i32, %c0_i32_0 : i32, i32
  }
  func.func @transform_5(%arg0: i32) -> (i32, i32) {
    %c0_i32 = arith.constant 0 : i32
    %c0_i32_0 = arith.constant 0 : i32
    %c0_i32_1 = arith.constant 0 : i32
    return %c0_i32, %c0_i32_0 : i32, i32
  }
  func.func @transform_6(%arg0: i32) -> (i32, i32) {
    %c0_i32 = arith.constant 0 : i32
    %c0_i32_0 = arith.constant 0 : i32
    %c0_i32_1 = arith.constant 0 : i32
    return %c0_i32, %c0_i32_0 : i32, i32
  }
  func.func @transform_7(%arg0: i32) -> (i32, i32) {
    %c0_i32 = arith.constant 0 : i32
    %c0_i32_0 = arith.constant 0 : i32
    %c0_i32_1 = arith.constant 0 : i32
    return %c0_i32, %c0_i32_0 : i32, i32
  }
  func.func @transform_8(%arg0: i32) -> (i32, i32, i32) {
    %c0_i32 = arith.constant 0 : i32
    %c0_i32_0 = arith.constant 0 : i32
    %c0_i32_1 = arith.constant 0 : i32
    %c0_i32_2 = arith.constant 0 : i32
    return %c0_i32, %c0_i32_0, %c0_i32_1 : i32, i32, i32
  }
  func.func @transform_9(%arg0: i32) -> (i32, i32, i32) {
    %c0_i32 = arith.constant 0 : i32
    %c0_i32_0 = arith.constant 0 : i32
    %c0_i32_1 = arith.constant 0 : i32
    %c0_i32_2 = arith.constant 0 : i32
    return %c0_i32, %c0_i32_0, %c0_i32_1 : i32, i32, i32
  }
  func.func @transform_10(%arg0: i32) -> (i32, i32, i32) {
    %c0_i32 = arith.constant 0 : i32
    %c0_i32_0 = arith.constant 0 : i32
    %c0_i32_1 = arith.constant 0 : i32
    %c0_i32_2 = arith.constant 0 : i32
    return %c0_i32, %c0_i32_0, %c0_i32_1 : i32, i32, i32
  }
  func.func @transform_11(%arg0: i32) -> (i32, i32, i32) {
    %c0_i32 = arith.constant 0 : i32
    %c0_i32_0 = arith.constant 0 : i32
    %c0_i32_1 = arith.constant 0 : i32
    %c0_i32_2 = arith.constant 0 : i32
    return %c0_i32, %c0_i32_0, %c0_i32_1 : i32, i32, i32
  }
  func.func @transform_12(%arg0: i32) -> (i32, i32, i32) {
    %c0_i32 = arith.constant 0 : i32
    %c0_i32_0 = arith.constant 0 : i32
    %c0_i32_1 = arith.constant 0 : i32
    %c0_i32_2 = arith.constant 0 : i32
    return %c0_i32, %c0_i32_0, %c0_i32_1 : i32, i32, i32
  }
  func.func @transform_13(%arg0: i32) -> (i32, i32, i32) {
    %c0_i32 = arith.constant 0 : i32
    %c0_i32_0 = arith.constant 0 : i32
    %c0_i32_1 = arith.constant 0 : i32
    %c0_i32_2 = arith.constant 0 : i32
    return %c0_i32, %c0_i32_0, %c0_i32_1 : i32, i32, i32
  }
  func.func @transform_14(%arg0: i32) -> (i32, i32, i32) {
    %c0_i32 = arith.constant 0 : i32
    %c0_i32_0 = arith.constant 0 : i32
    %c0_i32_1 = arith.constant 0 : i32
    %c0_i32_2 = arith.constant 0 : i32
    return %c0_i32, %c0_i32_0, %c0_i32_1 : i32, i32, i32
  }
  func.func @transform_15(%arg0: i32) -> (i32, i32, i32) {
    %c0_i32 = arith.constant 0 : i32
    %c0_i32_0 = arith.constant 0 : i32
    %c0_i32_1 = arith.constant 0 : i32
    %c0_i32_2 = arith.constant 0 : i32
    return %c0_i32, %c0_i32_0, %c0_i32_1 : i32, i32, i32
  }
  func.func @transform_16(%arg0: i32) -> (i32, i32, i32) {
    %c0_i32 = arith.constant 0 : i32
    %c0_i32_0 = arith.constant 0 : i32
    %c0_i32_1 = arith.constant 0 : i32
    %c0_i32_2 = arith.constant 0 : i32
    return %c0_i32, %c0_i32_0, %c0_i32_1 : i32, i32, i32
  }
  func.func @transform_17(%arg0: i32) -> (i32, i32, i32) {
    %c0_i32 = arith.constant 0 : i32
    %c0_i32_0 = arith.constant 0 : i32
    %c0_i32_1 = arith.constant 0 : i32
    %c0_i32_2 = arith.constant 0 : i32
    return %c0_i32, %c0_i32_0, %c0_i32_1 : i32, i32, i32
  }
  func.func @transform_18(%arg0: i32) -> (i32, i32, i32) {
    %c0_i32 = arith.constant 0 : i32
    %c0_i32_0 = arith.constant 0 : i32
    %c0_i32_1 = arith.constant 0 : i32
    %c0_i32_2 = arith.constant 0 : i32
    return %c0_i32, %c0_i32_0, %c0_i32_1 : i32, i32, i32
  }
  func.func @transform_19(%arg0: i32) -> (i32, i32, i32) {
    %c0_i32 = arith.constant 0 : i32
    %c0_i32_0 = arith.constant 0 : i32
    %c0_i32_1 = arith.constant 0 : i32
    %c0_i32_2 = arith.constant 0 : i32
    return %c0_i32, %c0_i32_0, %c0_i32_1 : i32, i32, i32
  }
  func.func @transform_20(%arg0: i32) -> (i32, i32) {
    %c0_i32 = arith.constant 0 : i32
    %c0_i32_0 = arith.constant 0 : i32
    %c0_i32_1 = arith.constant 0 : i32
    return %c0_i32, %c0_i32_0 : i32, i32
  }
  func.func @transform_21(%arg0: i32) -> (i32, i32) {
    %c0_i32 = arith.constant 0 : i32
    %c0_i32_0 = arith.constant 0 : i32
    %c0_i32_1 = arith.constant 0 : i32
    return %c0_i32, %c0_i32_0 : i32, i32
  }
  func.func @transform_22(%arg0: i32) -> (i32, i32) {
    %c0_i32 = arith.constant 0 : i32
    %c0_i32_0 = arith.constant 0 : i32
    %c0_i32_1 = arith.constant 0 : i32
    return %c0_i32, %c0_i32_0 : i32, i32
  }
  func.func @transform_23(%arg0: i32) -> (i32, i32) {
    %c0_i32 = arith.constant 0 : i32
    %c0_i32_0 = arith.constant 0 : i32
    %c0_i32_1 = arith.constant 0 : i32
    return %c0_i32, %c0_i32_0 : i32, i32
  }
  func.func @transform_24(%arg0: i32) -> (i32, i32, i32) {
    %c0_i32 = arith.constant 0 : i32
    %c0_i32_0 = arith.constant 0 : i32
    %c0_i32_1 = arith.constant 0 : i32
    return %arg0, %c0_i32, %c0_i32_0 : i32, i32, i32
  }
}

</mosaic_0001>

<bundles_post_ra>
// kernel: tpu_custom_call.1
= control target key start
LH: loop header
LB: loop body
LE: loop exit
PB: predicated region body
PF: predicated region fallthrough
CT: control target
= control target key end

     0   :  { %s14943_s0 = inlined_call_operand.hbm [shape: f32[1,48,8], index: 0, kind: input, shape index: {}]   ;;  %s14944_s1 = inlined_call_operand.hbm [shape: f32[8,128], index: 1, kind: input, shape index: {}]   ;;  %s14945_s2 = inlined_call_operand.hbm [shape: f32[24,128], index: 2, kind: input, shape index: {}]   ;;  %s14946_s3 = inlined_call_operand.hbm [shape: f32[1,2,128], index: 3, kind: input, shape index: {}]   ;;  %s14947_s4 = inlined_call_operand.hbm [shape: f32[8,24], index: 4, kind: input, shape index: {}]   ;;  %s14948_s5 = inlined_call_operand.hbm [shape: f32[4,128], index: 5, kind: input, shape index: {}]   ;;  %s14949_s6 = inlined_call_operand.hbm [shape: f32[1,128], index: 6, kind: input, shape index: {}]   ;;  %s14950_s7 = inlined_call_operand.hbm [shape: f32[1,128], index: 7, kind: input, shape index: {}]   ;;  %s14951_s8 = inlined_call_operand.hbm [shape: bf16[3,128,384], index: 8, kind: input, shape index: {}]   ;;  %s14952_s9 = inlined_call_operand.hbm [shape: f32[3,1,384], index: 9, kind: input, shape index: {}]   ;;  %s14953_s10 = inlined_call_operand.hbm [shape: bf16[3,128,128], index: 10, kind: input, shape index: {}]   ;;  %s14954_s11 = inlined_call_operand.hbm [shape: f32[3,1,128], index: 11, kind: input, shape index: {}]   ;;  %s14955_s12 = inlined_call_operand.hbm [shape: f32[3,1,128], index: 12, kind: input, shape index: {}]   ;;  %s14956_s13 = inlined_call_operand.hbm [shape: f32[3,1,128], index: 13, kind: input, shape index: {}]   ;;  %s14957_s14 = inlined_call_operand.hbm [shape: bf16[3,128,512], index: 14, kind: input, shape index: {}]   ;;  %s14958_s15 = inlined_call_operand.hbm [shape: f32[3,1,512], index: 15, kind: input, shape index: {}]   ;;  %s14959_s16 = inlined_call_operand.hbm [shape: bf16[3,512,128], index: 16, kind: input, shape index: {}]   ;;  %s14960_s17 = inlined_call_operand.hbm [shape: f32[3,1,128], index: 17, kind: input, shape index: {}]   ;;  %s14961_s18 = inlined_call_operand.hbm [shape: f32[3,1,128], index: 18, kind: input, shape index: {}]   ;;  %s14962_s19 = inlined_call_operand.hbm [shape: f32[3,1,128], index: 19, kind: input, shape index: {}]   ;;  %s14963_s20 = inlined_call_operand.hbm [shape: bf16[128,128], index: 20, kind: input, shape index: {}]   ;;  %s14964_s21 = inlined_call_operand.hbm [shape: f32[1,128], index: 21, kind: input, shape index: {}]   ;;  %s14965_s22 = inlined_call_operand.hbm [shape: bf16[128,128], index: 22, kind: input, shape index: {}]   ;;  %s14966_s23 = inlined_call_operand.hbm [shape: f32[1,128], index: 23, kind: input, shape index: {}]   ;;  %s14967_s24 = inlined_call_operand.hbm [shape: f32[1,16,128], index: 24, kind: output, shape index: {}]  }
   0x1   :  { %14978 = sst [smem:[#allocation55_spill]] %s14943_s0 }
   0x2   :  { %14979 = sst [smem:[#allocation56_spill]] %s14944_s1 }
   0x3   :  { %14980 = sst [smem:[#allocation57_spill]] %s14945_s2 }
   0x4   :  { %14981 = sst [smem:[#allocation58_spill]] %s14946_s3 }
   0x5   :  { %14982 = sst [smem:[#allocation59_spill]] %s14947_s4 }
   0x6   :  { %14983 = sst [smem:[#allocation60_spill]] %s14948_s5 }
   0x7   :  { %14984 = sst [smem:[#allocation61_spill]] %s14949_s6 }
   0x8   :  { %14985 = sst [smem:[#allocation62_spill]] %s14950_s7 }
   0x9   :  { %14986 = sst [smem:[#allocation63_spill]] %s14951_s8 }
   0xa   :  { %14987 = sst [smem:[#allocation64_spill]] %s14967_s24 }
   0xb   :  { %29 = vsyncpa [#allocation3], 0 }
   0xc   :  { %30 = vsyncpa [#allocation6], 0 }
   0xd   :  { %31 = vsyncpa [#allocation9], 0 }
   0xe   :  { %32 = vsyncpa [#allocation12], 0 }
   0xf   :  { %33 = vsyncpa [#allocation15], 0 }
  0x10   :  { %34 = vsyncpa [#allocation18], 0 }
  0x11   :  { %35 = vsyncpa [#allocation21], 0 }
  0x12   :  { %36 = vsyncpa [#allocation24], 0 }
  0x13   :  { %37 = vsyncpa [#allocation27], 0 }
  0x14   :  { %38 = vsyncpa [#allocation30], 0 }
  0x15   :  { %39 = vsyncpa [#allocation33], 0 }
  0x16   :  { %40 = vsyncpa [#allocation36], 0 }
  0x17   :  { %41 = vsyncpa [#allocation39], 0 }
  0x18   :  { %42 = vsyncpa [#allocation4], 0  ;;  %s12626_s5 = smov [#allocation5]   ;;  %s12627_s27 = smov [#allocation8]  }
  0x19   :  { %s61_s26 = sshll.u32 %s12626_s5, 4  ;;  %s83_s28 = sshll.u32 %s12627_s27, 4  ;;  %s62_s26 = int_to_ptr.vmem [resolvable:$true] %s61_s26  ;;  %s84_s28 = int_to_ptr.vmem [resolvable:$true] %s83_s28 }
  0x1a   :  { %s14988_s29 = sld [smem:[#allocation56_spill]] }
  0x20   :  { %s12048_s0 = scalar_lea.hbm %s14988_s29, 128 }
  0x21   :  { %p12049_p0 = scmp.ne.s32.totalorder %s14988_s29, %s12048_s0  ;;  %p12052_p1 = scmp.lt.u32.totalorder %s12048_s0, %s14988_s29 }
  0x23   :  { %p12054_p2 = pnand %p12052_p1, %p12049_p0 }
  0x25   :  { %12057 = shalt.err (!%p12054_p2)
}
  0x26   :  { %s12058_s8 = scalar_lea.vmem %s62_s26, 128  ;;  %p12063_p4 = scmp.lt.s32.totalorder %s62_s26, %s62_s26 }
  0x27   :  { %p12059_p3 = scmp.ne.s32.totalorder %s62_s26, %s12058_s8  ;;  %p12064_p5 = scmp.lt.s32.totalorder %s12058_s8, %s12058_s8 }
  0x29   :  { %p12065_p6 = por %p12064_p5, %p12063_p4 }
  0x2b   :  { %p12066_p7 = pnand %p12065_p6, %p12059_p3 }
  0x2d   :  { %12069 = shalt.err (!%p12066_p7)
}
  0x2e   :  { %64 = dma.hbm_to_vmem [thread:$0]  %s14988_s29, 128, %s62_s26, [#allocation6]  }
  0x2f   :  { %s14989_s6 = sld [smem:[#allocation58_spill]] }
  0x35   :  { %s12070_s2 = scalar_lea.hbm %s14989_s6, 32 }
  0x36   :  { %p12071_p8 = scmp.ne.s32.totalorder %s14989_s6, %s12070_s2  ;;  %p12074_p9 = scmp.lt.u32.totalorder %s12070_s2, %s14989_s6 }
  0x38   :  { %p12076_p10 = pnand %p12074_p9, %p12071_p8 }
  0x3a   :  { %12079 = shalt.err (!%p12076_p10)
}
  0x3b   :  { %s12080_s25 = scalar_lea.vmem %s84_s28, 32  ;;  %p12085_p12 = scmp.lt.s32.totalorder %s84_s28, %s84_s28 }
  0x3c   :  { %p12081_p11 = scmp.ne.s32.totalorder %s84_s28, %s12080_s25  ;;  %p12086_p13 = scmp.lt.s32.totalorder %s12080_s25, %s12080_s25 }
  0x3e   :  { %p12087_p0 = por %p12086_p13, %p12085_p12 }
  0x40   :  { %p12088_p1 = pnand %p12087_p0, %p12081_p11 }
  0x42   :  { %12091 = shalt.err (!%p12088_p1)
}
  0x43   :  { %86 = dma.hbm_to_vmem [thread:$0]  %s14989_s6, 32, %s84_s28, [#allocation9]  }
  0x44   :  { %s12628_s8 = smov [#allocation11]   ;;  %s12629_s1 = smov [#allocation14]  }
  0x45   :  { %s103_s4 = sshll.u32 %s12628_s8, 4  ;;  %s123_s5 = sshll.u32 %s12629_s1, 4  ;;  %s104_s4 = int_to_ptr.vmem [resolvable:$true] %s103_s4  ;;  %s124_s5 = int_to_ptr.vmem [resolvable:$true] %s123_s5 }
  0x46   :  { %s14990_s7 = sld [smem:[#allocation60_spill]] }
  0x4c   :  { %s12092_s30 = scalar_lea.hbm %s14990_s7, 64 }
  0x4d   :  { %p12093_p2 = scmp.ne.s32.totalorder %s14990_s7, %s12092_s30  ;;  %p12096_p3 = scmp.lt.u32.totalorder %s12092_s30, %s14990_s7 }
  0x4f   :  { %p12098_p4 = pnand %p12096_p3, %p12093_p2 }
  0x51   :  { %12101 = shalt.err (!%p12098_p4)
}
  0x52   :  { %s12102_s28 = scalar_lea.vmem %s104_s4, 64  ;;  %p12107_p6 = scmp.lt.s32.totalorder %s104_s4, %s104_s4 }
  0x53   :  { %p12103_p5 = scmp.ne.s32.totalorder %s104_s4, %s12102_s28  ;;  %p12108_p7 = scmp.lt.s32.totalorder %s12102_s28, %s12102_s28 }
  0x55   :  { %p12109_p8 = por %p12108_p7, %p12107_p6 }
  0x57   :  { %p12110_p9 = pnand %p12109_p8, %p12103_p5 }
  0x59   :  { %12113 = shalt.err (!%p12110_p9)
}
  0x5a   :  { %106 = dma.hbm_to_vmem [thread:$0]  %s14990_s7, 64, %s104_s4, [#allocation12]  }
  0x5b   :  { %s14991_s1 = sld [smem:[#allocation62_spill]] }
  0x61   :  { %s12114_s27 = scalar_lea.hbm %s14991_s1, 16 }
  0x62   :  { %p12115_p10 = scmp.ne.s32.totalorder %s14991_s1, %s12114_s27  ;;  %p12118_p11 = scmp.lt.u32.totalorder %s12114_s27, %s14991_s1 }
  0x64   :  { %p12120_p12 = pnand %p12118_p11, %p12115_p10 }
  0x66   :  { %12123 = shalt.err (!%p12120_p12)
}
  0x67   :  { %s12124_s3 = scalar_lea.vmem %s124_s5, 16  ;;  %s12128_s25 = scalar_lea.vmem %s124_s5, 32 }
  0x68   :  { %p12125_p13 = scmp.ne.s32.totalorder %s124_s5, %s12124_s3  ;;  %p12129_p0 = scmp.lt.s32.totalorder %s124_s5, %s124_s5 }
  0x69   :  { %p12130_p1 = scmp.lt.s32.totalorder %s12128_s25, %s12124_s3 }
  0x6b   :  { %p12131_p2 = por %p12130_p1, %p12129_p0 }
  0x6d   :  { %p12132_p3 = pnand %p12131_p2, %p12125_p13 }
  0x6f   :  { %12135 = shalt.err (!%p12132_p3)
}
  0x70   :  { %126 = dma.hbm_to_vmem [thread:$0]  %s14991_s1, 16, %s124_s5, [#allocation15]  }
  0x71   :  { %s12630_s28 = smov [#allocation17]   ;;  %s12136_s8 = scalar_lea.hbm %s14952_s9, 144 }
  0x72   :  { %s144_s6 = sshll.u32 %s12630_s28, 4  ;;  %p12137_p4 = scmp.ne.s32.totalorder %s14952_s9, %s12136_s8  ;;  %s145_s6 = int_to_ptr.vmem [resolvable:$true] %s144_s6 }
  0x73   :  { %p12140_p5 = scmp.lt.u32.totalorder %s12136_s8, %s14952_s9 }
  0x75   :  { %p12142_p6 = pnand %p12140_p5, %p12137_p4 }
  0x77   :  { %12145 = shalt.err (!%p12142_p6)
}
  0x78   :  { %s12146_s0 = scalar_lea.vmem %s145_s6, 144  ;;  %s12150_s5 = scalar_lea.vmem %s145_s6, 160 }
  0x79   :  { %p12147_p7 = scmp.ne.s32.totalorder %s145_s6, %s12146_s0  ;;  %p12151_p8 = scmp.lt.s32.totalorder %s145_s6, %s145_s6 }
  0x7a   :  { %p12152_p9 = scmp.lt.s32.totalorder %s12150_s5, %s12146_s0 }
  0x7c   :  { %p12153_p10 = por %p12152_p9, %p12151_p8 }
  0x7e   :  { %p12154_p11 = pnand %p12153_p10, %p12147_p7 }
  0x80   :  { %12157 = shalt.err (!%p12154_p11)
}
  0x81   :  { %s12631_s1 = smov 48   ;;  %s12632_s3 = smov 3  }
  0x82   :  { %150 = dma.hbm_to_vmem [thread:$0]  %s14952_s9, 144, %s145_s6, [#allocation18], %s12631_s1, %s12631_s1, %s12632_s3  }
  0x83   :  { %s12633_s7 = smov [#allocation20]   ;;  %s12158_s8 = scalar_lea.hbm %s14954_s11, 48 }
  0x84   :  { %s168_s28 = sshll.u32 %s12633_s7, 4  ;;  %p12159_p12 = scmp.ne.s32.totalorder %s14954_s11, %s12158_s8  ;;  %s169_s28 = int_to_ptr.vmem [resolvable:$true] %s168_s28 }
  0x85   :  { %p12162_p13 = scmp.lt.u32.totalorder %s12158_s8, %s14954_s11 }
  0x87   :  { %p12164_p0 = pnand %p12162_p13, %p12159_p12 }
  0x89   :  { %12167 = shalt.err (!%p12164_p0)
}
  0x8a   :  { %s12168_s0 = scalar_lea.vmem %s169_s28, 48  ;;  %s12172_s9 = scalar_lea.vmem %s169_s28, 64 }
  0x8b   :  { %p12169_p1 = scmp.ne.s32.totalorder %s169_s28, %s12168_s0  ;;  %p12173_p2 = scmp.lt.s32.totalorder %s169_s28, %s169_s28 }
  0x8c   :  { %p12174_p3 = scmp.lt.s32.totalorder %s12172_s9, %s12168_s0 }
  0x8e   :  { %p12175_p4 = por %p12174_p3, %p12173_p2 }
  0x90   :  { %p12176_p5 = pnand %p12175_p4, %p12169_p1 }
  0x92   :  { %12179 = shalt.err (!%p12176_p5)
}
  0x93   :  { %s12634_s6 = smov 16   ;;  %s12635_s5 = smov 1  }
  0x94   :  { %174 = dma.hbm_to_vmem [thread:$0]  %s14954_s11, 48, %s169_s28, [#allocation21], %s12634_s6, %s12634_s6, %s12635_s5  }
  0x95   :  { %s12636_s25 = smov [#allocation23]   ;;  %s12180_s29 = scalar_lea.hbm %s14956_s13, 48 }
  0x96   :  { %s192_s4 = sshll.u32 %s12636_s25, 4  ;;  %p12181_p6 = scmp.ne.s32.totalorder %s14956_s13, %s12180_s29  ;;  %s193_s4 = int_to_ptr.vmem [resolvable:$true] %s192_s4 }
  0x97   :  { %p12184_p7 = scmp.lt.u32.totalorder %s12180_s29, %s14956_s13 }
  0x99   :  { %p12186_p8 = pnand %p12184_p7, %p12181_p6 }
  0x9b   :  { %12189 = shalt.err (!%p12186_p8)
}
  0x9c   :  { %s12190_s30 = scalar_lea.vmem %s193_s4, 48  ;;  %s12194_s11 = scalar_lea.vmem %s193_s4, 64 }
  0x9d   :  { %p12191_p9 = scmp.ne.s32.totalorder %s193_s4, %s12190_s30  ;;  %p12195_p10 = scmp.lt.s32.totalorder %s193_s4, %s193_s4 }
  0x9e   :  { %p12196_p11 = scmp.lt.s32.totalorder %s12194_s11, %s12190_s30 }
  0xa0   :  { %p12197_p12 = por %p12196_p11, %p12195_p10 }
  0xa2   :  { %p12198_p13 = pnand %p12197_p12, %p12191_p9 }
  0xa4   :  { %12201 = shalt.err (!%p12198_p13)
}
  0xa5   :  { %198 = dma.hbm_to_vmem [thread:$0]  %s14956_s13, 48, %s193_s4, [#allocation24], %s12634_s6, %s12634_s6, %s12635_s5  }
  0xa6   :  { %s12637_s9 = smov [#allocation26]   ;;  %s12638_s3 = smov [#allocation29]  }
  0xa7   :  { %s216_s1 = sshll.u32 %s12637_s9, 4  ;;  %s240_s25 = sshll.u32 %s12638_s3, 4  ;;  %s217_s1 = int_to_ptr.vmem [resolvable:$true] %s216_s1  ;;  %s241_s25 = int_to_ptr.vmem [resolvable:$true] %s240_s25 }
  0xa8   :  { %s12202_s29 = scalar_lea.hbm %s14958_s15, 192 }
  0xa9   :  { %p12203_p0 = scmp.ne.s32.totalorder %s14958_s15, %s12202_s29  ;;  %p12206_p1 = scmp.lt.u32.totalorder %s12202_s29, %s14958_s15 }
  0xab   :  { %p12208_p2 = pnand %p12206_p1, %p12203_p0 }
  0xad   :  { %12211 = shalt.err (!%p12208_p2)
}
  0xae   :  { %s12212_s13 = scalar_lea.vmem %s217_s1, 192  ;;  %p12217_p4 = scmp.lt.s32.totalorder %s217_s1, %s217_s1 }
  0xaf   :  { %p12213_p3 = scmp.ne.s32.totalorder %s217_s1, %s12212_s13  ;;  %p12218_p5 = scmp.lt.s32.totalorder %s12212_s13, %s12212_s13 }
  0xb1   :  { %p12219_p6 = por %p12218_p5, %p12217_p4 }
  0xb3   :  { %p12220_p7 = pnand %p12219_p6, %p12213_p3 }
  0xb5   :  { %12223 = shalt.err (!%p12220_p7)
}
  0xb6   :  { %s12639_s4 = smov 64   ;;  %s12640_s30 = smov 4  }
  0xb7   :  { %222 = dma.hbm_to_vmem [thread:$0]  %s14958_s15, 192, %s217_s1, [#allocation27], %s12639_s4, %s12639_s4, %s12640_s30  }
  0xb8   :  { %s12224_s3 = scalar_lea.hbm %s14960_s17, 48 }
  0xb9   :  { %p12225_p8 = scmp.ne.s32.totalorder %s14960_s17, %s12224_s3  ;;  %p12228_p9 = scmp.lt.u32.totalorder %s12224_s3, %s14960_s17 }
  0xbb   :  { %p12230_p10 = pnand %p12228_p9, %p12225_p8 }
  0xbd   :  { %12233 = shalt.err (!%p12230_p10)
}
  0xbe   :  { %s12234_s27 = scalar_lea.vmem %s241_s25, 48  ;;  %s12238_s2 = scalar_lea.vmem %s241_s25, 64 }
  0xbf   :  { %p12235_p11 = scmp.ne.s32.totalorder %s241_s25, %s12234_s27  ;;  %p12239_p12 = scmp.lt.s32.totalorder %s241_s25, %s241_s25 }
  0xc0   :  { %p12240_p13 = scmp.lt.s32.totalorder %s12238_s2, %s12234_s27 }
  0xc2   :  { %p12241_p0 = por %p12240_p13, %p12239_p12 }
  0xc4   :  { %p12242_p1 = pnand %p12241_p0, %p12235_p11 }
  0xc6   :  { %12245 = shalt.err (!%p12242_p1)
}
  0xc7   :  { %246 = dma.hbm_to_vmem [thread:$0]  %s14960_s17, 48, %s241_s25, [#allocation30], %s12634_s6, %s12634_s6, %s12635_s5  }
  0xc8   :  { %s12641_s24 = smov [#allocation32]   ;;  %s12642_s11 = smov [#allocation35]  }
  0xc9   :  { %s264_s13 = sshll.u32 %s12641_s24, 4  ;;  %s289_s28 = sshll.u32 %s12642_s11, 4  ;;  %s265_s13 = int_to_ptr.vmem [resolvable:$true] %s264_s13  ;;  %s290_s28 = int_to_ptr.vmem [resolvable:$true] %s289_s28 }
  0xca   :  { %s12246_s3 = scalar_lea.hbm %s14962_s19, 48 }
  0xcb   :  { %p12247_p2 = scmp.ne.s32.totalorder %s14962_s19, %s12246_s3  ;;  %p12250_p3 = scmp.lt.u32.totalorder %s12246_s3, %s14962_s19 }
  0xcd   :  { %p12252_p4 = pnand %p12250_p3, %p12247_p2 }
  0xcf   :  { %12255 = shalt.err (!%p12252_p4)
}
  0xd0   :  { %s12256_s17 = scalar_lea.vmem %s265_s13, 48  ;;  %s12260_s25 = scalar_lea.vmem %s265_s13, 64 }
  0xd1   :  { %p12257_p5 = scmp.ne.s32.totalorder %s265_s13, %s12256_s17  ;;  %p12261_p6 = scmp.lt.s32.totalorder %s265_s13, %s265_s13 }
  0xd2   :  { %p12262_p7 = scmp.lt.s32.totalorder %s12260_s25, %s12256_s17 }
  0xd4   :  { %p12263_p8 = por %p12262_p7, %p12261_p6 }
  0xd6   :  { %p12264_p9 = pnand %p12263_p8, %p12257_p5 }
  0xd8   :  { %12267 = shalt.err (!%p12264_p9)
}
  0xd9   :  { %270 = dma.hbm_to_vmem [thread:$0]  %s14962_s19, 48, %s265_s13, [#allocation33], %s12634_s6, %s12634_s6, %s12635_s5  }
  0xda   :  { %s12268_s24 = scalar_lea.hbm %s14964_s21, 16 }
  0xdb   :  { %p12269_p10 = scmp.ne.s32.totalorder %s14964_s21, %s12268_s24  ;;  %p12272_p11 = scmp.lt.u32.totalorder %s12268_s24, %s14964_s21 }
  0xdd   :  { %p12274_p12 = pnand %p12272_p11, %p12269_p10 }
  0xdf   :  { %12277 = shalt.err (!%p12274_p12)
}
  0xe0   :  { %s12278_s7 = scalar_lea.vmem %s290_s28, 16  ;;  %s12282_s26 = scalar_lea.vmem %s290_s28, 32 }
  0xe1   :  { %p12279_p13 = scmp.ne.s32.totalorder %s290_s28, %s12278_s7  ;;  %p12283_p0 = scmp.lt.s32.totalorder %s290_s28, %s290_s28 }
  0xe2   :  { %p12284_p1 = scmp.lt.s32.totalorder %s12282_s26, %s12278_s7 }
  0xe4   :  { %p12285_p2 = por %p12284_p1, %p12283_p0 }
  0xe6   :  { %p12286_p3 = pnand %p12285_p2, %p12279_p13 }
  0xe8   :  { %12289 = shalt.err (!%p12286_p3)
}
  0xe9   :  { %292 = dma.hbm_to_vmem [thread:$0]  %s14964_s21, 16, %s290_s28, [#allocation36]  }
  0xea   :  { %s12643_s29 = smov [#allocation2]   ;;  %s14992_s27 = sld [smem:[#allocation55_spill]] }
  0xeb   :  { %s48_s8 = sshll.u32 %s12643_s29, 4  ;;  %s49_s8 = int_to_ptr.vmem [resolvable:$true] %s48_s8 }
  0xf0   :  { %s12290_s2 = scalar_lea.hbm %s14992_s27, 768 }
  0xf1   :  { %p12291_p4 = scmp.ne.s32.totalorder %s14992_s27, %s12290_s2  ;;  %p12294_p5 = scmp.lt.u32.totalorder %s12290_s2, %s14992_s27 }
  0xf3   :  { %p12296_p6 = pnand %p12294_p5, %p12291_p4 }
  0xf5   :  { %12299 = shalt.err (!%p12296_p6)
}
  0xf6   :  { %s12300_s0 = scalar_lea.vmem %s49_s8, 768  ;;  %p12305_p8 = scmp.lt.s32.totalorder %s49_s8, %s49_s8 }
  0xf7   :  { %p12301_p7 = scmp.ne.s32.totalorder %s49_s8, %s12300_s0  ;;  %p12306_p9 = scmp.lt.s32.totalorder %s12300_s0, %s12300_s0 }
  0xf9   :  { %p12307_p10 = por %p12306_p9, %p12305_p8 }
  0xfb   :  { %p12308_p11 = pnand %p12307_p10, %p12301_p7 }
  0xfd   :  { %12311 = shalt.err (!%p12308_p11)
}
  0xfe   :  { %s12644_s21 = smov 128   ;;  %s12645_s28 = smov 8  }
  0xff   :  { %54 = dma.hbm_to_vmem [thread:$0]  %s14992_s27, 768, %s49_s8, [#allocation3], %s12644_s21, %s12644_s21, %s12645_s28  }
 0x100   :  { %s12646_s7 = smov [#allocation7]   ;;  %s12647_s19 = smov [#allocation10]  }
 0x101   :  { %s70_s26 = sshll.u32 %s12646_s7, 4  ;;  %s93_s13 = sshll.u32 %s12647_s19, 4  ;;  %s71_s26 = int_to_ptr.vmem [resolvable:$true] %s70_s26  ;;  %s94_s13 = int_to_ptr.vmem [resolvable:$true] %s93_s13 }
 0x102   :  { %s14993_s25 = sld [smem:[#allocation57_spill]] }
 0x108   :  { %s12312_s2 = scalar_lea.hbm %s14993_s25, 384 }
 0x109   :  { %p12313_p12 = scmp.ne.s32.totalorder %s14993_s25, %s12312_s2  ;;  %p12316_p13 = scmp.lt.u32.totalorder %s12312_s2, %s14993_s25 }
 0x10b   :  { %p12318_p0 = pnand %p12316_p13, %p12313_p12 }
 0x10d   :  { %12321 = shalt.err (!%p12318_p0)
}
 0x10e   :  { %s12322_s8 = scalar_lea.vmem %s71_s26, 384  ;;  %p12327_p2 = scmp.lt.s32.totalorder %s71_s26, %s71_s26 }
 0x10f   :  { %p12323_p1 = scmp.ne.s32.totalorder %s71_s26, %s12322_s8  ;;  %p12328_p3 = scmp.lt.s32.totalorder %s12322_s8, %s12322_s8 }
 0x111   :  { %p12329_p4 = por %p12328_p3, %p12327_p2 }
 0x113   :  { %p12330_p5 = pnand %p12329_p4, %p12323_p1 }
 0x115   :  { %12333 = shalt.err (!%p12330_p5)
}
 0x116   :  { %76 = dma.hbm_to_vmem [thread:$0]  %s14993_s25, 384, %s71_s26, [#allocation6], %s12644_s21, %s12644_s21, %s12645_s28  }
 0x117   :  { %s14994_s7 = sld [smem:[#allocation59_spill]] }
 0x11d   :  { %s12334_s19 = scalar_lea.hbm %s14994_s7, 128 }
 0x11e   :  { %p12335_p6 = scmp.ne.s32.totalorder %s14994_s7, %s12334_s19  ;;  %p12338_p7 = scmp.lt.u32.totalorder %s12334_s19, %s14994_s7 }
 0x120   :  { %p12340_p8 = pnand %p12338_p7, %p12335_p6 }
 0x122   :  { %12343 = shalt.err (!%p12340_p8)
}
 0x123   :  { %s12344_s1 = scalar_lea.vmem %s94_s13, 128  ;;  %p12349_p10 = scmp.lt.s32.totalorder %s94_s13, %s94_s13 }
 0x124   :  { %p12345_p9 = scmp.ne.s32.totalorder %s94_s13, %s12344_s1  ;;  %p12350_p11 = scmp.lt.s32.totalorder %s12344_s1, %s12344_s1 }
 0x126   :  { %p12351_p12 = por %p12350_p11, %p12349_p10 }
 0x128   :  { %p12352_p13 = pnand %p12351_p12, %p12345_p9 }
 0x12a   :  { %12355 = shalt.err (!%p12352_p13)
}
 0x12b   :  { %96 = dma.hbm_to_vmem [thread:$0]  %s14994_s7, 128, %s94_s13, [#allocation9]  }
 0x12c   :  { %s12648_s24 = smov [#allocation13]   ;;  %s12649_s8 = smov [#allocation16]  }
 0x12d   :  { %s113_s11 = sshll.u32 %s12648_s24, 4  ;;  %s132_s27 = sshll.u32 %s12649_s8, 4  ;;  %s114_s11 = int_to_ptr.vmem [resolvable:$true] %s113_s11  ;;  %s12980_s27 = int_to_ptr.vmem [resolvable:$true] %s132_s27 }
 0x12e   :  { %s14995_s3 = sld [smem:[#allocation61_spill]] }
 0x134   :  { %s12356_s19 = scalar_lea.hbm %s14995_s3, 16 }
 0x135   :  { %p12357_p0 = scmp.ne.s32.totalorder %s14995_s3, %s12356_s19  ;;  %p12360_p1 = scmp.lt.u32.totalorder %s12356_s19, %s14995_s3 }
 0x137   :  { %p12362_p2 = pnand %p12360_p1, %p12357_p0 }
 0x139   :  { %12365 = shalt.err (!%p12362_p2)
}
 0x13a   :  { %s12366_s13 = scalar_lea.vmem %s114_s11, 16  ;;  %s12370_s7 = scalar_lea.vmem %s114_s11, 32 }
 0x13b   :  { %p12367_p3 = scmp.ne.s32.totalorder %s114_s11, %s12366_s13  ;;  %p12371_p4 = scmp.lt.s32.totalorder %s114_s11, %s114_s11 }
 0x13c   :  { %p12372_p5 = scmp.lt.s32.totalorder %s12370_s7, %s12366_s13 }
 0x13e   :  { %p12373_p6 = por %p12372_p5, %p12371_p4 }
 0x140   :  { %p12374_p7 = pnand %p12373_p6, %p12367_p3 }
 0x142   :  { %12377 = shalt.err (!%p12374_p7)
}
 0x143   :  { %116 = dma.hbm_to_vmem [thread:$0]  %s14995_s3, 16, %s114_s11, [#allocation12]  }
 0x144   :  { %s14996_s8 = sld [smem:[#allocation63_spill]] }
 0x14a   :  { %s12378_s0 = scalar_lea.hbm %s14996_s8, 9216 }
 0x14b   :  { %p12379_p8 = scmp.ne.s32.totalorder %s14996_s8, %s12378_s0  ;;  %p12382_p9 = scmp.lt.u32.totalorder %s12378_s0, %s14996_s8 }
 0x14d   :  { %p12384_p10 = pnand %p12382_p9, %p12379_p8 }
 0x14f   :  { %12387 = shalt.err (!%p12384_p10)
}
 0x150   :  { %s12388_s2 = scalar_lea.vmem %s12980_s27, 9216  ;;  %p12393_p12 = scmp.lt.s32.totalorder %s12980_s27, %s12980_s27 }
 0x151   :  { %p12389_p11 = scmp.ne.s32.totalorder %s12980_s27, %s12388_s2  ;;  %p12394_p13 = scmp.lt.s32.totalorder %s12388_s2, %s12388_s2 }
 0x153   :  { %p12395_p0 = por %p12394_p13, %p12393_p12 }
 0x155   :  { %p12396_p1 = pnand %p12395_p0, %p12389_p11 }
 0x157   :  { %12399 = shalt.err (!%p12396_p1)
}
 0x158   :  { %s12650_s11 = smov 192   ;;  %s12651_s3 = smov 12  }
 0x159   :  { %138 = dma.hbm_to_vmem [thread:$0]  %s14996_s8, 9216, %s12980_s27, [#allocation15], %s12650_s11, %s12650_s11, %s12651_s3  }
 0x15a   :  { %s12652_s7 = smov [#allocation19]   ;;  %s12653_s26 = smov [#allocation22]  }
 0x15b   :  { %s156_s1 = sshll.u32 %s12652_s7, 4  ;;  %s180_s25 = sshll.u32 %s12653_s26, 4  ;;  %s157_s1 = int_to_ptr.vmem [resolvable:$true] %s156_s1  ;;  %s13011_s25 = int_to_ptr.vmem [resolvable:$true] %s180_s25 }
 0x15c   :  { %s12400_s9 = scalar_lea.hbm %s14953_s10, 3072 }
 0x15d   :  { %p12401_p2 = scmp.ne.s32.totalorder %s14953_s10, %s12400_s9  ;;  %p12404_p3 = scmp.lt.u32.totalorder %s12400_s9, %s14953_s10 }
 0x15f   :  { %p12406_p4 = pnand %p12404_p3, %p12401_p2 }
 0x161   :  { %12409 = shalt.err (!%p12406_p4)
}
 0x162   :  { %s12410_s27 = scalar_lea.vmem %s157_s1, 3072  ;;  %p12415_p6 = scmp.lt.s32.totalorder %s157_s1, %s157_s1 }
 0x163   :  { %p12411_p5 = scmp.ne.s32.totalorder %s157_s1, %s12410_s27  ;;  %p12416_p7 = scmp.lt.s32.totalorder %s12410_s27, %s12410_s27 }
 0x165   :  { %p12417_p8 = por %p12416_p7, %p12415_p6 }
 0x167   :  { %p12418_p9 = pnand %p12417_p8, %p12411_p5 }
 0x169   :  { %12421 = shalt.err (!%p12418_p9)
}
 0x16a   :  { %162 = dma.hbm_to_vmem [thread:$0]  %s14953_s10, 3072, %s157_s1, [#allocation18], %s12639_s4, %s12639_s4, %s12640_s30  }
 0x16b   :  { %s12422_s13 = scalar_lea.hbm %s14955_s12, 48 }
 0x16c   :  { %p12423_p10 = scmp.ne.s32.totalorder %s14955_s12, %s12422_s13  ;;  %p12426_p11 = scmp.lt.u32.totalorder %s12422_s13, %s14955_s12 }
 0x16e   :  { %p12428_p12 = pnand %p12426_p11, %p12423_p10 }
 0x170   :  { %12431 = shalt.err (!%p12428_p12)
}
 0x171   :  { %s12432_s9 = scalar_lea.vmem %s13011_s25, 48  ;;  %s12436_s10 = scalar_lea.vmem %s13011_s25, 64 }
 0x172   :  { %p12433_p13 = scmp.ne.s32.totalorder %s13011_s25, %s12432_s9  ;;  %p12437_p0 = scmp.lt.s32.totalorder %s13011_s25, %s13011_s25 }
 0x173   :  { %p12438_p1 = scmp.lt.s32.totalorder %s12436_s10, %s12432_s9 }
 0x175   :  { %p12439_p2 = por %p12438_p1, %p12437_p0 }
 0x177   :  { %p12440_p3 = pnand %p12439_p2, %p12433_p13 }
 0x179   :  { %12443 = shalt.err (!%p12440_p3)
}
 0x17a   :  { %186 = dma.hbm_to_vmem [thread:$0]  %s14955_s12, 48, %s13011_s25, [#allocation21], %s12634_s6, %s12634_s6, %s12635_s5  }
 0x17b   :  { %s12654_s29 = smov [#allocation25]   ;;  %s12655_s2 = smov [#allocation28]  }
 0x17c   :  { %s204_s17 = sshll.u32 %s12654_s29, 4  ;;  %s228_s27 = sshll.u32 %s12655_s2, 4  ;;  %s205_s17 = int_to_ptr.vmem [resolvable:$true] %s204_s17  ;;  %s229_s27 = int_to_ptr.vmem [resolvable:$true] %s228_s27 }
 0x17d   :  { %s12444_s3 = scalar_lea.hbm %s14957_s14, 12288 }
 0x17e   :  { %p12445_p4 = scmp.ne.s32.totalorder %s14957_s14, %s12444_s3  ;;  %p12448_p5 = scmp.lt.u32.totalorder %s12444_s3, %s14957_s14 }
 0x180   :  { %p12450_p6 = pnand %p12448_p5, %p12445_p4 }
 0x182   :  { %12453 = shalt.err (!%p12450_p6)
}
 0x183   :  { %s12454_s12 = scalar_lea.vmem %s205_s17, 12288  ;;  %p12459_p8 = scmp.lt.s32.totalorder %s205_s17, %s205_s17 }
 0x184   :  { %p12455_p7 = scmp.ne.s32.totalorder %s205_s17, %s12454_s12  ;;  %p12460_p9 = scmp.lt.s32.totalorder %s12454_s12, %s12454_s12 }
 0x186   :  { %p12461_p10 = por %p12460_p9, %p12459_p8 }
 0x188   :  { %p12462_p11 = pnand %p12461_p10, %p12455_p7 }
 0x18a   :  { %12465 = shalt.err (!%p12462_p11)
}
 0x18b   :  { %s12656_s25 = smov 256   ;;  %s12466_s1 = scalar_lea.hbm %s14959_s16, 12288 }
 0x18c   :  { %210 = dma.hbm_to_vmem [thread:$0]  %s14957_s14, 12288, %s205_s17, [#allocation24], %s12656_s25, %s12656_s25, %s12634_s6  }
 0x18d   :  { %p12467_p12 = scmp.ne.s32.totalorder %s14959_s16, %s12466_s1  ;;  %p12470_p13 = scmp.lt.u32.totalorder %s12466_s1, %s14959_s16 }
 0x18f   :  { %p12472_p0 = pnand %p12470_p13, %p12467_p12 }
 0x191   :  { %12475 = shalt.err (!%p12472_p0)
}
 0x192   :  { %s12476_s11 = scalar_lea.vmem %s229_s27, 12288  ;;  %p12481_p2 = scmp.lt.s32.totalorder %s229_s27, %s229_s27 }
 0x193   :  { %p12477_p1 = scmp.ne.s32.totalorder %s229_s27, %s12476_s11  ;;  %p12482_p3 = scmp.lt.s32.totalorder %s12476_s11, %s12476_s11 }
 0x195   :  { %p12483_p4 = por %p12482_p3, %p12481_p2 }
 0x197   :  { %p12484_p5 = pnand %p12483_p4, %p12477_p1 }
 0x199   :  { %12487 = shalt.err (!%p12484_p5)
}
 0x19a   :  { %234 = dma.hbm_to_vmem [thread:$0]  %s14959_s16, 12288, %s229_s27, [#allocation27], %s12639_s4, %s12639_s4, %s12640_s30  }
 0x19b   :  { %s12657_s3 = smov [#allocation31]   ;;  %s12658_s13 = smov [#allocation34]  }
 0x19c   :  { %s252_s15 = sshll.u32 %s12657_s3, 4  ;;  %s276_s7 = sshll.u32 %s12658_s13, 4  ;;  %s253_s15 = int_to_ptr.vmem [resolvable:$true] %s252_s15  ;;  %s277_s7 = int_to_ptr.vmem [resolvable:$true] %s276_s7 }
 0x19d   :  { %s12488_s25 = scalar_lea.hbm %s14961_s18, 48 }
 0x19e   :  { %p12489_p6 = scmp.ne.s32.totalorder %s14961_s18, %s12488_s25  ;;  %p12492_p7 = scmp.lt.u32.totalorder %s12488_s25, %s14961_s18 }
 0x1a0   :  { %p12494_p8 = pnand %p12492_p7, %p12489_p6 }
 0x1a2   :  { %12497 = shalt.err (!%p12494_p8)
}
 0x1a3   :  { %s12498_s16 = scalar_lea.vmem %s253_s15, 48  ;;  %s12502_s27 = scalar_lea.vmem %s253_s15, 64 }
 0x1a4   :  { %p12499_p9 = scmp.ne.s32.totalorder %s253_s15, %s12498_s16  ;;  %p12503_p10 = scmp.lt.s32.totalorder %s253_s15, %s253_s15 }
 0x1a5   :  { %p12504_p11 = scmp.lt.s32.totalorder %s12502_s27, %s12498_s16 }
 0x1a7   :  { %p12505_p12 = por %p12504_p11, %p12503_p10 }
 0x1a9   :  { %p12506_p13 = pnand %p12505_p12, %p12499_p9 }
 0x1ab   :  { %12509 = shalt.err (!%p12506_p13)
}
 0x1ac   :  { %258 = dma.hbm_to_vmem [thread:$0]  %s14961_s18, 48, %s253_s15, [#allocation30], %s12634_s6, %s12634_s6, %s12635_s5  }
 0x1ad   :  { %s12510_s8 = scalar_lea.hbm %s14963_s20, 1024 }
 0x1ae   :  { %p12511_p0 = scmp.ne.s32.totalorder %s14963_s20, %s12510_s8  ;;  %p12514_p1 = scmp.lt.u32.totalorder %s12510_s8, %s14963_s20 }
 0x1b0   :  { %p12516_p2 = pnand %p12514_p1, %p12511_p0 }
 0x1b2   :  { %12519 = shalt.err (!%p12516_p2)
}
 0x1b3   :  { %s12520_s13 = scalar_lea.vmem %s277_s7, 1024  ;;  %p12525_p4 = scmp.lt.s32.totalorder %s277_s7, %s277_s7 }
 0x1b4   :  { %p12521_p3 = scmp.ne.s32.totalorder %s277_s7, %s12520_s13  ;;  %p12526_p5 = scmp.lt.s32.totalorder %s12520_s13, %s12520_s13 }
 0x1b6   :  { %p12527_p6 = por %p12526_p5, %p12525_p4 }
 0x1b8   :  { %p12528_p7 = pnand %p12527_p6, %p12521_p3 }
 0x1ba   :  { %12531 = shalt.err (!%p12528_p7)
}
 0x1bb   :  { %282 = dma.hbm_to_vmem [thread:$0]  %s14963_s20, 1024, %s277_s7, [#allocation33], %s12639_s4, %s12639_s4, %s12640_s30  }
 0x1bc   :  { %s12659_s5 = smov [#allocation37]   ;;  %s12660_s26 = smov [#allocation38]  }
 0x1bd   :  { %s298_s15 = sshll.u32 %s12659_s5, 4  ;;  %s311_s12 = sshll.u32 %s12660_s26, 4  ;;  %s299_s15 = int_to_ptr.vmem [resolvable:$true] %s298_s15  ;;  %s312_s12 = int_to_ptr.vmem [resolvable:$true] %s311_s12 }
 0x1be   :  { %s12532_s0 = scalar_lea.hbm %s14965_s22, 1024 }
 0x1bf   :  { %p12533_p8 = scmp.ne.s32.totalorder %s14965_s22, %s12532_s0  ;;  %p12536_p9 = scmp.lt.u32.totalorder %s12532_s0, %s14965_s22 }
 0x1c1   :  { %p12538_p10 = pnand %p12536_p9, %p12533_p8 }
 0x1c3   :  { %12541 = shalt.err (!%p12538_p10)
}
 0x1c4   :  { %s12542_s20 = scalar_lea.vmem %s299_s15, 1024  ;;  %p12547_p12 = scmp.lt.s32.totalorder %s299_s15, %s299_s15 }
 0x1c5   :  { %p12543_p11 = scmp.ne.s32.totalorder %s299_s15, %s12542_s20  ;;  %p12548_p13 = scmp.lt.s32.totalorder %s12542_s20, %s12542_s20 }
 0x1c7   :  { %p12549_p0 = por %p12548_p13, %p12547_p12 }
 0x1c9   :  { %p12550_p1 = pnand %p12549_p0, %p12543_p11 }
 0x1cb   :  { %12553 = shalt.err (!%p12550_p1)
}
 0x1cc   :  { %304 = dma.hbm_to_vmem [thread:$0]  %s14965_s22, 1024, %s299_s15, [#allocation36], %s12639_s4, %s12639_s4, %s12640_s30  }
 0x1cd   :  { %s12554_s2 = scalar_lea.hbm %s14966_s23, 16 }
 0x1ce   :  { %p12555_p2 = scmp.ne.s32.totalorder %s14966_s23, %s12554_s2  ;;  %p12558_p3 = scmp.lt.u32.totalorder %s12554_s2, %s14966_s23 }
 0x1d0   :  { %p12560_p4 = pnand %p12558_p3, %p12555_p2 }
 0x1d2   :  { %12563 = shalt.err (!%p12560_p4)
}
 0x1d3   :  { %s12564_s3 = scalar_lea.vmem %s312_s12, 16  ;;  %s12568_s13 = scalar_lea.vmem %s312_s12, 32 }
 0x1d4   :  { %p12565_p5 = scmp.ne.s32.totalorder %s312_s12, %s12564_s3  ;;  %p12569_p6 = scmp.lt.s32.totalorder %s312_s12, %s312_s12 }
 0x1d5   :  { %p12570_p7 = scmp.lt.s32.totalorder %s12568_s13, %s12564_s3 }
 0x1d7   :  { %p12571_p8 = por %p12570_p7, %p12569_p6 }
 0x1d9   :  { %p12572_p9 = pnand %p12571_p8, %p12565_p5 }
 0x1db   :  { %12575 = shalt.err (!%p12572_p9)
}
 0x1dc   :  { %314 = dma.hbm_to_vmem [thread:$0]  %s14966_s23, 16, %s312_s12, [#allocation39]  }
 0x1dd   :  { %12598 = dma.done.wait [#allocation3], 768  }
 0x1de   :  { %12599 = vsyncadd [#allocation3], 4294966528 }
 0x1df   :  { %12600 = dma.done.wait [#allocation6], 512  }
 0x1e0   :  { %12601 = vsyncadd [#allocation6], 4294966784 }
 0x1e1   :  { %12602 = dma.done.wait [#allocation9], 160  }
 0x1e2   :  { %12603 = vsyncadd [#allocation9], 4294967136 }
 0x1e3   :  { %12604 = dma.done.wait [#allocation12], 80  }
 0x1e4   :  { %12605 = vsyncadd [#allocation12], 4294967216 }
 0x1e5   :  { %12606 = dma.done.wait [#allocation15], 9232  }
 0x1e6   :  { %12607 = vsyncadd [#allocation15], 4294958064 }
 0x1e7   :  { %12608 = dma.done.wait [#allocation18], 3216  }
 0x1e8   :  { %12609 = vsyncadd [#allocation18], 4294964080 }
 0x1e9   :  { %12610 = dma.done.wait [#allocation21], 96  }
 0x1ea   :  { %12611 = vsyncadd [#allocation21], 4294967200 }
 0x1eb   :  { %12612 = dma.done.wait [#allocation24], 12336  }
 0x1ec   :  { %12613 = vsyncadd [#allocation24], 4294954960 }
 0x1ed   :  { %12614 = dma.done.wait [#allocation27], 12480  }
 0x1ee   :  { %12615 = vsyncadd [#allocation27], 4294954816 }
 0x1ef   :  { %12616 = dma.done.wait [#allocation30], 96  }
 0x1f0   :  { %12617 = vsyncadd [#allocation30], 4294967200 }
 0x1f1   :  { %12618 = dma.done.wait [#allocation33], 1072  }
 0x1f2   :  { %12619 = vsyncadd [#allocation33], 4294966224 }
 0x1f3   :  { %12620 = dma.done.wait [#allocation36], 1040  }
 0x1f4   :  { %12621 = vsyncadd [#allocation36], 4294966256 }
 0x1f5   :  { %12622 = dma.done.wait [#allocation39], 16  }
 0x1f6   :  { %12623 = vsyncadd [#allocation39], 4294967280  ;;  %v12661_v0 = vmov 0.0   ;;  %vm12662_vm0 = vmmov 0   ;;  %v397_v1 = vld [vmem:[#allocation5] sm:$0xff]  ;;  %vm409_vm1 = vcmask 1043456   ;;  %v492_v16 = vlaneseq }
 0x1f7   :  { %10538 = vmatprep.subr.bf16.mxu0 %v12661_v0  ;;  %10540 = vmatprep.mubr.msk.bf16.mxu0 %vm12662_vm0, %v12661_v0  ;;  %v388_v2 = vld [vmem:[#allocation2] sm:$0xff]  ;;  %v389_v3 = vld [vmem:[#allocation2 + $0x8] sm:$0xff]  ;;  %v398_v4 = vpack.c.bf16 %v397_v1, %v397_v1  ;;  %vm399_vm2 = vcmask 64512   ;;  %v390_v7 = vld [vmem:[#allocation2 + $0x10] sm:$0xff]  ;;  %v12663_v14 = vmov 1966171168  }
 0x1f8   :  { %v394_v6 = vpack.c.bf16 %v389_v3, %v388_v2  ;;  %v391_v8 = vld [vmem:[#allocation2 + $0x18] sm:$0xff]  ;;  %v392_v10 = vld [vmem:[#allocation2 + $0x20] sm:$0xff]  ;;  %v393_v11 = vld [vmem:[#allocation2 + $0x28] sm:$0xff]  ;;  %v490_v15 = vunpack.c.l.s4 %v12663_v14  ;;  %v13145_v18 = vshrl.u32 %v492_v16, 7  ;;  %vm1127_vm3 = vcmask 195584   ;;  %s12665_s23 = smov [#allocation40]  }
 0x1f9   :  { %v411_v5 = vsel %vm409_vm1, %v398_v4, 0  ;;  %v395_v9 = vpack.c.bf16 %v391_v8, %v390_v7  ;;  %v396_v12 = vpack.c.bf16 %v393_v11, %v392_v10  ;;  %v11296_v13 = vld [vmem:[#allocation16 + $0x4] ss:$12 sps:$4 sm:$0xff]   ;;  %v470_v23 = vld [vmem:[#allocation7] sm:$0xff]  ;;  %v11298_v53 = vld [vmem:[#allocation16] ss:$12 sps:$4 sm:$0xff]  }
 0x1fa   :  { %10539 = vmatpush3.bf16.msra.mxu0 %v411_v5  ;;  %806 = vmatprep.subr.bf16.mxu1 %v11296_v13  ;;  %v491_v17 = vunpack.c.0.s8 %v490_v15  ;;  %v9483_v20 = vld.sshfl [vmem:[#allocation8] sm:$0x11 pattern:$0x75316420]  ;;  %v13149_v22 = vsub.s32 0, %v13145_v18  ;;  %v471_v26 = vld [vmem:[#allocation7 + $0x8] sm:$0xff] }
 0x1fb   :  { %10552 = vmatprep.subr.bf16.mxu0 %v12661_v0  ;;  %v488_v29 = vcombine.high %v9483_v20, %v9483_v20  ;;  %v472_v37 = vld [vmem:[#allocation7 + $0x10] sm:$0xff]  ;;  %807 = vmatpush1.bf16.msra.mxu1 %v11298_v53  ;;  %v11304_v1 = vld [vmem:[#allocation16 + $0x34] ss:$12 sps:$4 sm:$0xff]   ;;  %v11306_v3 = vld [vmem:[#allocation16 + $0x30] ss:$12 sps:$4 sm:$0xff]   ;;  %s9456_s30 = sshll.u32 %s12665_s23, 4  ;;  %s9457_s30 = int_to_ptr.vmem [resolvable:$true] %s9456_s30 }
 0x1fc   :  { %v494_v19 = vsub.s32 %v491_v17, %v13145_v18  ;;  %v11299_v54 = vld [vmem:[#allocation16 + $0x8] ss:$12 sps:$4 sm:$0xff]   ;;  %v11302_v61 = vld [vmem:[#allocation16 + $0x18] ss:$12 sps:$4 sm:$0xff]   ;;  %v11303_v62 = vld [vmem:[#allocation16 + $0x20] ss:$12 sps:$4 sm:$0xff]   ;;  %p12581_p11 = scmp.lt.s32.totalorder %s9457_s30, %s9457_s30 }
 0x1fd   :  { %10541 = vmatmul.mubr.msk.bf16.vlgmr.msra.gmra.mrb[0].mxu0 %vm399_vm2, %v394_v6  ;;  %v11300_v59 = vld [vmem:[#allocation16 + $0x1c] ss:$12 sps:$4 sm:$0xff]   ;;  %v11307_v4 = vld [vmem:[#allocation16 + $0x38] ss:$12 sps:$4 sm:$0xff]   ;;  %v11319_v13 = vld [vmem:[#allocation16 + $0x80] ss:$12 sps:$4 sm:$0xff]  }
 0x1fe   :  { %10544 = vmatprep.mubr.msk.bf16.mxu0 %vm12662_vm0, %v12661_v0  ;;  %v495_v21 = vrot.slane %v9483_v20, %v494_v19  ;;  %v502_v36 = vrot.slane %v488_v29, %v494_v19  ;;  %10553 = vmatpush3.bf16.msra.mxu0 %v11299_v54  ;;  %v11308_v5 = vld [vmem:[#allocation16 + $0x4c] ss:$12 sps:$4 sm:$0xff]   ;;  %v11310_v6 = vld [vmem:[#allocation16 + $0x48] ss:$12 sps:$4 sm:$0xff]   ;;  %v11311_v7 = vld [vmem:[#allocation16 + $0x50] ss:$12 sps:$4 sm:$0xff]  }
 0x1ff   :  { %10554 = vmatprep.subr.bf16.mxu0 %v12661_v0  ;;  %808 = vmatprep.subr.bf16.mxu1 %v11300_v59  ;;  %v11312_v8 = vld [vmem:[#allocation16 + $0x64] ss:$12 sps:$4 sm:$0xff]   ;;  %v11315_v10 = vld [vmem:[#allocation16 + $0x68] ss:$12 sps:$4 sm:$0xff]   ;;  %v11324_v17 = vld [vmem:[#allocation16 + $0xac] ss:$12 sps:$4 sm:$0xff]  }
 0x200   :  { %v506_v24 = vrot.slane %v495_v21, %v13149_v22  ;;  %v510_v41 = vrot.slane %v502_v36, %v13149_v22  ;;  %809 = vmatpush1.bf16.msra.mxu1 %v11302_v61  ;;  %v11316_v11 = vld [vmem:[#allocation16 + $0x7c] ss:$12 sps:$4 sm:$0xff]   ;;  %v11320_v14 = vld [vmem:[#allocation16 + $0x94] ss:$12 sps:$4 sm:$0xff]   ;;  %v11323_v16 = vld [vmem:[#allocation16 + $0x98] ss:$12 sps:$4 sm:$0xff]  }
 0x201   :  { %810 = vmatprep.subr.bf16.mxu1 %v11304_v1  ;;  %v11322_v15 = vld [vmem:[#allocation16 + $0x90] ss:$12 sps:$4 sm:$0xff]   ;;  %v11326_v19 = vld [vmem:[#allocation16 + $0xa8] ss:$12 sps:$4 sm:$0xff]   ;;  %v12664_v21 = vmov 0   ;;  %s12576_s18 = scalar_lea.vmem %s9457_s30, 256 }
 0x202   :  { %10555 = vmatpush3.bf16.msra.mxu0 %v11303_v62  ;;  %v11327_v20 = vld [vmem:[#allocation16 + $0xb0] ss:$12 sps:$4 sm:$0xff]   ;;  %838 = vmatprep.mubr.bf16.mxu1 %v12664_v21  ;;  %p12577_p10 = scmp.ne.s32.totalorder %s9457_s30, %s12576_s18  ;;  %p12582_p12 = scmp.lt.s32.totalorder %s12576_s18, %s12576_s18 }
 0x203   :  { %10556 = vmatprep.subr.bf16.mxu0 %v12661_v0 }
 0x204   :  { %811 = vmatpush1.bf16.msra.mxu1 %v11306_v3  ;;  %p12583_p13 = por %p12582_p12, %p12581_p11 }
 0x205   :  { %10545 = vmatmul.mubr.msk.bf16.gmra.mrb[4].mxu0 %vm399_vm2, %v395_v9  ;;  %812 = vmatprep.subr.bf16.mxu1 %v11308_v5  ;;  %v11314_v9 = vld [vmem:[#allocation16 + $0x60] ss:$12 sps:$4 sm:$0xff]  }
 0x206   :  { %10548 = vmatprep.mubr.msk.bf16.mxu0 %vm12662_vm0, %v12661_v0  ;;  %10557 = vmatpush3.bf16.msra.mxu0 %v11307_v4  ;;  %v9484_v4 = vld [vmem:[#allocation13] ss:$0 sm:$0xff]  ;;  %p12584_p0 = pnand %p12583_p13, %p12577_p10 }
 0x207   :  { %10558 = vmatprep.subr.bf16.mxu0 %v12661_v0 }
 0x208   :  { %813 = vmatpush1.bf16.msra.mxu1 %v11310_v6 }
 0x209   :  { %814 = vmatprep.subr.bf16.mxu1 %v11312_v8 }
 0x20a   :  { %10559 = vmatpush3.bf16.msra.mxu0 %v11311_v7 }
 0x20b   :  { %10560 = vmatprep.subr.bf16.mxu0 %v12661_v0 }
 0x20c   :  { %815 = vmatpush1.bf16.msra.mxu1 %v11314_v9 }
 0x20d   :  { %10549 = vmatmul.mubr.msk.bf16.gmra.mrb[8].mxu0 %vm399_vm2, %v396_v12  ;;  %v11318_v12 = vld [vmem:[#allocation16 + $0x78] ss:$12 sps:$4 sm:$0xff]   ;;  %816 = vmatprep.subr.bf16.mxu1 %v11316_v11 }
 0x20e   :  { %10568 = vmatprep.mubr.msk.bf16.mxu0 %vm12662_vm0, %v12661_v0  ;;  %10561 = vmatpush3.bf16.msra.mxu0 %v11315_v10 }
 0x20f   :  { %10562 = vmatprep.subr.bf16.mxu0 %v12661_v0 }
 0x210   :  { %817 = vmatpush1.bf16.msra.mxu1 %v11318_v12 }
 0x211   :  { %818 = vmatprep.subr.bf16.mxu1 %v11320_v14  ;;  %v9485_v14 = vld [vmem:[#allocation14] ss:$0 sm:$0xff] }
 0x212   :  { %10563 = vmatpush3.bf16.msra.mxu0 %v11319_v13 }
 0x213   :  { %10564 = vmatprep.subr.bf16.mxu0 %v12661_v0 }
 0x214   :  { %819 = vmatpush1.bf16.msra.mxu1 %v11322_v15 }
 0x215   :  { %820 = vmatprep.subr.bf16.mxu1 %v11324_v17 }
 0x216   :  { %10565 = vmatpush3.bf16.msra.mxu0 %v11323_v16 }
 0x217   :  { %10566 = vmatprep.subr.bf16.mxu0 %v12661_v0 }
 0x218   :  { %821 = vmatpush1.bf16.msra.mxu1 %v11326_v19 }
 0x21a   :  { %10567 = vmatpush3.bf16.msra.mxu0 %v11327_v20 }
 0x2d0   :  { %v447_v25 = vpop.f32.mrb[0].mxu0 }
 0x2d1   :  { %v473_v27 = vadd.f32 %v470_v23, %v447_v25  ;;  %v10542_v28 = vpop.f32.mrb[1].mxu0 }
 0x2d2   :  { %v450_v30 = vpop.f32.mrb[2].mxu0 }
 0x2d3   :  { %v13152_v31 = vadd.f32 %v506_v24, %v473_v27  ;;  %v474_v32 = vadd.f32 %v471_v26, %v450_v30  ;;  %v10543_v33 = vpop.f32.mrb[3].mxu0 }
 0x2d5   :  { %v13154_v34 = vadd.f32 %v506_v24, %v474_v32  ;;  %521 = vadd.xlane.f32.xlu0 %v13152_v31  ;;  %v540_v35 = vmul.f32 %v13152_v31, %v13152_v31 }
 0x2d7   :  { %546 = vadd.xlane.f32.xlu1 %v540_v35  ;;  %v541_v42 = vmul.f32 %v13154_v34, %v13154_v34 }
 0x2d8   :  { %v455_v38 = vpop.f32.mrb[4].mxu0 }
 0x2d9   :  { %v475_v39 = vadd.f32 %v472_v37, %v455_v38  ;;  %523 = vadd.xlane.f32.xlu0 %v13154_v34  ;;  %v10546_v40 = vpop.f32.mrb[5].mxu0 }
 0x2da   :  { %v458_v43 = vpop.f32.mrb[6].mxu0 }
 0x2db   :  { %v13163_v44 = vadd.f32 %v506_v24, %v475_v39  ;;  %v476_v45 = vadd.f32 %v470_v23, %v458_v43  ;;  %548 = vadd.xlane.f32.xlu1 %v541_v42  ;;  %v10547_v46 = vpop.f32.mrb[7].mxu0 }
 0x2dd   :  { %v13165_v47 = vadd.f32 %v510_v41, %v476_v45  ;;  %525 = vadd.xlane.f32.xlu0 %v13163_v44  ;;  %v542_v48 = vmul.f32 %v13163_v44, %v13163_v44 }
 0x2df   :  { %527 = vadd.xlane.f32.xlu1 %v13165_v47  ;;  %v543_v52 = vmul.f32 %v13165_v47, %v13165_v47 }
 0x2e0   :  { %v463_v49 = vpop.f32.mrb[8].mxu0 }
 0x2e1   :  { %v477_v50 = vadd.f32 %v471_v26, %v463_v49  ;;  %550 = vadd.xlane.f32.xlu0 %v542_v48  ;;  %v10550_v51 = vpop.f32.mrb[9].mxu0 }
 0x2e2   :  { %v466_v55 = vpop.f32.mrb[10].mxu0 }
 0x2e3   :  { %v13173_v56 = vadd.f32 %v510_v41, %v477_v50  ;;  %v478_v57 = vadd.f32 %v472_v37, %v466_v55  ;;  %552 = vadd.xlane.f32.xlu1 %v543_v52  ;;  %v10551_v58 = vpop.f32.mrb[11].mxu0 }
 0x2e5   :  { %v13175_v60 = vadd.f32 %v510_v41, %v478_v57  ;;  %529 = vadd.xlane.f32.xlu0 %v13173_v56  ;;  %v544_v63 = vmul.f32 %v13173_v56, %v13173_v56 }
 0x2e7   :  { %531 = vadd.xlane.f32.xlu1 %v13175_v60  ;;  %v545_v2 = vmul.f32 %v13175_v60, %v13175_v60 }
 0x2e9   :  { %554 = vadd.xlane.f32.xlu0 %v544_v63 }
 0x2eb   :  { %556 = vadd.xlane.f32.xlu1 %v545_v2 }
 0x362   :  { %v522_v23 = vpop.xlane.xlu0 %521 }
 0x363   :  { %v534_v24 = vmul.f32 0.0078125, %v522_v23 }
 0x364   :  { %v547_v25 = vpop.xlane.xlu1 %546 }
 0x365   :  { %v564_v26 = vmul.f32 %v534_v24, %v534_v24  ;;  %v558_v27 = vmul.f32 0.0078125, %v547_v25  ;;  %v576_v57 = vsub.f32 %v13152_v31, %v534_v24 }
 0x366   :  { %v524_v28 = vpop.xlane.xlu0 %523 }
 0x367   :  { %v570_v29 = vsub.f32 %v558_v27, %v564_v26  ;;  %v535_v30 = vmul.f32 0.0078125, %v524_v28 }
 0x368   :  { %v549_v32 = vpop.xlane.xlu1 %548 }
 0x369   :  { %v582_v33 = vadd.f32 1e-05, %v570_v29  ;;  %v565_v35 = vmul.f32 %v535_v30, %v535_v30  ;;  %v559_v36 = vmul.f32 0.0078125, %v549_v32  ;;  %v577_v5 = vsub.f32 %v13154_v34, %v535_v30 }
 0x36a   :  { %v526_v37 = vpop.xlane.xlu0 %525 }
 0x36b   :  { %11672 = vrsqrt.f32 %v582_v33  ;;  %v571_v38 = vsub.f32 %v559_v36, %v565_v35  ;;  %v536_v39 = vmul.f32 0.0078125, %v526_v37 }
 0x36c   :  { %v528_v40 = vpop.xlane.xlu1 %527 }
 0x36d   :  { %v583_v41 = vadd.f32 1e-05, %v571_v38  ;;  %v537_v42 = vmul.f32 0.0078125, %v528_v40  ;;  %v566_v45 = vmul.f32 %v536_v39, %v536_v39  ;;  %v578_v17 = vsub.f32 %v13163_v44, %v536_v39 }
 0x36e   :  { %v551_v43 = vpop.xlane.xlu0 %550 }
 0x36f   :  { %11674 = vrsqrt.f32 %v583_v41  ;;  %v560_v46 = vmul.f32 0.0078125, %v551_v43  ;;  %v567_v49 = vmul.f32 %v537_v42, %v537_v42  ;;  %v579_v23 = vsub.f32 %v13165_v47, %v537_v42  ;;  %v624_v42 = vld [vmem:[#allocation11] sm:$0xf] }
 0x370   :  { %v553_v48 = vpop.xlane.xlu1 %552  ;;  %v625_v43 = vpack.c.bf16 %v624_v42, %v624_v42 }
 0x371   :  { %v572_v50 = vsub.f32 %v560_v46, %v566_v45  ;;  %v561_v51 = vmul.f32 0.0078125, %v553_v48  ;;  %v13222_v46 = vsub.s32 2, %v13145_v18  ;;  %v13225_v48 = vsub.s32 1, %v13145_v18 }
 0x372   :  { %v530_v52 = vpop.xlane.xlu0 %529  ;;  %v1204_v45 = vshrl.u32 %v625_v43, 16 }
 0x373   :  { %v584_v53 = vadd.f32 1e-05, %v572_v50  ;;  %v573_v54 = vsub.f32 %v561_v51, %v567_v49  ;;  %v538_v55 = vmul.f32 0.0078125, %v530_v52  ;;  %v987_v49 = vpack.i.b16 %v625_v43, %v625_v43  ;;  %v661_v51 = vld [vmem:[#allocation17] sm:$0x7] }
 0x374   :  { %v532_v58 = vpop.xlane.xlu1 %531  ;;  %v13227_v50 = vpack.i.b16 %v1204_v45, %v1204_v45  ;;  %v13230_v52 = vrot.slane %v661_v51, %v13222_v46 }
 0x375   :  { %v11673_v59 = vpop.eup %11672  ;;  %11676 = vrsqrt.f32 %v584_v53  ;;  %v585_v61 = vadd.f32 1e-05, %v573_v54  ;;  %v539_v62 = vmul.f32 0.0078125, %v532_v58  ;;  %v568_v2 = vmul.f32 %v538_v55, %v538_v55 }
 0x376   :  { %v555_v63 = vpop.xlane.xlu0 %554  ;;  %v594_v1 = vmul.f32 %v11673_v59, %v576_v57  ;;  %v580_v29 = vsub.f32 %v13173_v56, %v538_v55  ;;  %v992_v53 = vrot.slane %v987_v49, %v13149_v22  ;;  %v1210_v54 = vrot.slane %v13227_v50, %v13149_v22 }
 0x377   :  { %11678 = vrsqrt.f32 %v585_v61  ;;  %v562_v3 = vmul.f32 0.0078125, %v555_v63  ;;  %v569_v8 = vmul.f32 %v539_v62, %v539_v62  ;;  %v581_v33 = vsub.f32 %v13175_v60, %v539_v62 }
 0x378   :  { %v557_v6 = vpop.xlane.xlu1 %556  ;;  %v606_v31 = vmul.f32 %v9484_v4, %v594_v1  ;;  %v1680_v55 = vrot.slane %v987_v49, %v13225_v48  ;;  %v13237_v57 = vrot.slane %v661_v51, %v13225_v48  ;;  %v13240_v58 = vrot.slane %v661_v51, %v13149_v22 }
 0x379   :  { %v11675_v7 = vpop.eup %11674  ;;  %v574_v9 = vsub.f32 %v562_v3, %v568_v2  ;;  %v563_v10 = vmul.f32 0.0078125, %v557_v6  ;;  %v13243_v2 = vcombine.low %v992_v53, %v992_v53  ;;  %v13245_v3 = vcombine.low %v1210_v54, %v1210_v54 }
 0x37a   :  { %v595_v11 = vmul.f32 %v11675_v7, %v577_v5  ;;  %v13194_v19 = vadd.f32 %v9485_v14, %v606_v31 }
 0x37b   :  { %v586_v12 = vadd.f32 1e-05, %v574_v9  ;;  %v575_v13 = vsub.f32 %v563_v10, %v569_v8 }
 0x37c   :  { %v607_v15 = vmul.f32 %v9484_v4, %v595_v11 }
 0x37d   :  { %11680 = vrsqrt.f32 %v586_v12  ;;  %v587_v16 = vadd.f32 1e-05, %v575_v13 }
 0x37e   :  { %v13196_v20 = vadd.f32 %v9485_v14, %v607_v15 }
 0x37f   :  { %v11677_v34 = vpop.eup %11676  ;;  %11682 = vrsqrt.f32 %v587_v16 }
 0x380   :  { %v626_v24 = vpack.c.bf16 %v13196_v20, %v13194_v19  ;;  %v596_v25 = vmul.f32 %v11677_v34, %v578_v17 }
 0x381   :  { %v11679_v26 = vpop.eup %11678 }
 0x382   :  { %839 = vmatmul.mubr.bf16.vlgmr.msra.gmra.mrb[0].mxu1 %v626_v24  ;;  %10569 = vmatmul.mubr.bf16.vlgmr.msra.gmra.mrb[12].mxu0 %v626_v24  ;;  %v597_v27 = vmul.f32 %v11679_v26, %v579_v23  ;;  %v608_v28 = vmul.f32 %v9484_v4, %v596_v25 }
 0x383   :  { %848 = vmatprep.mubr.bf16.mxu1 %v12664_v21  ;;  %10572 = vmatprep.mubr.msk.bf16.mxu0 %vm12662_vm0, %v12661_v0 }
 0x384   :  { %v609_v44 = vmul.f32 %v9484_v4, %v597_v27  ;;  %v13205_v30 = vadd.f32 %v9485_v14, %v608_v28 }
 0x386   :  { %v13207_v47 = vadd.f32 %v9485_v14, %v609_v44 }
 0x387   :  { %v11681_v32 = vpop.eup %11680 }
 0x388   :  { %v627_v35 = vpack.c.bf16 %v13207_v47, %v13205_v30  ;;  %v598_v36 = vmul.f32 %v11681_v32, %v580_v29 }
 0x389   :  { %v11683_v37 = vpop.eup %11682 }
 0x38a   :  { %849 = vmatmul.mubr.bf16.gmra.mrb[4].mxu1 %v627_v35  ;;  %10573 = vmatmul.mubr.bf16.gmra.mrb[16].mxu0 %v627_v35  ;;  %v599_v38 = vmul.f32 %v11683_v37, %v581_v33  ;;  %v610_v39 = vmul.f32 %v9484_v4, %v598_v36 }
 0x38b   :  { %858 = vmatprep.mubr.bf16.mxu1 %v12664_v21  ;;  %10576 = vmatprep.mubr.msk.bf16.mxu0 %vm12662_vm0, %v12661_v0 }
 0x38c   :  { %v611_v56 = vmul.f32 %v9484_v4, %v599_v38  ;;  %v13215_v40 = vadd.f32 %v9485_v14, %v610_v39  ;;  %v13247_v4 = vcombine.low %v1680_v55, %v1680_v55 }
 0x38e   :  { %v13217_v41 = vadd.f32 %v9485_v14, %v611_v56 }
 0x390   :  { %v628_v60 = vpack.c.bf16 %v13217_v41, %v13215_v40 }
 0x392   :  { %859 = vmatmul.mubr.bf16.gmra.mrb[8].mxu1 %v628_v60  ;;  %10577 = vmatmul.mubr.bf16.gmra.mrb[20].mxu0 %v628_v60 }
 0x455   :  { %v840_v59 = vpop.f32.mrb[0].mxu1  ;;  %v903_v61 = vpop.f32.mrb[12].mxu0 }
 0x456   :  { %v904_v62 = vadd.f32 %v903_v61, %v13230_v52  ;;  %v842_v63 = vpop.f32.mrb[1].mxu1  ;;  %v10570_v1 = vpop.f32.mrb[13].mxu0  ;;  %v841_v8 = vadd.f32 %v840_v59, %v13240_v58 }
 0x457   :  { %v843_v5 = vadd.f32 %v842_v63, %v13237_v57  ;;  %v844_v6 = vpop.f32.mrb[2].mxu1  ;;  %v906_v7 = vpop.f32.mrb[14].mxu0 }
 0x458   :  { %v13251_v9 = vpack.c.bf16 %v904_v62, %v904_v62  ;;  %v845_v10 = vadd.f32 %v844_v6, %v13240_v58  ;;  %v907_v11 = vadd.f32 %v906_v7, %v13230_v52  ;;  %v846_v31 = vpop.f32.mrb[3].mxu1  ;;  %v10571_v12 = vpop.f32.mrb[15].mxu0  ;;  %v2024_v7 = vrot.slane %v13227_v50, %v13225_v48 }
 0x459   :  { %v13255_v13 = vpack.c.bf16 %v843_v5, %v843_v5  ;;  %v847_v14 = vadd.f32 %v846_v31, %v13237_v57 }
 0x45a   :  { %v13258_v15 = vpack.c.bf16 %v845_v10, %v841_v8  ;;  %v13260_v16 = vpack.c.bf16 %v907_v11, %v907_v11  ;;  %v1407_v23 = vmul.bf16 %v13251_v9, %v13245_v3  ;;  %v1198_v24 = vmul.bf16 %v13251_v9, %v13243_v2 }
 0x45b   :  { %v13262_v17 = vpack.c.bf16 %v847_v14, %v847_v14  ;;  %v997_v34 = vmul.bf16 %v13255_v13, %v13243_v2  ;;  %v1215_v25 = vmul.bf16 %v13255_v13, %v13245_v3  ;;  %v1685_v28 = vmul.bf16 %v13255_v13, %v13247_v4 }
 0x45c   :  { %10584 = vmatprep.mubr.bf16.mxu1 %v13258_v15  ;;  %v1408_v26 = vmul.bf16 %v13260_v16, %v13245_v3  ;;  %v1199_v27 = vmul.bf16 %v13260_v16, %v13243_v2  ;;  %v1878_v36 = vmul.bf16 %v13260_v16, %v13247_v4  ;;  %v1877_v60 = vmul.bf16 %v13251_v9, %v13247_v4 }
 0x45d   :  { %v850_v44 = vpop.f32.mrb[4].mxu1  ;;  %v13279_v29 = vpop.f32.mrb[16].mxu0  ;;  %v998_v32 = vmul.bf16 %v13262_v17, %v13243_v2  ;;  %v1216_v33 = vmul.bf16 %v13262_v17, %v13245_v3  ;;  %v1686_v35 = vmul.bf16 %v13262_v17, %v13247_v4 }
 0x45e   :  { %v852_v37 = vpop.f32.mrb[5].mxu1  ;;  %v10574_v38 = vpop.f32.mrb[17].mxu0  ;;  %v13289_v39 = vcombine.low %v1407_v23, %v1408_v26  ;;  %v13291_v56 = vcombine.low %v1198_v24, %v1199_v27  ;;  %v851_v54 = vadd.f32 %v850_v44, %v13240_v58  ;;  %v13305_v1 = vcombine.low %v1877_v60, %v1878_v36 }
 0x45f   :  { %v853_v42 = vadd.f32 %v852_v37, %v13237_v57  ;;  %v854_v43 = vpop.f32.mrb[6].mxu1  ;;  %v914_v45 = vpop.f32.mrb[18].mxu0  ;;  %v9524_v49 = vcombine.low %v997_v34, %v998_v32  ;;  %v13296_v51 = vcombine.low %v1215_v25, %v1216_v33  ;;  %v13298_v53 = vcombine.low %v1685_v28, %v1686_v35 }
 0x460   :  { %v855_v55 = vadd.f32 %v854_v43, %v13240_v58  ;;  %v856_v59 = vpop.f32.mrb[7].mxu1  ;;  %v10575_v61 = vpop.f32.mrb[19].mxu0  ;;  %v915_v63 = vadd.f32 %v914_v45, %v13230_v52  ;;  %v13317_v25 = vcombine.low %v2024_v7, %v2024_v7 }
 0x461   :  { %v13302_v62 = vpack.c.bf16 %v853_v42, %v853_v42  ;;  %10580 = vmatprep.subr.bf16.mxu1 %v9524_v49  ;;  %v857_v6 = vadd.f32 %v856_v59, %v13237_v57 }
 0x462   :  { %v927_v5 = vpack.c.bf16 %v855_v55, %v851_v54  ;;  %10581 = vmatpush3.bf16.xpose.msra.mxu1 %v9524_v49  ;;  %v13312_v10 = vpack.c.bf16 %v915_v63, %v915_v63  ;;  %v2030_v60 = vmul.bf16 %v13262_v17, %v13317_v25 }
 0x463   :  { %v999_v8 = vmul.bf16 %v13302_v62, %v13243_v2  ;;  %v13314_v14 = vpack.c.bf16 %v857_v6, %v857_v6 }
 0x464   :  { %v1410_v38 = vmul.bf16 %v13312_v10, %v13245_v3  ;;  %v935_v59 = vunpack.c.h.b16 %v927_v5  ;;  %v1201_v6 = vmul.bf16 %v13312_v10, %v13243_v2  ;;  %v2029_v5 = vmul.bf16 %v13255_v13, %v13317_v25 }
 0x465   :  { %v860_v11 = vpop.f32.mrb[8].mxu1  ;;  %v919_v31 = vpop.f32.mrb[20].mxu0  ;;  %v9525_v12 = vcombine.low %v999_v8, %v999_v8  ;;  %v1000_v43 = vmul.bf16 %v13314_v14, %v13243_v2  ;;  %v1218_v45 = vmul.bf16 %v13314_v14, %v13245_v3 }
 0x466   :  { %v920_v34 = vadd.f32 %v919_v31, %v13230_v52  ;;  %v862_v23 = vpop.f32.mrb[9].mxu1  ;;  %v10578_v24 = vpop.f32.mrb[21].mxu0  ;;  %v861_v28 = vadd.f32 %v860_v11, %v13240_v58  ;;  %v1217_v11 = vmul.bf16 %v13302_v62, %v13245_v3 }
 0x467   :  { %v863_v26 = vadd.f32 %v862_v23, %v13237_v57  ;;  %v864_v27 = vpop.f32.mrb[10].mxu1  ;;  %v13320_v50 = vpop.f32.mrb[22].mxu0  ;;  %10582 = vmatprep.subr.bf16.mxu1 %v9525_v12  ;;  %v13354_v23 = vpack.c.bf16 %v851_v54, %v851_v54 }
 0x468   :  { %v10014_v44 = vpack.c.bf16 %v920_v34, %v920_v34  ;;  %v865_v32 = vadd.f32 %v864_v27, %v13240_v58  ;;  %v866_v33 = vpop.f32.mrb[11].mxu1  ;;  %v10579_v35 = vpop.f32.mrb[23].mxu0  ;;  %v9531_v13 = vcombine.low %v1217_v11, %v1217_v11 }
 0x469   :  { %v10008_v36 = vpack.c.bf16 %v863_v26, %v863_v26  ;;  %v867_v37 = vadd.f32 %v866_v33, %v13237_v57  ;;  %v1688_v26 = vmul.bf16 %v13314_v14, %v13247_v4  ;;  %v13366_v35 = vcombine.low %v2029_v5, %v2030_v60 }
 0x46a   :  { %v928_v42 = vpack.c.bf16 %v865_v32, %v861_v28  ;;  %10583 = vmatpush3.bf16.xpose.msra.mxu1 %v9525_v12  ;;  %v1411_v58 = vmul.bf16 %v10014_v44, %v13245_v3  ;;  %v1202_v17 = vmul.bf16 %v10014_v44, %v13243_v2  ;;  %v1880_v28 = vmul.bf16 %v13312_v10, %v13247_v4 }
 0x46b   :  { %v13334_v49 = vpack.c.bf16 %v867_v37, %v867_v37  ;;  %10596 = vmatprep.subr.bf16.mxu1 %v13296_v51  ;;  %v1001_v57 = vmul.bf16 %v10008_v36, %v13243_v2  ;;  %v1219_v55 = vmul.bf16 %v10008_v36, %v13245_v3  ;;  %v1689_v27 = vmul.bf16 %v10008_v36, %v13247_v4 }
 0x46c   :  { %v936_v61 = vunpack.c.l.b16 %v928_v42  ;;  %v13340_v63 = vcombine.low %v1410_v38, %v1411_v58  ;;  %v13350_v34 = vcombine.low %v1201_v6, %v1202_v17  ;;  %v1881_v33 = vmul.bf16 %v10014_v44, %v13247_v4 }
 0x46d   :  { %v9527_v7 = vcombine.low %v1000_v43, %v1001_v57  ;;  %v1002_v8 = vmul.bf16 %v13334_v49, %v13243_v2  ;;  %v9532_v31 = vcombine.low %v1218_v45, %v1219_v55  ;;  %v13364_v54 = vcombine.low %v1688_v26, %v1689_v27 }
 0x46e   :  { %v13348_v12 = vpack.c.b16 %v936_v61, %v935_v59  ;;  %v13370_v37 = vcombine.low %v1880_v28, %v1881_v33  ;;  %v2032_v38 = vmul.bf16 %v13314_v14, %v13317_v25  ;;  %v2033_v42 = vmul.bf16 %v10008_v36, %v13317_v25 }
 0x46f   :  { %10588 = vmatprep.subr.bf16.mxu0 %v9527_v7  ;;  %v9528_v24 = vcombine.low %v1002_v8, %v1002_v8  ;;  %v2221_v43 = vmul.bf16 %v13251_v9, %v13317_v25  ;;  %v2222_v45 = vmul.bf16 %v13260_v16, %v13317_v25  ;;  %v912_v60 = vadd.f32 %v13279_v29, %v13230_v52 }
 0x470   :  { %10589 = vmatpush3.bf16.xpose.msra.mxu0 %v9527_v7  ;;  %10592 = vmatprep.mubr.bf16.mxu0 %v13348_v12  ;;  %v2224_v57 = vmul.bf16 %v13312_v10, %v13317_v25  ;;  %v2225_v14 = vmul.bf16 %v10014_v44, %v13317_v25  ;;  %v1220_v9 = vmul.bf16 %v13334_v49, %v13245_v3 }
 0x471   :  { %10585 = vmatmul.mubr.bf16.vlgmr.msra.gmra.mrb[12].mxu1 %v13354_v23  ;;  %10590 = vmatprep.subr.bf16.mxu0 %v9528_v24  ;;  %v13383_v58 = vcombine.low %v2221_v43, %v2222_v45  ;;  %v13390_v36 = vpack.c.bf16 %v912_v60, %v912_v60  ;;  %v13395_v16 = vpack.c.bf16 %v865_v32, %v865_v32 }
 0x472   :  { %10597 = vmatpush3.bf16.xpose.msra.mxu1 %v13296_v51  ;;  %10600 = vmatprep.mubr.bf16.mxu1 %v13258_v15  ;;  %v13381_v51 = vcombine.low %v2032_v38, %v2033_v42  ;;  %v13388_v55 = vcombine.low %v2224_v57, %v2225_v14  ;;  %v9533_v10 = vcombine.low %v1220_v9, %v1220_v9 }
 0x473   :  { %10598 = vmatprep.subr.bf16.mxu1 %v9531_v13  ;;  %v1409_v29 = vmul.bf16 %v13390_v36, %v13245_v3  ;;  %v923_v17 = vadd.f32 %v13320_v50, %v13230_v52 }
 0x475   :  { %v9535_v44 = vcombine.low %v1409_v29, %v1409_v29  ;;  %v13407_v59 = vpack.c.bf16 %v923_v17, %v923_v17 }
 0x477   :  { %v1429_v32 = vsel %vm409_vm1, %v9535_v44, 0  ;;  %v1412_v61 = vmul.bf16 %v13407_v59, %v13245_v3 }
 0x478   :  { %10591 = vmatpush3.bf16.xpose.msra.mxu0 %v9528_v24 }
 0x479   :  { %10604 = vmatprep.subr.bf16.mxu0 %v9532_v31 }
 0x47a   :  { %10599 = vmatpush3.bf16.xpose.msra.mxu1 %v9531_v13 }
 0x47b   :  { %10612 = vmatprep.subr.bf16.mxu1 %v13289_v39 }
 0x47f   :  { %10593 = vmatmul.mubr.bf16.vlgmr.msra.gmra.mrb[24].mxu0 %v13395_v16 }
 0x480   :  { %10605 = vmatpush3.bf16.xpose.msra.mxu0 %v9532_v31  ;;  %10608 = vmatprep.mubr.bf16.mxu0 %v13348_v12 }
 0x481   :  { %10601 = vmatmul.mubr.bf16.vlgmr.msra.gmra.mrb[16].mxu1 %v13354_v23  ;;  %10606 = vmatprep.subr.bf16.mxu0 %v9533_v10 }
 0x482   :  { %10613 = vmatpush3.bf16.msra.mxu1 %v13289_v39  ;;  %v9539_v39 = vcombine.low %v1412_v61, %v1412_v61 }
 0x483   :  { %11232 = vmatprep.subr.msk.bf16.mxu1 %vm409_vm1, %v9535_v44 }
 0x484   :  { %v1495_v52 = vsel %vm409_vm1, %v9539_v39, 0 }
 0x486   :  { %10615 = vmatpush3.bf16.msra.mxu1 %v1429_v32 }
 0x487   :  { %10628 = vmatprep.subr.bf16.mxu1 %v13291_v56 }
 0x488   :  { %10607 = vmatpush3.bf16.xpose.msra.mxu0 %v9533_v10 }
 0x489   :  { %10620 = vmatprep.subr.bf16.mxu0 %v13340_v63 }
 0x48f   :  { %10609 = vmatmul.mubr.bf16.vlgmr.msra.gmra.mrb[28].mxu0 %v13395_v16 }
 0x490   :  { %10621 = vmatpush3.bf16.msra.mxu0 %v13340_v63 }
 0x491   :  { %11233 = vmatprep.subr.msk.bf16.mxu0 %vm409_vm1, %v9539_v39 }
 0x494   :  { %10623 = vmatpush3.bf16.msra.mxu0 %v1495_v52 }
 0x495   :  { %10636 = vmatprep.subr.bf16.mxu0 %v13350_v34 }
 0x544   :  { %v13418_v50 = vpop.f32.mrb[12].mxu1 }
 0x545   :  { %v1051_v6 = vpop.f32.mrb[13].mxu1  ;;  %v1134_v44 = vsel %vm1127_vm3, %v13418_v50, -inf }
 0x546   :  { %v10587_v7 = vpop.f32.mrb[14].mxu1  ;;  %v1128_v42 = vsel %vm1127_vm3, %v1051_v6, -inf }
 0x547   :  { %v1054_v8 = vpop.f32.mrb[15].mxu1 }
 0x548   :  { %v1131_v43 = vsel %vm1127_vm3, %v1054_v8, -inf }
 0x552   :  { %v13420_v11 = vpop.f32.mrb[24].mxu0 }
 0x553   :  { %v13422_v31 = vpop.f32.mrb[25].mxu0  ;;  %v1143_v61 = vsel %vm1127_vm3, %v13420_v11, -inf }
 0x554   :  { %v10595_v5 = vpop.f32.mrb[26].mxu0  ;;  %v10602_v24 = vpop.f32.mrb[16].mxu1  ;;  %v1137_v17 = vsel %vm1127_vm3, %v13422_v31, -inf }
 0x555   :  { %v13424_v26 = vpop.f32.mrb[27].mxu0  ;;  %v1265_v63 = vpop.f32.mrb[17].mxu1  ;;  %v1343_v38 = vsel %vm1127_vm3, %v10602_v24, -inf }
 0x556   :  { %v10603_v27 = vpop.f32.mrb[18].mxu1  ;;  %v1337_v28 = vsel %vm1127_vm3, %v1265_v63, -inf  ;;  %v1140_v32 = vsel %vm1127_vm3, %v13424_v26, -inf }
 0x557   :  { %1338 = vmax.xlane.f32.xlu0 %v1337_v28  ;;  %v1268_v33 = vpop.f32.mrb[19].mxu1 }
 0x558   :  { %v1340_v13 = vsel %vm1127_vm3, %v1268_v33, -inf }
 0x559   :  { %1341 = vmax.xlane.f32.xlu1 %v1340_v13 }
 0x55b   :  { %1344 = vmax.xlane.f32.xlu0 %v1343_v38 }
 0x55d   :  { %1129 = vmax.xlane.f32.xlu1 %v1128_v42 }
 0x55f   :  { %1132 = vmax.xlane.f32.xlu0 %v1131_v43 }
 0x562   :  { %v10610_v45 = vpop.f32.mrb[28].mxu0 }
 0x563   :  { %v1323_v60 = vpop.f32.mrb[29].mxu0  ;;  %v1352_v10 = vsel %vm1127_vm3, %v10610_v45, -inf }
 0x564   :  { %v10611_v57 = vpop.f32.mrb[30].mxu0  ;;  %v1346_v14 = vsel %vm1127_vm3, %v1323_v60, -inf }
 0x565   :  { %1347 = vmax.xlane.f32.xlu1 %v1346_v14  ;;  %v1326_v9 = vpop.f32.mrb[31].mxu0 }
 0x566   :  { %v1349_v29 = vsel %vm1127_vm3, %v1326_v9, -inf }
 0x567   :  { %1350 = vmax.xlane.f32.xlu0 %v1349_v29 }
 0x569   :  { %1353 = vmax.xlane.f32.xlu1 %v1352_v10 }
 0x56b   :  { %1135 = vmax.xlane.f32.xlu0 %v1134_v44 }
 0x56d   :  { %1138 = vmax.xlane.f32.xlu1 %v1137_v17 }
 0x56f   :  { %1141 = vmax.xlane.f32.xlu0 %v1140_v32 }
 0x571   :  { %1144 = vmax.xlane.f32.xlu1 %v1143_v61 }
 0x5e4   :  { %v1339_v39 = vpop.xlane.xlu0 %1338 }
 0x5e5   :  { %v1355_v52 = vsub.f32 %v1265_v63, %v1339_v39 }
 0x5e6   :  { %v1342_v7 = vpop.xlane.xlu1 %1341 }
 0x5e7   :  { %v1361_v5 = vmul.f32 1.442695, %v1355_v52  ;;  %v1356_v27 = vsub.f32 %v1268_v33, %v1342_v7 }
 0x5e8   :  { %v1345_v28 = vpop.xlane.xlu0 %1344 }
 0x5e9   :  { %11684 = vpow2.f32 %v1361_v5  ;;  %v1363_v13 = vmul.f32 1.442695, %v1356_v27  ;;  %v1357_v38 = vsub.f32 %v10602_v24, %v1345_v28 }
 0x5ea   :  { %v1130_v42 = vpop.xlane.xlu1 %1129 }
 0x5eb   :  { %11686 = vpow2.f32 %v1363_v13  ;;  %v1365_v43 = vmul.f32 1.442695, %v1357_v38  ;;  %v1146_v57 = vsub.f32 %v1051_v6, %v1130_v42 }
 0x5ec   :  { %v1133_v14 = vpop.xlane.xlu0 %1132 }
 0x5ed   :  { %11688 = vpow2.f32 %v1365_v43  ;;  %v1152_v29 = vmul.f32 1.442695, %v1146_v57  ;;  %v1147_v10 = vsub.f32 %v1054_v8, %v1133_v14 }
 0x5ef   :  { %11690 = vpow2.f32 %v1152_v29  ;;  %v1154_v44 = vmul.f32 1.442695, %v1147_v10 }
 0x5f1   :  { %11692 = vpow2.f32 %v1154_v44 }
 0x5f2   :  { %v1348_v17 = vpop.xlane.xlu1 %1347 }
 0x5f3   :  { %v13442_v63 = vpop.eup %11684  ;;  %v1358_v32 = vsub.f32 %v1323_v60, %v1348_v17 }
 0x5f4   :  { %v1351_v33 = vpop.xlane.xlu0 %1350  ;;  %v1373_v61 = vsel %vm1127_vm3, %v13442_v63, 0.0 }
 0x5f5   :  { %v13446_v24 = vpop.eup %11686  ;;  %v1367_v39 = vmul.f32 1.442695, %v1358_v32  ;;  %v1359_v52 = vsub.f32 %v1326_v9, %v1351_v33  ;;  %1374 = vadd.xlane.f32.xlu0 %v1373_v61 }
 0x5f6   :  { %v1354_v6 = vpop.xlane.xlu1 %1353  ;;  %v1376_v8 = vsel %vm1127_vm3, %v13446_v24, 0.0 }
 0x5f7   :  { %v13450_v7 = vpop.eup %11688  ;;  %11694 = vpow2.f32 %v1367_v39  ;;  %v1369_v5 = vmul.f32 1.442695, %v1359_v52  ;;  %v1360_v27 = vsub.f32 %v10610_v45, %v1354_v6  ;;  %1377 = vadd.xlane.f32.xlu1 %v1376_v8 }
 0x5f8   :  { %v1136_v60 = vpop.xlane.xlu0 %1135  ;;  %v1379_v28 = vsel %vm1127_vm3, %v13450_v7, 0.0 }
 0x5f9   :  { %v13454_v13 = vpop.eup %11690  ;;  %11696 = vpow2.f32 %v1369_v5  ;;  %v1371_v38 = vmul.f32 1.442695, %v1360_v27  ;;  %v1148_v9 = vsub.f32 %v13418_v50, %v1136_v60  ;;  %1380 = vadd.xlane.f32.xlu0 %v1379_v28 }
 0x5fa   :  { %v1139_v42 = vpop.xlane.xlu1 %1138  ;;  %v1164_v43 = vsel %vm1127_vm3, %v13454_v13, 0.0 }
 0x5fb   :  { %v13459_v57 = vpop.eup %11692  ;;  %11698 = vpow2.f32 %v1371_v38  ;;  %v1156_v45 = vmul.f32 1.442695, %v1148_v9  ;;  %v1149_v14 = vsub.f32 %v13422_v31, %v1139_v42  ;;  %1165 = vadd.xlane.f32.xlu1 %v1164_v43 }
 0x5fc   :  { %v1142_v29 = vpop.xlane.xlu0 %1141  ;;  %v1167_v10 = vsel %vm1127_vm3, %v13459_v57, 0.0 }
 0x5fd   :  { %11700 = vpow2.f32 %v1156_v45  ;;  %v1158_v44 = vmul.f32 1.442695, %v1149_v14  ;;  %v1150_v50 = vsub.f32 %v13424_v26, %v1142_v29  ;;  %1168 = vadd.xlane.f32.xlu0 %v1167_v10 }
 0x5fe   :  { %v1145_v17 = vpop.xlane.xlu1 %1144 }
 0x5ff   :  { %11702 = vpow2.f32 %v1158_v44  ;;  %v1160_v32 = vmul.f32 1.442695, %v1150_v50  ;;  %v1151_v33 = vsub.f32 %v13420_v11, %v1145_v17 }
 0x601   :  { %v13466_v61 = vpop.eup %11694  ;;  %11704 = vpow2.f32 %v1160_v32  ;;  %v1162_v39 = vmul.f32 1.442695, %v1151_v33 }
 0x602   :  { %v1382_v31 = vsel %vm1127_vm3, %v13466_v61, 0.0 }
 0x603   :  { %v13470_v52 = vpop.eup %11696  ;;  %11706 = vpow2.f32 %v1162_v39  ;;  %1383 = vadd.xlane.f32.xlu1 %v1382_v31 }
 0x604   :  { %v1385_v26 = vsel %vm1127_vm3, %v13470_v52, 0.0 }
 0x605   :  { %v13474_v6 = vpop.eup %11698  ;;  %1386 = vadd.xlane.f32.xlu0 %v1385_v26 }
 0x606   :  { %v1388_v11 = vsel %vm1127_vm3, %v13474_v6, 0.0 }
 0x607   :  { %v13478_v8 = vpop.eup %11700  ;;  %1389 = vadd.xlane.f32.xlu1 %v1388_v11 }
 0x608   :  { %v1170_v5 = vsel %vm1127_vm3, %v13478_v8, 0.0 }
 0x609   :  { %v13482_v27 = vpop.eup %11702  ;;  %1171 = vadd.xlane.f32.xlu0 %v1170_v5  ;;  %v1200_v5 = vmul.bf16 %v13390_v36, %v13243_v2 }
 0x60a   :  { %v1173_v60 = vsel %vm1127_vm3, %v13482_v27, 0.0 }
 0x60b   :  { %v13486_v28 = vpop.eup %11704  ;;  %1174 = vadd.xlane.f32.xlu1 %v1173_v60 }
 0x60c   :  { %v1176_v38 = vsel %vm1127_vm3, %v13486_v28, 0.0 }
 0x60d   :  { %v13490_v9 = vpop.eup %11706  ;;  %1177 = vadd.xlane.f32.xlu0 %v1176_v38 }
 0x60e   :  { %v1179_v42 = vsel %vm1127_vm3, %v13490_v9, 0.0 }
 0x60f   :  { %1180 = vadd.xlane.f32.xlu1 %v1179_v42 }
 0x682   :  { %v1375_v43 = vpop.xlane.xlu0 %1374 }
 0x683   :  { %11708 = vrcp.f32 %v1375_v43 }
 0x684   :  { %v1378_v45 = vpop.xlane.xlu1 %1377 }
 0x685   :  { %11710 = vrcp.f32 %v1378_v45 }
 0x686   :  { %v1381_v14 = vpop.xlane.xlu0 %1380 }
 0x687   :  { %11712 = vrcp.f32 %v1381_v14 }
 0x688   :  { %v1166_v29 = vpop.xlane.xlu1 %1165 }
 0x689   :  { %11714 = vrcp.f32 %v1166_v29 }
 0x68a   :  { %v1169_v10 = vpop.xlane.xlu0 %1168 }
 0x68b   :  { %11716 = vrcp.f32 %v1169_v10 }
 0x68d   :  { %v11709_v44 = vpop.eup %11708 }
 0x68e   :  { %v1397_v32 = vmul.f32 %v11709_v44, %v13442_v63 }
 0x68f   :  { %v11711_v50 = vpop.eup %11710 }
 0x690   :  { %v1384_v17 = vpop.xlane.xlu1 %1383  ;;  %v1398_v33 = vmul.f32 %v11711_v50, %v13446_v24  ;;  %v9543_v24 = vcombine.low %v1200_v5, %v1200_v5 }
 0x691   :  { %v11713_v39 = vpop.eup %11712  ;;  %11718 = vrcp.f32 %v1384_v17 }
 0x692   :  { %v1387_v31 = vpop.xlane.xlu0 %1386  ;;  %v1403_v26 = vpack.c.bf16 %v1398_v33, %v1397_v32  ;;  %v1399_v11 = vmul.f32 %v11713_v39, %v13450_v7  ;;  %v1561_v10 = vsel %vm409_vm1, %v9543_v24, 0 }
 0x693   :  { %v11715_v60 = vpop.eup %11714  ;;  %11720 = vrcp.f32 %v1387_v31  ;;  %v1203_v31 = vmul.bf16 %v13407_v59, %v13243_v2 }
 0x694   :  { %v1390_v38 = vpop.xlane.xlu1 %1389  ;;  %10616 = vmatprep.mubr.msk.bf16.mxu1 %vm1127_vm3, %v1403_v26  ;;  %v1404_v42 = vpack.c.bf16 %v1399_v11, %v1399_v11  ;;  %v1188_v45 = vmul.f32 %v11715_v60, %v13454_v13  ;;  %v1687_v60 = vmul.bf16 %v13302_v62, %v13247_v4 }
 0x695   :  { %v11717_v43 = vpop.eup %11716  ;;  %11722 = vrcp.f32 %v1390_v38 }
 0x696   :  { %10617 = vmatmul.mubr.msk.bf16.vlgmr.msra.gmra.mrb[20].mxu1 %vm1127_vm3, %v1404_v42  ;;  %v1172_v63 = vpop.xlane.xlu0 %1171  ;;  %v1189_v14 = vmul.f32 %v11717_v43, %v13459_v57 }
 0x697   :  { %10629 = vmatpush3.bf16.msra.mxu1 %v13291_v56  ;;  %11724 = vrcp.f32 %v1172_v63 }
 0x698   :  { %11234 = vmatprep.subr.msk.bf16.mxu1 %vm409_vm1, %v9543_v24  ;;  %v1175_v7 = vpop.xlane.xlu1 %1174  ;;  %v1194_v29 = vpack.c.bf16 %v1189_v14, %v1188_v45  ;;  %v1879_v14 = vmul.bf16 %v13390_v36, %v13247_v4 }
 0x699   :  { %11726 = vrcp.f32 %v1175_v7 }
 0x69a   :  { %10632 = vmatprep.mubr.msk.bf16.mxu1 %vm1127_vm3, %v1194_v29  ;;  %v1178_v44 = vpop.xlane.xlu0 %1177 }
 0x69b   :  { %v11719_v50 = vpop.eup %11718  ;;  %10631 = vmatpush3.bf16.msra.mxu1 %v1561_v10  ;;  %11728 = vrcp.f32 %v1178_v44 }
 0x69c   :  { %10644 = vmatprep.subr.bf16.mxu1 %v13298_v53  ;;  %v1181_v13 = vpop.xlane.xlu1 %1180  ;;  %v1400_v56 = vmul.f32 %v11719_v50, %v13466_v61  ;;  %v9547_v61 = vcombine.low %v1203_v31, %v1203_v31 }
 0x69d   :  { %v11721_v57 = vpop.eup %11720  ;;  %11730 = vrcp.f32 %v1181_v13 }
 0x69e   :  { %v1401_v17 = vmul.f32 %v11721_v57, %v13470_v52  ;;  %v1627_v24 = vsel %vm409_vm1, %v9547_v61, 0 }
 0x69f   :  { %v11723_v32 = vpop.eup %11722 }
 0x6a0   :  { %v1405_v33 = vpack.c.bf16 %v1401_v17, %v1400_v56  ;;  %v1402_v39 = vmul.f32 %v11723_v32, %v13474_v6  ;;  %v9552_v6 = vcombine.low %v1687_v60, %v1687_v60 }
 0x6a1   :  { %v11725_v26 = vpop.eup %11724 }
 0x6a2   :  { %10624 = vmatprep.mubr.msk.bf16.mxu0 %vm1127_vm3, %v1405_v33  ;;  %v1406_v11 = vpack.c.bf16 %v1402_v39, %v1402_v39  ;;  %v1190_v5 = vmul.f32 %v11725_v26, %v13478_v8 }
 0x6a3   :  { %v11727_v38 = vpop.eup %11726 }
 0x6a4   :  { %10625 = vmatmul.mubr.msk.bf16.vlgmr.msra.gmra.mrb[32].mxu0 %vm1127_vm3, %v1406_v11  ;;  %v1195_v52 = vpack.c.bf16 %v1190_v5, %v1190_v5  ;;  %v1191_v43 = vmul.f32 %v11727_v38, %v13482_v27  ;;  %v1690_v27 = vmul.bf16 %v13334_v49, %v13247_v4 }
 0x6a5   :  { %v11729_v42 = vpop.eup %11728  ;;  %10637 = vmatpush3.bf16.msra.mxu0 %v13350_v34 }
 0x6a6   :  { %11235 = vmatprep.subr.msk.bf16.mxu0 %vm409_vm1, %v9547_v61  ;;  %10633 = vmatmul.mubr.msk.bf16.vlgmr.msra.gmra.mrb[20].mxu1 %vm1127_vm3, %v1195_v52  ;;  %v1192_v8 = vmul.f32 %v11729_v42, %v13486_v28 }
 0x6a7   :  { %v11731_v63 = vpop.eup %11730  ;;  %10645 = vmatpush3.bf16.xpose.msra.mxu1 %v13298_v53  ;;  %10648 = vmatprep.mubr.bf16.mxu1 %v13258_v15  ;;  %v9554_v53 = vcombine.low %v1690_v27, %v1690_v27 }
 0x6a8   :  { %10646 = vmatprep.subr.bf16.mxu1 %v9552_v6  ;;  %v1196_v45 = vpack.c.bf16 %v1192_v8, %v1191_v43  ;;  %v1193_v34 = vmul.f32 %v11731_v63, %v13490_v9  ;;  %v9556_v9 = vcombine.low %v1879_v14, %v1879_v14 }
 0x6a9   :  { %10639 = vmatpush3.bf16.msra.mxu0 %v1627_v24 }
 0x6aa   :  { %10652 = vmatprep.subr.bf16.mxu0 %v13364_v54  ;;  %10640 = vmatprep.mubr.msk.bf16.mxu0 %vm1127_vm3, %v1196_v45  ;;  %v1197_v28 = vpack.c.bf16 %v1193_v34, %v1193_v34  ;;  %v1899_v7 = vsel %vm409_vm1, %v9556_v9, 0 }
 0x6af   :  { %10647 = vmatpush3.bf16.xpose.msra.mxu1 %v9552_v6 }
 0x6b0   :  { %10660 = vmatprep.subr.bf16.mxu1 %v13305_v1  ;;  %10641 = vmatmul.mubr.msk.bf16.vlgmr.msra.gmra.mrb[32].mxu0 %vm1127_vm3, %v1197_v28 }
 0x6b1   :  { %10656 = vmatprep.mubr.bf16.mxu0 %v13348_v12 }
 0x6b2   :  { %10653 = vmatpush3.bf16.xpose.msra.mxu0 %v13364_v54  ;;  %v1882_v54 = vmul.bf16 %v13407_v59, %v13247_v4 }
 0x6b3   :  { %10654 = vmatprep.subr.bf16.mxu0 %v9554_v53 }
 0x6b4   :  { %v9560_v29 = vcombine.low %v1882_v54, %v1882_v54 }
 0x6b6   :  { %10649 = vmatmul.mubr.bf16.vlgmr.msra.gmra.mrb[24].mxu1 %v13354_v23 }
 0x6b7   :  { %10661 = vmatpush3.bf16.msra.mxu1 %v13305_v1  ;;  %v1965_v1 = vsel %vm409_vm1, %v9560_v29, 0 }
 0x6b8   :  { %11236 = vmatprep.subr.msk.bf16.mxu1 %vm409_vm1, %v9556_v9 }
 0x6ba   :  { %10655 = vmatpush3.bf16.xpose.msra.mxu0 %v9554_v53 }
 0x6bb   :  { %10663 = vmatpush3.bf16.msra.mxu1 %v1899_v7  ;;  %10668 = vmatprep.subr.bf16.mxu0 %v13370_v37 }
 0x6bc   :  { %10676 = vmatprep.subr.bf16.mxu1 %v13366_v35 }
 0x6c1   :  { %10657 = vmatmul.mubr.bf16.vlgmr.msra.gmra.mrb[36].mxu0 %v13395_v16 }
 0x6c2   :  { %10669 = vmatpush3.bf16.msra.mxu0 %v13370_v37 }
 0x6c3   :  { %11237 = vmatprep.subr.msk.bf16.mxu0 %vm409_vm1, %v9560_v29 }
 0x6c6   :  { %10671 = vmatpush3.bf16.msra.mxu0 %v1965_v1 }
 0x6c7   :  { %10684 = vmatprep.subr.bf16.mxu0 %v13381_v51 }
 0x789   :  { %v10650_v10 = vpop.f32.mrb[24].mxu1 }
 0x78a   :  { %v1735_v44 = vpop.f32.mrb[25].mxu1  ;;  %v1813_v17 = vsel %vm1127_vm3, %v10650_v10, -inf }
 0x78b   :  { %v10651_v50 = vpop.f32.mrb[26].mxu1  ;;  %v1807_v13 = vsel %vm1127_vm3, %v1735_v44, -inf }
 0x78c   :  { %1808 = vmax.xlane.f32.xlu0 %v1807_v13  ;;  %v1738_v57 = vpop.f32.mrb[27].mxu1 }
 0x78d   :  { %v1810_v56 = vsel %vm1127_vm3, %v1738_v57, -inf }
 0x78e   :  { %1811 = vmax.xlane.f32.xlu1 %v1810_v56 }
 0x790   :  { %1814 = vmax.xlane.f32.xlu0 %v1813_v17 }
 0x794   :  { %v10658_v37 = vpop.f32.mrb[36].mxu0 }
 0x795   :  { %v1793_v32 = vpop.f32.mrb[37].mxu0  ;;  %v1822_v11 = vsel %vm1127_vm3, %v10658_v37, -inf }
 0x796   :  { %v10659_v33 = vpop.f32.mrb[38].mxu0  ;;  %v1816_v39 = vsel %vm1127_vm3, %v1793_v32, -inf }
 0x797   :  { %1817 = vmax.xlane.f32.xlu1 %v1816_v39  ;;  %v1796_v31 = vpop.f32.mrb[39].mxu0 }
 0x798   :  { %v1819_v26 = vsel %vm1127_vm3, %v1796_v31, -inf }
 0x799   :  { %1820 = vmax.xlane.f32.xlu0 %v1819_v26 }
 0x79b   :  { %1823 = vmax.xlane.f32.xlu1 %v1822_v11 }
 0x819   :  { %v1809_v5 = vpop.xlane.xlu0 %1808 }
 0x81a   :  { %v1825_v60 = vsub.f32 %v1735_v44, %v1809_v5 }
 0x81b   :  { %v1812_v38 = vpop.xlane.xlu1 %1811 }
 0x81c   :  { %v1831_v61 = vmul.f32 1.442695, %v1825_v60  ;;  %v1826_v52 = vsub.f32 %v1738_v57, %v1812_v38 }
 0x81d   :  { %v1815_v42 = vpop.xlane.xlu0 %1814 }
 0x81e   :  { %11732 = vpow2.f32 %v1831_v61  ;;  %v1833_v6 = vmul.f32 1.442695, %v1826_v52  ;;  %v1827_v43 = vsub.f32 %v10650_v10, %v1815_v42 }
 0x820   :  { %11734 = vpow2.f32 %v1833_v6  ;;  %v1835_v8 = vmul.f32 1.442695, %v1827_v43  ;;  %v2031_v43 = vmul.bf16 %v13302_v62, %v13317_v25  ;;  %v2034_v62 = vmul.bf16 %v13334_v49, %v13317_v25 }
 0x822   :  { %11736 = vpow2.f32 %v1835_v8 }
 0x824   :  { %v1818_v63 = vpop.xlane.xlu1 %1817 }
 0x825   :  { %v1828_v24 = vsub.f32 %v1793_v32, %v1818_v63  ;;  %v9565_v63 = vcombine.low %v2031_v43, %v2031_v43 }
 0x826   :  { %v1821_v45 = vpop.xlane.xlu0 %1820 }
 0x827   :  { %v1837_v34 = vmul.f32 1.442695, %v1828_v24  ;;  %v1829_v27 = vsub.f32 %v1796_v31, %v1821_v45 }
 0x828   :  { %v11733_v28 = vpop.eup %11732  ;;  %v1824_v53 = vpop.xlane.xlu1 %1823 }
 0x829   :  { %11738 = vpow2.f32 %v1837_v34  ;;  %v1839_v14 = vmul.f32 1.442695, %v1829_v27  ;;  %v1830_v9 = vsub.f32 %v10658_v37, %v1824_v53  ;;  %v1843_v7 = vsel %vm1127_vm3, %v11733_v28, 0.0 }
 0x82a   :  { %v11735_v54 = vpop.eup %11734  ;;  %1844 = vadd.xlane.f32.xlu0 %v1843_v7 }
 0x82b   :  { %11740 = vpow2.f32 %v1839_v14  ;;  %v1841_v29 = vmul.f32 1.442695, %v1830_v9  ;;  %v1846_v1 = vsel %vm1127_vm3, %v11735_v54, 0.0 }
 0x82c   :  { %v11737_v10 = vpop.eup %11736  ;;  %1847 = vadd.xlane.f32.xlu1 %v1846_v1 }
 0x82d   :  { %11742 = vpow2.f32 %v1841_v29  ;;  %v1849_v44 = vsel %vm1127_vm3, %v11737_v10, 0.0 }
 0x82e   :  { %1850 = vadd.xlane.f32.xlu0 %v1849_v44 }
 0x833   :  { %v11739_v50 = vpop.eup %11738 }
 0x834   :  { %v1852_v13 = vsel %vm1127_vm3, %v11739_v50, 0.0 }
 0x835   :  { %v11741_v57 = vpop.eup %11740  ;;  %1853 = vadd.xlane.f32.xlu1 %v1852_v13 }
 0x836   :  { %v1855_v56 = vsel %vm1127_vm3, %v11741_v57, 0.0 }
 0x837   :  { %v11743_v17 = vpop.eup %11742  ;;  %1856 = vadd.xlane.f32.xlu0 %v1855_v56 }
 0x838   :  { %v1858_v37 = vsel %vm1127_vm3, %v11743_v17, 0.0 }
 0x839   :  { %1859 = vadd.xlane.f32.xlu1 %v1858_v37 }
 0x8b7   :  { %v1845_v32 = vpop.xlane.xlu0 %1844 }
 0x8b8   :  { %11744 = vrcp.f32 %v1845_v32 }
 0x8b9   :  { %v1848_v33 = vpop.xlane.xlu1 %1847 }
 0x8ba   :  { %11746 = vrcp.f32 %v1848_v33 }
 0x8bb   :  { %v1851_v39 = vpop.xlane.xlu0 %1850 }
 0x8bc   :  { %11748 = vrcp.f32 %v1851_v39 }
 0x8c2   :  { %v11745_v31 = vpop.eup %11744  ;;  %v1854_v26 = vpop.xlane.xlu1 %1853 }
 0x8c3   :  { %11750 = vrcp.f32 %v1854_v26  ;;  %v1867_v60 = vmul.f32 %v11745_v31, %v11733_v28 }
 0x8c4   :  { %v11747_v11 = vpop.eup %11746  ;;  %v1857_v5 = vpop.xlane.xlu0 %1856 }
 0x8c5   :  { %11752 = vrcp.f32 %v1857_v5  ;;  %v1868_v38 = vmul.f32 %v11747_v11, %v11735_v54 }
 0x8c6   :  { %v11749_v61 = vpop.eup %11748  ;;  %v1860_v52 = vpop.xlane.xlu1 %1859 }
 0x8c7   :  { %11754 = vrcp.f32 %v1860_v52  ;;  %v1873_v42 = vpack.c.bf16 %v1868_v38, %v1867_v60  ;;  %v1869_v6 = vmul.f32 %v11749_v61, %v11737_v10 }
 0x8c9   :  { %10664 = vmatprep.mubr.msk.bf16.mxu1 %vm1127_vm3, %v1873_v42  ;;  %v1874_v8 = vpack.c.bf16 %v1869_v6, %v1869_v6 }
 0x8cb   :  { %10665 = vmatmul.mubr.msk.bf16.vlgmr.msra.gmra.mrb[20].mxu1 %vm1127_vm3, %v1874_v8 }
 0x8cc   :  { %10677 = vmatpush3.bf16.xpose.msra.mxu1 %v13366_v35  ;;  %10680 = vmatprep.mubr.bf16.mxu1 %v13258_v15  ;;  %v9567_v15 = vcombine.low %v2034_v62, %v2034_v62  ;;  %v2223_v35 = vmul.bf16 %v13390_v36, %v13317_v25 }
 0x8cd   :  { %v11751_v24 = vpop.eup %11750  ;;  %10678 = vmatprep.subr.bf16.mxu1 %v9565_v63 }
 0x8ce   :  { %v1870_v34 = vmul.f32 %v11751_v24, %v11739_v50  ;;  %v9569_v49 = vcombine.low %v2223_v35, %v2223_v35 }
 0x8cf   :  { %v11753_v45 = vpop.eup %11752 }
 0x8d0   :  { %v1871_v27 = vmul.f32 %v11753_v45, %v11741_v57  ;;  %v2243_v7 = vsel %vm409_vm1, %v9569_v49, 0 }
 0x8d1   :  { %v11755_v28 = vpop.eup %11754 }
 0x8d2   :  { %v1875_v53 = vpack.c.bf16 %v1871_v27, %v1870_v34  ;;  %v1872_v14 = vmul.f32 %v11755_v28, %v11743_v17 }
 0x8d4   :  { %10679 = vmatpush3.bf16.xpose.msra.mxu1 %v9565_v63  ;;  %10672 = vmatprep.mubr.msk.bf16.mxu0 %vm1127_vm3, %v1875_v53  ;;  %v1876_v9 = vpack.c.bf16 %v1872_v14, %v1872_v14 }
 0x8d5   :  { %10692 = vmatprep.subr.bf16.mxu1 %v13383_v58 }
 0x8d6   :  { %10673 = vmatmul.mubr.msk.bf16.vlgmr.msra.gmra.mrb[32].mxu0 %vm1127_vm3, %v1876_v9 }
 0x8d7   :  { %10685 = vmatpush3.bf16.xpose.msra.mxu0 %v13381_v51  ;;  %10688 = vmatprep.mubr.bf16.mxu0 %v13348_v12  ;;  %v2226_v12 = vmul.bf16 %v13407_v59, %v13317_v25 }
 0x8d8   :  { %10686 = vmatprep.subr.bf16.mxu0 %v9567_v15 }
 0x8d9   :  { %v9573_v51 = vcombine.low %v2226_v12, %v2226_v12 }
 0x8db   :  { %10681 = vmatmul.mubr.bf16.vlgmr.msra.gmra.mrb[28].mxu1 %v13354_v23  ;;  %v2309_v23 = vsel %vm409_vm1, %v9573_v51, 0 }
 0x8dc   :  { %10693 = vmatpush3.bf16.msra.mxu1 %v13383_v58 }
 0x8dd   :  { %11238 = vmatprep.subr.msk.bf16.mxu1 %vm409_vm1, %v9569_v49 }
 0x8df   :  { %10687 = vmatpush3.bf16.xpose.msra.mxu0 %v9567_v15 }
 0x8e0   :  { %10695 = vmatpush3.bf16.msra.mxu1 %v2243_v7  ;;  %10700 = vmatprep.subr.bf16.mxu0 %v13388_v55 }
 0x8e1   :  { %10708 = vmatprep.subr.bf16.mxu1 %v12661_v0 }
 0x8e6   :  { %10689 = vmatmul.mubr.bf16.vlgmr.msra.gmra.mrb[40].mxu0 %v13395_v16 }
 0x8e7   :  { %10701 = vmatpush3.bf16.msra.mxu0 %v13388_v55 }
 0x8e8   :  { %11239 = vmatprep.subr.msk.bf16.mxu0 %vm409_vm1, %v9573_v51 }
 0x8eb   :  { %10703 = vmatpush3.bf16.msra.mxu0 %v2309_v23 }
 0x9ae   :  { %v10682_v58 = vpop.f32.mrb[28].mxu1 }
 0x9af   :  { %v2079_v36 = vpop.f32.mrb[29].mxu1  ;;  %v2157_v16 = vsel %vm1127_vm3, %v10682_v58, -inf }
 0x9b0   :  { %v10683_v54 = vpop.f32.mrb[30].mxu1  ;;  %v2151_v29 = vsel %vm1127_vm3, %v2079_v36, -inf }
 0x9b1   :  { %2152 = vmax.xlane.f32.xlu0 %v2151_v29  ;;  %v2082_v1 = vpop.f32.mrb[31].mxu1 }
 0x9b2   :  { %v2154_v10 = vsel %vm1127_vm3, %v2082_v1, -inf }
 0x9b3   :  { %2155 = vmax.xlane.f32.xlu1 %v2154_v10 }
 0x9b5   :  { %2158 = vmax.xlane.f32.xlu0 %v2157_v16 }
 0x9b9   :  { %v10690_v59 = vpop.f32.mrb[40].mxu0 }
 0x9ba   :  { %v2137_v55 = vpop.f32.mrb[41].mxu0  ;;  %v2166_v56 = vsel %vm1127_vm3, %v10690_v59, -inf }
 0x9bb   :  { %v10691_v44 = vpop.f32.mrb[42].mxu0  ;;  %v2160_v50 = vsel %vm1127_vm3, %v2137_v55, -inf }
 0x9bc   :  { %2161 = vmax.xlane.f32.xlu1 %v2160_v50  ;;  %v2140_v13 = vpop.f32.mrb[43].mxu0  ;;  %v11328_v44 = vld [vmem:[#allocation19] sm:$0xff]  }
 0x9bd   :  { %v2163_v57 = vsel %vm1127_vm3, %v2140_v13, -inf }
 0x9be   :  { %2164 = vmax.xlane.f32.xlu0 %v2163_v57 }
 0x9c0   :  { %2167 = vmax.xlane.f32.xlu1 %v2166_v56 }
 0xa3e   :  { %v2153_v17 = vpop.xlane.xlu0 %2152 }
 0xa3f   :  { %v2169_v37 = vsub.f32 %v2079_v36, %v2153_v17 }
 0xa40   :  { %v2156_v32 = vpop.xlane.xlu1 %2155 }
 0xa41   :  { %v2175_v33 = vmul.f32 1.442695, %v2169_v37  ;;  %v2170_v39 = vsub.f32 %v2082_v1, %v2156_v32  ;;  %v11330_v32 = vld [vmem:[#allocation19 + $0x10] sm:$0xff]  }
 0xa42   :  { %v2159_v31 = vpop.xlane.xlu0 %2158 }
 0xa43   :  { %11756 = vpow2.f32 %v2175_v33  ;;  %v2177_v26 = vmul.f32 1.442695, %v2170_v39  ;;  %v2171_v11 = vsub.f32 %v10682_v58, %v2159_v31 }
 0xa45   :  { %11758 = vpow2.f32 %v2177_v26  ;;  %v2179_v5 = vmul.f32 1.442695, %v2171_v11  ;;  %v11331_v11 = vld [vmem:[#allocation19 + $0x18] sm:$0xff]  }
 0xa47   :  { %11760 = vpow2.f32 %v2179_v5  ;;  %v11332_v5 = vld [vmem:[#allocation19 + $0x20] sm:$0xff]  }
 0xa49   :  { %v2162_v60 = vpop.xlane.xlu1 %2161 }
 0xa4a   :  { %v2172_v38 = vsub.f32 %v2137_v55, %v2162_v60  ;;  %v11333_v60 = vld [vmem:[#allocation19 + $0x28] sm:$0xff]  }
 0xa4b   :  { %v2165_v61 = vpop.xlane.xlu0 %2164 }
 0xa4c   :  { %v2181_v52 = vmul.f32 1.442695, %v2172_v38  ;;  %v2173_v42 = vsub.f32 %v2140_v13, %v2165_v61  ;;  %v11329_v13 = vld [vmem:[#allocation19 + $0x8] sm:$0xff]   ;;  %v11334_v38 = vld [vmem:[#allocation19 + $0x30] sm:$0xff]   ;;  %v11335_v61 = vld [vmem:[#allocation19 + $0x38] sm:$0xff]  }
 0xa4d   :  { %v11757_v6 = vpop.eup %11756  ;;  %v2168_v43 = vpop.xlane.xlu1 %2167 }
 0xa4e   :  { %11762 = vpow2.f32 %v2181_v52  ;;  %v2183_v8 = vmul.f32 1.442695, %v2173_v42  ;;  %v2174_v63 = vsub.f32 %v10690_v59, %v2168_v43  ;;  %v2187_v24 = vsel %vm1127_vm3, %v11757_v6, 0.0 }
 0xa4f   :  { %v11759_v45 = vpop.eup %11758  ;;  %2188 = vadd.xlane.f32.xlu0 %v2187_v24 }
 0xa50   :  { %11764 = vpow2.f32 %v2183_v8  ;;  %v2185_v34 = vmul.f32 1.442695, %v2174_v63  ;;  %v2190_v27 = vsel %vm1127_vm3, %v11759_v45, 0.0 }
 0xa51   :  { %v11761_v28 = vpop.eup %11760  ;;  %2191 = vadd.xlane.f32.xlu1 %v2190_v27 }
 0xa52   :  { %11766 = vpow2.f32 %v2185_v34  ;;  %v2193_v53 = vsel %vm1127_vm3, %v11761_v28, 0.0 }
 0xa53   :  { %2194 = vadd.xlane.f32.xlu0 %v2193_v53  ;;  %v11336_v53 = vld [vmem:[#allocation25] ss:$16 sps:$4 sm:$0xff]  }
 0xa58   :  { %v11763_v14 = vpop.eup %11762 }
 0xa59   :  { %v2196_v62 = vsel %vm1127_vm3, %v11763_v14, 0.0 }
 0xa5a   :  { %v11765_v9 = vpop.eup %11764  ;;  %2197 = vadd.xlane.f32.xlu1 %v2196_v62  ;;  %v11339_v62 = vld [vmem:[#allocation25 + $0x8] ss:$16 sps:$4 sm:$0xff]  }
 0xa5b   :  { %v2199_v15 = vsel %vm1127_vm3, %v11765_v9, 0.0 }
 0xa5c   :  { %v11767_v35 = vpop.eup %11766  ;;  %2200 = vadd.xlane.f32.xlu0 %v2199_v15  ;;  %v9576_v15 = vld [vmem:[#allocation20] ss:$0 sm:$0xff] }
 0xa5d   :  { %v2202_v49 = vsel %vm1127_vm3, %v11767_v35, 0.0 }
 0xa5e   :  { %2203 = vadd.xlane.f32.xlu1 %v2202_v49 }
 0xadc   :  { %v2189_v7 = vpop.xlane.xlu0 %2188 }
 0xadd   :  { %11768 = vrcp.f32 %v2189_v7 }
 0xade   :  { %v2192_v12 = vpop.xlane.xlu1 %2191 }
 0xadf   :  { %11770 = vrcp.f32 %v2192_v12 }
 0xae0   :  { %v2195_v51 = vpop.xlane.xlu0 %2194 }
 0xae1   :  { %11772 = vrcp.f32 %v2195_v51 }
 0xae7   :  { %v11769_v23 = vpop.eup %11768  ;;  %v2198_v58 = vpop.xlane.xlu1 %2197 }
 0xae8   :  { %11774 = vrcp.f32 %v2198_v58  ;;  %v2211_v29 = vmul.f32 %v11769_v23, %v11757_v6 }
 0xae9   :  { %v11771_v36 = vpop.eup %11770  ;;  %v2201_v54 = vpop.xlane.xlu0 %2200 }
 0xaea   :  { %11776 = vrcp.f32 %v2201_v54  ;;  %v2212_v1 = vmul.f32 %v11771_v36, %v11759_v45 }
 0xaeb   :  { %v11773_v10 = vpop.eup %11772  ;;  %v2204_v16 = vpop.xlane.xlu1 %2203 }
 0xaec   :  { %11778 = vrcp.f32 %v2204_v16  ;;  %v2217_v59 = vpack.c.bf16 %v2212_v1, %v2211_v29  ;;  %v2213_v55 = vmul.f32 %v11773_v10, %v11761_v28 }
 0xaee   :  { %10696 = vmatprep.mubr.msk.bf16.mxu1 %vm1127_vm3, %v2217_v59  ;;  %v2218_v50 = vpack.c.bf16 %v2213_v55, %v2213_v55 }
 0xaf0   :  { %10697 = vmatmul.mubr.msk.bf16.vlgmr.msra.gmra.mrb[20].mxu1 %vm1127_vm3, %v2218_v50 }
 0xaf1   :  { %10709 = vmatpush3.bf16.msra.mxu1 %v11328_v44  ;;  %10724 = vmatprep.mubr.msk.bf16.mxu1 %vm12662_vm0, %v12661_v0 }
 0xaf2   :  { %v11775_v57 = vpop.eup %11774  ;;  %10710 = vmatprep.subr.bf16.mxu1 %v12661_v0 }
 0xaf3   :  { %v2214_v17 = vmul.f32 %v11775_v57, %v11763_v14  ;;  %v11338_v14 = vld [vmem:[#allocation25 + $0x4] ss:$16 sps:$4 sm:$0xff]  }
 0xaf4   :  { %v11777_v56 = vpop.eup %11776  ;;  %2823 = vmatprep.subr.bf16.mxu0 %v11338_v14  ;;  %v11372_v14 = vld [vmem:[#allocation25 + $0xc0] ss:$16 sps:$4 sm:$0xff]  }
 0xaf5   :  { %v2215_v37 = vmul.f32 %v11777_v56, %v11765_v9  ;;  %10711 = vmatpush3.bf16.msra.mxu1 %v11329_v13  ;;  %v11341_v9 = vld [vmem:[#allocation25 + $0xc] ss:$16 sps:$4 sm:$0xff]  }
 0xaf6   :  { %v11779_v33 = vpop.eup %11778  ;;  %10712 = vmatprep.subr.bf16.mxu1 %v12661_v0 }
 0xaf7   :  { %v2219_v39 = vpack.c.bf16 %v2215_v37, %v2214_v17  ;;  %v2216_v31 = vmul.f32 %v11779_v33, %v11767_v35 }
 0xaf9   :  { %10704 = vmatprep.mubr.msk.bf16.mxu0 %vm1127_vm3, %v2219_v39  ;;  %v2220_v26 = vpack.c.bf16 %v2216_v31, %v2216_v31  ;;  %10713 = vmatpush3.bf16.msra.mxu1 %v11330_v32  ;;  %v11342_v39 = vld [vmem:[#allocation25 + $0x20] ss:$16 sps:$4 sm:$0xff]   ;;  %v11344_v31 = vld [vmem:[#allocation25 + $0x24] ss:$16 sps:$4 sm:$0xff]  }
 0xafa   :  { %10714 = vmatprep.subr.bf16.mxu1 %v12661_v0 }
 0xafb   :  { %10705 = vmatmul.mubr.msk.bf16.vlgmr.msra.gmra.mrb[32].mxu0 %vm1127_vm3, %v2220_v26  ;;  %v11345_v26 = vld [vmem:[#allocation25 + $0x28] ss:$16 sps:$4 sm:$0xff]  }
 0xafc   :  { %2855 = vmatprep.mubr.bf16.mxu0 %v12664_v21  ;;  %2824 = vmatpush1.bf16.msra.mxu0 %v11336_v53  ;;  %v11369_v53 = vld [vmem:[#allocation25 + $0xa8] ss:$16 sps:$4 sm:$0xff]  }
 0xafd   :  { %10715 = vmatpush3.bf16.msra.mxu1 %v11331_v11  ;;  %2825 = vmatprep.subr.bf16.mxu0 %v11344_v31 }
 0xafe   :  { %10716 = vmatprep.subr.bf16.mxu1 %v12661_v0 }
 0xb00   :  { %2826 = vmatpush1.bf16.msra.mxu0 %v11342_v39 }
 0xb01   :  { %10717 = vmatpush3.bf16.msra.mxu1 %v11332_v5  ;;  %v11347_v5 = vld [vmem:[#allocation25 + $0x2c] ss:$16 sps:$4 sm:$0xff]  }
 0xb02   :  { %10718 = vmatprep.subr.bf16.mxu1 %v12661_v0 }
 0xb05   :  { %10719 = vmatpush3.bf16.msra.mxu1 %v11333_v60  ;;  %v11350_v60 = vld [vmem:[#allocation25 + $0x44] ss:$16 sps:$4 sm:$0xff]  }
 0xb06   :  { %10720 = vmatprep.subr.bf16.mxu1 %v12661_v0  ;;  %2827 = vmatprep.subr.bf16.mxu0 %v11350_v60 }
 0xb09   :  { %10721 = vmatpush3.bf16.msra.mxu1 %v11334_v38  ;;  %v11351_v38 = vld [vmem:[#allocation25 + $0x48] ss:$16 sps:$4 sm:$0xff]  }
 0xb0a   :  { %10722 = vmatprep.subr.bf16.mxu1 %v12661_v0 }
 0xb0d   :  { %10723 = vmatpush3.bf16.msra.mxu1 %v11335_v61  ;;  %v11353_v61 = vld [vmem:[#allocation25 + $0x4c] ss:$16 sps:$4 sm:$0xff]  }
 0xb0e   :  { %2886 = vmatprep.subr.bf16.mxu1 %v11341_v9  ;;  %v11375_v9 = vld [vmem:[#allocation25 + $0xc8] ss:$16 sps:$4 sm:$0xff]  }
 0xbc3   :  { %v10698_v52 = vpop.f32.mrb[20].mxu1 }
 0xbc4   :  { %v2279_v42 = vpop.f32.mrb[21].mxu1 }
 0xbc5   :  { %v10699_v6 = vpop.f32.mrb[22].mxu1 }
 0xbc6   :  { %v2282_v43 = vpop.f32.mrb[23].mxu1  ;;  %v11354_v6 = vld [vmem:[#allocation25 + $0x60] ss:$16 sps:$4 sm:$0xff]  }
 0xbc7   :  { %v2365_v8 = vpack.c.bf16 %v2282_v43, %v2279_v42  ;;  %v11359_v42 = vld [vmem:[#allocation25 + $0x6c] ss:$16 sps:$4 sm:$0xff]   ;;  %v11357_v43 = vld [vmem:[#allocation25 + $0x68] ss:$16 sps:$4 sm:$0xff]  }
 0xbc9   :  { %10725 = vmatmul.mubr.bf16.vlgmr.msra.gmra.mrb[32].mxu1 %v2365_v8  ;;  %v11360_v8 = vld [vmem:[#allocation25 + $0x80] ss:$16 sps:$4 sm:$0xff]  }
 0xbca   :  { %10728 = vmatprep.mubr.msk.bf16.mxu1 %vm12662_vm0, %v12661_v0  ;;  %2887 = vmatpush1.bf16.msra.mxu1 %v11339_v62  ;;  %v11374_v62 = vld [vmem:[#allocation25 + $0xc4] ss:$16 sps:$4 sm:$0xff]  }
 0xbcb   :  { %2888 = vmatprep.subr.bf16.mxu1 %v11347_v5 }
 0xbce   :  { %v10706_v63 = vpop.f32.mrb[32].mxu0  ;;  %2889 = vmatpush1.bf16.msra.mxu1 %v11345_v26 }
 0xbcf   :  { %v2345_v24 = vpop.f32.mrb[33].mxu0  ;;  %2890 = vmatprep.subr.bf16.mxu1 %v11353_v61 }
 0xbd0   :  { %v2366_v45 = vpack.c.bf16 %v2345_v24, %v10698_v52  ;;  %v10707_v34 = vpop.f32.mrb[34].mxu0  ;;  %v11356_v52 = vld [vmem:[#allocation25 + $0x64] ss:$16 sps:$4 sm:$0xff]   ;;  %v11363_v24 = vld [vmem:[#allocation25 + $0x88] ss:$16 sps:$4 sm:$0xff]  }
 0xbd1   :  { %v2348_v27 = vpop.f32.mrb[35].mxu0  ;;  %v11368_v34 = vld [vmem:[#allocation25 + $0xa4] ss:$16 sps:$4 sm:$0xff]  }
 0xbd2   :  { %v2367_v28 = vpack.c.bf16 %v10706_v63, %v2348_v27  ;;  %10729 = vmatmul.mubr.bf16.gmra.mrb[36].mxu1 %v2366_v45  ;;  %v11362_v63 = vld [vmem:[#allocation25 + $0x84] ss:$16 sps:$4 sm:$0xff]   ;;  %v11365_v45 = vld [vmem:[#allocation25 + $0x8c] ss:$16 sps:$4 sm:$0xff]  }
 0xbd3   :  { %10732 = vmatprep.mubr.msk.bf16.mxu1 %vm12662_vm0, %v12661_v0  ;;  %2891 = vmatpush1.bf16.msra.mxu1 %v11351_v38  ;;  %v11371_v27 = vld [vmem:[#allocation25 + $0xac] ss:$16 sps:$4 sm:$0xff]  }
 0xbd4   :  { %2892 = vmatprep.subr.bf16.mxu1 %v11359_v42 }
 0xbd7   :  { %2893 = vmatpush1.bf16.msra.mxu1 %v11357_v43 }
 0xbd8   :  { %2894 = vmatprep.subr.bf16.mxu1 %v11365_v45 }
 0xbda   :  { %10733 = vmatmul.mubr.bf16.gmra.mrb[40].mxu1 %v2367_v28  ;;  %v11366_v28 = vld [vmem:[#allocation25 + $0xa0] ss:$16 sps:$4 sm:$0xff]  }
 0xbdb   :  { %2918 = vmatprep.mubr.bf16.mxu1 %v12664_v21  ;;  %2895 = vmatpush1.bf16.msra.mxu1 %v11363_v24 }
 0xbdc   :  { %2896 = vmatprep.subr.bf16.mxu1 %v11371_v27 }
 0xbdf   :  { %2897 = vmatpush1.bf16.msra.mxu1 %v11369_v53 }
 0xc9c   :  { %v2473_v35 = vpop.f32.mrb[32].mxu1 }
 0xc9d   :  { %v2474_v49 = vadd.f32 %v9576_v15, %v2473_v35  ;;  %v10726_v7 = vpop.f32.mrb[33].mxu1  ;;  %v11380_v35 = vld [vmem:[#allocation25 + $0xe4] ss:$16 sps:$4 sm:$0xff]  }
 0xc9e   :  { %v2476_v12 = vpop.f32.mrb[34].mxu1  ;;  %v11378_v7 = vld [vmem:[#allocation25 + $0xe0] ss:$16 sps:$4 sm:$0xff]  }
 0xc9f   :  { %v13621_v51 = vadd.f32 %v2474_v49, %v13194_v19  ;;  %v2477_v23 = vadd.f32 %v9576_v15, %v2476_v12  ;;  %v10727_v58 = vpop.f32.mrb[35].mxu1  ;;  %v11383_v49 = vld [vmem:[#allocation25 + $0xec] ss:$16 sps:$4 sm:$0xff]   ;;  %v11381_v12 = vld [vmem:[#allocation25 + $0xe8] ss:$16 sps:$4 sm:$0xff]  }
 0xca0   :  { %v11385_v58 = vld [vmem:[#allocation28 + $0xc0] sm:$0xff]  }
 0xca1   :  { %v13624_v36 = vadd.f32 %v2477_v23, %v13196_v20  ;;  %2504 = vadd.xlane.f32.xlu0 %v13621_v51  ;;  %v2522_v54 = vmul.f32 %v13621_v51, %v13621_v51  ;;  %v11384_v23 = vld [vmem:[#allocation28 + $0x40] sm:$0xff]  }
 0xca3   :  { %2506 = vadd.xlane.f32.xlu1 %v13624_v36  ;;  %v2523_v1 = vmul.f32 %v13624_v36, %v13624_v36 }
 0xca5   :  { %2528 = vadd.xlane.f32.xlu0 %v2522_v54  ;;  %v2481_v29 = vpop.f32.mrb[36].mxu1 }
 0xca6   :  { %v2482_v10 = vadd.f32 %v9576_v15, %v2481_v29  ;;  %v10730_v19 = vpop.f32.mrb[37].mxu1 }
 0xca7   :  { %2530 = vadd.xlane.f32.xlu1 %v2523_v1  ;;  %v2484_v16 = vpop.f32.mrb[38].mxu1 }
 0xca8   :  { %v13633_v59 = vadd.f32 %v2482_v10, %v13205_v30  ;;  %v2485_v20 = vadd.f32 %v9576_v15, %v2484_v16  ;;  %v10731_v55 = vpop.f32.mrb[39].mxu1 }
 0xcaa   :  { %v13636_v44 = vadd.f32 %v2485_v20, %v13207_v47  ;;  %2508 = vadd.xlane.f32.xlu0 %v13633_v59  ;;  %v2524_v50 = vmul.f32 %v13633_v59, %v13633_v59 }
 0xcac   :  { %2510 = vadd.xlane.f32.xlu1 %v13636_v44  ;;  %v2525_v30 = vmul.f32 %v13636_v44, %v13636_v44 }
 0xcad   :  { %v2489_v13 = vpop.f32.mrb[40].mxu1 }
 0xcae   :  { %v2490_v57 = vadd.f32 %v9576_v15, %v2489_v13  ;;  %2532 = vadd.xlane.f32.xlu0 %v2524_v50  ;;  %v10734_v56 = vpop.f32.mrb[41].mxu1 }
 0xcaf   :  { %v2492_v17 = vpop.f32.mrb[42].mxu1 }
 0xcb0   :  { %v13645_v37 = vadd.f32 %v2490_v57, %v13215_v40  ;;  %v2493_v47 = vadd.f32 %v9576_v15, %v2492_v17  ;;  %2534 = vadd.xlane.f32.xlu1 %v2525_v30  ;;  %v10735_v32 = vpop.f32.mrb[43].mxu1  ;;  %v11377_v15 = vld [vmem:[#allocation25 + $0xcc] ss:$16 sps:$4 sm:$0xff]  }
 0xcb1   :  { %2898 = vmatprep.subr.bf16.mxu1 %v11377_v15 }
 0xcb2   :  { %v13648_v33 = vadd.f32 %v2493_v47, %v13217_v41  ;;  %2512 = vadd.xlane.f32.xlu0 %v13645_v37  ;;  %v2526_v11 = vmul.f32 %v13645_v37, %v13645_v37  ;;  %v11348_v41 = vld [vmem:[#allocation25 + $0x40] ss:$16 sps:$4 sm:$0xff]   ;;  %2899 = vmatpush1.bf16.msra.mxu1 %v11375_v9 }
 0xcb3   :  { %2828 = vmatpush1.bf16.msra.mxu0 %v11348_v41  ;;  %2900 = vmatprep.subr.bf16.mxu1 %v11383_v49 }
 0xcb4   :  { %2514 = vadd.xlane.f32.xlu1 %v13648_v33  ;;  %v2527_v40 = vmul.f32 %v13648_v33, %v13648_v33  ;;  %2829 = vmatprep.subr.bf16.mxu0 %v11356_v52 }
 0xcb6   :  { %2536 = vadd.xlane.f32.xlu0 %v2526_v11  ;;  %2901 = vmatpush1.bf16.msra.mxu1 %v11381_v12  ;;  %v13669_v12 = vld [vmem:[#allocation23] ss:$0 sm:$0xff] }
 0xcb7   :  { %2830 = vmatpush1.bf16.msra.mxu0 %v11354_v6  ;;  %10172 = vmatprep.subr.bf16.mxu1 %v11385_v58 }
 0xcb8   :  { %2538 = vadd.xlane.f32.xlu1 %v2527_v40  ;;  %2831 = vmatprep.subr.bf16.mxu0 %v11362_v63 }
 0xcbb   :  { %2832 = vmatpush1.bf16.msra.mxu0 %v11360_v8 }
 0xcbc   :  { %2833 = vmatprep.subr.bf16.mxu0 %v11368_v34 }
 0xcbf   :  { %2834 = vmatpush1.bf16.msra.mxu0 %v11366_v28  ;;  %v13662_v28 = vld [vmem:[#allocation22] ss:$0 sm:$0xff] }
 0xcc0   :  { %2835 = vmatprep.subr.bf16.mxu0 %v11374_v62 }
 0xcc3   :  { %2836 = vmatpush1.bf16.msra.mxu0 %v11372_v14 }
 0xcc4   :  { %2837 = vmatprep.subr.bf16.mxu0 %v11380_v35 }
 0xcc7   :  { %2838 = vmatpush1.bf16.msra.mxu0 %v11378_v7 }
 0xcc8   :  { %10138 = vmatprep.subr.bf16.mxu0 %v11384_v23 }
 0xd2e   :  { %v2505_v54 = vpop.xlane.xlu0 %2504 }
 0xd2f   :  { %v2516_v29 = vmul.f32 0.0078125, %v2505_v54 }
 0xd30   :  { %v2507_v1 = vpop.xlane.xlu1 %2506 }
 0xd31   :  { %v2517_v10 = vmul.f32 0.0078125, %v2507_v1  ;;  %v2546_v16 = vmul.f32 %v2516_v29, %v2516_v29  ;;  %v2558_v8 = vsub.f32 %v13621_v51, %v2516_v29 }
 0xd32   :  { %v2529_v19 = vpop.xlane.xlu0 %2528 }
 0xd33   :  { %v2540_v20 = vmul.f32 0.0078125, %v2529_v19  ;;  %v2547_v50 = vmul.f32 %v2517_v10, %v2517_v10  ;;  %v2559_v45 = vsub.f32 %v13624_v36, %v2517_v10 }
 0xd34   :  { %v2531_v55 = vpop.xlane.xlu1 %2530 }
 0xd35   :  { %v2552_v13 = vsub.f32 %v2540_v20, %v2546_v16  ;;  %v2541_v57 = vmul.f32 0.0078125, %v2531_v55  ;;  %v11386_v55 = vld [vmem:[#allocation28] sm:$0xff]  }
 0xd37   :  { %v2564_v56 = vadd.f32 1e-05, %v2552_v13  ;;  %v2553_v30 = vsub.f32 %v2541_v57, %v2547_v50  ;;  %v2509_v17 = vpop.xlane.xlu0 %2508  ;;  %v11387_v50 = vld [vmem:[#allocation28 + $0x80] sm:$0xff]  }
 0xd38   :  { %v2518_v47 = vmul.f32 0.0078125, %v2509_v17 }
 0xd39   :  { %11780 = vrsqrt.f32 %v2564_v56  ;;  %v2565_v32 = vadd.f32 1e-05, %v2553_v30  ;;  %v2511_v39 = vpop.xlane.xlu1 %2510  ;;  %v11388_v56 = vld [vmem:[#allocation28 + $0x48] sm:$0xff]  }
 0xd3a   :  { %v2519_v31 = vmul.f32 0.0078125, %v2511_v39  ;;  %v2548_v11 = vmul.f32 %v2518_v47, %v2518_v47  ;;  %v2560_v19 = vsub.f32 %v13633_v59, %v2518_v47  ;;  %v11389_v30 = vld [vmem:[#allocation28 + $0xc8] sm:$0xff]  }
 0xd3b   :  { %11782 = vrsqrt.f32 %v2565_v32  ;;  %v2533_v26 = vpop.xlane.xlu0 %2532  ;;  %v11390_v32 = vld [vmem:[#allocation28 + $0x8] sm:$0xff]  }
 0xd3c   :  { %v2542_v5 = vmul.f32 0.0078125, %v2533_v26  ;;  %v2549_v41 = vmul.f32 %v2519_v31, %v2519_v31  ;;  %v2561_v13 = vsub.f32 %v13636_v44, %v2519_v31  ;;  %v11391_v39 = vld [vmem:[#allocation28 + $0x88] sm:$0xff]   ;;  %v11392_v44 = vld [vmem:[#allocation28 + $0x50] sm:$0xff]  }
 0xd3d   :  { %v2535_v40 = vpop.xlane.xlu1 %2534  ;;  %v11393_v31 = vld [vmem:[#allocation28 + $0xd0] sm:$0xff]  }
 0xd3e   :  { %v2554_v60 = vsub.f32 %v2542_v5, %v2548_v11  ;;  %v2543_v38 = vmul.f32 0.0078125, %v2535_v40 }
 0xd3f   :  { %v2513_v61 = vpop.xlane.xlu0 %2512 }
 0xd40   :  { %v2566_v52 = vadd.f32 1e-05, %v2554_v60  ;;  %v2555_v42 = vsub.f32 %v2543_v38, %v2549_v41  ;;  %v13656_v6 = vmul.f32 0.0078125, %v2513_v61 }
 0xd41   :  { %v2515_v43 = vpop.xlane.xlu1 %2514 }
 0xd42   :  { %11784 = vrsqrt.f32 %v2566_v52  ;;  %v2567_v63 = vadd.f32 1e-05, %v2555_v42  ;;  %v13660_v34 = vmul.f32 0.0078125, %v2515_v43  ;;  %v2550_v53 = vmul.f32 %v13656_v6, %v13656_v6  ;;  %v11394_v52 = vld [vmem:[#allocation28 + $0x10] sm:$0xff]   ;;  %v11397_v43 = vld [vmem:[#allocation28 + $0xd8] sm:$0xff]  }
 0xd43   :  { %v11781_v24 = vpop.eup %11780  ;;  %v2537_v27 = vpop.xlane.xlu0 %2536  ;;  %v2562_v11 = vsub.f32 %v13645_v37, %v13656_v6  ;;  %v11395_v37 = vld [vmem:[#allocation28 + $0x90] sm:$0xff]   ;;  %v11396_v6 = vld [vmem:[#allocation28 + $0x58] sm:$0xff]  }
 0xd44   :  { %11786 = vrsqrt.f32 %v2567_v63  ;;  %v2544_v14 = vmul.f32 0.0078125, %v2537_v27  ;;  %v2576_v62 = vmul.f32 %v11781_v24, %v2558_v8  ;;  %v2551_v51 = vmul.f32 %v13660_v34, %v13660_v34  ;;  %v11398_v24 = vld [vmem:[#allocation28 + $0x18] sm:$0xff]   ;;  %v11401_v27 = vld [vmem:[#allocation28 + $0xe0] sm:$0xff]  }
 0xd45   :  { %v11783_v9 = vpop.eup %11782  ;;  %v2539_v15 = vpop.xlane.xlu1 %2538  ;;  %v2563_v60 = vsub.f32 %v13648_v33, %v13660_v34  ;;  %v11400_v34 = vld [vmem:[#allocation28 + $0x60] sm:$0xff]  }
 0xd46   :  { %v2556_v35 = vsub.f32 %v2544_v14, %v2550_v53  ;;  %v2545_v49 = vmul.f32 0.0078125, %v2539_v15  ;;  %v2577_v7 = vmul.f32 %v11783_v9, %v2559_v45  ;;  %v2588_v36 = vmul.f32 %v13662_v28, %v2576_v62  ;;  %v11399_v45 = vld [vmem:[#allocation28 + $0x98] sm:$0xff]   ;;  %v11403_v9 = vld [vmem:[#allocation28 + $0xa0] sm:$0xff]   ;;  %v11405_v15 = vld [vmem:[#allocation28 + $0xe8] sm:$0xff]  }
 0xd48   :  { %v2568_v23 = vadd.f32 1e-05, %v2556_v35  ;;  %v2557_v58 = vsub.f32 %v2545_v49, %v2551_v51  ;;  %v2589_v54 = vmul.f32 %v13662_v28, %v2577_v7  ;;  %v13673_v1 = vadd.f32 %v13669_v12, %v2588_v36  ;;  %v11404_v51 = vld [vmem:[#allocation28 + $0x68] sm:$0xff]   ;;  %v11408_v7 = vld [vmem:[#allocation28 + $0x70] sm:$0xff]  }
 0xd49   :  { %v11406_v35 = vld [vmem:[#allocation28 + $0x28] sm:$0xff]   ;;  %v11409_v36 = vld [vmem:[#allocation28 + $0xf0] sm:$0xff]  }
 0xd4a   :  { %11788 = vrsqrt.f32 %v2568_v23  ;;  %v2569_v29 = vadd.f32 1e-05, %v2557_v58  ;;  %v13676_v10 = vadd.f32 %v13669_v12, %v2589_v54  ;;  %v11407_v49 = vld [vmem:[#allocation28 + $0xa8] sm:$0xff]   ;;  %v11411_v23 = vld [vmem:[#allocation28 + $0xb0] sm:$0xff]   ;;  %v11412_v58 = vld [vmem:[#allocation28 + $0x78] sm:$0xff]  }
 0xd4b   :  { %v11413_v54 = vld [vmem:[#allocation28 + $0xf8] sm:$0xff]  }
 0xd4c   :  { %v11785_v16 = vpop.eup %11784  ;;  %11790 = vrsqrt.f32 %v2569_v29  ;;  %v2606_v20 = vpack.c.bf16 %v13676_v10, %v13673_v1  ;;  %v11414_v29 = vld [vmem:[#allocation28 + $0x38] sm:$0xff]  }
 0xd4d   :  { %v2578_v57 = vmul.f32 %v11785_v16, %v2560_v19  ;;  %v11415_v19 = vld [vmem:[#allocation28 + $0xb8] sm:$0xff]   ;;  %v2641_v16 = vld [vmem:[#allocation26] sm:$0xf] }
 0xd4e   :  { %v11787_v17 = vpop.eup %11786  ;;  %2856 = vmatmul.mubr.bf16.vlgmr.msra.gmra.mrb[44].mxu0 %v2606_v20  ;;  %2919 = vmatmul.mubr.bf16.vlgmr.msra.gmra.mrb[44].mxu1 %v2606_v20  ;;  %v13712_v20 = vsub.s32 3, %v13145_v18 }
 0xd4f   :  { %2865 = vmatprep.mubr.bf16.mxu0 %v12664_v21  ;;  %2928 = vmatprep.mubr.bf16.mxu1 %v12664_v21  ;;  %v2579_v59 = vmul.f32 %v11787_v17, %v2561_v13  ;;  %v2590_v47 = vmul.f32 %v13662_v28, %v2578_v57  ;;  %v13721_v13 = vrot.slane %v2641_v16, %v13225_v48 }
 0xd50   :  { %10139 = vmatpush3.bf16.msra.mxu0 %v11386_v55  ;;  %10173 = vmatpush3.bf16.msra.mxu1 %v11387_v50  ;;  %v13715_v55 = vrot.slane %v2641_v16, %v13149_v22  ;;  %v13718_v50 = vrot.slane %v2641_v16, %v13222_v46  ;;  %v13724_v57 = vrot.slane %v2641_v16, %v13712_v20 }
 0xd51   :  { %v2591_v26 = vmul.f32 %v13662_v28, %v2579_v59  ;;  %10140 = vmatprep.subr.bf16.mxu0 %v11388_v56  ;;  %10174 = vmatprep.subr.bf16.mxu1 %v11389_v30  ;;  %v13689_v5 = vadd.f32 %v13669_v12, %v2590_v47 }
 0xd53   :  { %v13692_v40 = vadd.f32 %v13669_v12, %v2591_v26 }
 0xd54   :  { %v11789_v41 = vpop.eup %11788  ;;  %10141 = vmatpush3.bf16.msra.mxu0 %v11390_v32  ;;  %10175 = vmatpush3.bf16.msra.mxu1 %v11391_v39 }
 0xd55   :  { %v2607_v38 = vpack.c.bf16 %v13692_v40, %v13689_v5  ;;  %v2580_v61 = vmul.f32 %v11789_v41, %v2562_v11  ;;  %10142 = vmatprep.subr.bf16.mxu0 %v11392_v44  ;;  %10176 = vmatprep.subr.bf16.mxu1 %v11393_v31 }
 0xd56   :  { %v11791_v42 = vpop.eup %11790 }
 0xd57   :  { %2866 = vmatmul.mubr.bf16.gmra.mrb[48].mxu0 %v2607_v38  ;;  %2929 = vmatmul.mubr.bf16.gmra.mrb[48].mxu1 %v2607_v38  ;;  %v2581_v8 = vmul.f32 %v11791_v42, %v2563_v60  ;;  %v2592_v63 = vmul.f32 %v13662_v28, %v2580_v61 }
 0xd58   :  { %2875 = vmatprep.mubr.bf16.mxu0 %v12664_v21  ;;  %2938 = vmatprep.mubr.bf16.mxu1 %v12664_v21 }
 0xd59   :  { %v2593_v33 = vmul.f32 %v13662_v28, %v2581_v8  ;;  %10143 = vmatpush3.bf16.msra.mxu0 %v11394_v52  ;;  %10177 = vmatpush3.bf16.msra.mxu1 %v11395_v37  ;;  %v13703_v53 = vadd.f32 %v13669_v12, %v2592_v63  ;;  %v11402_v28 = vld [vmem:[#allocation28 + $0x20] sm:$0xff]  }
 0xd5a   :  { %10144 = vmatprep.subr.bf16.mxu0 %v11396_v6  ;;  %10178 = vmatprep.subr.bf16.mxu1 %v11397_v43 }
 0xd5b   :  { %v13706_v14 = vadd.f32 %v13669_v12, %v2593_v33  ;;  %v11410_v12 = vld [vmem:[#allocation28 + $0x30] sm:$0xff]  }
 0xd5d   :  { %v2608_v62 = vpack.c.bf16 %v13706_v14, %v13703_v53  ;;  %10145 = vmatpush3.bf16.msra.mxu0 %v11398_v24  ;;  %10179 = vmatpush3.bf16.msra.mxu1 %v11399_v45 }
 0xd5e   :  { %10146 = vmatprep.subr.bf16.mxu0 %v11400_v34  ;;  %10180 = vmatprep.subr.bf16.mxu1 %v11401_v27 }
 0xd5f   :  { %2876 = vmatmul.mubr.bf16.gmra.mrb[52].mxu0 %v2608_v62  ;;  %2939 = vmatmul.mubr.bf16.gmra.mrb[52].mxu1 %v2608_v62 }
 0xd61   :  { %10147 = vmatpush3.bf16.msra.mxu0 %v11402_v28  ;;  %10181 = vmatpush3.bf16.msra.mxu1 %v11403_v9 }
 0xd62   :  { %10148 = vmatprep.subr.bf16.mxu0 %v11404_v51  ;;  %10182 = vmatprep.subr.bf16.mxu1 %v11405_v15 }
 0xd65   :  { %10149 = vmatpush3.bf16.msra.mxu0 %v11406_v35  ;;  %10183 = vmatpush3.bf16.msra.mxu1 %v11407_v49 }
 0xd66   :  { %10150 = vmatprep.subr.bf16.mxu0 %v11408_v7  ;;  %10184 = vmatprep.subr.bf16.mxu1 %v11409_v36 }
 0xd69   :  { %10151 = vmatpush3.bf16.msra.mxu0 %v11410_v12  ;;  %10185 = vmatpush3.bf16.msra.mxu1 %v11411_v23 }
 0xd6a   :  { %10152 = vmatprep.subr.bf16.mxu0 %v11412_v58  ;;  %10186 = vmatprep.subr.bf16.mxu1 %v11413_v54 }
 0xd6d   :  { %10153 = vmatpush3.bf16.msra.mxu0 %v11414_v29  ;;  %10187 = vmatpush3.bf16.msra.mxu1 %v11415_v19 }
 0xd6e   :  { %10736 = vmatprep.subr.bf16.mxu1 %v12661_v0 }
 0xe21   :  { %v2857_v56 = vpop.f32.mrb[44].mxu0  ;;  %v2920_v30 = vpop.f32.mrb[44].mxu1 }
 0xe22   :  { %v2858_v17 = vadd.f32 %v2857_v56, %v13715_v55  ;;  %v2921_v59 = vadd.f32 %v2920_v30, %v13718_v50  ;;  %v2859_v18 = vpop.f32.mrb[45].mxu0  ;;  %v2922_v47 = vpop.f32.mrb[45].mxu1 }
 0xe23   :  { %v2860_v32 = vadd.f32 %v2859_v18, %v13721_v13  ;;  %v2923_v39 = vadd.f32 %v2922_v47, %v13724_v57  ;;  %v2861_v26 = vpop.f32.mrb[46].mxu0  ;;  %v2924_v44 = vpop.f32.mrb[46].mxu1 }
 0xe24   :  { %v2862_v31 = vadd.f32 %v2861_v26, %v13715_v55  ;;  %v2925_v11 = vadd.f32 %v2924_v44, %v13718_v50  ;;  %v2863_v41 = vpop.f32.mrb[47].mxu0  ;;  %v2926_v60 = vpop.f32.mrb[47].mxu1  ;;  %v2949_v52 = vmax.f32 %v2858_v17, 0.0  ;;  %v2951_v37 = vmax.f32 %v2921_v59, 0.0 }
 0xe25   :  { %v2864_v38 = vadd.f32 %v2863_v41, %v13721_v13  ;;  %v2927_v61 = vadd.f32 %v2926_v60, %v13724_v57  ;;  %v2950_v43 = vmax.f32 %v2860_v32, 0.0  ;;  %v2952_v8 = vmax.f32 %v2923_v39, 0.0 }
 0xe26   :  { %v2953_v42 = vmax.f32 %v2862_v31, 0.0  ;;  %v2955_v6 = vmax.f32 %v2925_v11, 0.0 }
 0xe27   :  { %v2954_v63 = vmax.f32 %v2864_v38, 0.0  ;;  %v2956_v33 = vmax.f32 %v2927_v61, 0.0 }
 0xe28   :  { %v2973_v24 = vpack.c.bf16 %v2953_v42, %v2949_v52  ;;  %v2975_v45 = vpack.c.bf16 %v2955_v6, %v2951_v37 }
 0xe29   :  { %v2974_v34 = vpack.c.bf16 %v2954_v63, %v2950_v43  ;;  %v2976_v27 = vpack.c.bf16 %v2956_v33, %v2952_v8 }
 0xe2a   :  { %v2867_v62 = vpop.f32.mrb[48].mxu0  ;;  %v2930_v28 = vpop.f32.mrb[48].mxu1 }
 0xe2b   :  { %v2868_v9 = vadd.f32 %v2867_v62, %v13715_v55  ;;  %v2931_v51 = vadd.f32 %v2930_v28, %v13718_v50  ;;  %v2869_v15 = vpop.f32.mrb[49].mxu0  ;;  %v2932_v35 = vpop.f32.mrb[49].mxu1  ;;  %3280 = vmatprep.mubr.bf16.mxu0 %v2974_v34  ;;  %3337 = vmatprep.mubr.bf16.mxu1 %v2976_v27 }
 0xe2c   :  { %v2870_v49 = vadd.f32 %v2869_v15, %v13721_v13  ;;  %v2933_v7 = vadd.f32 %v2932_v35, %v13724_v57  ;;  %v2871_v36 = vpop.f32.mrb[50].mxu0  ;;  %v2934_v12 = vpop.f32.mrb[50].mxu1  ;;  %3281 = vmatmul.mubr.bf16.vlgmr.msra.gmra.mrb[56].mxu0 %v2973_v24  ;;  %3338 = vmatmul.mubr.bf16.vlgmr.msra.gmra.mrb[56].mxu1 %v2975_v45 }
 0xe2d   :  { %v2872_v23 = vadd.f32 %v2871_v36, %v13715_v55  ;;  %v2935_v58 = vadd.f32 %v2934_v12, %v13718_v50  ;;  %v2873_v54 = vpop.f32.mrb[51].mxu0  ;;  %v2936_v29 = vpop.f32.mrb[51].mxu1  ;;  %v2957_v56 = vmax.f32 %v2868_v9, 0.0  ;;  %v2959_v30 = vmax.f32 %v2931_v51, 0.0 }
 0xe2e   :  { %v2874_v19 = vadd.f32 %v2873_v54, %v13721_v13  ;;  %v2937_v16 = vadd.f32 %v2936_v29, %v13724_v57  ;;  %v2958_v18 = vmax.f32 %v2870_v49, 0.0  ;;  %v2960_v47 = vmax.f32 %v2933_v7, 0.0  ;;  %v9619_v54 = vld [vmem:[#allocation29] ss:$0 sm:$0xff] }
 0xe2f   :  { %v2961_v17 = vmax.f32 %v2872_v23, 0.0  ;;  %v2963_v59 = vmax.f32 %v2935_v58, 0.0 }
 0xe30   :  { %v2962_v32 = vmax.f32 %v2874_v19, 0.0  ;;  %v2964_v39 = vmax.f32 %v2937_v16, 0.0 }
 0xe31   :  { %v2977_v26 = vpack.c.bf16 %v2961_v17, %v2957_v56  ;;  %v2979_v44 = vpack.c.bf16 %v2963_v59, %v2959_v30 }
 0xe32   :  { %v2978_v31 = vpack.c.bf16 %v2962_v32, %v2958_v18  ;;  %v2980_v11 = vpack.c.bf16 %v2964_v39, %v2960_v47  ;;  %v2877_v41 = vpop.f32.mrb[52].mxu0  ;;  %v2940_v60 = vpop.f32.mrb[52].mxu1 }
 0xe33   :  { %v2878_v38 = vadd.f32 %v2877_v41, %v13715_v55  ;;  %v2941_v61 = vadd.f32 %v2940_v60, %v13718_v50  ;;  %v2879_v52 = vpop.f32.mrb[53].mxu0  ;;  %v2942_v37 = vpop.f32.mrb[53].mxu1 }
 0xe34   :  { %v2880_v42 = vadd.f32 %v2879_v52, %v13721_v13  ;;  %v2943_v6 = vadd.f32 %v2942_v37, %v13724_v57  ;;  %v2881_v43 = vpop.f32.mrb[54].mxu0  ;;  %v2944_v8 = vpop.f32.mrb[54].mxu1  ;;  %3288 = vmatprep.mubr.bf16.mxu0 %v2978_v31  ;;  %3345 = vmatprep.mubr.bf16.mxu1 %v2980_v11 }
 0xe35   :  { %v2882_v63 = vadd.f32 %v2881_v43, %v13715_v55  ;;  %v2945_v33 = vadd.f32 %v2944_v8, %v13718_v50  ;;  %v2883_v24 = vpop.f32.mrb[55].mxu0  ;;  %v2946_v45 = vpop.f32.mrb[55].mxu1  ;;  %3289 = vmatmul.mubr.bf16.gmra.mrb[60].mxu0 %v2977_v26  ;;  %3346 = vmatmul.mubr.bf16.gmra.mrb[60].mxu1 %v2979_v44  ;;  %v2965_v62 = vmax.f32 %v2878_v38, 0.0  ;;  %v2967_v28 = vmax.f32 %v2941_v61, 0.0 }
 0xe36   :  { %v2884_v34 = vadd.f32 %v2883_v24, %v13721_v13  ;;  %v2947_v27 = vadd.f32 %v2946_v45, %v13724_v57  ;;  %v2966_v15 = vmax.f32 %v2880_v42, 0.0  ;;  %v2968_v35 = vmax.f32 %v2943_v6, 0.0  ;;  %v11416_v13 = vld [vmem:[#allocation16 + $0xc0] ss:$12 sps:$4 sm:$0xff]   ;;  %v11418_v57 = vld [vmem:[#allocation16 + $0xc4] ss:$12 sps:$4 sm:$0xff]  }
 0xe37   :  { %v2969_v9 = vmax.f32 %v2882_v63, 0.0  ;;  %v2971_v51 = vmax.f32 %v2945_v33, 0.0  ;;  %3654 = vmatprep.subr.bf16.mxu0 %v11418_v57 }
 0xe38   :  { %v2970_v49 = vmax.f32 %v2884_v34, 0.0  ;;  %v2972_v7 = vmax.f32 %v2947_v27, 0.0  ;;  %3655 = vmatpush1.bf16.msra.mxu0 %v11416_v13 }
 0xe39   :  { %v2981_v36 = vpack.c.bf16 %v2969_v9, %v2965_v62  ;;  %v2983_v55 = vpack.c.bf16 %v2971_v51, %v2967_v28 }
 0xe3a   :  { %v2982_v12 = vpack.c.bf16 %v2970_v49, %v2966_v15  ;;  %v2984_v50 = vpack.c.bf16 %v2972_v7, %v2968_v35 }
 0xe3c   :  { %3296 = vmatprep.mubr.bf16.mxu0 %v2982_v12  ;;  %3353 = vmatprep.mubr.bf16.mxu1 %v2984_v50 }
 0xe3d   :  { %3297 = vmatmul.mubr.bf16.gmra.mrb[64].mxu0 %v2981_v36  ;;  %3354 = vmatmul.mubr.bf16.gmra.mrb[64].mxu1 %v2983_v55 }
 0xe3e   :  { %3686 = vmatprep.mubr.bf16.mxu0 %v12664_v21  ;;  %10752 = vmatprep.mubr.msk.bf16.mxu1 %vm12662_vm0, %v12661_v0 }
 0xeff   :  { %v10154_v23 = vpop.f32.mrb[56].mxu0  ;;  %v10188_v58 = vpop.f32.mrb[56].mxu1 }
 0xf00   :  { %v10155_v29 = vpop.f32.mrb[57].mxu0  ;;  %v10189_v19 = vpop.f32.mrb[57].mxu1 }
 0xf01   :  { %v10156_v16 = vadd.f32 %v10155_v29, %v10154_v23  ;;  %v10190_v56 = vadd.f32 %v10189_v19, %v10188_v58  ;;  %v10157_v30 = vpop.f32.mrb[58].mxu0  ;;  %v10191_v17 = vpop.f32.mrb[58].mxu1 }
 0xf02   :  { %v10158_v59 = vpop.f32.mrb[59].mxu0  ;;  %v10192_v18 = vpop.f32.mrb[59].mxu1 }
 0xf03   :  { %v3283_v47 = vadd.f32 %v10156_v16, %v9619_v54  ;;  %v10159_v32 = vadd.f32 %v10158_v59, %v10157_v30  ;;  %v10193_v39 = vadd.f32 %v10192_v18, %v10191_v17  ;;  %v11419_v30 = vld [vmem:[#allocation16 + $0xc8] ss:$12 sps:$4 sm:$0xff]   ;;  %v11420_v59 = vld [vmem:[#allocation16 + $0xd8] ss:$12 sps:$4 sm:$0xff]  }
 0xf04   :  { %10737 = vmatpush3.bf16.msra.mxu1 %v11419_v30  ;;  %v11422_v18 = vld [vmem:[#allocation16 + $0xdc] ss:$12 sps:$4 sm:$0xff]  }
 0xf05   :  { %v3340_v26 = vadd.f32 %v10190_v56, %v3283_v47  ;;  %v3286_v44 = vadd.f32 %v10159_v32, %v9619_v54  ;;  %10738 = vmatprep.subr.bf16.mxu1 %v12661_v0  ;;  %3656 = vmatprep.subr.bf16.mxu0 %v11422_v18  ;;  %v11423_v47 = vld [vmem:[#allocation16 + $0xe0] ss:$12 sps:$4 sm:$0xff]  }
 0xf06   :  { %3657 = vmatpush1.bf16.msra.mxu0 %v11420_v59  ;;  %v11426_v32 = vld [vmem:[#allocation16 + $0xf4] ss:$12 sps:$4 sm:$0xff]  }
 0xf07   :  { %v3343_v31 = vadd.f32 %v10193_v39, %v3286_v44  ;;  %v13754_v11 = vadd.f32 %v3340_v26, %v13673_v1  ;;  %v11427_v39 = vld [vmem:[#allocation16 + $0xf8] ss:$12 sps:$4 sm:$0xff]   ;;  %3658 = vmatprep.subr.bf16.mxu0 %v11426_v32  ;;  %v11428_v44 = vld [vmem:[#allocation16 + $0x108] ss:$12 sps:$4 sm:$0xff]  }
 0xf08   :  { %v10160_v41 = vpop.f32.mrb[60].mxu0  ;;  %v10194_v60 = vpop.f32.mrb[60].mxu1  ;;  %10739 = vmatpush3.bf16.msra.mxu1 %v11423_v47  ;;  %v11430_v26 = vld [vmem:[#allocation16 + $0x10c] ss:$12 sps:$4 sm:$0xff]  }
 0xf09   :  { %v10161_v38 = vpop.f32.mrb[61].mxu0  ;;  %v10195_v61 = vpop.f32.mrb[61].mxu1  ;;  %3370 = vadd.xlane.f32.xlu0 %v13754_v11  ;;  %v13758_v52 = vadd.f32 %v3343_v31, %v13676_v10  ;;  %v3388_v1 = vmul.f32 %v13754_v11, %v13754_v11  ;;  %10740 = vmatprep.subr.bf16.mxu1 %v12661_v0  ;;  %v11431_v31 = vld [vmem:[#allocation16 + $0x110] ss:$12 sps:$4 sm:$0xff]  }
 0xf0a   :  { %v10162_v37 = vadd.f32 %v10161_v38, %v10160_v41  ;;  %v10196_v42 = vadd.f32 %v10195_v61, %v10194_v60  ;;  %v10163_v6 = vpop.f32.mrb[62].mxu0  ;;  %v10197_v43 = vpop.f32.mrb[62].mxu1  ;;  %v11434_v41 = vld [vmem:[#allocation16 + $0x124] ss:$12 sps:$4 sm:$0xff]   ;;  %v11432_v60 = vld [vmem:[#allocation16 + $0x120] ss:$12 sps:$4 sm:$0xff]  }
 0xf0b   :  { %v10164_v8 = vpop.f32.mrb[63].mxu0  ;;  %v10198_v63 = vpop.f32.mrb[63].mxu1  ;;  %3372 = vadd.xlane.f32.xlu1 %v13758_v52  ;;  %v3389_v34 = vmul.f32 %v13758_v52, %v13758_v52  ;;  %v11435_v38 = vld [vmem:[#allocation16 + $0x128] ss:$12 sps:$4 sm:$0xff]  }
 0xf0c   :  { %v3291_v33 = vadd.f32 %v10162_v37, %v9619_v54  ;;  %v10165_v24 = vadd.f32 %v10164_v8, %v10163_v6  ;;  %v10199_v45 = vadd.f32 %v10198_v63, %v10197_v43  ;;  %10741 = vmatpush3.bf16.msra.mxu1 %v11427_v39  ;;  %v11438_v61 = vld [vmem:[#allocation16 + $0x13c] ss:$12 sps:$4 sm:$0xff]   ;;  %v11436_v37 = vld [vmem:[#allocation16 + $0x138] ss:$12 sps:$4 sm:$0xff]   ;;  %v11442_v6 = vld [vmem:[#allocation16 + $0x154] ss:$12 sps:$4 sm:$0xff]  }
 0xf0d   :  { %3394 = vadd.xlane.f32.xlu0 %v3388_v1  ;;  %10742 = vmatprep.subr.bf16.mxu1 %v12661_v0  ;;  %v11440_v43 = vld [vmem:[#allocation16 + $0x150] ss:$12 sps:$4 sm:$0xff]   ;;  %v11443_v8 = vld [vmem:[#allocation16 + $0x158] ss:$12 sps:$4 sm:$0xff]   ;;  %v11444_v1 = vld [vmem:[#allocation16 + $0x168] ss:$12 sps:$4 sm:$0xff]  }
 0xf0e   :  { %v3348_v10 = vadd.f32 %v10196_v42, %v3291_v33  ;;  %v3294_v27 = vadd.f32 %v10165_v24, %v9619_v54  ;;  %v11439_v42 = vld [vmem:[#allocation16 + $0x140] ss:$12 sps:$4 sm:$0xff]   ;;  %v11447_v33 = vld [vmem:[#allocation16 + $0x170] ss:$12 sps:$4 sm:$0xff]  }
 0xf0f   :  { %3396 = vadd.xlane.f32.xlu1 %v3389_v34  ;;  %v11446_v63 = vld [vmem:[#allocation16 + $0x16c] ss:$12 sps:$4 sm:$0xff]  }
 0xf10   :  { %v3351_v62 = vadd.f32 %v10199_v45, %v3294_v27  ;;  %v10166_v28 = vpop.f32.mrb[64].mxu0  ;;  %v10200_v9 = vpop.f32.mrb[64].mxu1  ;;  %v13766_v51 = vadd.f32 %v3348_v10, %v13689_v5  ;;  %10743 = vmatpush3.bf16.msra.mxu1 %v11431_v31 }
 0xf11   :  { %v10167_v15 = vpop.f32.mrb[65].mxu0  ;;  %v10201_v35 = vpop.f32.mrb[65].mxu1  ;;  %10744 = vmatprep.subr.bf16.mxu1 %v12661_v0 }
 0xf12   :  { %v10168_v49 = vadd.f32 %v10167_v15, %v10166_v28  ;;  %v10202_v7 = vadd.f32 %v10201_v35, %v10200_v9  ;;  %v10203_v36 = vpop.f32.mrb[66].mxu1  ;;  %3374 = vadd.xlane.f32.xlu0 %v13766_v51  ;;  %v10169_v55 = vpop.f32.mrb[66].mxu0  ;;  %v13770_v12 = vadd.f32 %v3351_v62, %v13692_v40  ;;  %v3390_v5 = vmul.f32 %v13766_v51, %v13766_v51 }
 0xf13   :  { %v10170_v50 = vpop.f32.mrb[67].mxu0  ;;  %v10204_v13 = vpop.f32.mrb[67].mxu1 }
 0xf14   :  { %v3299_v57 = vadd.f32 %v10168_v49, %v9619_v54  ;;  %v10171_v23 = vadd.f32 %v10170_v50, %v10169_v55  ;;  %v10205_v58 = vadd.f32 %v10204_v13, %v10203_v36  ;;  %3376 = vadd.xlane.f32.xlu1 %v13770_v12  ;;  %v3391_v16 = vmul.f32 %v13770_v12, %v13770_v12 }
 0xf15   :  { %10745 = vmatpush3.bf16.msra.mxu1 %v11435_v38 }
 0xf16   :  { %v3356_v29 = vadd.f32 %v10202_v7, %v3299_v57  ;;  %v3302_v19 = vadd.f32 %v10171_v23, %v9619_v54  ;;  %3398 = vadd.xlane.f32.xlu0 %v3390_v5  ;;  %10746 = vmatprep.subr.bf16.mxu1 %v12661_v0 }
 0xf18   :  { %v3359_v56 = vadd.f32 %v10205_v58, %v3302_v19  ;;  %3400 = vadd.xlane.f32.xlu1 %v3391_v16  ;;  %v13778_v40 = vadd.f32 %v3356_v29, %v13703_v53 }
 0xf19   :  { %10747 = vmatpush3.bf16.msra.mxu1 %v11439_v42 }
 0xf1a   :  { %3378 = vadd.xlane.f32.xlu0 %v13778_v40  ;;  %v13782_v17 = vadd.f32 %v3359_v56, %v13706_v14  ;;  %v3392_v54 = vmul.f32 %v13778_v40, %v13778_v40  ;;  %v11424_v14 = vld [vmem:[#allocation16 + $0xf0] ss:$12 sps:$4 sm:$0xff]   ;;  %10748 = vmatprep.subr.bf16.mxu1 %v12661_v0 }
 0xf1b   :  { %3659 = vmatpush1.bf16.msra.mxu0 %v11424_v14 }
 0xf1c   :  { %3380 = vadd.xlane.f32.xlu1 %v13782_v17  ;;  %v3393_v53 = vmul.f32 %v13782_v17, %v13782_v17  ;;  %3660 = vmatprep.subr.bf16.mxu0 %v11430_v26 }
 0xf1d   :  { %10749 = vmatpush3.bf16.msra.mxu1 %v11443_v8 }
 0xf1e   :  { %3402 = vadd.xlane.f32.xlu0 %v3392_v54  ;;  %10750 = vmatprep.subr.bf16.mxu1 %v12661_v0 }
 0xf1f   :  { %3661 = vmatpush1.bf16.msra.mxu0 %v11428_v44 }
 0xf20   :  { %3404 = vadd.xlane.f32.xlu1 %v3393_v53  ;;  %3662 = vmatprep.subr.bf16.mxu0 %v11434_v41  ;;  %v9652_v41 = vld [vmem:[#allocation31] ss:$0 sm:$0xff] }
 0xf21   :  { %10751 = vmatpush3.bf16.msra.mxu1 %v11447_v33 }
 0xf23   :  { %3663 = vmatpush1.bf16.msra.mxu0 %v11432_v60 }
 0xf24   :  { %3664 = vmatprep.subr.bf16.mxu0 %v11438_v61 }
 0xf27   :  { %3665 = vmatpush1.bf16.msra.mxu0 %v11436_v37 }
 0xf28   :  { %3666 = vmatprep.subr.bf16.mxu0 %v11442_v6 }
 0xf2b   :  { %3667 = vmatpush1.bf16.msra.mxu0 %v11440_v43 }
 0xf2c   :  { %3668 = vmatprep.subr.bf16.mxu0 %v11446_v63 }
 0xf2f   :  { %3669 = vmatpush1.bf16.msra.mxu0 %v11444_v1 }
 0xf96   :  { %v3371_v24 = vpop.xlane.xlu0 %3370 }
 0xf97   :  { %v3382_v45 = vmul.f32 0.0078125, %v3371_v24 }
 0xf98   :  { %v3373_v34 = vpop.xlane.xlu1 %3372 }
 0xf99   :  { %v3383_v10 = vmul.f32 0.0078125, %v3373_v34  ;;  %v3412_v62 = vmul.f32 %v3382_v45, %v3382_v45  ;;  %v3424_v14 = vsub.f32 %v13754_v11, %v3382_v45  ;;  %v9653_v11 = vld [vmem:[#allocation32] ss:$0 sm:$0xff] }
 0xf9a   :  { %v3395_v27 = vpop.xlane.xlu0 %3394 }
 0xf9b   :  { %v3406_v28 = vmul.f32 0.0078125, %v3395_v27  ;;  %v3413_v15 = vmul.f32 %v3383_v10, %v3383_v10  ;;  %v3425_v26 = vsub.f32 %v13758_v52, %v3383_v10 }
 0xf9c   :  { %v3397_v9 = vpop.xlane.xlu1 %3396 }
 0xf9d   :  { %v3418_v35 = vsub.f32 %v3406_v28, %v3412_v62  ;;  %v3407_v49 = vmul.f32 0.0078125, %v3397_v9 }
 0xf9f   :  { %v3430_v7 = vadd.f32 1e-05, %v3418_v35  ;;  %v3419_v36 = vsub.f32 %v3407_v49, %v3413_v15  ;;  %v3375_v55 = vpop.xlane.xlu0 %3374 }
 0xfa0   :  { %v3384_v50 = vmul.f32 0.0078125, %v3375_v55 }
 0xfa1   :  { %11792 = vrsqrt.f32 %v3430_v7  ;;  %v3431_v13 = vadd.f32 1e-05, %v3419_v36  ;;  %v3377_v57 = vpop.xlane.xlu1 %3376 }
 0xfa2   :  { %v3385_v23 = vmul.f32 0.0078125, %v3377_v57  ;;  %v3414_v5 = vmul.f32 %v3384_v50, %v3384_v50  ;;  %v3426_v27 = vsub.f32 %v13766_v51, %v3384_v50 }
 0xfa3   :  { %11794 = vrsqrt.f32 %v3431_v13  ;;  %v3399_v58 = vpop.xlane.xlu0 %3398 }
 0xfa4   :  { %v3408_v29 = vmul.f32 0.0078125, %v3399_v58  ;;  %v3415_v16 = vmul.f32 %v3385_v23, %v3385_v23  ;;  %v3427_v9 = vsub.f32 %v13770_v12, %v3385_v23 }
 0xfa5   :  { %v3401_v19 = vpop.xlane.xlu1 %3400 }
 0xfa6   :  { %v3420_v56 = vsub.f32 %v3408_v29, %v3414_v5  ;;  %v3409_v30 = vmul.f32 0.0078125, %v3401_v19 }
 0xfa7   :  { %v3379_v59 = vpop.xlane.xlu0 %3378 }
 0xfa8   :  { %v3432_v18 = vadd.f32 1e-05, %v3420_v56  ;;  %v3421_v54 = vsub.f32 %v3409_v30, %v3415_v16  ;;  %v3386_v53 = vmul.f32 0.0078125, %v3379_v59  ;;  %v3509_v56 = vld [vmem:[#allocation17 + $0x3] sm:$0x7] }
 0xfa9   :  { %v3381_v47 = vpop.xlane.xlu1 %3380  ;;  %v13827_v30 = vrot.slane %v3509_v56, %v13222_v46  ;;  %v13830_v59 = vrot.slane %v3509_v56, %v13225_v48 }
 0xfaa   :  { %11796 = vrsqrt.f32 %v3432_v18  ;;  %v3433_v32 = vadd.f32 1e-05, %v3421_v54  ;;  %v3387_v44 = vmul.f32 0.0078125, %v3381_v47  ;;  %v3416_v38 = vmul.f32 %v3386_v53, %v3386_v53 }
 0xfab   :  { %v11793_v39 = vpop.eup %11792  ;;  %v3403_v31 = vpop.xlane.xlu0 %3402  ;;  %v3428_v51 = vsub.f32 %v13778_v40, %v3386_v53  ;;  %v13833_v18 = vrot.slane %v3509_v56, %v13149_v22 }
 0xfac   :  { %v3442_v60 = vmul.f32 %v11793_v39, %v3424_v14  ;;  %11798 = vrsqrt.f32 %v3433_v32  ;;  %v3410_v61 = vmul.f32 0.0078125, %v3403_v31  ;;  %v3417_v42 = vmul.f32 %v3387_v44, %v3387_v44 }
 0xfad   :  { %v11795_v37 = vpop.eup %11794  ;;  %v3405_v6 = vpop.xlane.xlu1 %3404  ;;  %v3429_v12 = vsub.f32 %v13782_v17, %v3387_v44 }
 0xfae   :  { %v3443_v43 = vmul.f32 %v11795_v37, %v3425_v26  ;;  %v3422_v8 = vsub.f32 %v3410_v61, %v3416_v38  ;;  %v3411_v63 = vmul.f32 0.0078125, %v3405_v6  ;;  %v3454_v1 = vmul.f32 %v9652_v41, %v3442_v60 }
 0xfb0   :  { %v3434_v33 = vadd.f32 1e-05, %v3422_v8  ;;  %v3423_v24 = vsub.f32 %v3411_v63, %v3417_v42  ;;  %v3455_v45 = vmul.f32 %v9652_v41, %v3443_v43  ;;  %v13798_v34 = vadd.f32 %v9653_v11, %v3454_v1 }
 0xfb2   :  { %11800 = vrsqrt.f32 %v3434_v33  ;;  %v3435_v52 = vadd.f32 1e-05, %v3423_v24  ;;  %v13800_v10 = vadd.f32 %v9653_v11, %v3455_v45 }
 0xfb4   :  { %v11797_v62 = vpop.eup %11796  ;;  %11802 = vrsqrt.f32 %v3435_v52  ;;  %v3472_v28 = vpack.c.bf16 %v13800_v10, %v13798_v34 }
 0xfb5   :  { %v3444_v15 = vmul.f32 %v11797_v62, %v3426_v27 }
 0xfb6   :  { %v11799_v35 = vpop.eup %11798  ;;  %3687 = vmatmul.mubr.bf16.vlgmr.msra.gmra.mrb[68].mxu0 %v3472_v28  ;;  %10753 = vmatmul.mubr.bf16.vlgmr.msra.gmra.mrb[68].mxu1 %v3472_v28 }
 0xfb7   :  { %3696 = vmatprep.mubr.bf16.mxu0 %v12664_v21  ;;  %10756 = vmatprep.mubr.msk.bf16.mxu1 %vm12662_vm0, %v12661_v0  ;;  %v3445_v49 = vmul.f32 %v11799_v35, %v3427_v9  ;;  %v3456_v7 = vmul.f32 %v9652_v41, %v3444_v15 }
 0xfb9   :  { %v3457_v36 = vmul.f32 %v9652_v41, %v3445_v49  ;;  %v13810_v55 = vadd.f32 %v9653_v11, %v3456_v7 }
 0xfbb   :  { %v13812_v50 = vadd.f32 %v9653_v11, %v3457_v36 }
 0xfbc   :  { %v11801_v13 = vpop.eup %11800 }
 0xfbd   :  { %v3473_v57 = vpack.c.bf16 %v13812_v50, %v13810_v55  ;;  %v3446_v23 = vmul.f32 %v11801_v13, %v3428_v51 }
 0xfbe   :  { %v11803_v58 = vpop.eup %11802 }
 0xfbf   :  { %3697 = vmatmul.mubr.bf16.gmra.mrb[72].mxu0 %v3473_v57  ;;  %10757 = vmatmul.mubr.bf16.gmra.mrb[72].mxu1 %v3473_v57  ;;  %v3447_v5 = vmul.f32 %v11803_v58, %v3429_v12  ;;  %v3458_v29 = vmul.f32 %v9652_v41, %v3446_v23 }
 0xfc0   :  { %3706 = vmatprep.mubr.bf16.mxu0 %v12664_v21  ;;  %10760 = vmatprep.mubr.msk.bf16.mxu1 %vm12662_vm0, %v12661_v0 }
 0xfc1   :  { %v3459_v40 = vmul.f32 %v9652_v41, %v3447_v5  ;;  %v13820_v19 = vadd.f32 %v9653_v11, %v3458_v29 }
 0xfc3   :  { %v13822_v16 = vadd.f32 %v9653_v11, %v3459_v40 }
 0xfc5   :  { %v3474_v17 = vpack.c.bf16 %v13822_v16, %v13820_v19 }
 0xfc7   :  { %3707 = vmatmul.mubr.bf16.gmra.mrb[76].mxu0 %v3474_v17  ;;  %10761 = vmatmul.mubr.bf16.gmra.mrb[76].mxu1 %v3474_v17 }
0x1089   :  { %v3688_v54 = vpop.f32.mrb[68].mxu0  ;;  %v3751_v53 = vpop.f32.mrb[68].mxu1 }
0x108a   :  { %v3752_v47 = vadd.f32 %v3751_v53, %v13827_v30  ;;  %v3690_v14 = vpop.f32.mrb[69].mxu0  ;;  %v10754_v32 = vpop.f32.mrb[69].mxu1  ;;  %v3689_v31 = vadd.f32 %v3688_v54, %v13833_v18 }
0x108b   :  { %v3691_v39 = vadd.f32 %v3690_v14, %v13830_v59  ;;  %v3692_v26 = vpop.f32.mrb[70].mxu0  ;;  %v3754_v44 = vpop.f32.mrb[70].mxu1 }
0x108c   :  { %v13838_v41 = vpack.c.bf16 %v3752_v47, %v3752_v47  ;;  %v3693_v60 = vadd.f32 %v3692_v26, %v13833_v18  ;;  %v3755_v38 = vadd.f32 %v3754_v44, %v13827_v30  ;;  %v3694_v61 = vpop.f32.mrb[71].mxu0  ;;  %v10755_v37 = vpop.f32.mrb[71].mxu1 }
0x108d   :  { %v10018_v42 = vpack.c.bf16 %v3691_v39, %v3691_v39  ;;  %v3695_v6 = vadd.f32 %v3694_v61, %v13830_v59 }
0x108e   :  { %v13843_v43 = vpack.c.bf16 %v3693_v60, %v3689_v31  ;;  %v13845_v8 = vpack.c.bf16 %v3755_v38, %v3755_v38  ;;  %v4232_v63 = vmul.bf16 %v13838_v41, %v13245_v3  ;;  %v4034_v1 = vmul.bf16 %v13838_v41, %v13243_v2 }
0x108f   :  { %v10019_v11 = vpack.c.bf16 %v3695_v6, %v3695_v6  ;;  %v3834_v33 = vmul.bf16 %v10018_v42, %v13243_v2  ;;  %v4040_v24 = vmul.bf16 %v10018_v42, %v13245_v3  ;;  %v4502_v45 = vmul.bf16 %v10018_v42, %v13247_v4 }
0x1090   :  { %10768 = vmatprep.mubr.bf16.mxu0 %v13843_v43  ;;  %10784 = vmatprep.mubr.bf16.mxu1 %v13843_v43  ;;  %v4233_v52 = vmul.bf16 %v13845_v8, %v13245_v3  ;;  %v4035_v27 = vmul.bf16 %v13845_v8, %v13243_v2  ;;  %v4694_v62 = vmul.bf16 %v13838_v41, %v13247_v4 }
0x1091   :  { %v3835_v28 = vmul.bf16 %v10019_v11, %v13243_v2  ;;  %v4041_v9 = vmul.bf16 %v10019_v11, %v13245_v3  ;;  %v4503_v15 = vmul.bf16 %v10019_v11, %v13247_v4  ;;  %v4695_v35 = vmul.bf16 %v13845_v8, %v13247_v4 }
0x1092   :  { %v3698_v49 = vpop.f32.mrb[72].mxu0  ;;  %v3759_v7 = vpop.f32.mrb[72].mxu1  ;;  %v13867_v36 = vcombine.low %v4232_v63, %v4233_v52  ;;  %v13869_v51 = vcombine.low %v4034_v1, %v4035_v27  ;;  %v4838_v13 = vmul.bf16 %v10018_v42, %v13317_v25  ;;  %v4839_v12 = vmul.bf16 %v10019_v11, %v13317_v25 }
0x1093   :  { %v3700_v57 = vpop.f32.mrb[73].mxu0  ;;  %v10758_v23 = vpop.f32.mrb[73].mxu1  ;;  %v9691_v58 = vcombine.low %v3834_v33, %v3835_v28  ;;  %v9696_v5 = vcombine.low %v4040_v24, %v4041_v9  ;;  %v13874_v56 = vcombine.low %v4502_v45, %v4503_v15  ;;  %v13876_v54 = vcombine.low %v4694_v62, %v4695_v35 }
0x1094   :  { %v3701_v29 = vadd.f32 %v3700_v57, %v13830_v59  ;;  %v3702_v40 = vpop.f32.mrb[74].mxu0  ;;  %v3762_v17 = vpop.f32.mrb[74].mxu1  ;;  %v13878_v53 = vcombine.low %v4838_v13, %v4839_v12  ;;  %v3699_v47 = vadd.f32 %v3698_v49, %v13833_v18  ;;  %v3760_v37 = vadd.f32 %v3759_v7, %v13827_v30 }
0x1095   :  { %v3703_v14 = vadd.f32 %v3702_v40, %v13833_v18  ;;  %v3704_v32 = vpop.f32.mrb[75].mxu0  ;;  %v10759_v39 = vpop.f32.mrb[75].mxu1  ;;  %10764 = vmatprep.subr.bf16.mxu0 %v9691_v58  ;;  %v3763_v44 = vadd.f32 %v3762_v17, %v13827_v30  ;;  %10780 = vmatprep.subr.bf16.mxu1 %v9696_v5 }
0x1096   :  { %v13882_v26 = vpack.c.bf16 %v3701_v29, %v3701_v29  ;;  %10765 = vmatpush3.bf16.xpose.msra.mxu0 %v9691_v58  ;;  %v3705_v60 = vadd.f32 %v3704_v32, %v13830_v59  ;;  %10781 = vmatpush3.bf16.xpose.msra.mxu1 %v9696_v5  ;;  %v13899_v13 = vpack.c.bf16 %v3760_v37, %v3760_v37 }
0x1097   :  { %v3775_v31 = vpack.c.bf16 %v3703_v14, %v3699_v47  ;;  %v13891_v42 = vpack.c.bf16 %v3763_v44, %v3763_v44 }
0x1098   :  { %v3836_v38 = vmul.bf16 %v13882_v26, %v13243_v2  ;;  %v4042_v61 = vmul.bf16 %v13882_v26, %v13245_v3  ;;  %v10021_v33 = vpack.c.bf16 %v3705_v60, %v3705_v60  ;;  %v4234_v37 = vmul.bf16 %v13899_v13, %v13245_v3 }
0x1099   :  { %v4235_v23 = vmul.bf16 %v13891_v42, %v13245_v3  ;;  %v3783_v32 = vunpack.c.h.b16 %v3775_v31  ;;  %v4037_v60 = vmul.bf16 %v13891_v42, %v13243_v2 }
0x109a   :  { %v3708_v6 = vpop.f32.mrb[76].mxu0  ;;  %v3767_v63 = vpop.f32.mrb[76].mxu1  ;;  %v9692_v1 = vcombine.low %v3836_v38, %v3836_v38  ;;  %v9697_v11 = vcombine.low %v4042_v61, %v4042_v61  ;;  %v3837_v5 = vmul.bf16 %v10021_v33, %v13243_v2  ;;  %v4043_v29 = vmul.bf16 %v10021_v33, %v13245_v3 }
0x109b   :  { %v3768_v24 = vadd.f32 %v3767_v63, %v13827_v30  ;;  %v3710_v45 = vpop.f32.mrb[77].mxu0  ;;  %v10762_v52 = vpop.f32.mrb[77].mxu1  ;;  %v3709_v9 = vadd.f32 %v3708_v6, %v13833_v18  ;;  %v13919_v63 = vpack.c.bf16 %v3699_v47, %v3699_v47  ;;  %v9701_v47 = vcombine.low %v4234_v37, %v4234_v37 }
0x109c   :  { %v3711_v27 = vadd.f32 %v3710_v45, %v13830_v59  ;;  %v3712_v62 = vpop.f32.mrb[78].mxu0  ;;  %v13895_v28 = vpop.f32.mrb[78].mxu1  ;;  %10766 = vmatprep.subr.bf16.mxu0 %v9692_v1  ;;  %10782 = vmatprep.subr.bf16.mxu1 %v9697_v11  ;;  %v4697_v52 = vmul.bf16 %v13891_v42, %v13247_v4 }
0x109d   :  { %v10028_v15 = vpack.c.bf16 %v3768_v24, %v3768_v24  ;;  %v3713_v35 = vadd.f32 %v3712_v62, %v13833_v18  ;;  %v3714_v49 = vpop.f32.mrb[79].mxu0  ;;  %v10763_v7 = vpop.f32.mrb[79].mxu1  ;;  %v4505_v24 = vmul.bf16 %v10021_v33, %v13247_v4 }
0x109e   :  { %v10022_v12 = vpack.c.bf16 %v3711_v27, %v3711_v27  ;;  %v3715_v57 = vadd.f32 %v3714_v49, %v13830_v59  ;;  %10767 = vmatpush3.bf16.xpose.msra.mxu0 %v9692_v1  ;;  %10783 = vmatpush3.bf16.xpose.msra.mxu1 %v9697_v11  ;;  %v4841_v49 = vmul.bf16 %v10021_v33, %v13317_v25 }
0x109f   :  { %v3776_v58 = vpack.c.bf16 %v3713_v35, %v3709_v9  ;;  %v4236_v40 = vmul.bf16 %v10028_v15, %v13245_v3  ;;  %10796 = vmatprep.subr.bf16.mxu1 %v13867_v36  ;;  %v4038_v14 = vmul.bf16 %v10028_v15, %v13243_v2  ;;  %v4698_v27 = vmul.bf16 %v10028_v15, %v13247_v4 }
0x10a0   :  { %v13907_v18 = vpack.c.bf16 %v3715_v57, %v3715_v57  ;;  %v3838_v17 = vmul.bf16 %v10022_v12, %v13243_v2  ;;  %v4044_v59 = vmul.bf16 %v10022_v12, %v13245_v3  ;;  %v4506_v45 = vmul.bf16 %v10022_v12, %v13247_v4 }
0x10a1   :  { %v3784_v39 = vunpack.c.l.b16 %v3776_v58  ;;  %v9704_v44 = vcombine.low %v4235_v23, %v4236_v40  ;;  %v13923_v11 = vcombine.low %v4037_v60, %v4038_v14  ;;  %v13936_v9 = vcombine.low %v4697_v52, %v4698_v27 }
0x10a2   :  { %v9694_v38 = vcombine.low %v3837_v5, %v3838_v17  ;;  %v3839_v61 = vmul.bf16 %v13907_v18, %v13243_v2  ;;  %v9698_v6 = vcombine.low %v4043_v29, %v4044_v59  ;;  %v13932_v62 = vcombine.low %v4505_v24, %v4506_v45 }
0x10a3   :  { %v13921_v1 = vpack.c.b16 %v3784_v39, %v3783_v32  ;;  %v4842_v7 = vmul.bf16 %v10022_v12, %v13317_v25  ;;  %v5030_v57 = vmul.bf16 %v13838_v41, %v13317_v25  ;;  %v5031_v23 = vmul.bf16 %v13845_v8, %v13317_v25 }
0x10a4   :  { %10772 = vmatprep.subr.bf16.mxu0 %v9694_v38  ;;  %v9695_v31 = vcombine.low %v3839_v61, %v3839_v61  ;;  %v4254_v5 = vsel %vm409_vm1, %v9701_v47, 0  ;;  %v5033_v33 = vmul.bf16 %v13891_v42, %v13317_v25  ;;  %v5034_v12 = vmul.bf16 %v10028_v15, %v13317_v25 }
0x10a5   :  { %10769 = vmatmul.mubr.bf16.vlgmr.msra.gmra.mrb[80].mxu0 %v13919_v63  ;;  %10785 = vmatmul.mubr.bf16.vlgmr.msra.gmra.mrb[80].mxu1 %v13919_v63  ;;  %v13945_v58 = vcombine.low %v4841_v49, %v4842_v7  ;;  %v4045_v41 = vmul.bf16 %v13907_v18, %v13245_v3  ;;  %v13958_v8 = vpack.c.bf16 %v3713_v35, %v3713_v35 }
0x10a6   :  { %10773 = vmatpush3.bf16.xpose.msra.mxu0 %v9694_v38  ;;  %10776 = vmatprep.mubr.bf16.mxu0 %v13921_v1  ;;  %v13954_v29 = vcombine.low %v5033_v33, %v5034_v12  ;;  %v3771_v42 = vadd.f32 %v13895_v28, %v13827_v30 }
0x10a7   :  { %10797 = vmatpush3.bf16.msra.mxu1 %v13867_v36  ;;  %10774 = vmatprep.subr.bf16.mxu0 %v9695_v31  ;;  %v13948_v36 = vcombine.low %v5030_v57, %v5031_v23  ;;  %v9699_v40 = vcombine.low %v4045_v41, %v4045_v41 }
0x10a8   :  { %11240 = vmatprep.subr.msk.bf16.mxu1 %vm409_vm1, %v9701_v47  ;;  %v13964_v15 = vpack.c.bf16 %v3771_v42, %v3771_v42 }
0x10aa   :  { %v4237_v17 = vmul.bf16 %v13964_v15, %v13245_v3 }
0x10ab   :  { %10799 = vmatpush3.bf16.msra.mxu1 %v4254_v5 }
0x10ac   :  { %10812 = vmatprep.subr.bf16.mxu1 %v13869_v51  ;;  %v9705_v35 = vcombine.low %v4237_v17, %v4237_v17 }
0x10ae   :  { %10775 = vmatpush3.bf16.xpose.msra.mxu0 %v9695_v31  ;;  %v4320_v59 = vsel %vm409_vm1, %v9705_v35, 0 }
0x10af   :  { %10788 = vmatprep.subr.bf16.mxu0 %v9698_v6 }
0x10b5   :  { %10777 = vmatmul.mubr.bf16.vlgmr.msra.gmra.mrb[84].mxu0 %v13958_v8 }
0x10b6   :  { %10789 = vmatpush3.bf16.xpose.msra.mxu0 %v9698_v6  ;;  %10792 = vmatprep.mubr.bf16.mxu0 %v13921_v1 }
0x10b7   :  { %10790 = vmatprep.subr.bf16.mxu0 %v9699_v40 }
0x10be   :  { %10791 = vmatpush3.bf16.xpose.msra.mxu0 %v9699_v40 }
0x10bf   :  { %10804 = vmatprep.subr.bf16.mxu0 %v9704_v44 }
0x10c5   :  { %10793 = vmatmul.mubr.bf16.vlgmr.msra.gmra.mrb[88].mxu0 %v13958_v8 }
0x10c6   :  { %10805 = vmatpush3.bf16.msra.mxu0 %v9704_v44 }
0x10c7   :  { %11241 = vmatprep.subr.msk.bf16.mxu0 %vm409_vm1, %v9705_v35 }
0x10ca   :  { %10807 = vmatpush3.bf16.msra.mxu0 %v4320_v59 }
0x10cb   :  { %10820 = vmatprep.subr.bf16.mxu0 %v13923_v11 }
0x1178   :  { %v13972_v14 = vpop.f32.mrb[80].mxu0  ;;  %v10786_v30 = vpop.f32.mrb[80].mxu1 }
0x1179   :  { %v3888_v28 = vpop.f32.mrb[81].mxu0  ;;  %v4090_v32 = vpop.f32.mrb[81].mxu1  ;;  %v4168_v6 = vsel %vm1127_vm3, %v10786_v30, -inf  ;;  %v3970_v41 = vsel %vm1127_vm3, %v13972_v14, -inf }
0x117a   :  { %v10771_v39 = vpop.f32.mrb[82].mxu0  ;;  %v10787_v60 = vpop.f32.mrb[82].mxu1  ;;  %v4162_v38 = vsel %vm1127_vm3, %v4090_v32, -inf  ;;  %v3964_v31 = vsel %vm1127_vm3, %v3888_v28, -inf }
0x117b   :  { %v3891_v61 = vpop.f32.mrb[83].mxu0  ;;  %4163 = vmax.xlane.f32.xlu0 %v4162_v38  ;;  %v4093_v37 = vpop.f32.mrb[83].mxu1 }
0x117c   :  { %v4165_v44 = vsel %vm1127_vm3, %v4093_v37, -inf  ;;  %v3967_v24 = vsel %vm1127_vm3, %v3891_v61, -inf }
0x117d   :  { %4166 = vmax.xlane.f32.xlu1 %v4165_v44 }
0x117f   :  { %4169 = vmax.xlane.f32.xlu0 %v4168_v6 }
0x1181   :  { %3965 = vmax.xlane.f32.xlu1 %v3964_v31 }
0x1183   :  { %3968 = vmax.xlane.f32.xlu0 %v3967_v24 }
0x1188   :  { %v13979_v45 = vpop.f32.mrb[84].mxu0 }
0x1189   :  { %v13981_v52 = vpop.f32.mrb[85].mxu0  ;;  %v3979_v17 = vsel %vm1127_vm3, %v13979_v45, -inf }
0x118a   :  { %v10779_v27 = vpop.f32.mrb[86].mxu0  ;;  %v3973_v40 = vsel %vm1127_vm3, %v13981_v52, -inf }
0x118b   :  { %v13983_v47 = vpop.f32.mrb[87].mxu0 }
0x118c   :  { %v3976_v42 = vsel %vm1127_vm3, %v13983_v47, -inf }
0x1198   :  { %v13985_v49 = vpop.f32.mrb[88].mxu0 }
0x1199   :  { %v4148_v7 = vpop.f32.mrb[89].mxu0  ;;  %v4177_v12 = vsel %vm1127_vm3, %v13985_v49, -inf }
0x119a   :  { %v10795_v57 = vpop.f32.mrb[90].mxu0  ;;  %v4171_v23 = vsel %vm1127_vm3, %v4148_v7, -inf }
0x119b   :  { %4172 = vmax.xlane.f32.xlu1 %v4171_v23  ;;  %v4151_v5 = vpop.f32.mrb[91].mxu0 }
0x119c   :  { %v4174_v33 = vsel %vm1127_vm3, %v4151_v5, -inf }
0x119d   :  { %4175 = vmax.xlane.f32.xlu0 %v4174_v33 }
0x119f   :  { %4178 = vmax.xlane.f32.xlu1 %v4177_v12 }
0x11a1   :  { %3971 = vmax.xlane.f32.xlu0 %v3970_v41 }
0x11a3   :  { %3974 = vmax.xlane.f32.xlu1 %v3973_v40 }
0x11a5   :  { %3977 = vmax.xlane.f32.xlu0 %v3976_v42 }
0x11a7   :  { %3980 = vmax.xlane.f32.xlu1 %v3979_v17 }
0x1208   :  { %v4164_v35 = vpop.xlane.xlu0 %4163 }
0x1209   :  { %v4180_v59 = vsub.f32 %v4090_v32, %v4164_v35 }
0x120a   :  { %v4167_v39 = vpop.xlane.xlu1 %4166 }
0x120b   :  { %v4186_v60 = vmul.f32 1.442695, %v4180_v59  ;;  %v4181_v38 = vsub.f32 %v4093_v37, %v4167_v39 }
0x120c   :  { %v4170_v44 = vpop.xlane.xlu0 %4169 }
0x120d   :  { %11804 = vpow2.f32 %v4186_v60  ;;  %v4188_v6 = vmul.f32 1.442695, %v4181_v38  ;;  %v4182_v31 = vsub.f32 %v10786_v30, %v4170_v44 }
0x120e   :  { %v3966_v24 = vpop.xlane.xlu1 %3965 }
0x120f   :  { %11806 = vpow2.f32 %v4188_v6  ;;  %v4190_v27 = vmul.f32 1.442695, %v4182_v31  ;;  %v3982_v57 = vsub.f32 %v3888_v28, %v3966_v24 }
0x1210   :  { %v3969_v23 = vpop.xlane.xlu0 %3968 }
0x1211   :  { %11808 = vpow2.f32 %v4190_v27  ;;  %v3988_v33 = vmul.f32 1.442695, %v3982_v57  ;;  %v3983_v12 = vsub.f32 %v3891_v61, %v3969_v23 }
0x1213   :  { %11810 = vpow2.f32 %v3988_v33  ;;  %v3990_v41 = vmul.f32 1.442695, %v3983_v12 }
0x1215   :  { %11812 = vpow2.f32 %v3990_v41 }
0x1217   :  { %v13999_v40 = vpop.eup %11804 }
0x1218   :  { %v4198_v32 = vsel %vm1127_vm3, %v13999_v40, 0.0 }
0x1219   :  { %v14003_v37 = vpop.eup %11806  ;;  %4199 = vadd.xlane.f32.xlu0 %v4198_v32 }
0x121a   :  { %v4201_v30 = vsel %vm1127_vm3, %v14003_v37, 0.0 }
0x121b   :  { %v14007_v42 = vpop.eup %11808  ;;  %4202 = vadd.xlane.f32.xlu1 %v4201_v30 }
0x121c   :  { %v4204_v28 = vsel %vm1127_vm3, %v14007_v42, 0.0 }
0x121d   :  { %v14011_v61 = vpop.eup %11810  ;;  %4205 = vadd.xlane.f32.xlu0 %v4204_v28 }
0x121e   :  { %v4000_v17 = vsel %vm1127_vm3, %v14011_v61, 0.0 }
0x121f   :  { %v14015_v35 = vpop.eup %11812  ;;  %4001 = vadd.xlane.f32.xlu1 %v4000_v17 }
0x1220   :  { %v4003_v59 = vsel %vm1127_vm3, %v14015_v35, 0.0 }
0x1221   :  { %4004 = vadd.xlane.f32.xlu0 %v4003_v59 }
0x1228   :  { %v4173_v39 = vpop.xlane.xlu1 %4172 }
0x1229   :  { %v4183_v60 = vsub.f32 %v4148_v7, %v4173_v39 }
0x122a   :  { %v4176_v38 = vpop.xlane.xlu0 %4175 }
0x122b   :  { %v4192_v44 = vmul.f32 1.442695, %v4183_v60  ;;  %v4184_v6 = vsub.f32 %v4151_v5, %v4176_v38 }
0x122c   :  { %v4179_v31 = vpop.xlane.xlu1 %4178 }
0x122d   :  { %11814 = vpow2.f32 %v4192_v44  ;;  %v4194_v24 = vmul.f32 1.442695, %v4184_v6  ;;  %v4185_v27 = vsub.f32 %v13985_v49, %v4179_v31 }
0x122e   :  { %v3972_v57 = vpop.xlane.xlu0 %3971 }
0x122f   :  { %11816 = vpow2.f32 %v4194_v24  ;;  %v4196_v23 = vmul.f32 1.442695, %v4185_v27  ;;  %v3984_v33 = vsub.f32 %v13972_v14, %v3972_v57 }
0x1230   :  { %v3975_v12 = vpop.xlane.xlu1 %3974 }
0x1231   :  { %11818 = vpow2.f32 %v4196_v23  ;;  %v3992_v41 = vmul.f32 1.442695, %v3984_v33  ;;  %v3985_v32 = vsub.f32 %v13981_v52, %v3975_v12 }
0x1232   :  { %v3978_v30 = vpop.xlane.xlu0 %3977 }
0x1233   :  { %11820 = vpow2.f32 %v3992_v41  ;;  %v3994_v7 = vmul.f32 1.442695, %v3985_v32  ;;  %v3986_v5 = vsub.f32 %v13983_v47, %v3978_v30 }
0x1234   :  { %v3981_v28 = vpop.xlane.xlu1 %3980 }
0x1235   :  { %11822 = vpow2.f32 %v3994_v7  ;;  %v3996_v17 = vmul.f32 1.442695, %v3986_v5  ;;  %v3987_v49 = vsub.f32 %v13979_v45, %v3981_v28 }
0x1237   :  { %v14024_v59 = vpop.eup %11814  ;;  %11824 = vpow2.f32 %v3996_v17  ;;  %v3998_v39 = vmul.f32 1.442695, %v3987_v49 }
0x1238   :  { %v4207_v14 = vsel %vm1127_vm3, %v14024_v59, 0.0 }
0x1239   :  { %v14028_v60 = vpop.eup %11816  ;;  %11826 = vpow2.f32 %v3998_v39  ;;  %4208 = vadd.xlane.f32.xlu1 %v4207_v14 }
0x123a   :  { %v4210_v52 = vsel %vm1127_vm3, %v14028_v60, 0.0 }
0x123b   :  { %v14032_v47 = vpop.eup %11818  ;;  %4211 = vadd.xlane.f32.xlu0 %v4210_v52  ;;  %v4036_v52 = vmul.bf16 %v13899_v13, %v13243_v2 }
0x123c   :  { %v4213_v45 = vsel %vm1127_vm3, %v14032_v47, 0.0 }
0x123d   :  { %v14036_v38 = vpop.eup %11820  ;;  %4214 = vadd.xlane.f32.xlu1 %v4213_v45 }
0x123e   :  { %v4006_v44 = vsel %vm1127_vm3, %v14036_v38, 0.0 }
0x123f   :  { %v14040_v6 = vpop.eup %11822  ;;  %4007 = vadd.xlane.f32.xlu0 %v4006_v44 }
0x1240   :  { %v4009_v31 = vsel %vm1127_vm3, %v14040_v6, 0.0 }
0x1241   :  { %v14044_v24 = vpop.eup %11824  ;;  %4010 = vadd.xlane.f32.xlu1 %v4009_v31 }
0x1242   :  { %v4012_v27 = vsel %vm1127_vm3, %v14044_v24, 0.0 }
0x1243   :  { %v14048_v57 = vpop.eup %11826  ;;  %4013 = vadd.xlane.f32.xlu0 %v4012_v27  ;;  %v9709_v27 = vcombine.low %v4036_v52, %v4036_v52 }
0x1244   :  { %v4015_v23 = vsel %vm1127_vm3, %v14048_v57, 0.0 }
0x1245   :  { %4016 = vadd.xlane.f32.xlu1 %v4015_v23 }
0x12a6   :  { %v4200_v33 = vpop.xlane.xlu0 %4199 }
0x12a7   :  { %11828 = vrcp.f32 %v4200_v33 }
0x12a8   :  { %v4203_v12 = vpop.xlane.xlu1 %4202 }
0x12a9   :  { %11830 = vrcp.f32 %v4203_v12 }
0x12aa   :  { %v4206_v41 = vpop.xlane.xlu0 %4205 }
0x12ab   :  { %11832 = vrcp.f32 %v4206_v41 }
0x12ac   :  { %v4002_v32 = vpop.xlane.xlu1 %4001 }
0x12ad   :  { %11834 = vrcp.f32 %v4002_v32 }
0x12ae   :  { %v4005_v30 = vpop.xlane.xlu0 %4004 }
0x12af   :  { %11836 = vrcp.f32 %v4005_v30 }
0x12b1   :  { %v11829_v7 = vpop.eup %11828 }
0x12b2   :  { %v4222_v28 = vmul.f32 %v11829_v7, %v13999_v40 }
0x12b3   :  { %v11831_v5 = vpop.eup %11830 }
0x12b4   :  { %v4223_v17 = vmul.f32 %v11831_v5, %v14003_v37 }
0x12b5   :  { %v11833_v49 = vpop.eup %11832 }
0x12b6   :  { %v4228_v39 = vpack.c.bf16 %v4223_v17, %v4222_v28  ;;  %v4224_v14 = vmul.f32 %v11833_v49, %v14007_v42  ;;  %v4386_v42 = vsel %vm409_vm1, %v9709_v27, 0 }
0x12b7   :  { %v11835_v45 = vpop.eup %11834 }
0x12b8   :  { %10800 = vmatprep.mubr.msk.bf16.mxu1 %vm1127_vm3, %v4228_v39  ;;  %v4229_v44 = vpack.c.bf16 %v4224_v14, %v4224_v14  ;;  %v4024_v23 = vmul.f32 %v11835_v45, %v14011_v61  ;;  %v4039_v14 = vmul.bf16 %v13964_v15, %v13243_v2 }
0x12b9   :  { %v11837_v31 = vpop.eup %11836 }
0x12ba   :  { %10801 = vmatmul.mubr.msk.bf16.vlgmr.msra.gmra.mrb[84].mxu1 %vm1127_vm3, %v4229_v44  ;;  %v4025_v40 = vmul.f32 %v11837_v31, %v14015_v35  ;;  %v4504_v31 = vmul.bf16 %v13882_v26, %v13247_v4 }
0x12bb   :  { %10813 = vmatpush3.bf16.msra.mxu1 %v13869_v51 }
0x12bc   :  { %11242 = vmatprep.subr.msk.bf16.mxu1 %vm409_vm1, %v9709_v27  ;;  %v4030_v37 = vpack.c.bf16 %v4025_v40, %v4024_v23 }
0x12be   :  { %10816 = vmatprep.mubr.msk.bf16.mxu1 %vm1127_vm3, %v4030_v37 }
0x12bf   :  { %10815 = vmatpush3.bf16.msra.mxu1 %v4386_v42 }
0x12c0   :  { %10828 = vmatprep.subr.bf16.mxu1 %v13874_v56 }
0x12c6   :  { %v4209_v33 = vpop.xlane.xlu1 %4208 }
0x12c7   :  { %11838 = vrcp.f32 %v4209_v33 }
0x12c8   :  { %v4212_v12 = vpop.xlane.xlu0 %4211 }
0x12c9   :  { %11840 = vrcp.f32 %v4212_v12  ;;  %v4696_v12 = vmul.bf16 %v13899_v13, %v13247_v4 }
0x12ca   :  { %v4215_v41 = vpop.xlane.xlu1 %4214 }
0x12cb   :  { %11842 = vrcp.f32 %v4215_v41 }
0x12cc   :  { %v4008_v61 = vpop.xlane.xlu0 %4007 }
0x12cd   :  { %11844 = vrcp.f32 %v4008_v61 }
0x12ce   :  { %v4011_v35 = vpop.xlane.xlu1 %4010 }
0x12cf   :  { %11846 = vrcp.f32 %v4011_v35 }
0x12d0   :  { %v4014_v51 = vpop.xlane.xlu0 %4013 }
0x12d1   :  { %v11839_v32 = vpop.eup %11838  ;;  %11848 = vrcp.f32 %v4014_v51 }
0x12d2   :  { %v4017_v30 = vpop.xlane.xlu1 %4016  ;;  %v4225_v5 = vmul.f32 %v11839_v32, %v14024_v59  ;;  %v9713_v59 = vcombine.low %v4039_v14, %v4039_v14 }
0x12d3   :  { %v11841_v7 = vpop.eup %11840  ;;  %11850 = vrcp.f32 %v4017_v30 }
0x12d4   :  { %v4226_v28 = vmul.f32 %v11841_v7, %v14028_v60  ;;  %v4452_v42 = vsel %vm409_vm1, %v9713_v59, 0 }
0x12d5   :  { %v11843_v17 = vpop.eup %11842 }
0x12d6   :  { %v4230_v49 = vpack.c.bf16 %v4226_v28, %v4225_v5  ;;  %v4227_v39 = vmul.f32 %v11843_v17, %v14032_v47  ;;  %v9717_v47 = vcombine.low %v4504_v31, %v4504_v31 }
0x12d7   :  { %v11845_v52 = vpop.eup %11844 }
0x12d8   :  { %10808 = vmatprep.mubr.msk.bf16.mxu0 %vm1127_vm3, %v4230_v49  ;;  %v4231_v45 = vpack.c.bf16 %v4227_v39, %v4227_v39  ;;  %v4026_v44 = vmul.f32 %v11845_v52, %v14036_v38 }
0x12d9   :  { %v11847_v27 = vpop.eup %11846 }
0x12da   :  { %10809 = vmatmul.mubr.msk.bf16.vlgmr.msra.gmra.mrb[92].mxu0 %vm1127_vm3, %v4231_v45  ;;  %v4031_v60 = vpack.c.bf16 %v4026_v44, %v4026_v44  ;;  %v4027_v40 = vmul.f32 %v11847_v27, %v14040_v6  ;;  %v4507_v6 = vmul.bf16 %v13907_v18, %v13247_v4 }
0x12db   :  { %v11849_v23 = vpop.eup %11848  ;;  %10821 = vmatpush3.bf16.msra.mxu0 %v13923_v11 }
0x12dc   :  { %11243 = vmatprep.subr.msk.bf16.mxu0 %vm409_vm1, %v9713_v59  ;;  %10817 = vmatmul.mubr.msk.bf16.vlgmr.msra.gmra.mrb[84].mxu1 %vm1127_vm3, %v4031_v60  ;;  %v4028_v38 = vmul.f32 %v11849_v23, %v14044_v24 }
0x12dd   :  { %v11851_v37 = vpop.eup %11850  ;;  %10829 = vmatpush3.bf16.xpose.msra.mxu1 %v13874_v56  ;;  %10832 = vmatprep.mubr.bf16.mxu1 %v13843_v43  ;;  %v9719_v56 = vcombine.low %v4507_v6, %v4507_v6 }
0x12de   :  { %10830 = vmatprep.subr.bf16.mxu1 %v9717_v47  ;;  %v4032_v33 = vpack.c.bf16 %v4028_v38, %v4027_v40  ;;  %v4029_v11 = vmul.f32 %v11851_v37, %v14048_v57  ;;  %v9721_v57 = vcombine.low %v4696_v12, %v4696_v12 }
0x12df   :  { %10823 = vmatpush3.bf16.msra.mxu0 %v4452_v42 }
0x12e0   :  { %10836 = vmatprep.subr.bf16.mxu0 %v13932_v62  ;;  %10824 = vmatprep.mubr.msk.bf16.mxu0 %vm1127_vm3, %v4032_v33  ;;  %v4033_v24 = vpack.c.bf16 %v4029_v11, %v4029_v11  ;;  %v4716_v41 = vsel %vm409_vm1, %v9721_v57, 0 }
0x12e5   :  { %10831 = vmatpush3.bf16.xpose.msra.mxu1 %v9717_v47 }
0x12e6   :  { %10844 = vmatprep.subr.bf16.mxu1 %v13876_v54  ;;  %10825 = vmatmul.mubr.msk.bf16.vlgmr.msra.gmra.mrb[92].mxu0 %vm1127_vm3, %v4033_v24 }
0x12e7   :  { %10840 = vmatprep.mubr.bf16.mxu0 %v13921_v1 }
0x12e8   :  { %10837 = vmatpush3.bf16.xpose.msra.mxu0 %v13932_v62  ;;  %v4699_v62 = vmul.bf16 %v13964_v15, %v13247_v4 }
0x12e9   :  { %10838 = vmatprep.subr.bf16.mxu0 %v9719_v56 }
0x12ea   :  { %v9725_v61 = vcombine.low %v4699_v62, %v4699_v62 }
0x12ec   :  { %10833 = vmatmul.mubr.bf16.vlgmr.msra.gmra.mrb[88].mxu1 %v13919_v63 }
0x12ed   :  { %10845 = vmatpush3.bf16.msra.mxu1 %v13876_v54  ;;  %v4782_v54 = vsel %vm409_vm1, %v9725_v61, 0 }
0x12ee   :  { %11244 = vmatprep.subr.msk.bf16.mxu1 %vm409_vm1, %v9721_v57 }
0x12f0   :  { %10839 = vmatpush3.bf16.xpose.msra.mxu0 %v9719_v56 }
0x12f1   :  { %10847 = vmatpush3.bf16.msra.mxu1 %v4716_v41  ;;  %10852 = vmatprep.subr.bf16.mxu0 %v13936_v9 }
0x12f2   :  { %10860 = vmatprep.subr.bf16.mxu1 %v13878_v53 }
0x12f7   :  { %10841 = vmatmul.mubr.bf16.vlgmr.msra.gmra.mrb[96].mxu0 %v13958_v8 }
0x12f8   :  { %10853 = vmatpush3.bf16.msra.mxu0 %v13936_v9 }
0x12f9   :  { %11245 = vmatprep.subr.msk.bf16.mxu0 %vm409_vm1, %v9725_v61 }
0x12fc   :  { %10855 = vmatpush3.bf16.msra.mxu0 %v4782_v54 }
0x12fd   :  { %10868 = vmatprep.subr.bf16.mxu0 %v13945_v58 }
0x13bf   :  { %v10834_v35 = vpop.f32.mrb[88].mxu1 }
0x13c0   :  { %v4552_v51 = vpop.f32.mrb[89].mxu1  ;;  %v4630_v28 = vsel %vm1127_vm3, %v10834_v35, -inf }
0x13c1   :  { %v10835_v32 = vpop.f32.mrb[90].mxu1  ;;  %v4624_v30 = vsel %vm1127_vm3, %v4552_v51, -inf }
0x13c2   :  { %4625 = vmax.xlane.f32.xlu0 %v4624_v30  ;;  %v4555_v7 = vpop.f32.mrb[91].mxu1 }
0x13c3   :  { %v4627_v5 = vsel %vm1127_vm3, %v4555_v7, -inf }
0x13c4   :  { %4628 = vmax.xlane.f32.xlu1 %v4627_v5 }
0x13c6   :  { %4631 = vmax.xlane.f32.xlu0 %v4630_v28 }
0x13ca   :  { %v10842_v9 = vpop.f32.mrb[96].mxu0 }
0x13cb   :  { %v4610_v17 = vpop.f32.mrb[97].mxu0  ;;  %v4639_v45 = vsel %vm1127_vm3, %v10842_v9, -inf }
0x13cc   :  { %v10843_v49 = vpop.f32.mrb[98].mxu0  ;;  %v4633_v39 = vsel %vm1127_vm3, %v4610_v17, -inf }
0x13cd   :  { %4634 = vmax.xlane.f32.xlu1 %v4633_v39  ;;  %v4613_v14 = vpop.f32.mrb[99].mxu0 }
0x13ce   :  { %v4636_v52 = vsel %vm1127_vm3, %v4613_v14, -inf }
0x13cf   :  { %4637 = vmax.xlane.f32.xlu0 %v4636_v52 }
0x13d1   :  { %4640 = vmax.xlane.f32.xlu1 %v4639_v45 }
0x144f   :  { %v4626_v44 = vpop.xlane.xlu0 %4625 }
0x1450   :  { %v4642_v31 = vsub.f32 %v4552_v51, %v4626_v44 }
0x1451   :  { %v4629_v27 = vpop.xlane.xlu1 %4628 }
0x1452   :  { %v4648_v59 = vmul.f32 1.442695, %v4642_v31  ;;  %v4643_v60 = vsub.f32 %v4555_v7, %v4629_v27 }
0x1453   :  { %v4632_v23 = vpop.xlane.xlu0 %4631 }
0x1454   :  { %11852 = vpow2.f32 %v4648_v59  ;;  %v4650_v47 = vmul.f32 1.442695, %v4643_v60  ;;  %v4644_v40 = vsub.f32 %v10834_v35, %v4632_v23 }
0x1456   :  { %11854 = vpow2.f32 %v4650_v47  ;;  %v4652_v38 = vmul.f32 1.442695, %v4644_v40  ;;  %v4840_v40 = vmul.bf16 %v13882_v26, %v13317_v25  ;;  %v4843_v26 = vmul.bf16 %v13907_v18, %v13317_v25 }
0x1458   :  { %11856 = vpow2.f32 %v4652_v38 }
0x145a   :  { %v4635_v37 = vpop.xlane.xlu1 %4634 }
0x145b   :  { %v4645_v42 = vsub.f32 %v4610_v17, %v4635_v37  ;;  %v9729_v37 = vcombine.low %v4840_v40, %v4840_v40 }
0x145c   :  { %v4638_v33 = vpop.xlane.xlu0 %4637 }
0x145d   :  { %v4654_v11 = vmul.f32 1.442695, %v4645_v42  ;;  %v4646_v6 = vsub.f32 %v4613_v14, %v4638_v33 }
0x145e   :  { %v11853_v24 = vpop.eup %11852  ;;  %v4641_v56 = vpop.xlane.xlu1 %4640 }
0x145f   :  { %11858 = vpow2.f32 %v4654_v11  ;;  %v4656_v12 = vmul.f32 1.442695, %v4646_v6  ;;  %v4647_v57 = vsub.f32 %v10842_v9, %v4641_v56  ;;  %v4660_v41 = vsel %vm1127_vm3, %v11853_v24, 0.0 }
0x1460   :  { %v11855_v62 = vpop.eup %11854  ;;  %4661 = vadd.xlane.f32.xlu0 %v4660_v41 }
0x1461   :  { %11860 = vpow2.f32 %v4656_v12  ;;  %v4658_v61 = vmul.f32 1.442695, %v4647_v57  ;;  %v4663_v54 = vsel %vm1127_vm3, %v11855_v62, 0.0 }
0x1462   :  { %v11857_v35 = vpop.eup %11856  ;;  %4664 = vadd.xlane.f32.xlu1 %v4663_v54 }
0x1463   :  { %11862 = vpow2.f32 %v4658_v61  ;;  %v4666_v51 = vsel %vm1127_vm3, %v11857_v35, 0.0 }
0x1464   :  { %4667 = vadd.xlane.f32.xlu0 %v4666_v51 }
0x1469   :  { %v11859_v32 = vpop.eup %11858 }
0x146a   :  { %v4669_v30 = vsel %vm1127_vm3, %v11859_v32, 0.0 }
0x146b   :  { %v11861_v7 = vpop.eup %11860  ;;  %4670 = vadd.xlane.f32.xlu1 %v4669_v30 }
0x146c   :  { %v4672_v5 = vsel %vm1127_vm3, %v11861_v7, 0.0 }
0x146d   :  { %v11863_v28 = vpop.eup %11862  ;;  %4673 = vadd.xlane.f32.xlu0 %v4672_v5 }
0x146e   :  { %v4675_v9 = vsel %vm1127_vm3, %v11863_v28, 0.0 }
0x146f   :  { %4676 = vadd.xlane.f32.xlu1 %v4675_v9 }
0x14ed   :  { %v4662_v17 = vpop.xlane.xlu0 %4661 }
0x14ee   :  { %11864 = vrcp.f32 %v4662_v17 }
0x14ef   :  { %v4665_v49 = vpop.xlane.xlu1 %4664 }
0x14f0   :  { %11866 = vrcp.f32 %v4665_v49 }
0x14f1   :  { %v4668_v39 = vpop.xlane.xlu0 %4667 }
0x14f2   :  { %11868 = vrcp.f32 %v4668_v39 }
0x14f8   :  { %v11865_v14 = vpop.eup %11864  ;;  %v4671_v52 = vpop.xlane.xlu1 %4670 }
0x14f9   :  { %11870 = vrcp.f32 %v4671_v52  ;;  %v4684_v31 = vmul.f32 %v11865_v14, %v11853_v24 }
0x14fa   :  { %v11867_v45 = vpop.eup %11866  ;;  %v4674_v44 = vpop.xlane.xlu0 %4673 }
0x14fb   :  { %11872 = vrcp.f32 %v4674_v44  ;;  %v4685_v27 = vmul.f32 %v11867_v45, %v11855_v62 }
0x14fc   :  { %v11869_v59 = vpop.eup %11868  ;;  %v4677_v60 = vpop.xlane.xlu1 %4676 }
0x14fd   :  { %11874 = vrcp.f32 %v4677_v60  ;;  %v4690_v23 = vpack.c.bf16 %v4685_v27, %v4684_v31  ;;  %v4686_v47 = vmul.f32 %v11869_v59, %v11857_v35 }
0x14ff   :  { %10848 = vmatprep.mubr.msk.bf16.mxu1 %vm1127_vm3, %v4690_v23  ;;  %v4691_v38 = vpack.c.bf16 %v4686_v47, %v4686_v47 }
0x1501   :  { %10849 = vmatmul.mubr.msk.bf16.vlgmr.msra.gmra.mrb[84].mxu1 %vm1127_vm3, %v4691_v38 }
0x1502   :  { %10861 = vmatpush3.bf16.xpose.msra.mxu1 %v13878_v53  ;;  %10864 = vmatprep.mubr.bf16.mxu1 %v13843_v43  ;;  %v9731_v43 = vcombine.low %v4843_v26, %v4843_v26  ;;  %v5032_v53 = vmul.bf16 %v13899_v13, %v13317_v25 }
0x1503   :  { %v11871_v42 = vpop.eup %11870  ;;  %10862 = vmatprep.subr.bf16.mxu1 %v9729_v37 }
0x1504   :  { %v4687_v11 = vmul.f32 %v11871_v42, %v11859_v32  ;;  %v9733_v18 = vcombine.low %v5032_v53, %v5032_v53 }
0x1505   :  { %v11873_v33 = vpop.eup %11872 }
0x1506   :  { %v4688_v6 = vmul.f32 %v11873_v33, %v11861_v7  ;;  %v5052_v41 = vsel %vm409_vm1, %v9733_v18, 0 }
0x1507   :  { %v11875_v24 = vpop.eup %11874 }
0x1508   :  { %v4692_v56 = vpack.c.bf16 %v4688_v6, %v4687_v11  ;;  %v4689_v12 = vmul.f32 %v11875_v24, %v11863_v28 }
0x150a   :  { %10863 = vmatpush3.bf16.xpose.msra.mxu1 %v9729_v37  ;;  %10856 = vmatprep.mubr.msk.bf16.mxu0 %vm1127_vm3, %v4692_v56  ;;  %v4693_v57 = vpack.c.bf16 %v4689_v12, %v4689_v12 }
0x150b   :  { %10876 = vmatprep.subr.bf16.mxu1 %v13948_v36 }
0x150c   :  { %10857 = vmatmul.mubr.msk.bf16.vlgmr.msra.gmra.mrb[92].mxu0 %vm1127_vm3, %v4693_v57 }
0x150d   :  { %10869 = vmatpush3.bf16.xpose.msra.mxu0 %v13945_v58  ;;  %10872 = vmatprep.mubr.bf16.mxu0 %v13921_v1  ;;  %v5035_v1 = vmul.bf16 %v13964_v15, %v13317_v25 }
0x150e   :  { %10870 = vmatprep.subr.bf16.mxu0 %v9731_v43 }
0x150f   :  { %v9737_v13 = vcombine.low %v5035_v1, %v5035_v1 }
0x1511   :  { %10865 = vmatmul.mubr.bf16.vlgmr.msra.gmra.mrb[92].mxu1 %v13919_v63  ;;  %v5118_v63 = vsel %vm409_vm1, %v9737_v13, 0 }
0x1512   :  { %10877 = vmatpush3.bf16.msra.mxu1 %v13948_v36 }
0x1513   :  { %11246 = vmatprep.subr.msk.bf16.mxu1 %vm409_vm1, %v9733_v18 }
0x1515   :  { %10871 = vmatpush3.bf16.xpose.msra.mxu0 %v9731_v43 }
0x1516   :  { %10879 = vmatpush3.bf16.msra.mxu1 %v5052_v41  ;;  %10884 = vmatprep.subr.bf16.mxu0 %v13954_v29 }
0x1517   :  { %10892 = vmatprep.subr.bf16.mxu1 %v12661_v0 }
0x151c   :  { %10873 = vmatmul.mubr.bf16.vlgmr.msra.gmra.mrb[100].mxu0 %v13958_v8 }
0x151d   :  { %10885 = vmatpush3.bf16.msra.mxu0 %v13954_v29 }
0x151e   :  { %11247 = vmatprep.subr.msk.bf16.mxu0 %vm409_vm1, %v9737_v13 }
0x1521   :  { %10887 = vmatpush3.bf16.msra.mxu0 %v5118_v63 }
0x15e4   :  { %v10866_v58 = vpop.f32.mrb[92].mxu1 }
0x15e5   :  { %v4888_v36 = vpop.f32.mrb[93].mxu1  ;;  %v4966_v8 = vsel %vm1127_vm3, %v10866_v58, -inf }
0x15e6   :  { %v10867_v62 = vpop.f32.mrb[94].mxu1  ;;  %v4960_v61 = vsel %vm1127_vm3, %v4888_v36, -inf }
0x15e7   :  { %4961 = vmax.xlane.f32.xlu0 %v4960_v61  ;;  %v4891_v54 = vpop.f32.mrb[95].mxu1 }
0x15e8   :  { %v4963_v35 = vsel %vm1127_vm3, %v4891_v54, -inf }
0x15e9   :  { %4964 = vmax.xlane.f32.xlu1 %v4963_v35 }
0x15eb   :  { %4967 = vmax.xlane.f32.xlu0 %v4966_v8 }
0x15ef   :  { %v10874_v15 = vpop.f32.mrb[100].mxu0 }
0x15f0   :  { %v4946_v29 = vpop.f32.mrb[101].mxu0  ;;  %v4975_v5 = vsel %vm1127_vm3, %v10874_v15, -inf }
0x15f1   :  { %v10875_v51 = vpop.f32.mrb[102].mxu0  ;;  %v4969_v32 = vsel %vm1127_vm3, %v4946_v29, -inf }
0x15f2   :  { %4970 = vmax.xlane.f32.xlu1 %v4969_v32  ;;  %v4949_v30 = vpop.f32.mrb[103].mxu0  ;;  %v11448_v51 = vld [vmem:[#allocation19 + $0x40] sm:$0xff]  }
0x15f3   :  { %v4972_v7 = vsel %vm1127_vm3, %v4949_v30, -inf }
0x15f4   :  { %4973 = vmax.xlane.f32.xlu0 %v4972_v7 }
0x15f6   :  { %4976 = vmax.xlane.f32.xlu1 %v4975_v5 }
0x1674   :  { %v4962_v28 = vpop.xlane.xlu0 %4961 }
0x1675   :  { %v4978_v9 = vsub.f32 %v4888_v36, %v4962_v28 }
0x1676   :  { %v4965_v17 = vpop.xlane.xlu1 %4964 }
0x1677   :  { %v4984_v49 = vmul.f32 1.442695, %v4978_v9  ;;  %v4979_v39 = vsub.f32 %v4891_v54, %v4965_v17  ;;  %v11450_v17 = vld [vmem:[#allocation19 + $0x50] sm:$0xff]  }
0x1678   :  { %v4968_v14 = vpop.xlane.xlu0 %4967 }
0x1679   :  { %11876 = vpow2.f32 %v4984_v49  ;;  %v4986_v52 = vmul.f32 1.442695, %v4979_v39  ;;  %v4980_v45 = vsub.f32 %v10866_v58, %v4968_v14 }
0x167b   :  { %11878 = vpow2.f32 %v4986_v52  ;;  %v4988_v44 = vmul.f32 1.442695, %v4980_v45  ;;  %v11451_v45 = vld [vmem:[#allocation19 + $0x58] sm:$0xff]  }
0x167d   :  { %11880 = vpow2.f32 %v4988_v44  ;;  %v11452_v44 = vld [vmem:[#allocation19 + $0x60] sm:$0xff]  }
0x167f   :  { %v4971_v31 = vpop.xlane.xlu1 %4970 }
0x1680   :  { %v4981_v27 = vsub.f32 %v4946_v29, %v4971_v31  ;;  %v11453_v31 = vld [vmem:[#allocation19 + $0x68] sm:$0xff]  }
0x1681   :  { %v4974_v59 = vpop.xlane.xlu0 %4973 }
0x1682   :  { %v4990_v60 = vmul.f32 1.442695, %v4981_v27  ;;  %v4982_v23 = vsub.f32 %v4949_v30, %v4974_v59  ;;  %v11449_v30 = vld [vmem:[#allocation19 + $0x48] sm:$0xff]   ;;  %v11454_v27 = vld [vmem:[#allocation19 + $0x70] sm:$0xff]   ;;  %v11455_v59 = vld [vmem:[#allocation19 + $0x78] sm:$0xff]  }
0x1683   :  { %v11877_v47 = vpop.eup %11876  ;;  %v4977_v40 = vpop.xlane.xlu1 %4976 }
0x1684   :  { %11882 = vpow2.f32 %v4990_v60  ;;  %v4992_v38 = vmul.f32 1.442695, %v4982_v23  ;;  %v4983_v37 = vsub.f32 %v10874_v15, %v4977_v40  ;;  %v4996_v42 = vsel %vm1127_vm3, %v11877_v47, 0.0 }
0x1685   :  { %v11879_v33 = vpop.eup %11878  ;;  %4997 = vadd.xlane.f32.xlu0 %v4996_v42 }
0x1686   :  { %11884 = vpow2.f32 %v4992_v38  ;;  %v4994_v11 = vmul.f32 1.442695, %v4983_v37  ;;  %v4999_v6 = vsel %vm1127_vm3, %v11879_v33, 0.0 }
0x1687   :  { %v11881_v24 = vpop.eup %11880  ;;  %5000 = vadd.xlane.f32.xlu1 %v4999_v6 }
0x1688   :  { %11886 = vpow2.f32 %v4994_v11  ;;  %v5002_v56 = vsel %vm1127_vm3, %v11881_v24, 0.0 }
0x1689   :  { %5003 = vadd.xlane.f32.xlu0 %v5002_v56  ;;  %v11456_v56 = vld [vmem:[#allocation25 + $0x100] ss:$16 sps:$4 sm:$0xff]  }
0x168e   :  { %v11883_v12 = vpop.eup %11882 }
0x168f   :  { %v5005_v26 = vsel %vm1127_vm3, %v11883_v12, 0.0 }
0x1690   :  { %v11885_v57 = vpop.eup %11884  ;;  %5006 = vadd.xlane.f32.xlu1 %v5005_v26  ;;  %v11459_v26 = vld [vmem:[#allocation25 + $0x108] ss:$16 sps:$4 sm:$0xff]  }
0x1691   :  { %v5008_v43 = vsel %vm1127_vm3, %v11885_v57, 0.0 }
0x1692   :  { %v11887_v53 = vpop.eup %11886  ;;  %5009 = vadd.xlane.f32.xlu0 %v5008_v43  ;;  %v9740_v43 = vld [vmem:[#allocation20 + $0x1] ss:$0 sm:$0xff] }
0x1693   :  { %v5011_v18 = vsel %vm1127_vm3, %v11887_v53, 0.0 }
0x1694   :  { %5012 = vadd.xlane.f32.xlu1 %v5011_v18 }
0x1712   :  { %v4998_v41 = vpop.xlane.xlu0 %4997 }
0x1713   :  { %11888 = vrcp.f32 %v4998_v41 }
0x1714   :  { %v5001_v1 = vpop.xlane.xlu1 %5000 }
0x1715   :  { %11890 = vrcp.f32 %v5001_v1 }
0x1716   :  { %v5004_v13 = vpop.xlane.xlu0 %5003 }
0x1717   :  { %11892 = vrcp.f32 %v5004_v13 }
0x171d   :  { %v11889_v63 = vpop.eup %11888  ;;  %v5007_v58 = vpop.xlane.xlu1 %5006 }
0x171e   :  { %11894 = vrcp.f32 %v5007_v58  ;;  %v5020_v61 = vmul.f32 %v11889_v63, %v11877_v47 }
0x171f   :  { %v11891_v36 = vpop.eup %11890  ;;  %v5010_v62 = vpop.xlane.xlu0 %5009 }
0x1720   :  { %11896 = vrcp.f32 %v5010_v62  ;;  %v5021_v54 = vmul.f32 %v11891_v36, %v11879_v33 }
0x1721   :  { %v11893_v35 = vpop.eup %11892  ;;  %v5013_v8 = vpop.xlane.xlu1 %5012 }
0x1722   :  { %11898 = vrcp.f32 %v5013_v8  ;;  %v5026_v15 = vpack.c.bf16 %v5021_v54, %v5020_v61  ;;  %v5022_v29 = vmul.f32 %v11893_v35, %v11881_v24 }
0x1724   :  { %10880 = vmatprep.mubr.msk.bf16.mxu1 %vm1127_vm3, %v5026_v15  ;;  %v5027_v32 = vpack.c.bf16 %v5022_v29, %v5022_v29 }
0x1726   :  { %10881 = vmatmul.mubr.msk.bf16.vlgmr.msra.gmra.mrb[84].mxu1 %vm1127_vm3, %v5027_v32 }
0x1727   :  { %10893 = vmatpush3.bf16.msra.mxu1 %v11448_v51  ;;  %10908 = vmatprep.mubr.msk.bf16.mxu1 %vm12662_vm0, %v12661_v0 }
0x1728   :  { %v11895_v7 = vpop.eup %11894  ;;  %10894 = vmatprep.subr.bf16.mxu1 %v12661_v0 }
0x1729   :  { %v5023_v28 = vmul.f32 %v11895_v7, %v11883_v12  ;;  %v11458_v12 = vld [vmem:[#allocation25 + $0x104] ss:$16 sps:$4 sm:$0xff]  }
0x172a   :  { %v11897_v5 = vpop.eup %11896  ;;  %5638 = vmatprep.subr.bf16.mxu0 %v11458_v12  ;;  %v11492_v12 = vld [vmem:[#allocation25 + $0x1c0] ss:$16 sps:$4 sm:$0xff]  }
0x172b   :  { %v5024_v9 = vmul.f32 %v11897_v5, %v11885_v57  ;;  %10895 = vmatpush3.bf16.msra.mxu1 %v11449_v30  ;;  %v11461_v57 = vld [vmem:[#allocation25 + $0x10c] ss:$16 sps:$4 sm:$0xff]  }
0x172c   :  { %v11899_v49 = vpop.eup %11898  ;;  %10896 = vmatprep.subr.bf16.mxu1 %v12661_v0 }
0x172d   :  { %v5025_v39 = vmul.f32 %v11899_v49, %v11887_v53  ;;  %v5028_v14 = vpack.c.bf16 %v5024_v9, %v5023_v28 }
0x172f   :  { %10888 = vmatprep.mubr.msk.bf16.mxu0 %vm1127_vm3, %v5028_v14  ;;  %v5029_v52 = vpack.c.bf16 %v5025_v39, %v5025_v39  ;;  %10897 = vmatpush3.bf16.msra.mxu1 %v11450_v17  ;;  %v11462_v39 = vld [vmem:[#allocation25 + $0x120] ss:$16 sps:$4 sm:$0xff]   ;;  %v11464_v14 = vld [vmem:[#allocation25 + $0x124] ss:$16 sps:$4 sm:$0xff]  }
0x1730   :  { %10898 = vmatprep.subr.bf16.mxu1 %v12661_v0 }
0x1731   :  { %10889 = vmatmul.mubr.msk.bf16.vlgmr.msra.gmra.mrb[92].mxu0 %vm1127_vm3, %v5029_v52  ;;  %v11465_v52 = vld [vmem:[#allocation25 + $0x128] ss:$16 sps:$4 sm:$0xff]  }
0x1732   :  { %5670 = vmatprep.mubr.bf16.mxu0 %v12664_v21  ;;  %5639 = vmatpush1.bf16.msra.mxu0 %v11456_v56  ;;  %v11489_v56 = vld [vmem:[#allocation25 + $0x1a8] ss:$16 sps:$4 sm:$0xff]  }
0x1733   :  { %10899 = vmatpush3.bf16.msra.mxu1 %v11451_v45  ;;  %5640 = vmatprep.subr.bf16.mxu0 %v11464_v14 }
0x1734   :  { %10900 = vmatprep.subr.bf16.mxu1 %v12661_v0 }
0x1736   :  { %5641 = vmatpush1.bf16.msra.mxu0 %v11462_v39 }
0x1737   :  { %10901 = vmatpush3.bf16.msra.mxu1 %v11452_v44  ;;  %v11467_v44 = vld [vmem:[#allocation25 + $0x12c] ss:$16 sps:$4 sm:$0xff]  }
0x1738   :  { %10902 = vmatprep.subr.bf16.mxu1 %v12661_v0 }
0x173b   :  { %10903 = vmatpush3.bf16.msra.mxu1 %v11453_v31  ;;  %v11470_v31 = vld [vmem:[#allocation25 + $0x144] ss:$16 sps:$4 sm:$0xff]  }
0x173c   :  { %10904 = vmatprep.subr.bf16.mxu1 %v12661_v0  ;;  %5642 = vmatprep.subr.bf16.mxu0 %v11470_v31 }
0x173f   :  { %10905 = vmatpush3.bf16.msra.mxu1 %v11454_v27  ;;  %v11471_v27 = vld [vmem:[#allocation25 + $0x148] ss:$16 sps:$4 sm:$0xff]  }
0x1740   :  { %10906 = vmatprep.subr.bf16.mxu1 %v12661_v0 }
0x1743   :  { %10907 = vmatpush3.bf16.msra.mxu1 %v11455_v59  ;;  %v11473_v59 = vld [vmem:[#allocation25 + $0x14c] ss:$16 sps:$4 sm:$0xff]  }
0x1744   :  { %5701 = vmatprep.subr.bf16.mxu1 %v11461_v57  ;;  %v11495_v57 = vld [vmem:[#allocation25 + $0x1c8] ss:$16 sps:$4 sm:$0xff]  }
0x17f9   :  { %v10882_v60 = vpop.f32.mrb[84].mxu1 }
0x17fa   :  { %v5088_v23 = vpop.f32.mrb[85].mxu1 }
0x17fb   :  { %v10883_v47 = vpop.f32.mrb[86].mxu1 }
0x17fc   :  { %v5091_v40 = vpop.f32.mrb[87].mxu1  ;;  %v11474_v47 = vld [vmem:[#allocation25 + $0x160] ss:$16 sps:$4 sm:$0xff]  }
0x17fd   :  { %v5174_v38 = vpack.c.bf16 %v5091_v40, %v5088_v23  ;;  %v11479_v23 = vld [vmem:[#allocation25 + $0x16c] ss:$16 sps:$4 sm:$0xff]   ;;  %v11477_v40 = vld [vmem:[#allocation25 + $0x168] ss:$16 sps:$4 sm:$0xff]  }
0x17ff   :  { %10909 = vmatmul.mubr.bf16.vlgmr.msra.gmra.mrb[96].mxu1 %v5174_v38  ;;  %v11480_v38 = vld [vmem:[#allocation25 + $0x180] ss:$16 sps:$4 sm:$0xff]  }
0x1800   :  { %10912 = vmatprep.mubr.msk.bf16.mxu1 %vm12662_vm0, %v12661_v0  ;;  %5702 = vmatpush1.bf16.msra.mxu1 %v11459_v26  ;;  %v11494_v26 = vld [vmem:[#allocation25 + $0x1c4] ss:$16 sps:$4 sm:$0xff]  }
0x1801   :  { %5703 = vmatprep.subr.bf16.mxu1 %v11467_v44 }
0x1804   :  { %v10890_v37 = vpop.f32.mrb[92].mxu0  ;;  %5704 = vmatpush1.bf16.msra.mxu1 %v11465_v52 }
0x1805   :  { %v5154_v42 = vpop.f32.mrb[93].mxu0  ;;  %5705 = vmatprep.subr.bf16.mxu1 %v11473_v59 }
0x1806   :  { %v5175_v33 = vpack.c.bf16 %v5154_v42, %v10882_v60  ;;  %v10891_v11 = vpop.f32.mrb[94].mxu0  ;;  %v11476_v60 = vld [vmem:[#allocation25 + $0x164] ss:$16 sps:$4 sm:$0xff]   ;;  %v11483_v42 = vld [vmem:[#allocation25 + $0x188] ss:$16 sps:$4 sm:$0xff]  }
0x1807   :  { %v5157_v6 = vpop.f32.mrb[95].mxu0  ;;  %v11488_v11 = vld [vmem:[#allocation25 + $0x1a4] ss:$16 sps:$4 sm:$0xff]  }
0x1808   :  { %v5176_v24 = vpack.c.bf16 %v10890_v37, %v5157_v6  ;;  %10913 = vmatmul.mubr.bf16.gmra.mrb[100].mxu1 %v5175_v33  ;;  %v11482_v37 = vld [vmem:[#allocation25 + $0x184] ss:$16 sps:$4 sm:$0xff]   ;;  %v11485_v33 = vld [vmem:[#allocation25 + $0x18c] ss:$16 sps:$4 sm:$0xff]  }
0x1809   :  { %10916 = vmatprep.mubr.msk.bf16.mxu1 %vm12662_vm0, %v12661_v0  ;;  %5706 = vmatpush1.bf16.msra.mxu1 %v11471_v27  ;;  %v11491_v6 = vld [vmem:[#allocation25 + $0x1ac] ss:$16 sps:$4 sm:$0xff]  }
0x180a   :  { %5707 = vmatprep.subr.bf16.mxu1 %v11479_v23 }
0x180d   :  { %5708 = vmatpush1.bf16.msra.mxu1 %v11477_v40 }
0x180e   :  { %5709 = vmatprep.subr.bf16.mxu1 %v11485_v33 }
0x1810   :  { %10917 = vmatmul.mubr.bf16.gmra.mrb[104].mxu1 %v5176_v24  ;;  %v11486_v24 = vld [vmem:[#allocation25 + $0x1a0] ss:$16 sps:$4 sm:$0xff]  }
0x1811   :  { %5733 = vmatprep.mubr.bf16.mxu1 %v12664_v21  ;;  %5710 = vmatpush1.bf16.msra.mxu1 %v11483_v42 }
0x1812   :  { %5711 = vmatprep.subr.bf16.mxu1 %v11491_v6 }
0x1815   :  { %5712 = vmatpush1.bf16.msra.mxu1 %v11489_v56 }
0x18d2   :  { %v5284_v53 = vpop.f32.mrb[96].mxu1 }
0x18d3   :  { %v5285_v18 = vadd.f32 %v9740_v43, %v5284_v53  ;;  %v10910_v41 = vpop.f32.mrb[97].mxu1  ;;  %v11500_v53 = vld [vmem:[#allocation25 + $0x1e4] ss:$16 sps:$4 sm:$0xff]  }
0x18d4   :  { %v5287_v1 = vpop.f32.mrb[98].mxu1  ;;  %v11498_v41 = vld [vmem:[#allocation25 + $0x1e0] ss:$16 sps:$4 sm:$0xff]  }
0x18d5   :  { %v14179_v13 = vadd.f32 %v5285_v18, %v13798_v34  ;;  %v5288_v63 = vadd.f32 %v9740_v43, %v5287_v1  ;;  %v10911_v58 = vpop.f32.mrb[99].mxu1  ;;  %v11503_v18 = vld [vmem:[#allocation25 + $0x1ec] ss:$16 sps:$4 sm:$0xff]   ;;  %v11501_v1 = vld [vmem:[#allocation25 + $0x1e8] ss:$16 sps:$4 sm:$0xff]  }
0x18d6   :  { %v11505_v58 = vld [vmem:[#allocation28 + $0x1c0] sm:$0xff]  }
0x18d7   :  { %v14182_v36 = vadd.f32 %v5288_v63, %v13800_v10  ;;  %5317 = vadd.xlane.f32.xlu0 %v14179_v13  ;;  %v5335_v62 = vmul.f32 %v14179_v13, %v14179_v13  ;;  %v11504_v63 = vld [vmem:[#allocation28 + $0x140] sm:$0xff]  }
0x18d9   :  { %5319 = vadd.xlane.f32.xlu1 %v14182_v36  ;;  %v5336_v54 = vmul.f32 %v14182_v36, %v14182_v36 }
0x18db   :  { %5341 = vadd.xlane.f32.xlu0 %v5335_v62  ;;  %v5292_v61 = vpop.f32.mrb[100].mxu1 }
0x18dc   :  { %v5293_v35 = vadd.f32 %v9740_v43, %v5292_v61  ;;  %v10914_v34 = vpop.f32.mrb[101].mxu1 }
0x18dd   :  { %5343 = vadd.xlane.f32.xlu1 %v5336_v54  ;;  %v5295_v8 = vpop.f32.mrb[102].mxu1 }
0x18de   :  { %v14191_v15 = vadd.f32 %v5293_v35, %v13810_v55  ;;  %v5296_v10 = vadd.f32 %v9740_v43, %v5295_v8  ;;  %v10915_v29 = vpop.f32.mrb[103].mxu1 }
0x18e0   :  { %v14194_v51 = vadd.f32 %v5296_v10, %v13812_v50  ;;  %5321 = vadd.xlane.f32.xlu0 %v14191_v15  ;;  %v5337_v32 = vmul.f32 %v14191_v15, %v14191_v15 }
0x18e2   :  { %5323 = vadd.xlane.f32.xlu1 %v14194_v51  ;;  %v5338_v55 = vmul.f32 %v14194_v51, %v14194_v51 }
0x18e3   :  { %v5300_v30 = vpop.f32.mrb[104].mxu1 }
0x18e4   :  { %v5301_v7 = vadd.f32 %v9740_v43, %v5300_v30  ;;  %5345 = vadd.xlane.f32.xlu0 %v5337_v32  ;;  %v10918_v5 = vpop.f32.mrb[105].mxu1 }
0x18e5   :  { %v5303_v28 = vpop.f32.mrb[106].mxu1 }
0x18e6   :  { %v14203_v9 = vadd.f32 %v5301_v7, %v13820_v19  ;;  %v5304_v50 = vadd.f32 %v9740_v43, %v5303_v28  ;;  %5347 = vadd.xlane.f32.xlu1 %v5338_v55  ;;  %v10919_v17 = vpop.f32.mrb[107].mxu1  ;;  %v11497_v43 = vld [vmem:[#allocation25 + $0x1cc] ss:$16 sps:$4 sm:$0xff]  }
0x18e7   :  { %5713 = vmatprep.subr.bf16.mxu1 %v11497_v43 }
0x18e8   :  { %v14206_v49 = vadd.f32 %v5304_v50, %v13822_v16  ;;  %5325 = vadd.xlane.f32.xlu0 %v14203_v9  ;;  %v5339_v45 = vmul.f32 %v14203_v9, %v14203_v9  ;;  %v11468_v16 = vld [vmem:[#allocation25 + $0x140] ss:$16 sps:$4 sm:$0xff]   ;;  %5714 = vmatpush1.bf16.msra.mxu1 %v11495_v57 }
0x18e9   :  { %5643 = vmatpush1.bf16.msra.mxu0 %v11468_v16  ;;  %5715 = vmatprep.subr.bf16.mxu1 %v11503_v18 }
0x18ea   :  { %5327 = vadd.xlane.f32.xlu1 %v14206_v49  ;;  %v5340_v19 = vmul.f32 %v14206_v49, %v14206_v49  ;;  %5644 = vmatprep.subr.bf16.mxu0 %v11476_v60 }
0x18ec   :  { %5349 = vadd.xlane.f32.xlu0 %v5339_v45  ;;  %5716 = vmatpush1.bf16.msra.mxu1 %v11501_v1  ;;  %v14227_v1 = vld [vmem:[#allocation23 + $0x1] ss:$0 sm:$0xff] }
0x18ed   :  { %5645 = vmatpush1.bf16.msra.mxu0 %v11474_v47  ;;  %10326 = vmatprep.subr.bf16.mxu1 %v11505_v58 }
0x18ee   :  { %5351 = vadd.xlane.f32.xlu1 %v5340_v19  ;;  %5646 = vmatprep.subr.bf16.mxu0 %v11482_v37 }
0x18f1   :  { %5647 = vmatpush1.bf16.msra.mxu0 %v11480_v38 }
0x18f2   :  { %5648 = vmatprep.subr.bf16.mxu0 %v11488_v11 }
0x18f5   :  { %5649 = vmatpush1.bf16.msra.mxu0 %v11486_v24  ;;  %v14220_v24 = vld [vmem:[#allocation22 + $0x1] ss:$0 sm:$0xff] }
0x18f6   :  { %5650 = vmatprep.subr.bf16.mxu0 %v11494_v26 }
0x18f9   :  { %5651 = vmatpush1.bf16.msra.mxu0 %v11492_v12 }
0x18fa   :  { %5652 = vmatprep.subr.bf16.mxu0 %v11500_v53 }
0x18fd   :  { %5653 = vmatpush1.bf16.msra.mxu0 %v11498_v41 }
0x18fe   :  { %10292 = vmatprep.subr.bf16.mxu0 %v11504_v63 }
0x1964   :  { %v5318_v62 = vpop.xlane.xlu0 %5317 }
0x1965   :  { %v5329_v61 = vmul.f32 0.0078125, %v5318_v62 }
0x1966   :  { %v5320_v54 = vpop.xlane.xlu1 %5319 }
0x1967   :  { %v5330_v35 = vmul.f32 0.0078125, %v5320_v54  ;;  %v5359_v8 = vmul.f32 %v5329_v61, %v5329_v61  ;;  %v5371_v38 = vsub.f32 %v14179_v13, %v5329_v61 }
0x1968   :  { %v5342_v34 = vpop.xlane.xlu0 %5341 }
0x1969   :  { %v5353_v10 = vmul.f32 0.0078125, %v5342_v34  ;;  %v5360_v32 = vmul.f32 %v5330_v35, %v5330_v35  ;;  %v5372_v33 = vsub.f32 %v14182_v36, %v5330_v35 }
0x196a   :  { %v5344_v29 = vpop.xlane.xlu1 %5343 }
0x196b   :  { %v5365_v30 = vsub.f32 %v5353_v10, %v5359_v8  ;;  %v5354_v7 = vmul.f32 0.0078125, %v5344_v29  ;;  %v11506_v29 = vld [vmem:[#allocation28 + $0x100] sm:$0xff]  }
0x196d   :  { %v5377_v5 = vadd.f32 1e-05, %v5365_v30  ;;  %v5366_v55 = vsub.f32 %v5354_v7, %v5360_v32  ;;  %v5322_v28 = vpop.xlane.xlu0 %5321  ;;  %v11507_v32 = vld [vmem:[#allocation28 + $0x180] sm:$0xff]  }
0x196e   :  { %v5331_v50 = vmul.f32 0.0078125, %v5322_v28 }
0x196f   :  { %11900 = vrsqrt.f32 %v5377_v5  ;;  %v5378_v17 = vadd.f32 1e-05, %v5366_v55  ;;  %v5324_v39 = vpop.xlane.xlu1 %5323  ;;  %v11508_v5 = vld [vmem:[#allocation28 + $0x148] sm:$0xff]  }
0x1970   :  { %v5332_v14 = vmul.f32 0.0078125, %v5324_v39  ;;  %v5361_v45 = vmul.f32 %v5331_v50, %v5331_v50  ;;  %v5373_v34 = vsub.f32 %v14191_v15, %v5331_v50  ;;  %v11509_v55 = vld [vmem:[#allocation28 + $0x1c8] sm:$0xff]  }
0x1971   :  { %11902 = vrsqrt.f32 %v5378_v17  ;;  %v5346_v52 = vpop.xlane.xlu0 %5345  ;;  %v11510_v17 = vld [vmem:[#allocation28 + $0x108] sm:$0xff]  }
0x1972   :  { %v5355_v44 = vmul.f32 0.0078125, %v5346_v52  ;;  %v5362_v16 = vmul.f32 %v5332_v14, %v5332_v14  ;;  %v5374_v30 = vsub.f32 %v14194_v51, %v5332_v14  ;;  %v11511_v39 = vld [vmem:[#allocation28 + $0x188] sm:$0xff]   ;;  %v11512_v51 = vld [vmem:[#allocation28 + $0x150] sm:$0xff]  }
0x1973   :  { %v5348_v19 = vpop.xlane.xlu1 %5347  ;;  %v11513_v14 = vld [vmem:[#allocation28 + $0x1d0] sm:$0xff]  }
0x1974   :  { %v5367_v31 = vsub.f32 %v5355_v44, %v5361_v45  ;;  %v5356_v27 = vmul.f32 0.0078125, %v5348_v19 }
0x1975   :  { %v5326_v59 = vpop.xlane.xlu0 %5325 }
0x1976   :  { %v5379_v60 = vadd.f32 1e-05, %v5367_v31  ;;  %v5368_v23 = vsub.f32 %v5356_v27, %v5362_v16  ;;  %v14214_v47 = vmul.f32 0.0078125, %v5326_v59 }
0x1977   :  { %v5328_v40 = vpop.xlane.xlu1 %5327 }
0x1978   :  { %11904 = vrsqrt.f32 %v5379_v60  ;;  %v5380_v37 = vadd.f32 1e-05, %v5368_v23  ;;  %v14218_v11 = vmul.f32 0.0078125, %v5328_v40  ;;  %v5363_v56 = vmul.f32 %v14214_v47, %v14214_v47  ;;  %v11514_v60 = vld [vmem:[#allocation28 + $0x110] sm:$0xff]   ;;  %v11517_v40 = vld [vmem:[#allocation28 + $0x1d8] sm:$0xff]  }
0x1979   :  { %v11901_v42 = vpop.eup %11900  ;;  %v5350_v6 = vpop.xlane.xlu0 %5349  ;;  %v5375_v45 = vsub.f32 %v14203_v9, %v14214_v47  ;;  %v11515_v9 = vld [vmem:[#allocation28 + $0x190] sm:$0xff]   ;;  %v11516_v47 = vld [vmem:[#allocation28 + $0x158] sm:$0xff]  }
0x197a   :  { %11906 = vrsqrt.f32 %v5380_v37  ;;  %v5357_v12 = vmul.f32 0.0078125, %v5350_v6  ;;  %v5389_v26 = vmul.f32 %v11901_v42, %v5371_v38  ;;  %v5364_v13 = vmul.f32 %v14218_v11, %v14218_v11  ;;  %v11518_v42 = vld [vmem:[#allocation28 + $0x118] sm:$0xff]   ;;  %v11521_v6 = vld [vmem:[#allocation28 + $0x1e0] sm:$0xff]  }
0x197b   :  { %v11903_v57 = vpop.eup %11902  ;;  %v5352_v43 = vpop.xlane.xlu1 %5351  ;;  %v5376_v31 = vsub.f32 %v14206_v49, %v14218_v11  ;;  %v11520_v11 = vld [vmem:[#allocation28 + $0x160] sm:$0xff]  }
0x197c   :  { %v5369_v53 = vsub.f32 %v5357_v12, %v5363_v56  ;;  %v5358_v18 = vmul.f32 0.0078125, %v5352_v43  ;;  %v5390_v41 = vmul.f32 %v11903_v57, %v5372_v33  ;;  %v5401_v36 = vmul.f32 %v14220_v24, %v5389_v26  ;;  %v11519_v33 = vld [vmem:[#allocation28 + $0x198] sm:$0xff]   ;;  %v11523_v57 = vld [vmem:[#allocation28 + $0x1a0] sm:$0xff]   ;;  %v11525_v43 = vld [vmem:[#allocation28 + $0x1e8] sm:$0xff]  }
0x197e   :  { %v5381_v63 = vadd.f32 1e-05, %v5369_v53  ;;  %v5370_v58 = vsub.f32 %v5358_v18, %v5364_v13  ;;  %v5402_v62 = vmul.f32 %v14220_v24, %v5390_v41  ;;  %v14231_v54 = vadd.f32 %v14227_v1, %v5401_v36  ;;  %v11524_v13 = vld [vmem:[#allocation28 + $0x168] sm:$0xff]   ;;  %v11528_v41 = vld [vmem:[#allocation28 + $0x170] sm:$0xff]  }
0x197f   :  { %v11526_v53 = vld [vmem:[#allocation28 + $0x128] sm:$0xff]   ;;  %v11529_v36 = vld [vmem:[#allocation28 + $0x1f0] sm:$0xff]  }
0x1980   :  { %11908 = vrsqrt.f32 %v5381_v63  ;;  %v5382_v61 = vadd.f32 1e-05, %v5370_v58  ;;  %v14234_v35 = vadd.f32 %v14227_v1, %v5402_v62  ;;  %v11527_v18 = vld [vmem:[#allocation28 + $0x1a8] sm:$0xff]   ;;  %v11531_v63 = vld [vmem:[#allocation28 + $0x1b0] sm:$0xff]   ;;  %v11532_v58 = vld [vmem:[#allocation28 + $0x178] sm:$0xff]  }
0x1981   :  { %v11533_v62 = vld [vmem:[#allocation28 + $0x1f8] sm:$0xff]  }
0x1982   :  { %v11905_v8 = vpop.eup %11904  ;;  %11910 = vrsqrt.f32 %v5382_v61  ;;  %v5419_v10 = vpack.c.bf16 %v14234_v35, %v14231_v54  ;;  %v11534_v61 = vld [vmem:[#allocation28 + $0x138] sm:$0xff]  }
0x1983   :  { %v5391_v7 = vmul.f32 %v11905_v8, %v5373_v34  ;;  %v11535_v34 = vld [vmem:[#allocation28 + $0x1b8] sm:$0xff]  }
0x1984   :  { %v11907_v28 = vpop.eup %11906  ;;  %5671 = vmatmul.mubr.bf16.vlgmr.msra.gmra.mrb[104].mxu0 %v5419_v10  ;;  %5734 = vmatmul.mubr.bf16.vlgmr.msra.gmra.mrb[108].mxu1 %v5419_v10  ;;  %v5456_v8 = vld [vmem:[#allocation26 + $0x4] sm:$0xf] }
0x1985   :  { %5680 = vmatprep.mubr.bf16.mxu0 %v12664_v21  ;;  %5743 = vmatprep.mubr.bf16.mxu1 %v12664_v21  ;;  %v5392_v15 = vmul.f32 %v11907_v28, %v5374_v30  ;;  %v5403_v50 = vmul.f32 %v14220_v24, %v5391_v7  ;;  %v14270_v10 = vrot.slane %v5456_v8, %v13149_v22 }
0x1986   :  { %10293 = vmatpush3.bf16.msra.mxu0 %v11506_v29  ;;  %10327 = vmatpush3.bf16.msra.mxu1 %v11507_v32  ;;  %v14273_v29 = vrot.slane %v5456_v8, %v13222_v46  ;;  %v14276_v32 = vrot.slane %v5456_v8, %v13225_v48  ;;  %v14279_v30 = vrot.slane %v5456_v8, %v13712_v20 }
0x1987   :  { %v5404_v52 = vmul.f32 %v14220_v24, %v5392_v15  ;;  %10294 = vmatprep.subr.bf16.mxu0 %v11508_v5  ;;  %10328 = vmatprep.subr.bf16.mxu1 %v11509_v55  ;;  %v14247_v44 = vadd.f32 %v14227_v1, %v5403_v50 }
0x1989   :  { %v14250_v19 = vadd.f32 %v14227_v1, %v5404_v52 }
0x198a   :  { %v11909_v16 = vpop.eup %11908  ;;  %10295 = vmatpush3.bf16.msra.mxu0 %v11510_v17  ;;  %10329 = vmatpush3.bf16.msra.mxu1 %v11511_v39 }
0x198b   :  { %v5420_v27 = vpack.c.bf16 %v14250_v19, %v14247_v44  ;;  %v5393_v59 = vmul.f32 %v11909_v16, %v5375_v45  ;;  %10296 = vmatprep.subr.bf16.mxu0 %v11512_v51  ;;  %10330 = vmatprep.subr.bf16.mxu1 %v11513_v14 }
0x198c   :  { %v11911_v23 = vpop.eup %11910 }
0x198d   :  { %5681 = vmatmul.mubr.bf16.gmra.mrb[108].mxu0 %v5420_v27  ;;  %5744 = vmatmul.mubr.bf16.gmra.mrb[112].mxu1 %v5420_v27  ;;  %v5394_v38 = vmul.f32 %v11911_v23, %v5376_v31  ;;  %v5405_v37 = vmul.f32 %v14220_v24, %v5393_v59 }
0x198e   :  { %5690 = vmatprep.mubr.bf16.mxu0 %v12664_v21  ;;  %5753 = vmatprep.mubr.bf16.mxu1 %v12664_v21 }
0x198f   :  { %v5406_v49 = vmul.f32 %v14220_v24, %v5394_v38  ;;  %10297 = vmatpush3.bf16.msra.mxu0 %v11514_v60  ;;  %10331 = vmatpush3.bf16.msra.mxu1 %v11515_v9  ;;  %v14261_v56 = vadd.f32 %v14227_v1, %v5405_v37  ;;  %v11522_v24 = vld [vmem:[#allocation28 + $0x120] sm:$0xff]  }
0x1990   :  { %10298 = vmatprep.subr.bf16.mxu0 %v11516_v47  ;;  %10332 = vmatprep.subr.bf16.mxu1 %v11517_v40 }
0x1991   :  { %v14264_v12 = vadd.f32 %v14227_v1, %v5406_v49  ;;  %v11530_v1 = vld [vmem:[#allocation28 + $0x130] sm:$0xff]  }
0x1993   :  { %v5421_v26 = vpack.c.bf16 %v14264_v12, %v14261_v56  ;;  %10299 = vmatpush3.bf16.msra.mxu0 %v11518_v42  ;;  %10333 = vmatpush3.bf16.msra.mxu1 %v11519_v33 }
0x1994   :  { %10300 = vmatprep.subr.bf16.mxu0 %v11520_v11  ;;  %10334 = vmatprep.subr.bf16.mxu1 %v11521_v6 }
0x1995   :  { %5691 = vmatmul.mubr.bf16.gmra.mrb[112].mxu0 %v5421_v26  ;;  %5754 = vmatmul.mubr.bf16.gmra.mrb[116].mxu1 %v5421_v26 }
0x1997   :  { %10301 = vmatpush3.bf16.msra.mxu0 %v11522_v24  ;;  %10335 = vmatpush3.bf16.msra.mxu1 %v11523_v57 }
0x1998   :  { %10302 = vmatprep.subr.bf16.mxu0 %v11524_v13  ;;  %10336 = vmatprep.subr.bf16.mxu1 %v11525_v43 }
0x199b   :  { %10303 = vmatpush3.bf16.msra.mxu0 %v11526_v53  ;;  %10337 = vmatpush3.bf16.msra.mxu1 %v11527_v18 }
0x199c   :  { %10304 = vmatprep.subr.bf16.mxu0 %v11528_v41  ;;  %10338 = vmatprep.subr.bf16.mxu1 %v11529_v36 }
0x199f   :  { %10305 = vmatpush3.bf16.msra.mxu0 %v11530_v1  ;;  %10339 = vmatpush3.bf16.msra.mxu1 %v11531_v63 }
0x19a0   :  { %10306 = vmatprep.subr.bf16.mxu0 %v11532_v58  ;;  %10340 = vmatprep.subr.bf16.mxu1 %v11533_v62 }
0x19a3   :  { %10307 = vmatpush3.bf16.msra.mxu0 %v11534_v61  ;;  %10341 = vmatpush3.bf16.msra.mxu1 %v11535_v34 }
0x19a4   :  { %10920 = vmatprep.subr.bf16.mxu1 %v12661_v0 }
0x1a57   :  { %v5672_v7 = vpop.f32.mrb[104].mxu0  ;;  %v5735_v5 = vpop.f32.mrb[108].mxu1 }
0x1a58   :  { %v5673_v55 = vadd.f32 %v5672_v7, %v14270_v10  ;;  %v5736_v28 = vadd.f32 %v5735_v5, %v14273_v29  ;;  %v5674_v15 = vpop.f32.mrb[105].mxu0  ;;  %v5737_v50 = vpop.f32.mrb[109].mxu1 }
0x1a59   :  { %v5675_v17 = vadd.f32 %v5674_v15, %v14276_v32  ;;  %v5738_v39 = vadd.f32 %v5737_v50, %v14279_v30  ;;  %v5676_v52 = vpop.f32.mrb[106].mxu0  ;;  %v5739_v51 = vpop.f32.mrb[110].mxu1 }
0x1a5a   :  { %v5677_v14 = vadd.f32 %v5676_v52, %v14270_v10  ;;  %v5740_v45 = vadd.f32 %v5739_v51, %v14273_v29  ;;  %v5678_v16 = vpop.f32.mrb[107].mxu0  ;;  %v5741_v31 = vpop.f32.mrb[111].mxu1  ;;  %v5764_v60 = vmax.f32 %v5673_v55, 0.0  ;;  %v5766_v9 = vmax.f32 %v5736_v28, 0.0 }
0x1a5b   :  { %v5679_v27 = vadd.f32 %v5678_v16, %v14276_v32  ;;  %v5742_v59 = vadd.f32 %v5741_v31, %v14279_v30  ;;  %v5765_v40 = vmax.f32 %v5675_v17, 0.0  ;;  %v5767_v38 = vmax.f32 %v5738_v39, 0.0 }
0x1a5c   :  { %v5768_v23 = vmax.f32 %v5677_v14, 0.0  ;;  %v5770_v47 = vmax.f32 %v5740_v45, 0.0 }
0x1a5d   :  { %v5769_v37 = vmax.f32 %v5679_v27, 0.0  ;;  %v5771_v49 = vmax.f32 %v5742_v59, 0.0 }
0x1a5e   :  { %v5788_v42 = vpack.c.bf16 %v5768_v23, %v5764_v60  ;;  %v5790_v33 = vpack.c.bf16 %v5770_v47, %v5766_v9 }
0x1a5f   :  { %v5789_v11 = vpack.c.bf16 %v5769_v37, %v5765_v40  ;;  %v5791_v6 = vpack.c.bf16 %v5771_v49, %v5767_v38 }
0x1a60   :  { %v5682_v26 = vpop.f32.mrb[108].mxu0  ;;  %v5745_v24 = vpop.f32.mrb[112].mxu1 }
0x1a61   :  { %v5683_v57 = vadd.f32 %v5682_v26, %v14270_v10  ;;  %v5746_v13 = vadd.f32 %v5745_v24, %v14273_v29  ;;  %v5684_v43 = vpop.f32.mrb[109].mxu0  ;;  %v5747_v53 = vpop.f32.mrb[113].mxu1  ;;  %6097 = vmatprep.mubr.bf16.mxu0 %v5789_v11  ;;  %6154 = vmatprep.mubr.bf16.mxu1 %v5791_v6 }
0x1a62   :  { %v5685_v18 = vadd.f32 %v5684_v43, %v14276_v32  ;;  %v5748_v41 = vadd.f32 %v5747_v53, %v14279_v30  ;;  %v5686_v36 = vpop.f32.mrb[110].mxu0  ;;  %v5749_v1 = vpop.f32.mrb[114].mxu1  ;;  %6098 = vmatmul.mubr.bf16.vlgmr.msra.gmra.mrb[116].mxu0 %v5788_v42  ;;  %6155 = vmatmul.mubr.bf16.vlgmr.msra.gmra.mrb[120].mxu1 %v5790_v33 }
0x1a63   :  { %v5687_v63 = vadd.f32 %v5686_v36, %v14270_v10  ;;  %v5750_v58 = vadd.f32 %v5749_v1, %v14273_v29  ;;  %v5688_v62 = vpop.f32.mrb[111].mxu0  ;;  %v5751_v61 = vpop.f32.mrb[115].mxu1  ;;  %v5772_v7 = vmax.f32 %v5683_v57, 0.0  ;;  %v5774_v5 = vmax.f32 %v5746_v13, 0.0 }
0x1a64   :  { %v5689_v34 = vadd.f32 %v5688_v62, %v14276_v32  ;;  %v5752_v8 = vadd.f32 %v5751_v61, %v14279_v30  ;;  %v5773_v15 = vmax.f32 %v5685_v18, 0.0  ;;  %v5775_v50 = vmax.f32 %v5748_v41, 0.0  ;;  %v9783_v62 = vld [vmem:[#allocation29 + $0x1] ss:$0 sm:$0xff] }
0x1a65   :  { %v5776_v55 = vmax.f32 %v5687_v63, 0.0  ;;  %v5778_v28 = vmax.f32 %v5750_v58, 0.0 }
0x1a66   :  { %v5777_v17 = vmax.f32 %v5689_v34, 0.0  ;;  %v5779_v39 = vmax.f32 %v5752_v8, 0.0 }
0x1a67   :  { %v5792_v52 = vpack.c.bf16 %v5776_v55, %v5772_v7  ;;  %v5794_v51 = vpack.c.bf16 %v5778_v28, %v5774_v5 }
0x1a68   :  { %v5793_v14 = vpack.c.bf16 %v5777_v17, %v5773_v15  ;;  %v5795_v45 = vpack.c.bf16 %v5779_v39, %v5775_v50  ;;  %v5692_v16 = vpop.f32.mrb[112].mxu0  ;;  %v5755_v31 = vpop.f32.mrb[116].mxu1 }
0x1a69   :  { %v5693_v27 = vadd.f32 %v5692_v16, %v14270_v10  ;;  %v5756_v59 = vadd.f32 %v5755_v31, %v14273_v29  ;;  %v5694_v60 = vpop.f32.mrb[113].mxu0  ;;  %v5757_v9 = vpop.f32.mrb[117].mxu1 }
0x1a6a   :  { %v5695_v23 = vadd.f32 %v5694_v60, %v14276_v32  ;;  %v5758_v47 = vadd.f32 %v5757_v9, %v14279_v30  ;;  %v5696_v40 = vpop.f32.mrb[114].mxu0  ;;  %v5759_v38 = vpop.f32.mrb[118].mxu1  ;;  %6105 = vmatprep.mubr.bf16.mxu0 %v5793_v14  ;;  %6162 = vmatprep.mubr.bf16.mxu1 %v5795_v45 }
0x1a6b   :  { %v5697_v37 = vadd.f32 %v5696_v40, %v14270_v10  ;;  %v5760_v49 = vadd.f32 %v5759_v38, %v14273_v29  ;;  %v5698_v42 = vpop.f32.mrb[115].mxu0  ;;  %v5761_v33 = vpop.f32.mrb[119].mxu1  ;;  %6106 = vmatmul.mubr.bf16.gmra.mrb[120].mxu0 %v5792_v52  ;;  %6163 = vmatmul.mubr.bf16.gmra.mrb[124].mxu1 %v5794_v51  ;;  %v5780_v26 = vmax.f32 %v5693_v27, 0.0  ;;  %v5782_v24 = vmax.f32 %v5756_v59, 0.0 }
0x1a6c   :  { %v5699_v11 = vadd.f32 %v5698_v42, %v14276_v32  ;;  %v5762_v6 = vadd.f32 %v5761_v33, %v14279_v30  ;;  %v5781_v43 = vmax.f32 %v5695_v23, 0.0  ;;  %v5783_v53 = vmax.f32 %v5758_v47, 0.0  ;;  %v11536_v32 = vld [vmem:[#allocation16 + $0x180] ss:$12 sps:$4 sm:$0xff]   ;;  %v11538_v30 = vld [vmem:[#allocation16 + $0x184] ss:$12 sps:$4 sm:$0xff]  }
0x1a6d   :  { %v5784_v57 = vmax.f32 %v5697_v37, 0.0  ;;  %v5786_v13 = vmax.f32 %v5760_v49, 0.0  ;;  %6473 = vmatprep.subr.bf16.mxu0 %v11538_v30 }
0x1a6e   :  { %v5785_v18 = vmax.f32 %v5699_v11, 0.0  ;;  %v5787_v41 = vmax.f32 %v5762_v6, 0.0  ;;  %6474 = vmatpush1.bf16.msra.mxu0 %v11536_v32 }
0x1a6f   :  { %v5796_v36 = vpack.c.bf16 %v5784_v57, %v5780_v26  ;;  %v5798_v10 = vpack.c.bf16 %v5786_v13, %v5782_v24 }
0x1a70   :  { %v5797_v1 = vpack.c.bf16 %v5785_v18, %v5781_v43  ;;  %v5799_v29 = vpack.c.bf16 %v5787_v41, %v5783_v53 }
0x1a72   :  { %6113 = vmatprep.mubr.bf16.mxu0 %v5797_v1  ;;  %6170 = vmatprep.mubr.bf16.mxu1 %v5799_v29 }
0x1a73   :  { %6114 = vmatmul.mubr.bf16.gmra.mrb[124].mxu0 %v5796_v36  ;;  %6171 = vmatmul.mubr.bf16.gmra.mrb[128].mxu1 %v5798_v10 }
0x1a74   :  { %6505 = vmatprep.mubr.bf16.mxu0 %v12664_v21  ;;  %10936 = vmatprep.mubr.msk.bf16.mxu1 %vm12662_vm0, %v12661_v0 }
0x1b35   :  { %v10308_v63 = vpop.f32.mrb[116].mxu0  ;;  %v10342_v58 = vpop.f32.mrb[120].mxu1 }
0x1b36   :  { %v10309_v61 = vpop.f32.mrb[117].mxu0  ;;  %v10343_v34 = vpop.f32.mrb[121].mxu1 }
0x1b37   :  { %v10310_v8 = vadd.f32 %v10309_v61, %v10308_v63  ;;  %v10344_v7 = vadd.f32 %v10343_v34, %v10342_v58  ;;  %v10311_v5 = vpop.f32.mrb[118].mxu0  ;;  %v10345_v55 = vpop.f32.mrb[122].mxu1 }
0x1b38   :  { %v10312_v28 = vpop.f32.mrb[119].mxu0  ;;  %v10346_v15 = vpop.f32.mrb[123].mxu1 }
0x1b39   :  { %v6100_v50 = vadd.f32 %v10310_v8, %v9783_v62  ;;  %v10313_v17 = vadd.f32 %v10312_v28, %v10311_v5  ;;  %v10347_v39 = vadd.f32 %v10346_v15, %v10345_v55  ;;  %v11539_v5 = vld [vmem:[#allocation16 + $0x188] ss:$12 sps:$4 sm:$0xff]   ;;  %v11540_v28 = vld [vmem:[#allocation16 + $0x198] ss:$12 sps:$4 sm:$0xff]  }
0x1b3a   :  { %10921 = vmatpush3.bf16.msra.mxu1 %v11539_v5  ;;  %v11542_v15 = vld [vmem:[#allocation16 + $0x19c] ss:$12 sps:$4 sm:$0xff]  }
0x1b3b   :  { %v6157_v52 = vadd.f32 %v10344_v7, %v6100_v50  ;;  %v6103_v51 = vadd.f32 %v10313_v17, %v9783_v62  ;;  %10922 = vmatprep.subr.bf16.mxu1 %v12661_v0  ;;  %6475 = vmatprep.subr.bf16.mxu0 %v11542_v15  ;;  %v11543_v50 = vld [vmem:[#allocation16 + $0x1a0] ss:$12 sps:$4 sm:$0xff]  }
0x1b3c   :  { %6476 = vmatpush1.bf16.msra.mxu0 %v11540_v28  ;;  %v11546_v17 = vld [vmem:[#allocation16 + $0x1b4] ss:$12 sps:$4 sm:$0xff]  }
0x1b3d   :  { %v6160_v14 = vadd.f32 %v10347_v39, %v6103_v51  ;;  %v14309_v45 = vadd.f32 %v6157_v52, %v14231_v54  ;;  %v11547_v39 = vld [vmem:[#allocation16 + $0x1b8] ss:$12 sps:$4 sm:$0xff]   ;;  %6477 = vmatprep.subr.bf16.mxu0 %v11546_v17  ;;  %v11548_v51 = vld [vmem:[#allocation16 + $0x1c8] ss:$12 sps:$4 sm:$0xff]  }
0x1b3e   :  { %v10314_v16 = vpop.f32.mrb[120].mxu0  ;;  %v10348_v31 = vpop.f32.mrb[124].mxu1  ;;  %10923 = vmatpush3.bf16.msra.mxu1 %v11543_v50  ;;  %v11550_v52 = vld [vmem:[#allocation16 + $0x1cc] ss:$12 sps:$4 sm:$0xff]  }
0x1b3f   :  { %v10315_v27 = vpop.f32.mrb[121].mxu0  ;;  %v10349_v59 = vpop.f32.mrb[125].mxu1  ;;  %6189 = vadd.xlane.f32.xlu0 %v14309_v45  ;;  %v14313_v60 = vadd.f32 %v6160_v14, %v14234_v35  ;;  %v6207_v54 = vmul.f32 %v14309_v45, %v14309_v45  ;;  %10924 = vmatprep.subr.bf16.mxu1 %v12661_v0  ;;  %v11551_v14 = vld [vmem:[#allocation16 + $0x1d0] ss:$12 sps:$4 sm:$0xff]  }
0x1b40   :  { %v10316_v9 = vadd.f32 %v10315_v27, %v10314_v16  ;;  %v10350_v23 = vadd.f32 %v10349_v59, %v10348_v31  ;;  %v10317_v47 = vpop.f32.mrb[122].mxu0  ;;  %v10351_v40 = vpop.f32.mrb[126].mxu1  ;;  %v11554_v16 = vld [vmem:[#allocation16 + $0x1e4] ss:$12 sps:$4 sm:$0xff]   ;;  %v11552_v31 = vld [vmem:[#allocation16 + $0x1e0] ss:$12 sps:$4 sm:$0xff]  }
0x1b41   :  { %v10318_v38 = vpop.f32.mrb[123].mxu0  ;;  %v10352_v37 = vpop.f32.mrb[127].mxu1  ;;  %6191 = vadd.xlane.f32.xlu1 %v14313_v60  ;;  %v6208_v11 = vmul.f32 %v14313_v60, %v14313_v60  ;;  %v11555_v27 = vld [vmem:[#allocation16 + $0x1e8] ss:$12 sps:$4 sm:$0xff]  }
0x1b42   :  { %v6108_v49 = vadd.f32 %v10316_v9, %v9783_v62  ;;  %v10319_v42 = vadd.f32 %v10318_v38, %v10317_v47  ;;  %v10353_v33 = vadd.f32 %v10352_v37, %v10351_v40  ;;  %10925 = vmatpush3.bf16.msra.mxu1 %v11547_v39  ;;  %v11558_v59 = vld [vmem:[#allocation16 + $0x1fc] ss:$12 sps:$4 sm:$0xff]   ;;  %v11556_v9 = vld [vmem:[#allocation16 + $0x1f8] ss:$12 sps:$4 sm:$0xff]   ;;  %v11562_v47 = vld [vmem:[#allocation16 + $0x214] ss:$12 sps:$4 sm:$0xff]  }
0x1b43   :  { %6213 = vadd.xlane.f32.xlu0 %v6207_v54  ;;  %10926 = vmatprep.subr.bf16.mxu1 %v12661_v0  ;;  %v11560_v40 = vld [vmem:[#allocation16 + $0x210] ss:$12 sps:$4 sm:$0xff]   ;;  %v11563_v38 = vld [vmem:[#allocation16 + $0x218] ss:$12 sps:$4 sm:$0xff]   ;;  %v11564_v54 = vld [vmem:[#allocation16 + $0x228] ss:$12 sps:$4 sm:$0xff]  }
0x1b44   :  { %v6165_v35 = vadd.f32 %v10350_v23, %v6108_v49  ;;  %v6111_v6 = vadd.f32 %v10319_v42, %v9783_v62  ;;  %v11559_v23 = vld [vmem:[#allocation16 + $0x200] ss:$12 sps:$4 sm:$0xff]   ;;  %v11567_v49 = vld [vmem:[#allocation16 + $0x230] ss:$12 sps:$4 sm:$0xff]  }
0x1b45   :  { %6215 = vadd.xlane.f32.xlu1 %v6208_v11  ;;  %v11566_v37 = vld [vmem:[#allocation16 + $0x22c] ss:$12 sps:$4 sm:$0xff]  }
0x1b46   :  { %v6168_v26 = vadd.f32 %v10353_v33, %v6111_v6  ;;  %v10320_v24 = vpop.f32.mrb[124].mxu0  ;;  %v10354_v57 = vpop.f32.mrb[128].mxu1  ;;  %v14321_v13 = vadd.f32 %v6165_v35, %v14247_v44  ;;  %10927 = vmatpush3.bf16.msra.mxu1 %v11551_v14 }
0x1b47   :  { %v10321_v43 = vpop.f32.mrb[125].mxu0  ;;  %v10355_v53 = vpop.f32.mrb[129].mxu1  ;;  %10928 = vmatprep.subr.bf16.mxu1 %v12661_v0 }
0x1b48   :  { %v10322_v18 = vadd.f32 %v10321_v43, %v10320_v24  ;;  %v10356_v41 = vadd.f32 %v10355_v53, %v10354_v57  ;;  %v10357_v36 = vpop.f32.mrb[130].mxu1  ;;  %6193 = vadd.xlane.f32.xlu0 %v14321_v13  ;;  %v10323_v10 = vpop.f32.mrb[126].mxu0  ;;  %v14325_v1 = vadd.f32 %v6168_v26, %v14250_v19  ;;  %v6209_v44 = vmul.f32 %v14321_v13, %v14321_v13 }
0x1b49   :  { %v10324_v29 = vpop.f32.mrb[127].mxu0  ;;  %v10358_v32 = vpop.f32.mrb[131].mxu1 }
0x1b4a   :  { %v6116_v30 = vadd.f32 %v10322_v18, %v9783_v62  ;;  %v10325_v63 = vadd.f32 %v10324_v29, %v10323_v10  ;;  %v10359_v58 = vadd.f32 %v10358_v32, %v10357_v36  ;;  %6195 = vadd.xlane.f32.xlu1 %v14325_v1  ;;  %v6210_v8 = vmul.f32 %v14325_v1, %v14325_v1 }
0x1b4b   :  { %10929 = vmatpush3.bf16.msra.mxu1 %v11555_v27 }
0x1b4c   :  { %v6173_v61 = vadd.f32 %v10356_v41, %v6116_v30  ;;  %v6119_v34 = vadd.f32 %v10325_v63, %v9783_v62  ;;  %6217 = vadd.xlane.f32.xlu0 %v6209_v44  ;;  %10930 = vmatprep.subr.bf16.mxu1 %v12661_v0 }
0x1b4e   :  { %v6176_v7 = vadd.f32 %v10359_v58, %v6119_v34  ;;  %6219 = vadd.xlane.f32.xlu1 %v6210_v8  ;;  %v14333_v19 = vadd.f32 %v6173_v61, %v14261_v56 }
0x1b4f   :  { %10931 = vmatpush3.bf16.msra.mxu1 %v11559_v23 }
0x1b50   :  { %6197 = vadd.xlane.f32.xlu0 %v14333_v19  ;;  %v14337_v55 = vadd.f32 %v6176_v7, %v14264_v12  ;;  %v6211_v62 = vmul.f32 %v14333_v19, %v14333_v19  ;;  %v11544_v12 = vld [vmem:[#allocation16 + $0x1b0] ss:$12 sps:$4 sm:$0xff]   ;;  %10932 = vmatprep.subr.bf16.mxu1 %v12661_v0 }
0x1b51   :  { %6478 = vmatpush1.bf16.msra.mxu0 %v11544_v12 }
0x1b52   :  { %6199 = vadd.xlane.f32.xlu1 %v14337_v55  ;;  %v6212_v56 = vmul.f32 %v14337_v55, %v14337_v55  ;;  %6479 = vmatprep.subr.bf16.mxu0 %v11550_v52 }
0x1b53   :  { %10933 = vmatpush3.bf16.msra.mxu1 %v11563_v38 }
0x1b54   :  { %6221 = vadd.xlane.f32.xlu0 %v6211_v62  ;;  %10934 = vmatprep.subr.bf16.mxu1 %v12661_v0 }
0x1b55   :  { %6480 = vmatpush1.bf16.msra.mxu0 %v11548_v51 }
0x1b56   :  { %6223 = vadd.xlane.f32.xlu1 %v6212_v56  ;;  %6481 = vmatprep.subr.bf16.mxu0 %v11554_v16  ;;  %v9816_v16 = vld [vmem:[#allocation31 + $0x1] ss:$0 sm:$0xff] }
0x1b57   :  { %10935 = vmatpush3.bf16.msra.mxu1 %v11567_v49 }
0x1b59   :  { %6482 = vmatpush1.bf16.msra.mxu0 %v11552_v31 }
0x1b5a   :  { %6483 = vmatprep.subr.bf16.mxu0 %v11558_v59 }
0x1b5d   :  { %6484 = vmatpush1.bf16.msra.mxu0 %v11556_v9 }
0x1b5e   :  { %6485 = vmatprep.subr.bf16.mxu0 %v11562_v47 }
0x1b61   :  { %6486 = vmatpush1.bf16.msra.mxu0 %v11560_v40 }
0x1b62   :  { %6487 = vmatprep.subr.bf16.mxu0 %v11566_v37 }
0x1b65   :  { %6488 = vmatpush1.bf16.msra.mxu0 %v11564_v54 }
0x1bcc   :  { %v6190_v42 = vpop.xlane.xlu0 %6189 }
0x1bcd   :  { %v6201_v33 = vmul.f32 0.0078125, %v6190_v42 }
0x1bce   :  { %v6192_v11 = vpop.xlane.xlu1 %6191 }
0x1bcf   :  { %v6202_v35 = vmul.f32 0.0078125, %v6192_v11  ;;  %v6231_v26 = vmul.f32 %v6201_v33, %v6201_v33  ;;  %v6243_v12 = vsub.f32 %v14309_v45, %v6201_v33  ;;  %v9817_v45 = vld [vmem:[#allocation32 + $0x1] ss:$0 sm:$0xff] }
0x1bd0   :  { %v6214_v6 = vpop.xlane.xlu0 %6213 }
0x1bd1   :  { %v6225_v24 = vmul.f32 0.0078125, %v6214_v6  ;;  %v6232_v43 = vmul.f32 %v6202_v35, %v6202_v35  ;;  %v6244_v52 = vsub.f32 %v14313_v60, %v6202_v35 }
0x1bd2   :  { %v6216_v57 = vpop.xlane.xlu1 %6215 }
0x1bd3   :  { %v6237_v53 = vsub.f32 %v6225_v24, %v6231_v26  ;;  %v6226_v18 = vmul.f32 0.0078125, %v6216_v57 }
0x1bd5   :  { %v6249_v41 = vadd.f32 1e-05, %v6237_v53  ;;  %v6238_v36 = vsub.f32 %v6226_v18, %v6232_v43  ;;  %v6194_v10 = vpop.xlane.xlu0 %6193 }
0x1bd6   :  { %v6203_v29 = vmul.f32 0.0078125, %v6194_v10 }
0x1bd7   :  { %11912 = vrsqrt.f32 %v6249_v41  ;;  %v6250_v32 = vadd.f32 1e-05, %v6238_v36  ;;  %v6196_v30 = vpop.xlane.xlu1 %6195 }
0x1bd8   :  { %v6204_v63 = vmul.f32 0.0078125, %v6196_v30  ;;  %v6233_v44 = vmul.f32 %v6203_v29, %v6203_v29  ;;  %v6245_v6 = vsub.f32 %v14321_v13, %v6203_v29 }
0x1bd9   :  { %11914 = vrsqrt.f32 %v6250_v32  ;;  %v6218_v58 = vpop.xlane.xlu0 %6217 }
0x1bda   :  { %v6227_v61 = vmul.f32 0.0078125, %v6218_v58  ;;  %v6234_v8 = vmul.f32 %v6204_v63, %v6204_v63  ;;  %v6246_v57 = vsub.f32 %v14325_v1, %v6204_v63 }
0x1bdb   :  { %v6220_v34 = vpop.xlane.xlu1 %6219 }
0x1bdc   :  { %v6239_v7 = vsub.f32 %v6227_v61, %v6233_v44  ;;  %v6228_v5 = vmul.f32 0.0078125, %v6220_v34 }
0x1bdd   :  { %v6198_v28 = vpop.xlane.xlu0 %6197 }
0x1bde   :  { %v6251_v15 = vadd.f32 1e-05, %v6239_v7  ;;  %v6240_v62 = vsub.f32 %v6228_v5, %v6234_v8  ;;  %v6205_v56 = vmul.f32 0.0078125, %v6198_v28  ;;  %v6328_v7 = vld [vmem:[#allocation17 + $0x6] sm:$0x7] }
0x1bdf   :  { %v6200_v50 = vpop.xlane.xlu1 %6199  ;;  %v14382_v5 = vrot.slane %v6328_v7, %v13222_v46  ;;  %v14385_v28 = vrot.slane %v6328_v7, %v13225_v48 }
0x1be0   :  { %11916 = vrsqrt.f32 %v6251_v15  ;;  %v6252_v17 = vadd.f32 1e-05, %v6240_v62  ;;  %v6206_v51 = vmul.f32 0.0078125, %v6200_v50  ;;  %v6235_v27 = vmul.f32 %v6205_v56, %v6205_v56 }
0x1be1   :  { %v11913_v39 = vpop.eup %11912  ;;  %v6222_v14 = vpop.xlane.xlu0 %6221  ;;  %v6247_v13 = vsub.f32 %v14333_v19, %v6205_v56  ;;  %v14388_v15 = vrot.slane %v6328_v7, %v13149_v22 }
0x1be2   :  { %v6261_v31 = vmul.f32 %v11913_v39, %v6243_v12  ;;  %11918 = vrsqrt.f32 %v6252_v17  ;;  %v6229_v59 = vmul.f32 0.0078125, %v6222_v14  ;;  %v6236_v23 = vmul.f32 %v6206_v51, %v6206_v51 }
0x1be3   :  { %v11915_v9 = vpop.eup %11914  ;;  %v6224_v47 = vpop.xlane.xlu1 %6223  ;;  %v6248_v1 = vsub.f32 %v14337_v55, %v6206_v51 }
0x1be4   :  { %v6262_v40 = vmul.f32 %v11915_v9, %v6244_v52  ;;  %v6241_v38 = vsub.f32 %v6229_v59, %v6235_v27  ;;  %v6230_v37 = vmul.f32 0.0078125, %v6224_v47  ;;  %v6273_v54 = vmul.f32 %v9816_v16, %v6261_v31 }
0x1be6   :  { %v6253_v49 = vadd.f32 1e-05, %v6241_v38  ;;  %v6242_v42 = vsub.f32 %v6230_v37, %v6236_v23  ;;  %v6274_v33 = vmul.f32 %v9816_v16, %v6262_v40  ;;  %v14353_v11 = vadd.f32 %v9817_v45, %v6273_v54 }
0x1be8   :  { %11920 = vrsqrt.f32 %v6253_v49  ;;  %v6254_v60 = vadd.f32 1e-05, %v6242_v42  ;;  %v14355_v35 = vadd.f32 %v9817_v45, %v6274_v33 }
0x1bea   :  { %v11917_v26 = vpop.eup %11916  ;;  %11922 = vrsqrt.f32 %v6254_v60  ;;  %v6291_v24 = vpack.c.bf16 %v14355_v35, %v14353_v11 }
0x1beb   :  { %v6263_v43 = vmul.f32 %v11917_v26, %v6245_v6 }
0x1bec   :  { %v11919_v53 = vpop.eup %11918  ;;  %6506 = vmatmul.mubr.bf16.vlgmr.msra.gmra.mrb[128].mxu0 %v6291_v24  ;;  %10937 = vmatmul.mubr.bf16.vlgmr.msra.gmra.mrb[132].mxu1 %v6291_v24 }
0x1bed   :  { %6515 = vmatprep.mubr.bf16.mxu0 %v12664_v21  ;;  %10940 = vmatprep.mubr.msk.bf16.mxu1 %vm12662_vm0, %v12661_v0  ;;  %v6264_v18 = vmul.f32 %v11919_v53, %v6246_v57  ;;  %v6275_v41 = vmul.f32 %v9816_v16, %v6263_v43 }
0x1bef   :  { %v6276_v36 = vmul.f32 %v9816_v16, %v6264_v18  ;;  %v14365_v10 = vadd.f32 %v9817_v45, %v6275_v41 }
0x1bf1   :  { %v14367_v29 = vadd.f32 %v9817_v45, %v6276_v36 }
0x1bf2   :  { %v11921_v32 = vpop.eup %11920 }
0x1bf3   :  { %v6292_v30 = vpack.c.bf16 %v14367_v29, %v14365_v10  ;;  %v6265_v63 = vmul.f32 %v11921_v32, %v6247_v13 }
0x1bf4   :  { %v11923_v58 = vpop.eup %11922 }
0x1bf5   :  { %6516 = vmatmul.mubr.bf16.gmra.mrb[132].mxu0 %v6292_v30  ;;  %10941 = vmatmul.mubr.bf16.gmra.mrb[136].mxu1 %v6292_v30  ;;  %v6266_v44 = vmul.f32 %v11923_v58, %v6248_v1  ;;  %v6277_v61 = vmul.f32 %v9816_v16, %v6265_v63 }
0x1bf6   :  { %6525 = vmatprep.mubr.bf16.mxu0 %v12664_v21  ;;  %10944 = vmatprep.mubr.msk.bf16.mxu1 %vm12662_vm0, %v12661_v0 }
0x1bf7   :  { %v6278_v19 = vmul.f32 %v9816_v16, %v6266_v44  ;;  %v14375_v34 = vadd.f32 %v9817_v45, %v6277_v61 }
0x1bf9   :  { %v14377_v8 = vadd.f32 %v9817_v45, %v6278_v19 }
0x1bfb   :  { %v6293_v55 = vpack.c.bf16 %v14377_v8, %v14375_v34 }
0x1bfd   :  { %6526 = vmatmul.mubr.bf16.gmra.mrb[136].mxu0 %v6293_v55  ;;  %10945 = vmatmul.mubr.bf16.gmra.mrb[140].mxu1 %v6293_v55 }
0x1cbf   :  { %v6507_v62 = vpop.f32.mrb[128].mxu0  ;;  %v6570_v56 = vpop.f32.mrb[132].mxu1 }
0x1cc0   :  { %v6571_v50 = vadd.f32 %v6570_v56, %v14382_v5  ;;  %v6509_v12 = vpop.f32.mrb[129].mxu0  ;;  %v10938_v17 = vpop.f32.mrb[133].mxu1  ;;  %v6508_v14 = vadd.f32 %v6507_v62, %v14388_v15 }
0x1cc1   :  { %v6510_v39 = vadd.f32 %v6509_v12, %v14385_v28  ;;  %v6511_v52 = vpop.f32.mrb[130].mxu0  ;;  %v6573_v51 = vpop.f32.mrb[134].mxu1 }
0x1cc2   :  { %v14393_v16 = vpack.c.bf16 %v6571_v50, %v6571_v50  ;;  %v6512_v31 = vadd.f32 %v6511_v52, %v14388_v15  ;;  %v6574_v27 = vadd.f32 %v6573_v51, %v14382_v5  ;;  %v6513_v59 = vpop.f32.mrb[131].mxu0  ;;  %v10939_v9 = vpop.f32.mrb[135].mxu1 }
0x1cc3   :  { %v10032_v23 = vpack.c.bf16 %v6510_v39, %v6510_v39  ;;  %v6514_v47 = vadd.f32 %v6513_v59, %v14385_v28 }
0x1cc4   :  { %v14398_v40 = vpack.c.bf16 %v6512_v31, %v6508_v14  ;;  %v14400_v38 = vpack.c.bf16 %v6574_v27, %v6574_v27  ;;  %v7051_v37 = vmul.bf16 %v14393_v16, %v13245_v3  ;;  %v6853_v54 = vmul.bf16 %v14393_v16, %v13243_v2 }
0x1cc5   :  { %v10033_v45 = vpack.c.bf16 %v6514_v47, %v6514_v47  ;;  %v6653_v49 = vmul.bf16 %v10032_v23, %v13243_v2  ;;  %v6859_v42 = vmul.bf16 %v10032_v23, %v13245_v3  ;;  %v7321_v33 = vmul.bf16 %v10032_v23, %v13247_v4 }
0x1cc6   :  { %10952 = vmatprep.mubr.bf16.mxu0 %v14398_v40  ;;  %10968 = vmatprep.mubr.bf16.mxu1 %v14398_v40  ;;  %v7052_v60 = vmul.bf16 %v14400_v38, %v13245_v3  ;;  %v6854_v6 = vmul.bf16 %v14400_v38, %v13243_v2  ;;  %v7513_v26 = vmul.bf16 %v14393_v16, %v13247_v4 }
0x1cc7   :  { %v6654_v24 = vmul.bf16 %v10033_v45, %v13243_v2  ;;  %v6860_v57 = vmul.bf16 %v10033_v45, %v13245_v3  ;;  %v7322_v43 = vmul.bf16 %v10033_v45, %v13247_v4  ;;  %v7514_v53 = vmul.bf16 %v14400_v38, %v13247_v4 }
0x1cc8   :  { %v6517_v18 = vpop.f32.mrb[132].mxu0  ;;  %v6578_v41 = vpop.f32.mrb[136].mxu1  ;;  %v14422_v36 = vcombine.low %v7051_v37, %v7052_v60  ;;  %v14424_v13 = vcombine.low %v6853_v54, %v6854_v6  ;;  %v7657_v32 = vmul.bf16 %v10032_v23, %v13317_v25  ;;  %v7658_v1 = vmul.bf16 %v10033_v45, %v13317_v25 }
0x1cc9   :  { %v6519_v30 = vpop.f32.mrb[133].mxu0  ;;  %v10942_v63 = vpop.f32.mrb[137].mxu1  ;;  %v9855_v58 = vcombine.low %v6653_v49, %v6654_v24  ;;  %v9860_v44 = vcombine.low %v6859_v42, %v6860_v57  ;;  %v14429_v7 = vcombine.low %v7321_v33, %v7322_v43  ;;  %v14431_v62 = vcombine.low %v7513_v26, %v7514_v53 }
0x1cca   :  { %v6520_v61 = vadd.f32 %v6519_v30, %v14385_v28  ;;  %v6521_v19 = vpop.f32.mrb[134].mxu0  ;;  %v6581_v55 = vpop.f32.mrb[138].mxu1  ;;  %v14433_v56 = vcombine.low %v7657_v32, %v7658_v1  ;;  %v6518_v50 = vadd.f32 %v6517_v18, %v14388_v15  ;;  %v6579_v9 = vadd.f32 %v6578_v41, %v14382_v5 }
0x1ccb   :  { %v6522_v12 = vadd.f32 %v6521_v19, %v14388_v15  ;;  %v6523_v17 = vpop.f32.mrb[135].mxu0  ;;  %v10943_v39 = vpop.f32.mrb[139].mxu1  ;;  %10948 = vmatprep.subr.bf16.mxu0 %v9855_v58  ;;  %v6582_v51 = vadd.f32 %v6581_v55, %v14382_v5  ;;  %10964 = vmatprep.subr.bf16.mxu1 %v9860_v44 }
0x1ccc   :  { %v14437_v52 = vpack.c.bf16 %v6520_v61, %v6520_v61  ;;  %10949 = vmatpush3.bf16.xpose.msra.mxu0 %v9855_v58  ;;  %v6524_v31 = vadd.f32 %v6523_v17, %v14385_v28  ;;  %10965 = vmatpush3.bf16.xpose.msra.mxu1 %v9860_v44  ;;  %v14454_v32 = vpack.c.bf16 %v6579_v9, %v6579_v9 }
0x1ccd   :  { %v6594_v14 = vpack.c.bf16 %v6522_v12, %v6518_v50  ;;  %v14446_v23 = vpack.c.bf16 %v6582_v51, %v6582_v51 }
0x1cce   :  { %v6655_v27 = vmul.bf16 %v14437_v52, %v13243_v2  ;;  %v6861_v59 = vmul.bf16 %v14437_v52, %v13245_v3  ;;  %v10035_v49 = vpack.c.bf16 %v6524_v31, %v6524_v31  ;;  %v7053_v9 = vmul.bf16 %v14454_v32, %v13245_v3 }
0x1ccf   :  { %v7054_v63 = vmul.bf16 %v14446_v23, %v13245_v3  ;;  %v6602_v17 = vunpack.c.h.b16 %v6594_v14  ;;  %v6856_v31 = vmul.bf16 %v14446_v23, %v13243_v2 }
0x1cd0   :  { %v6527_v47 = vpop.f32.mrb[136].mxu0  ;;  %v6586_v37 = vpop.f32.mrb[140].mxu1  ;;  %v9856_v54 = vcombine.low %v6655_v27, %v6655_v27  ;;  %v9861_v45 = vcombine.low %v6861_v59, %v6861_v59  ;;  %v6656_v44 = vmul.bf16 %v10035_v49, %v13243_v2  ;;  %v6862_v61 = vmul.bf16 %v10035_v49, %v13245_v3 }
0x1cd1   :  { %v6587_v42 = vadd.f32 %v6586_v37, %v14382_v5  ;;  %v6529_v33 = vpop.f32.mrb[137].mxu0  ;;  %v10946_v60 = vpop.f32.mrb[141].mxu1  ;;  %v6528_v57 = vadd.f32 %v6527_v47, %v14388_v15  ;;  %v14474_v37 = vpack.c.bf16 %v6518_v50, %v6518_v50  ;;  %v9865_v50 = vcombine.low %v7053_v9, %v7053_v9 }
0x1cd2   :  { %v6530_v6 = vadd.f32 %v6529_v33, %v14385_v28  ;;  %v6531_v26 = vpop.f32.mrb[138].mxu0  ;;  %v14450_v24 = vpop.f32.mrb[142].mxu1  ;;  %10950 = vmatprep.subr.bf16.mxu0 %v9856_v54  ;;  %10966 = vmatprep.subr.bf16.mxu1 %v9861_v45  ;;  %v7516_v60 = vmul.bf16 %v14446_v23, %v13247_v4 }
0x1cd3   :  { %v10042_v43 = vpack.c.bf16 %v6587_v42, %v6587_v42  ;;  %v6532_v53 = vadd.f32 %v6531_v26, %v14388_v15  ;;  %v6533_v18 = vpop.f32.mrb[139].mxu0  ;;  %v10947_v41 = vpop.f32.mrb[143].mxu1  ;;  %v7324_v42 = vmul.bf16 %v10035_v49, %v13247_v4 }
0x1cd4   :  { %v10036_v1 = vpack.c.bf16 %v6530_v6, %v6530_v6  ;;  %v6534_v30 = vadd.f32 %v6533_v18, %v14385_v28  ;;  %10951 = vmatpush3.bf16.xpose.msra.mxu0 %v9856_v54  ;;  %10967 = vmatpush3.bf16.xpose.msra.mxu1 %v9861_v45  ;;  %v7660_v18 = vmul.bf16 %v10035_v49, %v13317_v25 }
0x1cd5   :  { %v6595_v58 = vpack.c.bf16 %v6532_v53, %v6528_v57  ;;  %v7055_v19 = vmul.bf16 %v10042_v43, %v13245_v3  ;;  %10980 = vmatprep.subr.bf16.mxu1 %v14422_v36  ;;  %v6857_v12 = vmul.bf16 %v10042_v43, %v13243_v2  ;;  %v7517_v6 = vmul.bf16 %v10042_v43, %v13247_v4 }
0x1cd6   :  { %v14462_v15 = vpack.c.bf16 %v6534_v30, %v6534_v30  ;;  %v6657_v55 = vmul.bf16 %v10036_v1, %v13243_v2  ;;  %v6863_v28 = vmul.bf16 %v10036_v1, %v13245_v3  ;;  %v7325_v33 = vmul.bf16 %v10036_v1, %v13247_v4 }
0x1cd7   :  { %v6603_v39 = vunpack.c.l.b16 %v6595_v58  ;;  %v9868_v51 = vcombine.low %v7054_v63, %v7055_v19  ;;  %v14478_v45 = vcombine.low %v6856_v31, %v6857_v12  ;;  %v14491_v57 = vcombine.low %v7516_v60, %v7517_v6 }
0x1cd8   :  { %v9858_v27 = vcombine.low %v6656_v44, %v6657_v55  ;;  %v6658_v59 = vmul.bf16 %v14462_v15, %v13243_v2  ;;  %v9862_v47 = vcombine.low %v6862_v61, %v6863_v28  ;;  %v14487_v26 = vcombine.low %v7324_v42, %v7325_v33 }
0x1cd9   :  { %v14476_v54 = vpack.c.b16 %v6603_v39, %v6602_v17  ;;  %v7661_v41 = vmul.bf16 %v10036_v1, %v13317_v25  ;;  %v7849_v30 = vmul.bf16 %v14393_v16, %v13317_v25  ;;  %v7850_v63 = vmul.bf16 %v14400_v38, %v13317_v25 }
0x1cda   :  { %10956 = vmatprep.subr.bf16.mxu0 %v9858_v27  ;;  %v9859_v14 = vcombine.low %v6658_v59, %v6658_v59  ;;  %v7073_v44 = vsel %vm409_vm1, %v9865_v50, 0  ;;  %v7852_v49 = vmul.bf16 %v14446_v23, %v13317_v25  ;;  %v7853_v1 = vmul.bf16 %v10042_v43, %v13317_v25 }
0x1cdb   :  { %10953 = vmatmul.mubr.bf16.vlgmr.msra.gmra.mrb[140].mxu0 %v14474_v37  ;;  %10969 = vmatmul.mubr.bf16.vlgmr.msra.gmra.mrb[144].mxu1 %v14474_v37  ;;  %v14500_v58 = vcombine.low %v7660_v18, %v7661_v41  ;;  %v6864_v16 = vmul.bf16 %v14462_v15, %v13245_v3  ;;  %v14513_v38 = vpack.c.bf16 %v6532_v53, %v6532_v53 }
0x1cdc   :  { %10957 = vmatpush3.bf16.xpose.msra.mxu0 %v9858_v27  ;;  %10960 = vmatprep.mubr.bf16.mxu0 %v14476_v54  ;;  %v14509_v61 = vcombine.low %v7852_v49, %v7853_v1  ;;  %v6590_v23 = vadd.f32 %v14450_v24, %v14382_v5 }
0x1cdd   :  { %10981 = vmatpush3.bf16.msra.mxu1 %v14422_v36  ;;  %10958 = vmatprep.subr.bf16.mxu0 %v9859_v14  ;;  %v14503_v36 = vcombine.low %v7849_v30, %v7850_v63  ;;  %v9863_v19 = vcombine.low %v6864_v16, %v6864_v16 }
0x1cde   :  { %11248 = vmatprep.subr.msk.bf16.mxu1 %vm409_vm1, %v9865_v50  ;;  %v14519_v43 = vpack.c.bf16 %v6590_v23, %v6590_v23 }
0x1ce0   :  { %v7056_v55 = vmul.bf16 %v14519_v43, %v13245_v3 }
0x1ce1   :  { %10983 = vmatpush3.bf16.msra.mxu1 %v7073_v44 }
0x1ce2   :  { %10996 = vmatprep.subr.bf16.mxu1 %v14424_v13  ;;  %v9869_v53 = vcombine.low %v7056_v55, %v7056_v55 }
0x1ce4   :  { %10959 = vmatpush3.bf16.xpose.msra.mxu0 %v9859_v14  ;;  %v7139_v28 = vsel %vm409_vm1, %v9869_v53, 0 }
0x1ce5   :  { %10972 = vmatprep.subr.bf16.mxu0 %v9862_v47 }
0x1ceb   :  { %10961 = vmatmul.mubr.bf16.vlgmr.msra.gmra.mrb[144].mxu0 %v14513_v38 }
0x1cec   :  { %10973 = vmatpush3.bf16.xpose.msra.mxu0 %v9862_v47  ;;  %10976 = vmatprep.mubr.bf16.mxu0 %v14476_v54 }
0x1ced   :  { %10974 = vmatprep.subr.bf16.mxu0 %v9863_v19 }
0x1cf4   :  { %10975 = vmatpush3.bf16.xpose.msra.mxu0 %v9863_v19 }
0x1cf5   :  { %10988 = vmatprep.subr.bf16.mxu0 %v9868_v51 }
0x1cfb   :  { %10977 = vmatmul.mubr.bf16.vlgmr.msra.gmra.mrb[148].mxu0 %v14513_v38 }
0x1cfc   :  { %10989 = vmatpush3.bf16.msra.mxu0 %v9868_v51 }
0x1cfd   :  { %11249 = vmatprep.subr.msk.bf16.mxu0 %vm409_vm1, %v9869_v53 }
0x1d00   :  { %10991 = vmatpush3.bf16.msra.mxu0 %v7139_v28 }
0x1d01   :  { %11004 = vmatprep.subr.bf16.mxu0 %v14478_v45 }
0x1dae   :  { %v14527_v12 = vpop.f32.mrb[140].mxu0  ;;  %v10970_v5 = vpop.f32.mrb[144].mxu1 }
0x1daf   :  { %v6707_v24 = vpop.f32.mrb[141].mxu0  ;;  %v6909_v17 = vpop.f32.mrb[145].mxu1  ;;  %v6987_v9 = vsel %vm1127_vm3, %v10970_v5, -inf  ;;  %v6789_v49 = vsel %vm1127_vm3, %v14527_v12, -inf }
0x1db0   :  { %v10955_v39 = vpop.f32.mrb[142].mxu0  ;;  %v10971_v31 = vpop.f32.mrb[146].mxu1  ;;  %v6981_v3 = vsel %vm1127_vm3, %v6909_v17, -inf  ;;  %v6783_v47 = vsel %vm1127_vm3, %v6707_v24, -inf }
0x1db1   :  { %v14530_v27 = vpop.f32.mrb[143].mxu0  ;;  %6982 = vmax.xlane.f32.xlu0 %v6981_v3  ;;  %v6912_v51 = vpop.f32.mrb[147].mxu1 }
0x1db2   :  { %v6984_v59 = vsel %vm1127_vm3, %v6912_v51, -inf  ;;  %v6786_v1 = vsel %vm1127_vm3, %v14530_v27, -inf }
0x1db3   :  { %6985 = vmax.xlane.f32.xlu1 %v6984_v59 }
0x1db5   :  { %6988 = vmax.xlane.f32.xlu0 %v6987_v9 }
0x1db9   :  { %6784 = vmax.xlane.f32.xlu0 %v6783_v47 }
0x1dbe   :  { %v14535_v14 = vpop.f32.mrb[144].mxu0 }
0x1dbf   :  { %v14537_v42 = vpop.f32.mrb[145].mxu0  ;;  %v6798_v23 = vsel %vm1127_vm3, %v14535_v14, -inf }
0x1dc0   :  { %v10963_v33 = vpop.f32.mrb[146].mxu0  ;;  %v6792_v19 = vsel %vm1127_vm3, %v14537_v42, -inf }
0x1dc1   :  { %v14539_v60 = vpop.f32.mrb[147].mxu0 }
0x1dc2   :  { %v6795_v16 = vsel %vm1127_vm3, %v14539_v60, -inf }
0x1dce   :  { %v10978_v6 = vpop.f32.mrb[148].mxu0 }
0x1dcf   :  { %v6967_v50 = vpop.f32.mrb[149].mxu0  ;;  %v6996_v18 = vsel %vm1127_vm3, %v10978_v6, -inf }
0x1dd0   :  { %6997 = vmax.xlane.f32.xlu1 %v6996_v18  ;;  %v10979_v41 = vpop.f32.mrb[150].mxu0  ;;  %v6990_v44 = vsel %vm1127_vm3, %v6967_v50, -inf }
0x1dd1   :  { %v6970_v30 = vpop.f32.mrb[151].mxu0 }
0x1dd2   :  { %v6993_v63 = vsel %vm1127_vm3, %v6970_v30, -inf }
0x1dd3   :  { %6994 = vmax.xlane.f32.xlu0 %v6993_v63 }
0x1dd4   :  { %6991 = vmax.xlane.f32.xlu1 %v6990_v44 }
0x1dd7   :  { %6790 = vmax.xlane.f32.xlu0 %v6789_v49 }
0x1dd8   :  { %6787 = vmax.xlane.f32.xlu1 %v6786_v1 }
0x1ddb   :  { %6796 = vmax.xlane.f32.xlu0 %v6795_v16 }
0x1ddc   :  { %6793 = vmax.xlane.f32.xlu1 %v6792_v19 }
0x1de0   :  { %6799 = vmax.xlane.f32.xlu1 %v6798_v23 }
0x1e3e   :  { %v6983_v55 = vpop.xlane.xlu0 %6982 }
0x1e3f   :  { %v6999_v53 = vsub.f32 %v6909_v17, %v6983_v55 }
0x1e40   :  { %v6986_v28 = vpop.xlane.xlu1 %6985 }
0x1e41   :  { %v7005_v39 = vmul.f32 1.442695, %v6999_v53  ;;  %v7000_v31 = vsub.f32 %v6912_v51, %v6986_v28 }
0x1e42   :  { %v6989_v3 = vpop.xlane.xlu0 %6988 }
0x1e43   :  { %11924 = vpow2.f32 %v7005_v39  ;;  %v7007_v59 = vmul.f32 1.442695, %v7000_v31  ;;  %v7001_v9 = vsub.f32 %v10970_v5, %v6989_v3 }
0x1e45   :  { %11926 = vpow2.f32 %v7007_v59  ;;  %v7009_v47 = vmul.f32 1.442695, %v7001_v9 }
0x1e46   :  { %v6785_v33 = vpop.xlane.xlu0 %6784 }
0x1e47   :  { %11928 = vpow2.f32 %v7009_v47  ;;  %v6801_v18 = vsub.f32 %v6707_v24, %v6785_v33 }
0x1e49   :  { %v6807_v41 = vmul.f32 1.442695, %v6801_v18 }
0x1e4b   :  { %11930 = vpow2.f32 %v6807_v41 }
0x1e4d   :  { %v14554_v63 = vpop.eup %11924 }
0x1e4e   :  { %v7017_v44 = vsel %vm1127_vm3, %v14554_v63, 0.0 }
0x1e4f   :  { %v14558_v17 = vpop.eup %11926  ;;  %7018 = vadd.xlane.f32.xlu0 %v7017_v44 }
0x1e50   :  { %v7020_v51 = vsel %vm1127_vm3, %v14558_v17, 0.0 }
0x1e51   :  { %v14562_v49 = vpop.eup %11928  ;;  %7021 = vadd.xlane.f32.xlu1 %v7020_v51 }
0x1e52   :  { %v7023_v5 = vsel %vm1127_vm3, %v14562_v49, 0.0 }
0x1e53   :  { %7024 = vadd.xlane.f32.xlu0 %v7023_v5 }
0x1e55   :  { %v14566_v24 = vpop.eup %11930 }
0x1e56   :  { %v6819_v1 = vsel %vm1127_vm3, %v14566_v24, 0.0 }
0x1e57   :  { %6820 = vadd.xlane.f32.xlu0 %v6819_v1 }
0x1e5d   :  { %v6998_v16 = vpop.xlane.xlu1 %6997 }
0x1e5e   :  { %v7004_v19 = vsub.f32 %v10978_v6, %v6998_v16 }
0x1e60   :  { %v7015_v23 = vmul.f32 1.442695, %v7004_v19  ;;  %v6995_v55 = vpop.xlane.xlu0 %6994 }
0x1e61   :  { %v7003_v53 = vsub.f32 %v6970_v30, %v6995_v55  ;;  %v6992_v28 = vpop.xlane.xlu1 %6991 }
0x1e62   :  { %11932 = vpow2.f32 %v7015_v23  ;;  %v7002_v39 = vsub.f32 %v6967_v50, %v6992_v28 }
0x1e63   :  { %v7013_v31 = vmul.f32 1.442695, %v7003_v53 }
0x1e64   :  { %v7011_v3 = vmul.f32 1.442695, %v7002_v39  ;;  %v6791_v59 = vpop.xlane.xlu0 %6790 }
0x1e65   :  { %11934 = vpow2.f32 %v7013_v31  ;;  %v6803_v9 = vsub.f32 %v14527_v12, %v6791_v59  ;;  %v6788_v47 = vpop.xlane.xlu1 %6787 }
0x1e66   :  { %11936 = vpow2.f32 %v7011_v3  ;;  %v6802_v33 = vsub.f32 %v14530_v27, %v6788_v47 }
0x1e67   :  { %v6811_v18 = vmul.f32 1.442695, %v6803_v9 }
0x1e68   :  { %v6809_v41 = vmul.f32 1.442695, %v6802_v33  ;;  %v6797_v44 = vpop.xlane.xlu0 %6796 }
0x1e69   :  { %11938 = vpow2.f32 %v6811_v18  ;;  %v6805_v6 = vsub.f32 %v14539_v60, %v6797_v44  ;;  %v6794_v30 = vpop.xlane.xlu1 %6793 }
0x1e6a   :  { %11940 = vpow2.f32 %v6809_v41  ;;  %v6804_v50 = vsub.f32 %v14537_v42, %v6794_v30 }
0x1e6b   :  { %v6815_v51 = vmul.f32 1.442695, %v6805_v6 }
0x1e6c   :  { %v14574_v5 = vpop.eup %11932  ;;  %v6813_v1 = vmul.f32 1.442695, %v6804_v50 }
0x1e6d   :  { %11942 = vpow2.f32 %v6815_v51  ;;  %v6800_v12 = vpop.xlane.xlu1 %6799  ;;  %v7032_v16 = vsel %vm1127_vm3, %v14574_v5, 0.0 }
0x1e6e   :  { %11944 = vpow2.f32 %v6813_v1  ;;  %v6806_v27 = vsub.f32 %v14535_v14, %v6800_v12  ;;  %7033 = vadd.xlane.f32.xlu1 %v7032_v16 }
0x1e6f   :  { %v14579_v19 = vpop.eup %11934 }
0x1e70   :  { %v14581_v60 = vpop.eup %11936  ;;  %v6817_v23 = vmul.f32 1.442695, %v6806_v27  ;;  %v7029_v42 = vsel %vm1127_vm3, %v14579_v19, 0.0  ;;  %v6855_v27 = vmul.bf16 %v14454_v32, %v13243_v2 }
0x1e71   :  { %7030 = vadd.xlane.f32.xlu0 %v7029_v42  ;;  %v7026_v55 = vsel %vm1127_vm3, %v14581_v60, 0.0 }
0x1e72   :  { %11946 = vpow2.f32 %v6817_v23  ;;  %7027 = vadd.xlane.f32.xlu1 %v7026_v55  ;;  %v9873_v42 = vcombine.low %v6855_v27, %v6855_v27 }
0x1e73   :  { %v14587_v53 = vpop.eup %11938 }
0x1e74   :  { %v14589_v28 = vpop.eup %11940  ;;  %v6825_v14 = vsel %vm1127_vm3, %v14587_v53, 0.0 }
0x1e75   :  { %6826 = vadd.xlane.f32.xlu0 %v6825_v14  ;;  %v6822_v39 = vsel %vm1127_vm3, %v14589_v28, 0.0 }
0x1e76   :  { %6823 = vadd.xlane.f32.xlu1 %v6822_v39 }
0x1e77   :  { %v14595_v31 = vpop.eup %11942 }
0x1e78   :  { %v14597_v3 = vpop.eup %11944  ;;  %v6831_v59 = vsel %vm1127_vm3, %v14595_v31, 0.0 }
0x1e79   :  { %6832 = vadd.xlane.f32.xlu0 %v6831_v59  ;;  %v6828_v9 = vsel %vm1127_vm3, %v14597_v3, 0.0 }
0x1e7a   :  { %6829 = vadd.xlane.f32.xlu1 %v6828_v9 }
0x1e7c   :  { %v14603_v47 = vpop.eup %11946 }
0x1e7d   :  { %v6834_v33 = vsel %vm1127_vm3, %v14603_v47, 0.0 }
0x1e7e   :  { %6835 = vadd.xlane.f32.xlu1 %v6834_v33 }
0x1edc   :  { %v7019_v18 = vpop.xlane.xlu0 %7018 }
0x1edd   :  { %11948 = vrcp.f32 %v7019_v18 }
0x1ede   :  { %v7022_v41 = vpop.xlane.xlu1 %7021 }
0x1edf   :  { %11950 = vrcp.f32 %v7022_v41 }
0x1ee0   :  { %v7025_v44 = vpop.xlane.xlu0 %7024 }
0x1ee1   :  { %11952 = vrcp.f32 %v7025_v44 }
0x1ee7   :  { %v11949_v6 = vpop.eup %11948 }
0x1ee8   :  { %v7041_v50 = vmul.f32 %v11949_v6, %v14554_v63  ;;  %v7205_v63 = vsel %vm409_vm1, %v9873_v42, 0 }
0x1ee9   :  { %v11951_v30 = vpop.eup %11950 }
0x1eea   :  { %v7042_v51 = vmul.f32 %v11951_v30, %v14558_v17  ;;  %v6821_v17 = vpop.xlane.xlu0 %6820 }
0x1eeb   :  { %v11953_v1 = vpop.eup %11952 }
0x1eec   :  { %v7043_v12 = vmul.f32 %v11953_v1, %v14562_v49  ;;  %v7047_v16 = vpack.c.bf16 %v7042_v51, %v7041_v50  ;;  %v6858_v1 = vmul.bf16 %v14519_v43, %v13243_v2 }
0x1eee   :  { %10984 = vmatprep.mubr.msk.bf16.mxu1 %vm1127_vm3, %v7047_v16  ;;  %v7048_v23 = vpack.c.bf16 %v7043_v12, %v7043_v12 }
0x1ef0   :  { %10985 = vmatmul.mubr.msk.bf16.vlgmr.msra.gmra.mrb[148].mxu1 %vm1127_vm3, %v7048_v23 }
0x1ef1   :  { %10997 = vmatpush3.bf16.msra.mxu1 %v14424_v13 }
0x1ef2   :  { %11250 = vmatprep.subr.msk.bf16.mxu1 %vm409_vm1, %v9873_v42 }
0x1ef5   :  { %10999 = vmatpush3.bf16.msra.mxu1 %v7205_v63  ;;  %v7323_v63 = vmul.bf16 %v14437_v52, %v13247_v4 }
0x1ef6   :  { %11012 = vmatprep.subr.bf16.mxu1 %v14429_v7 }
0x1efb   :  { %v7034_v49 = vpop.xlane.xlu1 %7033 }
0x1efc   :  { %11954 = vrcp.f32 %v7034_v49 }
0x1efe   :  { %v7031_v55 = vpop.xlane.xlu0 %7030 }
0x1eff   :  { %11956 = vrcp.f32 %v7031_v55  ;;  %v7028_v14 = vpop.xlane.xlu1 %7027 }
0x1f00   :  { %11958 = vrcp.f32 %v7028_v14  ;;  %v9881_v14 = vcombine.low %v7323_v63, %v7323_v63 }
0x1f01   :  { %11960 = vrcp.f32 %v6821_v17 }
0x1f02   :  { %v6827_v39 = vpop.xlane.xlu0 %6826 }
0x1f03   :  { %11962 = vrcp.f32 %v6827_v39  ;;  %v6824_v59 = vpop.xlane.xlu1 %6823 }
0x1f04   :  { %11964 = vrcp.f32 %v6824_v59 }
0x1f06   :  { %v6833_v13 = vpop.xlane.xlu0 %6832  ;;  %v11955_v9 = vpop.eup %11954 }
0x1f07   :  { %11966 = vrcp.f32 %v6833_v13  ;;  %v6830_v33 = vpop.xlane.xlu1 %6829  ;;  %v7046_v44 = vmul.f32 %v11955_v9, %v14574_v5 }
0x1f08   :  { %11968 = vrcp.f32 %v6830_v33 }
0x1f09   :  { %v11957_v18 = vpop.eup %11956  ;;  %v7050_v42 = vpack.c.bf16 %v7046_v44, %v7046_v44 }
0x1f0a   :  { %v11959_v41 = vpop.eup %11958  ;;  %v7045_v6 = vmul.f32 %v11957_v18, %v14579_v19 }
0x1f0b   :  { %v6836_v30 = vpop.xlane.xlu1 %6835  ;;  %v7044_v50 = vmul.f32 %v11959_v41, %v14581_v60  ;;  %v11961_v51 = vpop.eup %11960  ;;  %v9877_v60 = vcombine.low %v6858_v1, %v6858_v1 }
0x1f0c   :  { %11970 = vrcp.f32 %v6836_v30  ;;  %v6843_v5 = vmul.f32 %v11961_v51, %v14566_v24 }
0x1f0d   :  { %v11963_v12 = vpop.eup %11962  ;;  %v7049_v16 = vpack.c.bf16 %v7045_v6, %v7044_v50 }
0x1f0e   :  { %v11965_v27 = vpop.eup %11964  ;;  %v6845_v23 = vmul.f32 %v11963_v12, %v14587_v53 }
0x1f0f   :  { %10992 = vmatprep.mubr.msk.bf16.mxu0 %vm1127_vm3, %v7049_v16  ;;  %v6844_v19 = vmul.f32 %v11965_v27, %v14589_v28  ;;  %v7271_v28 = vsel %vm409_vm1, %v9877_v60, 0 }
0x1f10   :  { %10993 = vmatmul.mubr.msk.bf16.vlgmr.msra.gmra.mrb[152].mxu0 %vm1127_vm3, %v7050_v42  ;;  %v6850_v53 = vpack.c.bf16 %v6845_v23, %v6845_v23 }
0x1f11   :  { %v11967_v17 = vpop.eup %11966  ;;  %11005 = vmatpush3.bf16.msra.mxu0 %v14478_v45  ;;  %v6849_v2 = vpack.c.bf16 %v6844_v19, %v6843_v5 }
0x1f12   :  { %v11969_v49 = vpop.eup %11968  ;;  %11251 = vmatprep.subr.msk.bf16.mxu0 %vm409_vm1, %v9877_v60  ;;  %v6847_v55 = vmul.f32 %v11967_v17, %v14595_v31 }
0x1f13   :  { %11000 = vmatprep.mubr.msk.bf16.mxu1 %vm1127_vm3, %v6849_v2  ;;  %v6846_v24 = vmul.f32 %v11969_v49, %v14597_v3  ;;  %v7326_v3 = vmul.bf16 %v14462_v15, %v13247_v4 }
0x1f14   :  { %11001 = vmatmul.mubr.msk.bf16.vlgmr.msra.gmra.mrb[148].mxu1 %vm1127_vm3, %v6850_v53 }
0x1f15   :  { %11007 = vmatpush3.bf16.msra.mxu0 %v7271_v28  ;;  %11013 = vmatpush3.bf16.xpose.msra.mxu1 %v14429_v7  ;;  %v6851_v45 = vpack.c.bf16 %v6847_v55, %v6846_v24  ;;  %v9883_v7 = vcombine.low %v7326_v3, %v7326_v3 }
0x1f16   :  { %v11971_v39 = vpop.eup %11970  ;;  %11014 = vmatprep.subr.bf16.mxu1 %v9881_v14  ;;  %11016 = vmatprep.mubr.bf16.mxu1 %v14398_v40 }
0x1f17   :  { %v6848_v59 = vmul.f32 %v11971_v39, %v14603_v47  ;;  %11020 = vmatprep.subr.bf16.mxu0 %v14487_v26  ;;  %11008 = vmatprep.mubr.msk.bf16.mxu0 %vm1127_vm3, %v6851_v45  ;;  %v7515_v47 = vmul.bf16 %v14454_v32, %v13247_v4 }
0x1f19   :  { %v6852_v31 = vpack.c.bf16 %v6848_v59, %v6848_v59  ;;  %v9885_v13 = vcombine.low %v7515_v47, %v7515_v47 }
0x1f1b   :  { %v7535_v9 = vsel %vm409_vm1, %v9885_v13, 0 }
0x1f1c   :  { %11009 = vmatmul.mubr.msk.bf16.vlgmr.msra.gmra.mrb[152].mxu0 %vm1127_vm3, %v6852_v31 }
0x1f1d   :  { %11015 = vmatpush3.bf16.xpose.msra.mxu1 %v9881_v14  ;;  %11024 = vmatprep.mubr.bf16.mxu0 %v14476_v54 }
0x1f1e   :  { %11021 = vmatpush3.bf16.xpose.msra.mxu0 %v14487_v26  ;;  %11028 = vmatprep.subr.bf16.mxu1 %v14431_v62  ;;  %v7518_v26 = vmul.bf16 %v14519_v43, %v13247_v4 }
0x1f1f   :  { %11022 = vmatprep.subr.bf16.mxu0 %v9883_v7 }
0x1f20   :  { %v9889_v33 = vcombine.low %v7518_v26, %v7518_v26 }
0x1f24   :  { %11017 = vmatmul.mubr.bf16.vlgmr.msra.gmra.mrb[152].mxu1 %v14474_v37 }
0x1f25   :  { %11029 = vmatpush3.bf16.msra.mxu1 %v14431_v62  ;;  %v7601_v62 = vsel %vm409_vm1, %v9889_v33, 0 }
0x1f26   :  { %11023 = vmatpush3.bf16.xpose.msra.mxu0 %v9883_v7  ;;  %11252 = vmatprep.subr.msk.bf16.mxu1 %vm409_vm1, %v9885_v13 }
0x1f27   :  { %11036 = vmatprep.subr.bf16.mxu0 %v14491_v57 }
0x1f29   :  { %11031 = vmatpush3.bf16.msra.mxu1 %v7535_v9 }
0x1f2a   :  { %11044 = vmatprep.subr.bf16.mxu1 %v14433_v56 }
0x1f2d   :  { %11025 = vmatmul.mubr.bf16.vlgmr.msra.gmra.mrb[156].mxu0 %v14513_v38 }
0x1f2e   :  { %11037 = vmatpush3.bf16.msra.mxu0 %v14491_v57 }
0x1f2f   :  { %11253 = vmatprep.subr.msk.bf16.mxu0 %vm409_vm1, %v9889_v33 }
0x1f32   :  { %11039 = vmatpush3.bf16.msra.mxu0 %v7601_v62 }
0x1f33   :  { %11052 = vmatprep.subr.bf16.mxu0 %v14500_v58 }
0x1ff7   :  { %v11018_v18 = vpop.f32.mrb[152].mxu1 }
0x1ff8   :  { %v7371_v41 = vpop.f32.mrb[153].mxu1  ;;  %v7449_v50 = vsel %vm1127_vm3, %v11018_v18, -inf }
0x1ff9   :  { %v11019_v44 = vpop.f32.mrb[154].mxu1  ;;  %v7443_v6 = vsel %vm1127_vm3, %v7371_v41, -inf }
0x1ffa   :  { %7444 = vmax.xlane.f32.xlu0 %v7443_v6  ;;  %v7374_v4 = vpop.f32.mrb[155].mxu1 }
0x1ffb   :  { %v7446_v30 = vsel %vm1127_vm3, %v7374_v4, -inf }
0x1ffc   :  { %7447 = vmax.xlane.f32.xlu1 %v7446_v30 }
0x1ffe   :  { %7450 = vmax.xlane.f32.xlu0 %v7449_v50 }
0x2000   :  { %v11026_v57 = vpop.f32.mrb[156].mxu0 }
0x2001   :  { %v7429_v51 = vpop.f32.mrb[157].mxu0  ;;  %v7458_v23 = vsel %vm1127_vm3, %v11026_v57, -inf }
0x2002   :  { %v11027_v1 = vpop.f32.mrb[158].mxu0  ;;  %v7452_v12 = vsel %vm1127_vm3, %v7429_v51, -inf }
0x2003   :  { %7453 = vmax.xlane.f32.xlu1 %v7452_v12  ;;  %v7432_v16 = vpop.f32.mrb[159].mxu0 }
0x2004   :  { %v7455_v27 = vsel %vm1127_vm3, %v7432_v16, -inf }
0x2005   :  { %7456 = vmax.xlane.f32.xlu0 %v7455_v27 }
0x2007   :  { %7459 = vmax.xlane.f32.xlu1 %v7458_v23 }
0x2087   :  { %v7445_v42 = vpop.xlane.xlu0 %7444 }
0x2088   :  { %v7461_v5 = vsub.f32 %v7371_v41, %v7445_v42 }
0x2089   :  { %v7448_v19 = vpop.xlane.xlu1 %7447 }
0x208a   :  { %v7467_v60 = vmul.f32 1.442695, %v7461_v5  ;;  %v7462_v63 = vsub.f32 %v7374_v4, %v7448_v19 }
0x208b   :  { %v7451_v17 = vpop.xlane.xlu0 %7450 }
0x208c   :  { %11972 = vpow2.f32 %v7467_v60  ;;  %v7469_v2 = vmul.f32 1.442695, %v7462_v63  ;;  %v7463_v49 = vsub.f32 %v11018_v18, %v7451_v17  ;;  %v7659_v63 = vmul.bf16 %v14437_v52, %v13317_v25 }
0x208d   :  { %v7662_v52 = vmul.bf16 %v14462_v15, %v13317_v25 }
0x208e   :  { %11974 = vpow2.f32 %v7469_v2  ;;  %v7471_v53 = vmul.f32 1.442695, %v7463_v49  ;;  %v9893_v49 = vcombine.low %v7659_v63, %v7659_v63 }
0x2090   :  { %11976 = vpow2.f32 %v7471_v53  ;;  %v7454_v55 = vpop.xlane.xlu1 %7453 }
0x2091   :  { %v7464_v24 = vsub.f32 %v7429_v51, %v7454_v55 }
0x2092   :  { %v7457_v28 = vpop.xlane.xlu0 %7456 }
0x2093   :  { %v7473_v14 = vmul.f32 1.442695, %v7464_v24  ;;  %v7465_v45 = vsub.f32 %v7432_v16, %v7457_v28 }
0x2094   :  { %v7460_v39 = vpop.xlane.xlu1 %7459 }
0x2095   :  { %11978 = vpow2.f32 %v7473_v14  ;;  %v7475_v59 = vmul.f32 1.442695, %v7465_v45  ;;  %v7466_v31 = vsub.f32 %v11026_v57, %v7460_v39 }
0x2096   :  { %v11973_v3 = vpop.eup %11972 }
0x2097   :  { %11980 = vpow2.f32 %v7475_v59  ;;  %v7477_v7 = vmul.f32 1.442695, %v7466_v31  ;;  %v7479_v47 = vsel %vm1127_vm3, %v11973_v3, 0.0  ;;  %v9895_v59 = vcombine.low %v7662_v52, %v7662_v52 }
0x2098   :  { %v11975_v13 = vpop.eup %11974  ;;  %7480 = vadd.xlane.f32.xlu0 %v7479_v47 }
0x2099   :  { %11982 = vpow2.f32 %v7477_v7  ;;  %v7482_v9 = vsel %vm1127_vm3, %v11975_v13, 0.0 }
0x209a   :  { %v11977_v26 = vpop.eup %11976  ;;  %7483 = vadd.xlane.f32.xlu1 %v7482_v9 }
0x209b   :  { %v7485_v33 = vsel %vm1127_vm3, %v11977_v26, 0.0 }
0x209c   :  { %7486 = vadd.xlane.f32.xlu0 %v7485_v33 }
0x209f   :  { %v11979_v62 = vpop.eup %11978 }
0x20a0   :  { %v7488_v18 = vsel %vm1127_vm3, %v11979_v62, 0.0 }
0x20a1   :  { %v11981_v41 = vpop.eup %11980  ;;  %7489 = vadd.xlane.f32.xlu1 %v7488_v18 }
0x20a2   :  { %v7491_v44 = vsel %vm1127_vm3, %v11981_v41, 0.0 }
0x20a3   :  { %v11983_v6 = vpop.eup %11982  ;;  %7492 = vadd.xlane.f32.xlu0 %v7491_v44 }
0x20a4   :  { %v7494_v4 = vsel %vm1127_vm3, %v11983_v6, 0.0 }
0x20a5   :  { %7495 = vadd.xlane.f32.xlu1 %v7494_v4 }
0x2125   :  { %v7481_v30 = vpop.xlane.xlu0 %7480 }
0x2126   :  { %11984 = vrcp.f32 %v7481_v30 }
0x2127   :  { %v7484_v50 = vpop.xlane.xlu1 %7483 }
0x2128   :  { %11986 = vrcp.f32 %v7484_v50 }
0x2129   :  { %v7487_v57 = vpop.xlane.xlu0 %7486 }
0x212a   :  { %11988 = vrcp.f32 %v7487_v57 }
0x212e   :  { %v7490_v51 = vpop.xlane.xlu1 %7489 }
0x212f   :  { %11990 = vrcp.f32 %v7490_v51 }
0x2130   :  { %v11985_v1 = vpop.eup %11984  ;;  %v7493_v12 = vpop.xlane.xlu0 %7492 }
0x2131   :  { %11992 = vrcp.f32 %v7493_v12  ;;  %v7503_v23 = vmul.f32 %v11985_v1, %v11973_v3 }
0x2132   :  { %v11987_v16 = vpop.eup %11986  ;;  %v7496_v27 = vpop.xlane.xlu1 %7495 }
0x2133   :  { %11994 = vrcp.f32 %v7496_v27  ;;  %v7504_v42 = vmul.f32 %v11987_v16, %v11975_v13 }
0x2134   :  { %v11989_v5 = vpop.eup %11988 }
0x2135   :  { %v7505_v19 = vmul.f32 %v11989_v5, %v11977_v26  ;;  %v7509_v60 = vpack.c.bf16 %v7504_v42, %v7503_v23 }
0x2137   :  { %11032 = vmatprep.mubr.msk.bf16.mxu1 %vm1127_vm3, %v7509_v60  ;;  %v7510_v17 = vpack.c.bf16 %v7505_v19, %v7505_v19 }
0x2139   :  { %v11991_v2 = vpop.eup %11990  ;;  %11033 = vmatmul.mubr.msk.bf16.vlgmr.msra.gmra.mrb[148].mxu1 %vm1127_vm3, %v7510_v17 }
0x213a   :  { %11045 = vmatpush3.bf16.xpose.msra.mxu1 %v14433_v56  ;;  %11048 = vmatprep.mubr.bf16.mxu1 %v14398_v40  ;;  %v7506_v55 = vmul.f32 %v11991_v2, %v11979_v62  ;;  %v7851_v40 = vmul.bf16 %v14454_v32, %v13317_v25 }
0x213b   :  { %v11993_v53 = vpop.eup %11992  ;;  %11046 = vmatprep.subr.bf16.mxu1 %v9893_v49 }
0x213c   :  { %v7507_v24 = vmul.f32 %v11993_v53, %v11981_v41  ;;  %v9897_v56 = vcombine.low %v7851_v40, %v7851_v40 }
0x213d   :  { %v11995_v28 = vpop.eup %11994 }
0x213e   :  { %v7508_v14 = vmul.f32 %v11995_v28, %v11983_v6  ;;  %v7511_v45 = vpack.c.bf16 %v7507_v24, %v7506_v55  ;;  %v7871_v15 = vsel %vm409_vm1, %v9897_v56, 0 }
0x2140   :  { %11040 = vmatprep.mubr.msk.bf16.mxu0 %vm1127_vm3, %v7511_v45  ;;  %v7512_v39 = vpack.c.bf16 %v7508_v14, %v7508_v14 }
0x2142   :  { %11047 = vmatpush3.bf16.xpose.msra.mxu1 %v9893_v49  ;;  %11041 = vmatmul.mubr.msk.bf16.vlgmr.msra.gmra.mrb[152].mxu0 %vm1127_vm3, %v7512_v39 }
0x2143   :  { %11053 = vmatpush3.bf16.xpose.msra.mxu0 %v14500_v58  ;;  %11060 = vmatprep.subr.bf16.mxu1 %v14503_v36  ;;  %v7854_v58 = vmul.bf16 %v14519_v43, %v13317_v25 }
0x2144   :  { %11054 = vmatprep.subr.bf16.mxu0 %v9895_v59  ;;  %11056 = vmatprep.mubr.bf16.mxu0 %v14476_v54 }
0x2145   :  { %v9901_v32 = vcombine.low %v7854_v58, %v7854_v58 }
0x2149   :  { %11049 = vmatmul.mubr.bf16.vlgmr.msra.gmra.mrb[156].mxu1 %v14474_v37  ;;  %v7937_v37 = vsel %vm409_vm1, %v9901_v32, 0 }
0x214a   :  { %11061 = vmatpush3.bf16.msra.mxu1 %v14503_v36 }
0x214b   :  { %11055 = vmatpush3.bf16.xpose.msra.mxu0 %v9895_v59  ;;  %11254 = vmatprep.subr.msk.bf16.mxu1 %vm409_vm1, %v9897_v56 }
0x214c   :  { %11068 = vmatprep.subr.bf16.mxu0 %v14509_v61 }
0x214e   :  { %11063 = vmatpush3.bf16.msra.mxu1 %v7871_v15 }
0x214f   :  { %11076 = vmatprep.subr.bf16.mxu1 %v12661_v0 }
0x2152   :  { %11057 = vmatmul.mubr.bf16.vlgmr.msra.gmra.mrb[160].mxu0 %v14513_v38 }
0x2153   :  { %11069 = vmatpush3.bf16.msra.mxu0 %v14509_v61 }
0x2154   :  { %11255 = vmatprep.subr.msk.bf16.mxu0 %vm409_vm1, %v9901_v32 }
0x2157   :  { %11071 = vmatpush3.bf16.msra.mxu0 %v7937_v37 }
0x221c   :  { %v11050_v54 = vpop.f32.mrb[156].mxu1 }
0x221d   :  { %v7707_v36 = vpop.f32.mrb[157].mxu1  ;;  %v7785_v38 = vsel %vm1127_vm3, %v11050_v54, -inf }
0x221e   :  { %v11051_v31 = vpop.f32.mrb[158].mxu1  ;;  %v7779_v3 = vsel %vm1127_vm3, %v7707_v36, -inf }
0x221f   :  { %7780 = vmax.xlane.f32.xlu0 %v7779_v3  ;;  %v7710_v7 = vpop.f32.mrb[159].mxu1 }
0x2220   :  { %v7782_v25 = vsel %vm1127_vm3, %v7710_v7, -inf }
0x2221   :  { %7783 = vmax.xlane.f32.xlu1 %v7782_v25  ;;  %v11568_v25 = vld [vmem:[#allocation19 + $0x80] sm:$0xff]  }
0x2223   :  { %7786 = vmax.xlane.f32.xlu0 %v7785_v38 }
0x2225   :  { %v11058_v43 = vpop.f32.mrb[160].mxu0 }
0x2226   :  { %v7765_v61 = vpop.f32.mrb[161].mxu0  ;;  %v7794_v33 = vsel %vm1127_vm3, %v11058_v43, -inf }
0x2227   :  { %v11059_v47 = vpop.f32.mrb[162].mxu0  ;;  %v7788_v13 = vsel %vm1127_vm3, %v7765_v61, -inf }
0x2228   :  { %7789 = vmax.xlane.f32.xlu1 %v7788_v13  ;;  %v7768_v9 = vpop.f32.mrb[163].mxu0 }
0x2229   :  { %v7791_v26 = vsel %vm1127_vm3, %v7768_v9, -inf }
0x222a   :  { %7792 = vmax.xlane.f32.xlu0 %v7791_v26 }
0x222c   :  { %7795 = vmax.xlane.f32.xlu1 %v7794_v33 }
0x22ac   :  { %v7781_v62 = vpop.xlane.xlu0 %7780 }
0x22ad   :  { %v7797_v18 = vsub.f32 %v7707_v36, %v7781_v62 }
0x22ae   :  { %v7784_v41 = vpop.xlane.xlu1 %7783 }
0x22af   :  { %v7803_v44 = vmul.f32 1.442695, %v7797_v18  ;;  %v7798_v6 = vsub.f32 %v7710_v7, %v7784_v41  ;;  %v11570_v18 = vld [vmem:[#allocation19 + $0x90] sm:$0xff]  }
0x22b0   :  { %v7787_v4 = vpop.xlane.xlu0 %7786 }
0x22b1   :  { %11996 = vpow2.f32 %v7803_v44  ;;  %v7805_v30 = vmul.f32 1.442695, %v7798_v6  ;;  %v7799_v50 = vsub.f32 %v11050_v54, %v7787_v4  ;;  %v11571_v44 = vld [vmem:[#allocation19 + $0x98] sm:$0xff]   ;;  %v11572_v6 = vld [vmem:[#allocation19 + $0xa0] sm:$0xff]   ;;  %v11573_v4 = vld [vmem:[#allocation19 + $0xa8] sm:$0xff]  }
0x22b3   :  { %11998 = vpow2.f32 %v7805_v30  ;;  %v7807_v57 = vmul.f32 1.442695, %v7799_v50  ;;  %v11574_v30 = vld [vmem:[#allocation19 + $0xb0] sm:$0xff]   ;;  %v11575_v50 = vld [vmem:[#allocation19 + $0xb8] sm:$0xff]  }
0x22b5   :  { %12000 = vpow2.f32 %v7807_v57  ;;  %v7790_v51 = vpop.xlane.xlu1 %7789 }
0x22b6   :  { %v7800_v1 = vsub.f32 %v7765_v61, %v7790_v51  ;;  %v11569_v61 = vld [vmem:[#allocation19 + $0x88] sm:$0xff]  }
0x22b7   :  { %v7793_v12 = vpop.xlane.xlu0 %7792 }
0x22b8   :  { %v7809_v16 = vmul.f32 1.442695, %v7800_v1  ;;  %v7801_v27 = vsub.f32 %v7768_v9, %v7793_v12 }
0x22b9   :  { %v7796_v23 = vpop.xlane.xlu1 %7795 }
0x22ba   :  { %12002 = vpow2.f32 %v7809_v16  ;;  %v7811_v42 = vmul.f32 1.442695, %v7801_v27  ;;  %v7802_v5 = vsub.f32 %v11058_v43, %v7796_v23 }
0x22bb   :  { %v11997_v19 = vpop.eup %11996 }
0x22bc   :  { %12004 = vpow2.f32 %v7811_v42  ;;  %v7813_v60 = vmul.f32 1.442695, %v7802_v5  ;;  %v7815_v63 = vsel %vm1127_vm3, %v11997_v19, 0.0 }
0x22bd   :  { %v11999_v17 = vpop.eup %11998  ;;  %7816 = vadd.xlane.f32.xlu0 %v7815_v63  ;;  %v11576_v63 = vld [vmem:[#allocation25 + $0x200] ss:$16 sps:$4 sm:$0xff]  }
0x22be   :  { %12006 = vpow2.f32 %v7813_v60  ;;  %v7818_v2 = vsel %vm1127_vm3, %v11999_v17, 0.0 }
0x22bf   :  { %v12001_v49 = vpop.eup %12000  ;;  %7819 = vadd.xlane.f32.xlu1 %v7818_v2  ;;  %v11579_v2 = vld [vmem:[#allocation25 + $0x208] ss:$16 sps:$4 sm:$0xff]  }
0x22c0   :  { %v7821_v53 = vsel %vm1127_vm3, %v12001_v49, 0.0 }
0x22c1   :  { %7822 = vadd.xlane.f32.xlu0 %v7821_v53  ;;  %v9904_v53 = vld [vmem:[#allocation20 + $0x2] ss:$0 sm:$0xff] }
0x22c4   :  { %v12003_v55 = vpop.eup %12002 }
0x22c5   :  { %v7824_v24 = vsel %vm1127_vm3, %v12003_v55, 0.0 }
0x22c6   :  { %v12005_v28 = vpop.eup %12004  ;;  %7825 = vadd.xlane.f32.xlu1 %v7824_v24 }
0x22c7   :  { %v7827_v14 = vsel %vm1127_vm3, %v12005_v28, 0.0 }
0x22c8   :  { %v12007_v45 = vpop.eup %12006  ;;  %7828 = vadd.xlane.f32.xlu0 %v7827_v14 }
0x22c9   :  { %v7830_v52 = vsel %vm1127_vm3, %v12007_v45, 0.0 }
0x22ca   :  { %7831 = vadd.xlane.f32.xlu1 %v7830_v52 }
0x234a   :  { %v7817_v39 = vpop.xlane.xlu0 %7816 }
0x234b   :  { %12008 = vrcp.f32 %v7817_v39 }
0x234c   :  { %v7820_v59 = vpop.xlane.xlu1 %7819 }
0x234d   :  { %12010 = vrcp.f32 %v7820_v59 }
0x234e   :  { %v7823_v40 = vpop.xlane.xlu0 %7822 }
0x234f   :  { %12012 = vrcp.f32 %v7823_v40 }
0x2353   :  { %v7826_v56 = vpop.xlane.xlu1 %7825 }
0x2354   :  { %12014 = vrcp.f32 %v7826_v56 }
0x2355   :  { %v12009_v15 = vpop.eup %12008  ;;  %v7829_v58 = vpop.xlane.xlu0 %7828 }
0x2356   :  { %12016 = vrcp.f32 %v7829_v58  ;;  %v7839_v54 = vmul.f32 %v12009_v15, %v11997_v19 }
0x2357   :  { %v12011_v32 = vpop.eup %12010  ;;  %v7832_v37 = vpop.xlane.xlu1 %7831 }
0x2358   :  { %12018 = vrcp.f32 %v7832_v37  ;;  %v7840_v36 = vmul.f32 %v12011_v32, %v11999_v17  ;;  %v11578_v17 = vld [vmem:[#allocation25 + $0x204] ss:$16 sps:$4 sm:$0xff]  }
0x2359   :  { %v12013_v31 = vpop.eup %12012  ;;  %8457 = vmatprep.subr.bf16.mxu0 %v11578_v17  ;;  %v11620_v17 = vld [vmem:[#allocation25 + $0x2e4] ss:$16 sps:$4 sm:$0xff]  }
0x235a   :  { %v7841_v3 = vmul.f32 %v12013_v31, %v12001_v49  ;;  %v7845_v7 = vpack.c.bf16 %v7840_v36, %v7839_v54  ;;  %v11581_v49 = vld [vmem:[#allocation25 + $0x20c] ss:$16 sps:$4 sm:$0xff]  }
0x235c   :  { %11064 = vmatprep.mubr.msk.bf16.mxu1 %vm1127_vm3, %v7845_v7  ;;  %v7846_v38 = vpack.c.bf16 %v7841_v3, %v7841_v3 }
0x235e   :  { %v12015_v43 = vpop.eup %12014  ;;  %11065 = vmatmul.mubr.msk.bf16.vlgmr.msra.gmra.mrb[148].mxu1 %vm1127_vm3, %v7846_v38 }
0x235f   :  { %11077 = vmatpush3.bf16.msra.mxu1 %v11568_v25  ;;  %11092 = vmatprep.mubr.msk.bf16.mxu1 %vm12662_vm0, %v12661_v0  ;;  %v7842_v13 = vmul.f32 %v12015_v43, %v12003_v55 }
0x2360   :  { %v12017_v47 = vpop.eup %12016  ;;  %11078 = vmatprep.subr.bf16.mxu1 %v12661_v0 }
0x2361   :  { %v7843_v9 = vmul.f32 %v12017_v47, %v12005_v28 }
0x2362   :  { %v12019_v26 = vpop.eup %12018 }
0x2363   :  { %v7844_v33 = vmul.f32 %v12019_v26, %v12007_v45  ;;  %v7847_v62 = vpack.c.bf16 %v7843_v9, %v7842_v13  ;;  %11079 = vmatpush3.bf16.msra.mxu1 %v11569_v61  ;;  %v11582_v9 = vld [vmem:[#allocation25 + $0x220] ss:$16 sps:$4 sm:$0xff]   ;;  %v11584_v26 = vld [vmem:[#allocation25 + $0x224] ss:$16 sps:$4 sm:$0xff]  }
0x2364   :  { %11080 = vmatprep.subr.bf16.mxu1 %v12661_v0 }
0x2365   :  { %11072 = vmatprep.mubr.msk.bf16.mxu0 %vm1127_vm3, %v7847_v62  ;;  %v7848_v41 = vpack.c.bf16 %v7844_v33, %v7844_v33  ;;  %v11585_v33 = vld [vmem:[#allocation25 + $0x228] ss:$16 sps:$4 sm:$0xff]   ;;  %v11587_v62 = vld [vmem:[#allocation25 + $0x22c] ss:$16 sps:$4 sm:$0xff]  }
0x2367   :  { %11073 = vmatmul.mubr.msk.bf16.vlgmr.msra.gmra.mrb[152].mxu0 %vm1127_vm3, %v7848_v41  ;;  %11081 = vmatpush3.bf16.msra.mxu1 %v11570_v18  ;;  %v11590_v18 = vld [vmem:[#allocation25 + $0x244] ss:$16 sps:$4 sm:$0xff]   ;;  %v11591_v41 = vld [vmem:[#allocation25 + $0x248] ss:$16 sps:$4 sm:$0xff]  }
0x2368   :  { %11082 = vmatprep.subr.bf16.mxu1 %v12661_v0  ;;  %8489 = vmatprep.mubr.bf16.mxu0 %v12664_v21 }
0x2369   :  { %8458 = vmatpush1.bf16.msra.mxu0 %v11576_v63  ;;  %v11617_v63 = vld [vmem:[#allocation25 + $0x2cc] ss:$16 sps:$4 sm:$0xff]  }
0x236a   :  { %8459 = vmatprep.subr.bf16.mxu0 %v11584_v26 }
0x236b   :  { %11083 = vmatpush3.bf16.msra.mxu1 %v11571_v44  ;;  %v11593_v44 = vld [vmem:[#allocation25 + $0x24c] ss:$16 sps:$4 sm:$0xff]  }
0x236c   :  { %11084 = vmatprep.subr.bf16.mxu1 %v12661_v0 }
0x236d   :  { %8460 = vmatpush1.bf16.msra.mxu0 %v11582_v9 }
0x236e   :  { %8461 = vmatprep.subr.bf16.mxu0 %v11590_v18 }
0x236f   :  { %11085 = vmatpush3.bf16.msra.mxu1 %v11572_v6  ;;  %v11596_v6 = vld [vmem:[#allocation25 + $0x264] ss:$16 sps:$4 sm:$0xff]  }
0x2370   :  { %11086 = vmatprep.subr.bf16.mxu1 %v12661_v0 }
0x2373   :  { %11087 = vmatpush3.bf16.msra.mxu1 %v11573_v4  ;;  %v11599_v4 = vld [vmem:[#allocation25 + $0x26c] ss:$16 sps:$4 sm:$0xff]  }
0x2374   :  { %11088 = vmatprep.subr.bf16.mxu1 %v12661_v0 }
0x2377   :  { %11089 = vmatpush3.bf16.msra.mxu1 %v11574_v30  ;;  %v11594_v30 = vld [vmem:[#allocation25 + $0x260] ss:$16 sps:$4 sm:$0xff]  }
0x2378   :  { %11090 = vmatprep.subr.bf16.mxu1 %v12661_v0 }
0x237b   :  { %11091 = vmatpush3.bf16.msra.mxu1 %v11575_v50  ;;  %v11597_v50 = vld [vmem:[#allocation25 + $0x268] ss:$16 sps:$4 sm:$0xff]  }
0x237c   :  { %8520 = vmatprep.subr.bf16.mxu1 %v11581_v49  ;;  %v11618_v49 = vld [vmem:[#allocation25 + $0x2e0] ss:$16 sps:$4 sm:$0xff]  }
0x2431   :  { %v11066_v57 = vpop.f32.mrb[148].mxu1 }
0x2432   :  { %v7907_v51 = vpop.f32.mrb[149].mxu1 }
0x2433   :  { %v11067_v1 = vpop.f32.mrb[150].mxu1 }
0x2434   :  { %v7910_v12 = vpop.f32.mrb[151].mxu1  ;;  %v11603_v1 = vld [vmem:[#allocation25 + $0x288] ss:$16 sps:$4 sm:$0xff]  }
0x2435   :  { %v7993_v16 = vpack.c.bf16 %v7910_v12, %v7907_v51  ;;  %v11602_v51 = vld [vmem:[#allocation25 + $0x284] ss:$16 sps:$4 sm:$0xff]   ;;  %v11605_v12 = vld [vmem:[#allocation25 + $0x28c] ss:$16 sps:$4 sm:$0xff]  }
0x2437   :  { %11093 = vmatmul.mubr.bf16.vlgmr.msra.gmra.mrb[160].mxu1 %v7993_v16  ;;  %v11608_v16 = vld [vmem:[#allocation25 + $0x2a4] ss:$16 sps:$4 sm:$0xff]  }
0x2438   :  { %11096 = vmatprep.mubr.msk.bf16.mxu1 %vm12662_vm0, %v12661_v0  ;;  %8521 = vmatpush1.bf16.msra.mxu1 %v11579_v2  ;;  %v11623_v2 = vld [vmem:[#allocation25 + $0x2ec] ss:$16 sps:$4 sm:$0xff]  }
0x2439   :  { %8522 = vmatprep.subr.bf16.mxu1 %v11587_v62 }
0x243a   :  { %v11074_v27 = vpop.f32.mrb[152].mxu0 }
0x243b   :  { %v7973_v23 = vpop.f32.mrb[153].mxu0 }
0x243c   :  { %v7994_v42 = vpack.c.bf16 %v7973_v23, %v11066_v57  ;;  %v11075_v5 = vpop.f32.mrb[154].mxu0  ;;  %8523 = vmatpush1.bf16.msra.mxu1 %v11585_v33  ;;  %v11600_v57 = vld [vmem:[#allocation25 + $0x280] ss:$16 sps:$4 sm:$0xff]  }
0x243d   :  { %v7976_v19 = vpop.f32.mrb[155].mxu0  ;;  %8524 = vmatprep.subr.bf16.mxu1 %v11593_v44  ;;  %v11606_v23 = vld [vmem:[#allocation25 + $0x2a0] ss:$16 sps:$4 sm:$0xff]  }
0x243e   :  { %v7995_v60 = vpack.c.bf16 %v11074_v27, %v7976_v19  ;;  %v11611_v27 = vld [vmem:[#allocation25 + $0x2ac] ss:$16 sps:$4 sm:$0xff]   ;;  %v11612_v5 = vld [vmem:[#allocation25 + $0x2c0] ss:$16 sps:$4 sm:$0xff]   ;;  %v11614_v19 = vld [vmem:[#allocation25 + $0x2c4] ss:$16 sps:$4 sm:$0xff]  }
0x243f   :  { %11097 = vmatmul.mubr.bf16.gmra.mrb[164].mxu1 %v7994_v42  ;;  %v11609_v42 = vld [vmem:[#allocation25 + $0x2a8] ss:$16 sps:$4 sm:$0xff]  }
0x2440   :  { %11100 = vmatprep.mubr.msk.bf16.mxu1 %vm12662_vm0, %v12661_v0  ;;  %8525 = vmatpush1.bf16.msra.mxu1 %v11591_v41 }
0x2441   :  { %8526 = vmatprep.subr.bf16.mxu1 %v11599_v4 }
0x2444   :  { %8527 = vmatpush1.bf16.msra.mxu1 %v11597_v50 }
0x2445   :  { %8528 = vmatprep.subr.bf16.mxu1 %v11605_v12  ;;  %v14772_v12 = vld [vmem:[#allocation22 + $0x2] ss:$0 sm:$0xff] }
0x2447   :  { %11101 = vmatmul.mubr.bf16.gmra.mrb[168].mxu1 %v7995_v60  ;;  %v11615_v60 = vld [vmem:[#allocation25 + $0x2c8] ss:$16 sps:$4 sm:$0xff]  }
0x2448   :  { %8552 = vmatprep.mubr.bf16.mxu1 %v12664_v21  ;;  %8529 = vmatpush1.bf16.msra.mxu1 %v11603_v1 }
0x2449   :  { %8530 = vmatprep.subr.bf16.mxu1 %v11611_v27 }
0x244c   :  { %8531 = vmatpush1.bf16.msra.mxu1 %v11609_v42 }
0x244d   :  { %8532 = vmatprep.subr.bf16.mxu1 %v11617_v63 }
0x2450   :  { %8533 = vmatpush1.bf16.msra.mxu1 %v11615_v60 }
0x2451   :  { %8534 = vmatprep.subr.bf16.mxu1 %v11623_v2 }
0x250a   :  { %v8103_v55 = vpop.f32.mrb[160].mxu1 }
0x250b   :  { %v8104_v24 = vadd.f32 %v9904_v53, %v8103_v55  ;;  %v11094_v28 = vpop.f32.mrb[161].mxu1  ;;  %v11624_v55 = vld [vmem:[#allocation28 + $0x240] sm:$0xff]  }
0x250c   :  { %v8106_v14 = vpop.f32.mrb[162].mxu1 }
0x250d   :  { %v14734_v45 = vadd.f32 %v8104_v24, %v14353_v11  ;;  %v8107_v52 = vadd.f32 %v9904_v53, %v8106_v14  ;;  %v11095_v39 = vpop.f32.mrb[163].mxu1  ;;  %v11625_v24 = vld [vmem:[#allocation28 + $0x2c0] sm:$0xff]  }
0x250f   :  { %v14737_v59 = vadd.f32 %v8107_v52, %v14355_v35  ;;  %8136 = vadd.xlane.f32.xlu0 %v14734_v45  ;;  %v8154_v40 = vmul.f32 %v14734_v45, %v14734_v45 }
0x2511   :  { %8138 = vadd.xlane.f32.xlu1 %v14737_v59  ;;  %v8155_v11 = vmul.f32 %v14737_v59, %v14737_v59 }
0x2512   :  { %v8111_v56 = vpop.f32.mrb[164].mxu1 }
0x2513   :  { %v8112_v15 = vadd.f32 %v9904_v53, %v8111_v56  ;;  %8160 = vadd.xlane.f32.xlu0 %v8154_v40  ;;  %v11098_v58 = vpop.f32.mrb[165].mxu1 }
0x2514   :  { %v8114_v32 = vpop.f32.mrb[166].mxu1 }
0x2515   :  { %v14746_v37 = vadd.f32 %v8112_v15, %v14365_v10  ;;  %v8115_v35 = vadd.f32 %v9904_v53, %v8114_v32  ;;  %8162 = vadd.xlane.f32.xlu1 %v8155_v11  ;;  %v11099_v54 = vpop.f32.mrb[167].mxu1 }
0x2517   :  { %v14749_v36 = vadd.f32 %v8115_v35, %v14367_v29  ;;  %8140 = vadd.xlane.f32.xlu0 %v14746_v37  ;;  %v8156_v31 = vmul.f32 %v14746_v37, %v14746_v37 }
0x2519   :  { %8142 = vadd.xlane.f32.xlu1 %v14749_v36  ;;  %v8157_v10 = vmul.f32 %v14749_v36, %v14749_v36 }
0x251a   :  { %v8119_v3 = vpop.f32.mrb[168].mxu1 }
0x251b   :  { %v8120_v7 = vadd.f32 %v9904_v53, %v8119_v3  ;;  %8164 = vadd.xlane.f32.xlu0 %v8156_v31  ;;  %v11102_v25 = vpop.f32.mrb[169].mxu1 }
0x251c   :  { %v8122_v38 = vpop.f32.mrb[170].mxu1 }
0x251d   :  { %v14758_v43 = vadd.f32 %v8120_v7, %v14375_v34  ;;  %v8123_v29 = vadd.f32 %v9904_v53, %v8122_v38  ;;  %8166 = vadd.xlane.f32.xlu1 %v8157_v10  ;;  %v11103_v61 = vpop.f32.mrb[171].mxu1  ;;  %v11621_v53 = vld [vmem:[#allocation25 + $0x2e8] ss:$16 sps:$4 sm:$0xff]  }
0x251e   :  { %8535 = vmatpush1.bf16.msra.mxu1 %v11621_v53 }
0x251f   :  { %v14761_v47 = vadd.f32 %v8123_v29, %v14377_v8  ;;  %8144 = vadd.xlane.f32.xlu0 %v14758_v43  ;;  %v8158_v13 = vmul.f32 %v14758_v43, %v14758_v43  ;;  %v11588_v8 = vld [vmem:[#allocation25 + $0x240] ss:$16 sps:$4 sm:$0xff]   ;;  %10480 = vmatprep.subr.bf16.mxu1 %v11625_v24 }
0x2520   :  { %8462 = vmatpush1.bf16.msra.mxu0 %v11588_v8 }
0x2521   :  { %8146 = vadd.xlane.f32.xlu1 %v14761_v47  ;;  %v8159_v34 = vmul.f32 %v14761_v47, %v14761_v47  ;;  %8463 = vmatprep.subr.bf16.mxu0 %v11596_v6 }
0x2523   :  { %8168 = vadd.xlane.f32.xlu0 %v8158_v13 }
0x2524   :  { %8464 = vmatpush1.bf16.msra.mxu0 %v11594_v30 }
0x2525   :  { %8170 = vadd.xlane.f32.xlu1 %v8159_v34  ;;  %8465 = vmatprep.subr.bf16.mxu0 %v11602_v51 }
0x2528   :  { %8466 = vmatpush1.bf16.msra.mxu0 %v11600_v57 }
0x2529   :  { %8467 = vmatprep.subr.bf16.mxu0 %v11608_v16 }
0x252c   :  { %8468 = vmatpush1.bf16.msra.mxu0 %v11606_v23 }
0x252d   :  { %8469 = vmatprep.subr.bf16.mxu0 %v11614_v19 }
0x2530   :  { %8470 = vmatpush1.bf16.msra.mxu0 %v11612_v5 }
0x2531   :  { %8471 = vmatprep.subr.bf16.mxu0 %v11620_v17 }
0x2534   :  { %8472 = vmatpush1.bf16.msra.mxu0 %v11618_v49  ;;  %v14778_v49 = vld [vmem:[#allocation23 + $0x2] ss:$0 sm:$0xff] }
0x2535   :  { %10446 = vmatprep.subr.bf16.mxu0 %v11624_v55 }
0x259c   :  { %v8137_v28 = vpop.xlane.xlu0 %8136 }
0x259d   :  { %v8148_v14 = vmul.f32 0.0078125, %v8137_v28 }
0x259e   :  { %v8139_v52 = vpop.xlane.xlu1 %8138 }
0x259f   :  { %v8149_v39 = vmul.f32 0.0078125, %v8139_v52  ;;  %v8178_v56 = vmul.f32 %v8148_v14, %v8148_v14  ;;  %v8190_v4 = vsub.f32 %v14734_v45, %v8148_v14 }
0x25a0   :  { %v8161_v40 = vpop.xlane.xlu0 %8160 }
0x25a1   :  { %v8172_v15 = vmul.f32 0.0078125, %v8161_v40  ;;  %v8179_v11 = vmul.f32 %v8149_v39, %v8149_v39  ;;  %v8191_v16 = vsub.f32 %v14737_v59, %v8149_v39 }
0x25a2   :  { %v8163_v58 = vpop.xlane.xlu1 %8162 }
0x25a3   :  { %v8184_v32 = vsub.f32 %v8172_v15, %v8178_v56  ;;  %v8173_v35 = vmul.f32 0.0078125, %v8163_v58  ;;  %v11626_v56 = vld [vmem:[#allocation28 + $0x200] sm:$0xff]  }
0x25a4   :  { %v8141_v54 = vpop.xlane.xlu0 %8140  ;;  %v11627_v15 = vld [vmem:[#allocation28 + $0x280] sm:$0xff]  }
0x25a5   :  { %v8196_v31 = vadd.f32 1e-05, %v8184_v32  ;;  %v8185_v3 = vsub.f32 %v8173_v35, %v8179_v11  ;;  %v8150_v7 = vmul.f32 0.0078125, %v8141_v54  ;;  %v11628_v11 = vld [vmem:[#allocation28 + $0x248] sm:$0xff]  }
0x25a6   :  { %v8143_v25 = vpop.xlane.xlu1 %8142  ;;  %v11629_v32 = vld [vmem:[#allocation28 + $0x2c8] sm:$0xff]  }
0x25a7   :  { %12020 = vrsqrt.f32 %v8196_v31  ;;  %v8197_v10 = vadd.f32 1e-05, %v8185_v3  ;;  %v8151_v38 = vmul.f32 0.0078125, %v8143_v25  ;;  %v8180_v61 = vmul.f32 %v8150_v7, %v8150_v7  ;;  %v11630_v54 = vld [vmem:[#allocation28 + $0x208] sm:$0xff]   ;;  %v11632_v3 = vld [vmem:[#allocation28 + $0x250] sm:$0xff]  }
0x25a8   :  { %v8165_v29 = vpop.xlane.xlu0 %8164  ;;  %v8192_v59 = vsub.f32 %v14746_v37, %v8150_v7  ;;  %v11631_v31 = vld [vmem:[#allocation28 + $0x288] sm:$0xff]   ;;  %v11633_v7 = vld [vmem:[#allocation28 + $0x2d0] sm:$0xff]  }
0x25a9   :  { %12022 = vrsqrt.f32 %v8197_v10  ;;  %v8174_v13 = vmul.f32 0.0078125, %v8165_v29  ;;  %v8181_v26 = vmul.f32 %v8151_v38, %v8151_v38  ;;  %v8193_v52 = vsub.f32 %v14749_v36, %v8151_v38 }
0x25aa   :  { %v8167_v9 = vpop.xlane.xlu1 %8166 }
0x25ab   :  { %v8186_v33 = vsub.f32 %v8174_v13, %v8180_v61  ;;  %v8175_v62 = vmul.f32 0.0078125, %v8167_v9 }
0x25ac   :  { %v8145_v34 = vpop.xlane.xlu0 %8144 }
0x25ad   :  { %v8198_v8 = vadd.f32 1e-05, %v8186_v33  ;;  %v8187_v18 = vsub.f32 %v8175_v62, %v8181_v26  ;;  %v8152_v41 = vmul.f32 0.0078125, %v8145_v34  ;;  %v11634_v26 = vld [vmem:[#allocation28 + $0x210] sm:$0xff]   ;;  %v11637_v34 = vld [vmem:[#allocation28 + $0x2d8] sm:$0xff]  }
0x25ae   :  { %v8147_v44 = vpop.xlane.xlu1 %8146  ;;  %v11635_v33 = vld [vmem:[#allocation28 + $0x290] sm:$0xff]  }
0x25af   :  { %12024 = vrsqrt.f32 %v8198_v8  ;;  %v8199_v6 = vadd.f32 1e-05, %v8187_v18  ;;  %v14770_v30 = vmul.f32 0.0078125, %v8147_v44  ;;  %v8182_v51 = vmul.f32 %v8152_v41, %v8152_v41  ;;  %v11639_v44 = vld [vmem:[#allocation28 + $0x298] sm:$0xff]  }
0x25b0   :  { %v8169_v50 = vpop.xlane.xlu0 %8168  ;;  %v8194_v25 = vsub.f32 %v14758_v43, %v8152_v41  ;;  %v11636_v43 = vld [vmem:[#allocation28 + $0x258] sm:$0xff]  }
0x25b1   :  { %v12021_v57 = vpop.eup %12020  ;;  %12026 = vrsqrt.f32 %v8199_v6  ;;  %v8176_v1 = vmul.f32 0.0078125, %v8169_v50  ;;  %v8183_v5 = vmul.f32 %v14770_v30, %v14770_v30  ;;  %v8195_v61 = vsub.f32 %v14761_v47, %v14770_v30  ;;  %v11638_v41 = vld [vmem:[#allocation28 + $0x218] sm:$0xff]   ;;  %v11640_v6 = vld [vmem:[#allocation28 + $0x260] sm:$0xff]  }
0x25b2   :  { %v8171_v27 = vpop.xlane.xlu1 %8170  ;;  %v8208_v23 = vmul.f32 %v12021_v57, %v8190_v4  ;;  %v11641_v4 = vld [vmem:[#allocation28 + $0x2e0] sm:$0xff]  }
0x25b3   :  { %v12023_v42 = vpop.eup %12022  ;;  %v8188_v19 = vsub.f32 %v8176_v1, %v8182_v51  ;;  %v8177_v60 = vmul.f32 0.0078125, %v8171_v27  ;;  %v11643_v51 = vld [vmem:[#allocation28 + $0x2a0] sm:$0xff]   ;;  %v11644_v1 = vld [vmem:[#allocation28 + $0x268] sm:$0xff]  }
0x25b4   :  { %v8209_v45 = vmul.f32 %v12023_v42, %v8191_v16  ;;  %v8220_v63 = vmul.f32 %v14772_v12, %v8208_v23  ;;  %v11646_v16 = vld [vmem:[#allocation28 + $0x228] sm:$0xff]   ;;  %v11648_v23 = vld [vmem:[#allocation28 + $0x270] sm:$0xff]  }
0x25b5   :  { %v8200_v17 = vadd.f32 1e-05, %v8188_v19  ;;  %v8189_v2 = vsub.f32 %v8177_v60, %v8183_v5  ;;  %v11647_v27 = vld [vmem:[#allocation28 + $0x2a8] sm:$0xff]   ;;  %v11649_v42 = vld [vmem:[#allocation28 + $0x2f0] sm:$0xff]   ;;  %v11652_v60 = vld [vmem:[#allocation28 + $0x278] sm:$0xff]  }
0x25b6   :  { %v8221_v53 = vmul.f32 %v14772_v12, %v8209_v45  ;;  %v14783_v24 = vadd.f32 %v14778_v49, %v8220_v63  ;;  %v11650_v5 = vld [vmem:[#allocation28 + $0x230] sm:$0xff]   ;;  %v11653_v45 = vld [vmem:[#allocation28 + $0x2f8] sm:$0xff]  }
0x25b7   :  { %12028 = vrsqrt.f32 %v8200_v17  ;;  %v8201_v55 = vadd.f32 1e-05, %v8189_v2  ;;  %v11651_v19 = vld [vmem:[#allocation28 + $0x2b0] sm:$0xff]   ;;  %v11654_v63 = vld [vmem:[#allocation28 + $0x238] sm:$0xff]  }
0x25b8   :  { %v14786_v28 = vadd.f32 %v14778_v49, %v8221_v53  ;;  %v11655_v17 = vld [vmem:[#allocation28 + $0x2b8] sm:$0xff]  }
0x25b9   :  { %v12025_v14 = vpop.eup %12024  ;;  %12030 = vrsqrt.f32 %v8201_v55  ;;  %v8275_v2 = vld [vmem:[#allocation26 + $0x8] sm:$0xf] }
0x25ba   :  { %v8238_v39 = vpack.c.bf16 %v14786_v28, %v14783_v24  ;;  %v8210_v40 = vmul.f32 %v12025_v14, %v8192_v59  ;;  %v14824_v53 = vrot.slane %v8275_v2, %v13222_v46  ;;  %v14827_v55 = vrot.slane %v8275_v2, %v13225_v48 }
0x25bb   :  { %v12027_v58 = vpop.eup %12026  ;;  %v14830_v59 = vrot.slane %v8275_v2, %v13712_v20 }
0x25bc   :  { %8490 = vmatmul.mubr.bf16.vlgmr.msra.gmra.mrb[164].mxu0 %v8238_v39  ;;  %8553 = vmatmul.mubr.bf16.vlgmr.msra.gmra.mrb[172].mxu1 %v8238_v39  ;;  %v8211_v37 = vmul.f32 %v12027_v58, %v8193_v52  ;;  %v8222_v35 = vmul.f32 %v14772_v12, %v8210_v40 }
0x25bd   :  { %8499 = vmatprep.mubr.bf16.mxu0 %v12664_v21  ;;  %8562 = vmatprep.mubr.bf16.mxu1 %v12664_v21 }
0x25be   :  { %v8223_v36 = vmul.f32 %v14772_v12, %v8211_v37  ;;  %10447 = vmatpush3.bf16.msra.mxu0 %v11626_v56  ;;  %10481 = vmatpush3.bf16.msra.mxu1 %v11627_v15  ;;  %v14797_v10 = vadd.f32 %v14778_v49, %v8222_v35 }
0x25bf   :  { %10448 = vmatprep.subr.bf16.mxu0 %v11628_v11  ;;  %10482 = vmatprep.subr.bf16.mxu1 %v11629_v32 }
0x25c0   :  { %v14800_v38 = vadd.f32 %v14778_v49, %v8223_v36 }
0x25c1   :  { %v12029_v29 = vpop.eup %12028 }
0x25c2   :  { %v8239_v13 = vpack.c.bf16 %v14800_v38, %v14797_v10  ;;  %v8212_v9 = vmul.f32 %v12029_v29, %v8194_v25  ;;  %10449 = vmatpush3.bf16.msra.mxu0 %v11630_v54  ;;  %10483 = vmatpush3.bf16.msra.mxu1 %v11631_v31 }
0x25c3   :  { %v12031_v62 = vpop.eup %12030  ;;  %10450 = vmatprep.subr.bf16.mxu0 %v11632_v3  ;;  %10484 = vmatprep.subr.bf16.mxu1 %v11633_v7 }
0x25c4   :  { %8500 = vmatmul.mubr.bf16.gmra.mrb[168].mxu0 %v8239_v13  ;;  %8563 = vmatmul.mubr.bf16.gmra.mrb[176].mxu1 %v8239_v13  ;;  %v8213_v8 = vmul.f32 %v12031_v62, %v8195_v61  ;;  %v8224_v18 = vmul.f32 %v14772_v12, %v8212_v9 }
0x25c5   :  { %8509 = vmatprep.mubr.bf16.mxu0 %v12664_v21  ;;  %8572 = vmatprep.mubr.bf16.mxu1 %v12664_v21  ;;  %v11642_v21 = vld [vmem:[#allocation28 + $0x220] sm:$0xff]  }
0x25c6   :  { %v8225_v47 = vmul.f32 %v14772_v12, %v8213_v8  ;;  %10451 = vmatpush3.bf16.msra.mxu0 %v11634_v26  ;;  %10485 = vmatpush3.bf16.msra.mxu1 %v11635_v33  ;;  %v14811_v30 = vadd.f32 %v14778_v49, %v8224_v18  ;;  %v11645_v12 = vld [vmem:[#allocation28 + $0x2e8] sm:$0xff]  }
0x25c7   :  { %10452 = vmatprep.subr.bf16.mxu0 %v11636_v43  ;;  %10486 = vmatprep.subr.bf16.mxu1 %v11637_v34 }
0x25c8   :  { %v14814_v50 = vadd.f32 %v14778_v49, %v8225_v47  ;;  %v14821_v49 = vrot.slane %v8275_v2, %v13149_v22 }
0x25ca   :  { %v8240_v57 = vpack.c.bf16 %v14814_v50, %v14811_v30  ;;  %10453 = vmatpush3.bf16.msra.mxu0 %v11638_v41  ;;  %10487 = vmatpush3.bf16.msra.mxu1 %v11639_v44 }
0x25cb   :  { %10454 = vmatprep.subr.bf16.mxu0 %v11640_v6  ;;  %10488 = vmatprep.subr.bf16.mxu1 %v11641_v4 }
0x25cc   :  { %8510 = vmatmul.mubr.bf16.gmra.mrb[172].mxu0 %v8240_v57  ;;  %8573 = vmatmul.mubr.bf16.gmra.mrb[180].mxu1 %v8240_v57 }
0x25ce   :  { %10455 = vmatpush3.bf16.msra.mxu0 %v11642_v21  ;;  %10489 = vmatpush3.bf16.msra.mxu1 %v11643_v51 }
0x25cf   :  { %10456 = vmatprep.subr.bf16.mxu0 %v11644_v1  ;;  %10490 = vmatprep.subr.bf16.mxu1 %v11645_v12 }
0x25d2   :  { %10457 = vmatpush3.bf16.msra.mxu0 %v11646_v16  ;;  %10491 = vmatpush3.bf16.msra.mxu1 %v11647_v27 }
0x25d3   :  { %10458 = vmatprep.subr.bf16.mxu0 %v11648_v23  ;;  %10492 = vmatprep.subr.bf16.mxu1 %v11649_v42 }
0x25d6   :  { %10459 = vmatpush3.bf16.msra.mxu0 %v11650_v5  ;;  %10493 = vmatpush3.bf16.msra.mxu1 %v11651_v19 }
0x25d7   :  { %10460 = vmatprep.subr.bf16.mxu0 %v11652_v60  ;;  %10494 = vmatprep.subr.bf16.mxu1 %v11653_v45 }
0x25da   :  { %10461 = vmatpush3.bf16.msra.mxu0 %v11654_v63  ;;  %10495 = vmatpush3.bf16.msra.mxu1 %v11655_v17 }
0x25db   :  { %11104 = vmatprep.subr.bf16.mxu0 %v12661_v0  ;;  %11120 = vmatprep.subr.bf16.mxu1 %v12661_v0 }
0x268f   :  { %v8491_v14 = vpop.f32.mrb[164].mxu0  ;;  %v8554_v52 = vpop.f32.mrb[172].mxu1 }
0x2690   :  { %v8492_v39 = vadd.f32 %v8491_v14, %v14821_v49  ;;  %v8555_v40 = vadd.f32 %v8554_v52, %v14824_v53  ;;  %v8493_v56 = vpop.f32.mrb[165].mxu0  ;;  %v8556_v15 = vpop.f32.mrb[173].mxu1 }
0x2691   :  { %v8494_v22 = vadd.f32 %v8493_v56, %v14827_v55  ;;  %v8557_v58 = vadd.f32 %v8556_v15, %v14830_v59  ;;  %v8495_v46 = vpop.f32.mrb[166].mxu0  ;;  %v8558_v11 = vpop.f32.mrb[174].mxu1 }
0x2692   :  { %v8496_v48 = vadd.f32 %v8495_v46, %v14821_v49  ;;  %v8559_v32 = vadd.f32 %v8558_v11, %v14824_v53  ;;  %v8497_v20 = vpop.f32.mrb[167].mxu0  ;;  %v8560_v37 = vpop.f32.mrb[175].mxu1  ;;  %v8583_v54 = vmax.f32 %v8492_v39, 0.0  ;;  %v8585_v31 = vmax.f32 %v8555_v40, 0.0 }
0x2693   :  { %v8498_v35 = vadd.f32 %v8497_v20, %v14827_v55  ;;  %v8561_v36 = vadd.f32 %v8560_v37, %v14830_v59  ;;  %v8584_v25 = vmax.f32 %v8494_v22, 0.0  ;;  %v8586_v29 = vmax.f32 %v8557_v58, 0.0 }
0x2694   :  { %v8587_v3 = vmax.f32 %v8496_v48, 0.0  ;;  %v8589_v7 = vmax.f32 %v8559_v32, 0.0 }
0x2695   :  { %v8588_v61 = vmax.f32 %v8498_v35, 0.0  ;;  %v8590_v13 = vmax.f32 %v8561_v36, 0.0 }
0x2696   :  { %v8607_v9 = vpack.c.bf16 %v8587_v3, %v8583_v54  ;;  %v8609_v26 = vpack.c.bf16 %v8589_v7, %v8585_v31 }
0x2697   :  { %v8608_v33 = vpack.c.bf16 %v8588_v61, %v8584_v25  ;;  %v8610_v62 = vpack.c.bf16 %v8590_v13, %v8586_v29  ;;  %v8501_v43 = vpop.f32.mrb[168].mxu0  ;;  %v8564_v34 = vpop.f32.mrb[176].mxu1 }
0x2698   :  { %v8502_v8 = vadd.f32 %v8501_v43, %v14821_v49  ;;  %v8565_v18 = vadd.f32 %v8564_v34, %v14824_v53  ;;  %v8503_v47 = vpop.f32.mrb[169].mxu0  ;;  %v8566_v41 = vpop.f32.mrb[177].mxu1  ;;  %v9947_v34 = vld [vmem:[#allocation29 + $0x2] ss:$0 sm:$0xff] }
0x2699   :  { %v8504_v44 = vadd.f32 %v8503_v47, %v14827_v55  ;;  %v8567_v6 = vadd.f32 %v8566_v41, %v14830_v59  ;;  %v8505_v4 = vpop.f32.mrb[170].mxu0  ;;  %v8568_v57 = vpop.f32.mrb[178].mxu1  ;;  %8916 = vmatprep.mubr.bf16.mxu0 %v8608_v33  ;;  %8973 = vmatprep.mubr.bf16.mxu1 %v8610_v62 }
0x269a   :  { %v8506_v21 = vadd.f32 %v8505_v4, %v14821_v49  ;;  %v8569_v51 = vadd.f32 %v8568_v57, %v14824_v53  ;;  %v8507_v1 = vpop.f32.mrb[171].mxu0  ;;  %v8570_v12 = vpop.f32.mrb[179].mxu1  ;;  %8917 = vmatmul.mubr.bf16.vlgmr.msra.gmra.mrb[176].mxu0 %v8607_v9  ;;  %8974 = vmatmul.mubr.bf16.vlgmr.msra.gmra.mrb[184].mxu1 %v8609_v26  ;;  %v8591_v23 = vmax.f32 %v8502_v8, 0.0  ;;  %v8593_v42 = vmax.f32 %v8565_v18, 0.0 }
0x269b   :  { %v8508_v16 = vadd.f32 %v8507_v1, %v14827_v55  ;;  %v8571_v27 = vadd.f32 %v8570_v12, %v14830_v59  ;;  %v8592_v60 = vmax.f32 %v8504_v44, 0.0  ;;  %v8594_v45 = vmax.f32 %v8567_v6, 0.0 }
0x269c   :  { %v8595_v5 = vmax.f32 %v8506_v21, 0.0  ;;  %v8597_v19 = vmax.f32 %v8569_v51, 0.0 }
0x269d   :  { %v8596_v63 = vmax.f32 %v8508_v16, 0.0  ;;  %v8598_v17 = vmax.f32 %v8571_v27, 0.0 }
0x269e   :  { %v8611_v2 = vpack.c.bf16 %v8595_v5, %v8591_v23  ;;  %v8613_v14 = vpack.c.bf16 %v8597_v19, %v8593_v42 }
0x269f   :  { %v8612_v52 = vpack.c.bf16 %v8596_v63, %v8592_v60  ;;  %v8614_v39 = vpack.c.bf16 %v8598_v17, %v8594_v45  ;;  %v8511_v40 = vpop.f32.mrb[172].mxu0  ;;  %v8574_v56 = vpop.f32.mrb[180].mxu1 }
0x26a0   :  { %v8512_v15 = vadd.f32 %v8511_v40, %v14821_v49  ;;  %v8575_v22 = vadd.f32 %v8574_v56, %v14824_v53  ;;  %v8513_v58 = vpop.f32.mrb[173].mxu0  ;;  %v8576_v46 = vpop.f32.mrb[181].mxu1 }
0x26a1   :  { %v8514_v11 = vadd.f32 %v8513_v58, %v14827_v55  ;;  %v8577_v48 = vadd.f32 %v8576_v46, %v14830_v59  ;;  %v8515_v32 = vpop.f32.mrb[174].mxu0  ;;  %v8578_v20 = vpop.f32.mrb[182].mxu1  ;;  %8924 = vmatprep.mubr.bf16.mxu0 %v8612_v52  ;;  %8981 = vmatprep.mubr.bf16.mxu1 %v8614_v39 }
0x26a2   :  { %v8516_v37 = vadd.f32 %v8515_v32, %v14821_v49  ;;  %v8579_v35 = vadd.f32 %v8578_v20, %v14824_v53  ;;  %v8517_v36 = vpop.f32.mrb[175].mxu0  ;;  %v8580_v54 = vpop.f32.mrb[183].mxu1  ;;  %8925 = vmatmul.mubr.bf16.gmra.mrb[180].mxu0 %v8611_v2  ;;  %8982 = vmatmul.mubr.bf16.gmra.mrb[188].mxu1 %v8613_v14  ;;  %v8599_v7 = vmax.f32 %v8512_v15, 0.0  ;;  %v8601_v25 = vmax.f32 %v8575_v22, 0.0 }
0x26a3   :  { %v8518_v31 = vadd.f32 %v8517_v36, %v14827_v55  ;;  %v8581_v3 = vadd.f32 %v8580_v54, %v14830_v59  ;;  %v8600_v13 = vmax.f32 %v8514_v11, 0.0  ;;  %v8602_v9 = vmax.f32 %v8577_v48, 0.0 }
0x26a4   :  { %v8603_v29 = vmax.f32 %v8516_v37, 0.0  ;;  %v8605_v61 = vmax.f32 %v8579_v35, 0.0 }
0x26a5   :  { %v8604_v26 = vmax.f32 %v8518_v31, 0.0  ;;  %v8606_v33 = vmax.f32 %v8581_v3, 0.0 }
0x26a6   :  { %v8615_v62 = vpack.c.bf16 %v8603_v29, %v8599_v7  ;;  %v8617_v49 = vpack.c.bf16 %v8605_v61, %v8601_v25 }
0x26a7   :  { %v8616_v43 = vpack.c.bf16 %v8604_v26, %v8600_v13  ;;  %v8618_v53 = vpack.c.bf16 %v8606_v33, %v8602_v9 }
0x26a9   :  { %8932 = vmatprep.mubr.bf16.mxu0 %v8616_v43  ;;  %8989 = vmatprep.mubr.bf16.mxu1 %v8618_v53 }
0x26aa   :  { %8933 = vmatmul.mubr.bf16.gmra.mrb[184].mxu0 %v8615_v62  ;;  %8990 = vmatmul.mubr.bf16.gmra.mrb[192].mxu1 %v8617_v49 }
0x26ab   :  { %11108 = vmatprep.mubr.msk.bf16.mxu0 %vm12662_vm0, %v12661_v0  ;;  %11136 = vmatprep.mubr.msk.bf16.mxu1 %vm12662_vm0, %v12661_v0 }
0x276d   :  { %v10462_v55 = vpop.f32.mrb[176].mxu0  ;;  %v10496_v59 = vpop.f32.mrb[184].mxu1 }
0x276e   :  { %v10463_v8 = vpop.f32.mrb[177].mxu0  ;;  %v10497_v18 = vpop.f32.mrb[185].mxu1 }
0x276f   :  { %v10464_v47 = vadd.f32 %v10463_v8, %v10462_v55  ;;  %v10498_v41 = vadd.f32 %v10497_v18, %v10496_v59  ;;  %v10465_v44 = vpop.f32.mrb[178].mxu0  ;;  %v10499_v6 = vpop.f32.mrb[186].mxu1  ;;  %v11656_v55 = vld [vmem:[#allocation34] sm:$0xff]   ;;  %v11657_v59 = vld [vmem:[#allocation34 + $0x8] sm:$0xff]  }
0x2770   :  { %v10466_v4 = vpop.f32.mrb[179].mxu0  ;;  %v10500_v57 = vpop.f32.mrb[187].mxu1  ;;  %11121 = vmatpush3.bf16.msra.mxu1 %v11656_v55  ;;  %v11661_v8 = vld [vmem:[#allocation34 + $0x28] sm:$0xff]  }
0x2771   :  { %v8919_v21 = vadd.f32 %v10464_v47, %v9947_v34  ;;  %v10467_v51 = vadd.f32 %v10466_v4, %v10465_v44  ;;  %v10501_v1 = vadd.f32 %v10500_v57, %v10499_v6  ;;  %11122 = vmatprep.subr.bf16.mxu1 %v12661_v0 }
0x2773   :  { %v8976_v12 = vadd.f32 %v10498_v41, %v8919_v21  ;;  %v8922_v16 = vadd.f32 %v10467_v51, %v9947_v34 }
0x2774   :  { %11123 = vmatpush3.bf16.msra.mxu1 %v11657_v59 }
0x2775   :  { %v8979_v27 = vadd.f32 %v10501_v1, %v8922_v16  ;;  %v10468_v23 = vpop.f32.mrb[180].mxu0  ;;  %v10502_v42 = vpop.f32.mrb[188].mxu1  ;;  %v14861_v5 = vadd.f32 %v8976_v12, %v14783_v24  ;;  %11124 = vmatprep.subr.bf16.mxu1 %v12661_v0 }
0x2776   :  { %v10469_v19 = vpop.f32.mrb[181].mxu0  ;;  %v10503_v60 = vpop.f32.mrb[189].mxu1 }
0x2777   :  { %v10470_v45 = vadd.f32 %v10469_v19, %v10468_v23  ;;  %v10504_v63 = vadd.f32 %v10503_v60, %v10502_v42  ;;  %v10471_v17 = vpop.f32.mrb[182].mxu0  ;;  %v10505_v2 = vpop.f32.mrb[190].mxu1  ;;  %9008 = vadd.xlane.f32.xlu0 %v14861_v5  ;;  %v14865_v14 = vadd.f32 %v8979_v27, %v14786_v28  ;;  %v9026_v24 = vmul.f32 %v14861_v5, %v14861_v5 }
0x2778   :  { %v10472_v52 = vpop.f32.mrb[183].mxu0  ;;  %v10506_v39 = vpop.f32.mrb[191].mxu1 }
0x2779   :  { %v8927_v40 = vadd.f32 %v10470_v45, %v9947_v34  ;;  %v10473_v56 = vadd.f32 %v10472_v52, %v10471_v17  ;;  %v10507_v15 = vadd.f32 %v10506_v39, %v10505_v2  ;;  %9010 = vadd.xlane.f32.xlu1 %v14865_v14  ;;  %v9027_v46 = vmul.f32 %v14865_v14, %v14865_v14 }
0x277b   :  { %v8984_v22 = vadd.f32 %v10504_v63, %v8927_v40  ;;  %v8930_v58 = vadd.f32 %v10473_v56, %v9947_v34  ;;  %9032 = vadd.xlane.f32.xlu0 %v9026_v24 }
0x277d   :  { %v8987_v11 = vadd.f32 %v10507_v15, %v8930_v58  ;;  %v10508_v48 = vpop.f32.mrb[192].mxu1  ;;  %9034 = vadd.xlane.f32.xlu1 %v9027_v46  ;;  %v10474_v28 = vpop.f32.mrb[184].mxu0  ;;  %v14873_v32 = vadd.f32 %v8984_v22, %v14797_v10 }
0x277e   :  { %v10475_v20 = vpop.f32.mrb[185].mxu0  ;;  %v10509_v37 = vpop.f32.mrb[193].mxu1 }
0x277f   :  { %v10476_v35 = vadd.f32 %v10475_v20, %v10474_v28  ;;  %v10510_v36 = vadd.f32 %v10509_v37, %v10508_v48  ;;  %v10511_v54 = vpop.f32.mrb[194].mxu1  ;;  %9012 = vadd.xlane.f32.xlu0 %v14873_v32  ;;  %v10477_v31 = vpop.f32.mrb[186].mxu0  ;;  %v14877_v3 = vadd.f32 %v8987_v11, %v14800_v38  ;;  %v9028_v10 = vmul.f32 %v14873_v32, %v14873_v32 }
0x2780   :  { %v10478_v7 = vpop.f32.mrb[187].mxu0  ;;  %v10512_v25 = vpop.f32.mrb[195].mxu1 }
0x2781   :  { %v8935_v29 = vadd.f32 %v10476_v35, %v9947_v34  ;;  %v10479_v61 = vadd.f32 %v10478_v7, %v10477_v31  ;;  %v10513_v13 = vadd.f32 %v10512_v25, %v10511_v54  ;;  %9014 = vadd.xlane.f32.xlu1 %v14877_v3  ;;  %v9029_v33 = vmul.f32 %v14877_v3, %v14877_v3  ;;  %v9980_v54 = vld [vmem:[#allocation31 + $0x2] ss:$0 sm:$0xff] }
0x2783   :  { %v8992_v9 = vadd.f32 %v10510_v36, %v8935_v29  ;;  %v8938_v26 = vadd.f32 %v10479_v61, %v9947_v34  ;;  %9036 = vadd.xlane.f32.xlu0 %v9028_v10  ;;  %v11660_v34 = vld [vmem:[#allocation34 + $0x20] sm:$0xff]  }
0x2785   :  { %v8995_v62 = vadd.f32 %v10513_v13, %v8938_v26  ;;  %9038 = vadd.xlane.f32.xlu1 %v9029_v33  ;;  %v14885_v38 = vadd.f32 %v8992_v9, %v14811_v30  ;;  %v11658_v30 = vld [vmem:[#allocation34 + $0x10] sm:$0xff]  }
0x2786   :  { %11125 = vmatpush3.bf16.msra.mxu1 %v11658_v30 }
0x2787   :  { %9016 = vadd.xlane.f32.xlu0 %v14885_v38  ;;  %v14889_v49 = vadd.f32 %v8995_v62, %v14814_v50  ;;  %v9030_v43 = vmul.f32 %v14885_v38, %v14885_v38  ;;  %v11659_v50 = vld [vmem:[#allocation34 + $0x18] sm:$0xff]   ;;  %11126 = vmatprep.subr.bf16.mxu1 %v12661_v0 }
0x2789   :  { %9018 = vadd.xlane.f32.xlu1 %v14889_v49  ;;  %v9031_v53 = vmul.f32 %v14889_v49, %v14889_v49 }
0x278a   :  { %11127 = vmatpush3.bf16.msra.mxu1 %v11659_v50 }
0x278b   :  { %9040 = vadd.xlane.f32.xlu0 %v9030_v43  ;;  %11128 = vmatprep.subr.bf16.mxu1 %v12661_v0 }
0x278d   :  { %9042 = vadd.xlane.f32.xlu1 %v9031_v53 }
0x278e   :  { %11129 = vmatpush3.bf16.msra.mxu1 %v11660_v34 }
0x278f   :  { %11130 = vmatprep.subr.bf16.mxu1 %v12661_v0 }
0x2792   :  { %11131 = vmatpush3.bf16.msra.mxu1 %v11661_v8 }
0x2793   :  { %11132 = vmatprep.subr.bf16.mxu1 %v12661_v0 }
0x2804   :  { %v9009_v18 = vpop.xlane.xlu0 %9008 }
0x2805   :  { %v9020_v47 = vmul.f32 0.0078125, %v9009_v18 }
0x2806   :  { %v9011_v41 = vpop.xlane.xlu1 %9010 }
0x2807   :  { %v9021_v44 = vmul.f32 0.0078125, %v9011_v41  ;;  %v9050_v4 = vmul.f32 %v9020_v47, %v9020_v47  ;;  %v9062_v48 = vsub.f32 %v14861_v5, %v9020_v47  ;;  %v9981_v5 = vld [vmem:[#allocation32 + $0x2] ss:$0 sm:$0xff] }
0x2808   :  { %v9033_v6 = vpop.xlane.xlu0 %9032 }
0x2809   :  { %v9044_v57 = vmul.f32 0.0078125, %v9033_v6  ;;  %v9051_v51 = vmul.f32 %v9021_v44, %v9021_v44  ;;  %v9063_v31 = vsub.f32 %v14865_v14, %v9021_v44  ;;  %v9122_v6 = vld [vmem:[#allocation10] sm:$0xff] }
0x280a   :  { %v9035_v21 = vpop.xlane.xlu1 %9034 }
0x280b   :  { %v9056_v1 = vsub.f32 %v9044_v57, %v9050_v4  ;;  %v9045_v12 = vmul.f32 0.0078125, %v9035_v21 }
0x280c   :  { %v9013_v16 = vpop.xlane.xlu0 %9012 }
0x280d   :  { %v9068_v27 = vadd.f32 1e-05, %v9056_v1  ;;  %v9057_v23 = vsub.f32 %v9045_v12, %v9051_v51  ;;  %v9022_v42 = vmul.f32 0.0078125, %v9013_v16  ;;  %v9123_v12 = vpack.c.bf16 %v9122_v6, %v9122_v6 }
0x280e   :  { %v9015_v19 = vpop.xlane.xlu1 %9014 }
0x280f   :  { %12032 = vrsqrt.f32 %v9068_v27  ;;  %v9069_v60 = vadd.f32 1e-05, %v9057_v23  ;;  %v9023_v45 = vmul.f32 0.0078125, %v9015_v19  ;;  %v9052_v17 = vmul.f32 %v9022_v42, %v9022_v42 }
0x2810   :  { %v9037_v63 = vpop.xlane.xlu0 %9036  ;;  %v9064_v55 = vsub.f32 %v14873_v32, %v9022_v42 }
0x2811   :  { %12034 = vrsqrt.f32 %v9069_v60  ;;  %v9046_v2 = vmul.f32 0.0078125, %v9037_v63  ;;  %v9053_v39 = vmul.f32 %v9023_v45, %v9023_v45  ;;  %v9065_v14 = vsub.f32 %v14877_v3, %v9023_v45 }
0x2812   :  { %v9039_v52 = vpop.xlane.xlu1 %9038 }
0x2813   :  { %v9058_v40 = vsub.f32 %v9046_v2, %v9052_v17  ;;  %v9047_v56 = vmul.f32 0.0078125, %v9039_v52 }
0x2814   :  { %v9017_v15 = vpop.xlane.xlu0 %9016 }
0x2815   :  { %v9070_v24 = vadd.f32 1e-05, %v9058_v40  ;;  %v9059_v22 = vsub.f32 %v9047_v56, %v9053_v39  ;;  %v9024_v58 = vmul.f32 0.0078125, %v9017_v15  ;;  %v11662_v40 = vld [vmem:[#allocation34 + $0x30] sm:$0xff]   ;;  %v11663_v56 = vld [vmem:[#allocation34 + $0x38] sm:$0xff]   ;;  %v11664_v15 = vld [vmem:[#allocation37] sm:$0xff]  }
0x2816   :  { %v9019_v46 = vpop.xlane.xlu1 %9018  ;;  %11133 = vmatpush3.bf16.msra.mxu1 %v11662_v40 }
0x2817   :  { %12036 = vrsqrt.f32 %v9070_v24  ;;  %v9071_v11 = vadd.f32 1e-05, %v9059_v22  ;;  %v9025_v28 = vmul.f32 0.0078125, %v9019_v46  ;;  %v9054_v35 = vmul.f32 %v9024_v58, %v9024_v58  ;;  %11134 = vmatprep.subr.bf16.mxu1 %v12661_v0  ;;  %v11665_v24 = vld [vmem:[#allocation37 + $0x8] sm:$0xff]   ;;  %v11666_v22 = vld [vmem:[#allocation37 + $0x10] sm:$0xff]   ;;  %v11668_v46 = vld [vmem:[#allocation37 + $0x20] sm:$0xff]  }
0x2818   :  { %v9041_v20 = vpop.xlane.xlu0 %9040  ;;  %v9066_v4 = vsub.f32 %v14885_v38, %v9024_v58  ;;  %v11667_v58 = vld [vmem:[#allocation37 + $0x18] sm:$0xff]  }
0x2819   :  { %v12033_v37 = vpop.eup %12032  ;;  %12038 = vrsqrt.f32 %v9071_v11  ;;  %v9048_v36 = vmul.f32 0.0078125, %v9041_v20  ;;  %v9055_v61 = vmul.f32 %v9025_v28, %v9025_v28  ;;  %v9067_v51 = vsub.f32 %v14889_v49, %v9025_v28  ;;  %v11669_v11 = vld [vmem:[#allocation37 + $0x28] sm:$0xff]  }
0x281a   :  { %v9043_v7 = vpop.xlane.xlu1 %9042  ;;  %v9080_v25 = vmul.f32 %v12033_v37, %v9062_v48  ;;  %11135 = vmatpush3.bf16.msra.mxu1 %v11663_v56 }
0x281b   :  { %v12035_v29 = vpop.eup %12034  ;;  %v9060_v13 = vsub.f32 %v9048_v36, %v9054_v35  ;;  %v9049_v10 = vmul.f32 0.0078125, %v9043_v7 }
0x281c   :  { %v9081_v9 = vmul.f32 %v12035_v29, %v9063_v31  ;;  %v9092_v26 = vmul.f32 %v9980_v54, %v9080_v25  ;;  %v11670_v25 = vld [vmem:[#allocation37 + $0x30] sm:$0xff]   ;;  %v11671_v29 = vld [vmem:[#allocation37 + $0x38] sm:$0xff]  }
0x281d   :  { %v9072_v33 = vadd.f32 1e-05, %v9060_v13  ;;  %v9061_v62 = vsub.f32 %v9049_v10, %v9055_v61  ;;  %v9986_v61 = vld [vmem:[#allocation35] ss:$0 sm:$0xff] }
0x281e   :  { %v9093_v43 = vmul.f32 %v9980_v54, %v9081_v9  ;;  %v9104_v59 = vadd.f32 %v9981_v5, %v9092_v26 }
0x281f   :  { %12040 = vrsqrt.f32 %v9072_v33  ;;  %v9073_v53 = vadd.f32 1e-05, %v9061_v62 }
0x2820   :  { %v9105_v30 = vadd.f32 %v9981_v5, %v9093_v43 }
0x2821   :  { %v12037_v50 = vpop.eup %12036  ;;  %12042 = vrsqrt.f32 %v9073_v53 }
0x2822   :  { %v9110_v34 = vpack.c.bf16 %v9105_v30, %v9104_v59  ;;  %v9082_v8 = vmul.f32 %v12037_v50, %v9064_v55  ;;  %v9995_v55 = vld [vmem:[#allocation38] ss:$0 sm:$0xff] }
0x2823   :  { %v12039_v18 = vpop.eup %12038 }
0x2824   :  { %v9083_v47 = vmul.f32 %v12039_v18, %v9065_v14  ;;  %11105 = vmatpush3.bf16.msra.mxu0 %v9110_v34  ;;  %v9094_v41 = vmul.f32 %v9980_v54, %v9082_v8 }
0x2825   :  { %11106 = vmatprep.subr.bf16.mxu0 %v12661_v0 }
0x2826   :  { %v9106_v44 = vadd.f32 %v9981_v5, %v9094_v41  ;;  %v9095_v57 = vmul.f32 %v9980_v54, %v9083_v47 }
0x2828   :  { %v10046_v32 = vpack.c.bf16 %v9106_v44, %v9106_v44  ;;  %v9107_v23 = vadd.f32 %v9981_v5, %v9095_v57 }
0x2829   :  { %v12041_v21 = vpop.eup %12040 }
0x282a   :  { %v9084_v1 = vmul.f32 %v12041_v21, %v9066_v4  ;;  %v9131_v3 = vsel %vm409_vm1, %v10046_v32, 0  ;;  %v9111_v38 = vpack.c.bf16 %v9107_v23, %v9106_v44 }
0x282b   :  { %v12043_v16 = vpop.eup %12042  ;;  %11107 = vmatpush3.bf16.msra.mxu0 %v9131_v3 }
0x282c   :  { %v9085_v27 = vmul.f32 %v12043_v16, %v9067_v51  ;;  %11112 = vmatprep.subr.bf16.mxu0 %v12661_v0  ;;  %v9096_v42 = vmul.f32 %v9980_v54, %v9084_v1  ;;  %v9119_v63 = vunpack.c.h.b16 %v9111_v38 }
0x282e   :  { %11109 = vmatmul.mubr.msk.bf16.vlgmr.msra.gmra.mrb[188].mxu0 %vm1127_vm3, %v9123_v12  ;;  %v9097_v19 = vmul.f32 %v9980_v54, %v9085_v27  ;;  %v9108_v60 = vadd.f32 %v9981_v5, %v9096_v42 }
0x282f   :  { %11116 = vmatprep.mubr.msk.bf16.mxu0 %vm12662_vm0, %v12661_v0 }
0x2830   :  { %v9109_v49 = vadd.f32 %v9981_v5, %v9097_v19 }
0x2832   :  { %v9112_v45 = vpack.c.bf16 %v9109_v49, %v9108_v60  ;;  %v10047_v52 = vpack.c.bf16 %v9109_v49, %v9109_v49 }
0x2834   :  { %v9120_v17 = vunpack.c.l.b16 %v9112_v45  ;;  %v9177_v39 = vsel %vm409_vm1, %v10047_v52, 0 }
0x2836   :  { %v9173_v2 = vpack.c.b16 %v9120_v17, %v9119_v63 }
0x2838   :  { %11113 = vmatpush3.bf16.msra.mxu0 %v9173_v2 }
0x2839   :  { %11114 = vmatprep.subr.bf16.mxu0 %v12661_v0 }
0x283c   :  { %11115 = vmatpush3.bf16.msra.mxu0 %v9177_v39 }
0x283d   :  { %11140 = vmatprep.subr.bf16.mxu0 %v12661_v0 }
0x283f   :  { %11117 = vmatmul.mubr.msk.bf16.vlgmr.msra.gmra.mrb[192].mxu0 %vm1127_vm3, %v9123_v12 }
0x2840   :  { %11156 = vmatprep.mubr.msk.bf16.mxu0 %vm12662_vm0, %v12661_v0  ;;  %11141 = vmatpush3.bf16.msra.mxu0 %v11664_v15 }
0x2841   :  { %11142 = vmatprep.subr.bf16.mxu0 %v12661_v0 }
0x2844   :  { %11143 = vmatpush3.bf16.msra.mxu0 %v11665_v24 }
0x2845   :  { %11144 = vmatprep.subr.bf16.mxu0 %v12661_v0 }
0x2848   :  { %11145 = vmatpush3.bf16.msra.mxu0 %v11666_v22 }
0x2849   :  { %11146 = vmatprep.subr.bf16.mxu0 %v12661_v0 }
0x284c   :  { %11147 = vmatpush3.bf16.msra.mxu0 %v11667_v58 }
0x284d   :  { %11148 = vmatprep.subr.bf16.mxu0 %v12661_v0 }
0x2850   :  { %11149 = vmatpush3.bf16.msra.mxu0 %v11668_v46 }
0x2851   :  { %11150 = vmatprep.subr.bf16.mxu0 %v12661_v0 }
0x2854   :  { %11151 = vmatpush3.bf16.msra.mxu0 %v11669_v11 }
0x2855   :  { %11152 = vmatprep.subr.bf16.mxu0 %v12661_v0 }
0x2858   :  { %11153 = vmatpush3.bf16.msra.mxu0 %v11670_v25 }
0x2859   :  { %11154 = vmatprep.subr.bf16.mxu0 %v12661_v0 }
0x285c   :  { %11155 = vmatpush3.bf16.msra.mxu0 %v11671_v29 }
0x2901   :  { %v9167_v48 = vpop.f32.mrb[188].mxu0 }
0x2902   :  { %v11110_v28 = vpop.f32.mrb[189].mxu0 }
0x2903   :  { %v9170_v20 = vpop.f32.mrb[190].mxu0 }
0x2904   :  { %v11111_v37 = vpop.f32.mrb[191].mxu0 }
0x2912   :  { %v9213_v35 = vpop.f32.mrb[192].mxu0 }
0x2913   :  { %v9219_v36 = vpack.c.bf16 %v9213_v35, %v9167_v48  ;;  %v11118_v54 = vpop.f32.mrb[193].mxu0 }
0x2914   :  { %v9216_v31 = vpop.f32.mrb[194].mxu0 }
0x2915   :  { %11137 = vmatmul.mubr.bf16.vlgmr.msra.gmra.mrb[196].mxu1 %v9219_v36  ;;  %v11119_v7 = vpop.f32.mrb[195].mxu0 }
0x29e8   :  { %v9325_v13 = vpop.f32.mrb[196].mxu1 }
0x29e9   :  { %v9326_v10 = vadd.f32 %v9986_v61, %v9325_v13  ;;  %v11138_v9 = vpop.f32.mrb[197].mxu1 }
0x29ea   :  { %v9328_v26 = vpop.f32.mrb[198].mxu1 }
0x29eb   :  { %v9329_v33 = vadd.f32 %v9986_v61, %v9328_v26  ;;  %v11139_v62 = vpop.f32.mrb[199].mxu1  ;;  %v9332_v5 = vmax.f32 %v9326_v10, 0.0 }
0x29ed   :  { %v9333_v43 = vmax.f32 %v9329_v33, 0.0 }
0x29ef   :  { %v9334_v53 = vpack.c.bf16 %v9333_v43, %v9332_v5 }
0x29f1   :  { %11157 = vmatmul.mubr.bf16.vlgmr.msra.gmra.mrb[196].mxu0 %v9334_v53 }
0x2ac4   :  { %v9440_v59 = vpop.f32.mrb[196].mxu0 }
0x2ac5   :  { %v9441_v30 = vadd.f32 %v9995_v55, %v9440_v59  ;;  %v11158_v50 = vpop.f32.mrb[197].mxu0 }
0x2ac6   :  { %v9443_v14 = vpop.f32.mrb[198].mxu0 }
0x2ac7   :  { %12044 = vtanh.f32 %v9441_v30  ;;  %v9444_v34 = vadd.f32 %v9995_v55, %v9443_v14  ;;  %v11159_v0 = vpop.f32.mrb[199].mxu0 }
0x2ac9   :  { %12046 = vtanh.f32 %v9444_v34 }
0x2ad1   :  { %v12045_v8 = vpop.eup %12044 }
0x2ad2   :  { %9449 = vst [vmem:[#allocation40] sm:$0xff] %v12045_v8 }
0x2ad3   :  { %v12047_v18 = vpop.eup %12046 }
0x2ad4   :  { %9450 = vst [vmem:[#allocation40 + $0x8] sm:$0xff] %v12047_v18 }
0x2ad5   :  { %12587 = shalt.err (!%p12584_p0)
}
0x2ad6   :  { %s14997_s15 = sld [smem:[#allocation64_spill]] }
0x2adc   :  { %s12588_s26 = scalar_lea.hbm %s14997_s15, 256 }
0x2add   :  { %p12589_p1 = scmp.ne.s32.totalorder %s14997_s15, %s12588_s26  ;;  %p12592_p2 = scmp.lt.u32.totalorder %s12588_s26, %s14997_s15 }
0x2adf   :  { %p12594_p3 = pnand %p12592_p2, %p12589_p1 }
0x2ae1   :  { %12597 = shalt.err (!%p12594_p3)
}
0x2ae2   :  { %9462 = dma.vmem_to_hbm [thread:$0]  %s9457_s30, 256, %s14997_s15, [#allocation4], %s12644_s21, %s12644_s21, %s12645_s28  }
0x2ae3   :  { %12624 = dma.done.wait [#allocation4], 256  }
0x2ae4   :  { %12625 = vsyncadd [#allocation4], 4294967040 }
0x2ae5   :  { %9466 = vsyncpa [#allocation3], 1 }
0x2ae6   :  { %9467 = vsyncpa [#allocation6], 1 }
0x2ae7   :  { %9468 = vsyncpa [#allocation9], 1 }
0x2ae8   :  { %9469 = vsyncpa [#allocation12], 1 }
0x2ae9   :  { %9470 = vsyncpa [#allocation15], 1 }
0x2aea   :  { %9471 = vsyncpa [#allocation18], 1 }
0x2aeb   :  { %9472 = vsyncpa [#allocation21], 1 }
0x2aec   :  { %9473 = vsyncpa [#allocation24], 1 }
0x2aed   :  { %9474 = vsyncpa [#allocation27], 1 }
0x2aee   :  { %9475 = vsyncpa [#allocation30], 1 }
0x2aef   :  { %9476 = vsyncpa [#allocation33], 1 }
0x2af0   :  { %9477 = vsyncpa [#allocation36], 1 }
0x2af1   :  { %9478 = vsyncpa [#allocation39], 1 }
0x2af2   :  { %9479 = vsyncpa [#allocation4], 1 }

</bundles_post_ra>
